<compile_context>
chip_gen: v6e
topology: v6e:2x2x1
jax: 0.10.0
libtpu: 0.0.40
codegen_flags: <defaults>
</compile_context>

<pallas_src>
import functools

import jax
import jax.numpy as jnp
import numpy as np
from jax.experimental import pallas as pl
from jax.experimental.pallas import tpu as pltpu

IN_SIZE = 1      # in_size
HID1 = 16        # hid1_size
HID2 = 32        # hid2_size
KSIZE = 5        # k_conv_size
OUT_SIZE = 10    # len(classes)
BN_EPS = 1e-5

IMG = 32                  # input spatial size -> fc in-features = 32*5*5 = 800
H1 = IMG - KSIZE + 1      # 28  conv1 output spatial
P1 = H1 // 2              # 14  pool1 output spatial
H2 = P1 - KSIZE + 1       # 10  conv2 output spatial
P2 = H2 // 2              # 5   pool2 output spatial
L1 = P1 * HID1            # 224 lanes of pooled layer-1 activation (16*pj + c)
L2 = P2 * HID2            # 160 lanes of pooled layer-2 activation (32*pj + c)
NPAD = 128                # fc output padded to one full lane register


# ----------------------------------------------------------------------------
# The single fused Pallas kernel
# ----------------------------------------------------------------------------
def _fused_cnn_kernel(x_ref, w1e_ref, w1o_ref, sh1_ref, w2e_ref, w2o_ref, sh2_ref,
                      wfc_ref, bfc_ref, out_ref,
                      hm1_ref, y1u_ref, hm2_ref, p2u_ref, *, batch):
    f32 = jnp.float32

    # ---- layer 1: conv(1->16,5) + folded BN + ReLU + horizontal half of pool ----
    for b in range(batch):
        acc_e = jnp.zeros((H1, L1), f32)      # even output columns oj = 2*pj
        acc_o = jnp.zeros((H1, L1), f32)      # odd  output columns oj = 2*pj + 1
        for kh in range(KSIZE):
            r0 = b * IMG + kh
            lhs = x_ref[r0:r0 + H1, :]                                  # (28, 32)
            acc_e = acc_e + jnp.dot(lhs, w1e_ref[kh], preferred_element_type=f32)
            acc_o = acc_o + jnp.dot(lhs, w1o_ref[kh], preferred_element_type=f32)
        sh = sh1_ref[...]                                               # (1, 224)
        hm1_ref[b * H1:(b + 1) * H1, :] = jnp.maximum(
            jnp.maximum(acc_e + sh, acc_o + sh), 0.0)

    # ---- vertical half of pool1 + row compaction: rows (b, 2*pi / 2*pi+1) -> (b, pi)
    for b in range(batch):
        for pi in range(P1):
            s = b * H1 + 2 * pi
            y1u_ref[b * P1 + pi:b * P1 + pi + 1, :] = jnp.maximum(
                hm1_ref[s:s + 1, :], hm1_ref[s + 1:s + 2, :])

    # ---- layer 2: conv(16->32,5) + folded BN + ReLU + horizontal half of pool ----
    for b in range(batch):
        acc_e = jnp.zeros((H2, L2), f32)
        acc_o = jnp.zeros((H2, L2), f32)
        for kh in range(KSIZE):
            r0 = b * P1 + kh
            lhs = y1u_ref[r0:r0 + H2, :]                                # (10, 224)
            acc_e = acc_e + jnp.dot(lhs, w2e_ref[kh], preferred_element_type=f32)
            acc_o = acc_o + jnp.dot(lhs, w2o_ref[kh], preferred_element_type=f32)
        sh = sh2_ref[...]                                               # (1, 160)
        hm2_ref[b * H2:(b + 1) * H2, :] = jnp.maximum(
            jnp.maximum(acc_e + sh, acc_o + sh), 0.0)

    # ---- vertical half of pool2 ----
    for b in range(batch):
        for pi in range(P2):
            s = b * H2 + 2 * pi
            p2u_ref[b * P2 + pi:b * P2 + pi + 1, :] = jnp.maximum(
                hm2_ref[s:s + 1, :], hm2_ref[s + 1:s + 2, :])

    # ---- fc: flatten handled by host-side weight permutation + linear ----
    for b in range(batch):
        o = bfc_ref[...]                                                # (1, 128)
        for pi in range(P2):
            o = o + jnp.dot(p2u_ref[b * P2 + pi:b * P2 + pi + 1, :], wfc_ref[pi],
                            preferred_element_type=f32)
        out_ref[b:b + 1, :] = o


def cnn_forward(x_nchw, fp):
    """x: (B, 1, 32, 32) NCHW -> logits (B, 10), entirely inside one Pallas kernel."""
    B, C, H, W = x_nchw.shape
    assert C == IN_SIZE and H == IMG and W == IMG, (B, C, H, W)
    # C == 1, so the NCHW -> (B*H, W) flatten is a contiguous (free) reshape.
    x2d = x_nchw.reshape(B * IMG, IMG).astype(jnp.float32)

    out = pl.pallas_call(
        functools.partial(_fused_cnn_kernel, batch=B),
        out_shape=jax.ShapeDtypeStruct((B, NPAD), jnp.float32),
        scratch_shapes=[
            pltpu.VMEM((B * H1, L1), jnp.float32),   # hm1: relu + h-pooled conv1 rows
            pltpu.VMEM((B * P1, L1), jnp.float32),   # y1u: pooled layer-1 activation
            pltpu.VMEM((B * H2, L2), jnp.float32),   # hm2: relu + h-pooled conv2 rows
            pltpu.VMEM((B * P2, L2), jnp.float32),   # p2u: pooled layer-2 activation
        ],
    )(x2d, fp["w1e"], fp["w1o"], fp["sh1"], fp["w2e"], fp["w2o"], fp["sh2"],
      fp["wfc"], fp["bfc"])
    return out[:, :OUT_SIZE]


# ----------------------------------------------------------------------------
# Host-side parameter preparation (one-time): BN fold + banded block weights
# ----------------------------------------------------------------------------
def init_params(key):
    ks = jax.random.split(key, 14)
    p = {}
    # Conv weights stored HWIO (kh, kw, cin, cout); BN in inference mode.
    p["w1"] = jax.random.normal(ks[0], (KSIZE, KSIZE, IN_SIZE, HID1), jnp.float32) * 0.1
    p["b1"] = jax.random.normal(ks[1], (HID1,), jnp.float32) * 0.1
    p["g1"] = jax.random.uniform(ks[2], (HID1,), jnp.float32, 0.5, 1.5)
    p["beta1"] = jax.random.normal(ks[3], (HID1,), jnp.float32) * 0.1
    p["m1"] = jax.random.normal(ks[4], (HID1,), jnp.float32) * 0.1
    p["v1"] = jax.random.uniform(ks[5], (HID1,), jnp.float32, 0.5, 1.5)
    p["w2"] = jax.random.normal(ks[6], (KSIZE, KSIZE, HID1, HID2), jnp.float32) * 0.05
    p["b2"] = jax.random.normal(ks[7], (HID2,), jnp.float32) * 0.1
    p["g2"] = jax.random.uniform(ks[8], (HID2,), jnp.float32, 0.5, 1.5)
    p["beta2"] = jax.random.normal(ks[9], (HID2,), jnp.float32) * 0.1
    p["m2"] = jax.random.normal(ks[10], (HID2,), jnp.float32) * 0.1
    p["v2"] = jax.random.uniform(ks[11], (HID2,), jnp.float32, 0.5, 1.5)
    p["wfc"] = jax.random.normal(ks[12], (HID2 * KSIZE * KSIZE, OUT_SIZE), jnp.float32) * 0.05
    p["bfc"] = jax.random.normal(ks[13], (OUT_SIZE,), jnp.float32) * 0.1
    return p


def build_fused_params(p):
    """Fold BN scale into conv weights and re-layout them as banded block matrices."""
    s1 = np.asarray(p["g1"]) / np.sqrt(np.asarray(p["v1"]) + BN_EPS)
    sh1 = (np.asarray(p["b1"]) - np.asarray(p["m1"])) * s1 + np.asarray(p["beta1"])
    s2 = np.asarray(p["g2"]) / np.sqrt(np.asarray(p["v2"]) + BN_EPS)
    sh2 = (np.asarray(p["b2"]) - np.asarray(p["m2"])) * s2 + np.asarray(p["beta2"])
    w1 = np.asarray(p["w1"])      # (5, 5, 1, 16)  HWIO
    w2 = np.asarray(p["w2"])      # (5, 5, 16, 32) HWIO
    wfc = np.asarray(p["wfc"])    # (800, 10)
    bfc = np.asarray(p["bfc"])    # (10,)

    # layer-1 banded weights: input lane = image column j, output lane = 16*pj + co
    # (even/odd weights produce the even/odd conv columns of each pooling pair).
    w1e = np.zeros((KSIZE, IMG, L1), np.float32)
    w1o = np.zeros((KSIZE, IMG, L1), np.float32)
    for kh in range(KSIZE):
        for pj in range(P1):
            for kw in range(KSIZE):
                tap = w1[kh, kw, 0, :] * s1                              # (16,)
                w1e[kh, 2 * pj + kw, pj * HID1:(pj + 1) * HID1] = tap
                w1o[kh, 2 * pj + 1 + kw, pj * HID1:(pj + 1) * HID1] = tap
    sh1t = np.tile(sh1, P1).reshape(1, L1).astype(np.float32)

    # layer-2 banded weights: input lane = 16*pj1 + ci, output lane = 32*pj2 + co.
    w2e = np.zeros((KSIZE, L1, L2), np.float32)
    w2o = np.zeros((KSIZE, L1, L2), np.float32)
    for kh in range(KSIZE):
        for pj2 in range(P2):
            for kw in range(KSIZE):
                tap = w2[kh, kw, :, :] * s2[None, :]                     # (16, 32)
                pj1_e = 2 * pj2 + kw
                pj1_o = 2 * pj2 + 1 + kw
                w2e[kh, pj1_e * HID1:(pj1_e + 1) * HID1,
                    pj2 * HID2:(pj2 + 1) * HID2] = tap
                w2o[kh, pj1_o * HID1:(pj1_o + 1) * HID1,
                    pj2 * HID2:(pj2 + 1) * HID2] = tap
    sh2t = np.tile(sh2, P2).reshape(1, L2).astype(np.float32)

    # fc weight: rows re-permuted from PyTorch channel-major flatten (c*25 + h*5 + w)
    # to the kernel's pooled layout (matmul index pi2 = h, lane = 32*w + c); padded
    # to 128 output lanes so the final store is lane-dense.
    wfcb = np.zeros((P2, L2, NPAD), np.float32)
    for pi2 in range(P2):            # pooled row (h)
        for pj2 in range(P2):        # pooled col (w)
            rows = np.arange(HID2) * (P2 * P2) + pi2 * P2 + pj2
            wfcb[pi2, pj2 * HID2:(pj2 + 1) * HID2, :OUT_SIZE] = wfc[rows, :]
    bfcp = np.zeros((1, NPAD), np.float32)
    bfcp[0, :OUT_SIZE] = bfc

    fused = dict(w1e=w1e, w1o=w1o, sh1=sh1t, w2e=w2e, w2o=w2o, sh2=sh2t,
                 wfc=wfcb, bfc=bfcp)
    return {k: jnp.asarray(v) for k, v in fused.items()}


# ----------------------------------------------------------------------------
# Pure-JAX reference (for correctness check)
# ----------------------------------------------------------------------------
def reference_forward(x_nchw, p):
    dn = ("NCHW", "OIHW", "NCHW")
    hi = jax.lax.Precision.HIGHEST

    def bn(y, g, b, m, v):
        return (y - m[None, :, None, None]) / jnp.sqrt(v + BN_EPS)[None, :, None, None] \
            * g[None, :, None, None] + b[None, :, None, None]

    def pool(y):
        return jax.lax.reduce_window(y, -jnp.inf, jax.lax.max,
                                     (1, 1, 2, 2), (1, 1, 2, 2), "VALID")

    w1 = jnp.transpose(p["w1"], (3, 2, 0, 1))
    w2 = jnp.transpose(p["w2"], (3, 2, 0, 1))
    y = jax.lax.conv_general_dilated(x_nchw, w1, (1, 1), "VALID",
                                     dimension_numbers=dn, precision=hi)
    y = y + p["b1"][None, :, None, None]
    y = pool(jnp.maximum(bn(y, p["g1"], p["beta1"], p["m1"], p["v1"]), 0.0))
    y = jax.lax.conv_general_dilated(y, w2, (1, 1), "VALID",
                                     dimension_numbers=dn, precision=hi)
    y = y + p["b2"][None, :, None, None]
    y = pool(jnp.maximum(bn(y, p["g2"], p["beta2"], p["m2"], p["v2"]), 0.0))
    flat = y.reshape(y.shape[0], -1)
    return jnp.dot(flat, p["wfc"], precision=hi) + p["bfc"][None, :]


if __name__ == "__main__":
    key = jax.random.PRNGKey(0)
    pkey, xkey = jax.random.split(key)
    params = init_params(pkey)
    fused = build_fused_params(params)   # one-time host-side prep

    # 32x32 input so the flattened layer-2 output is hid2*5*5 = 800 (fc in-features).
    x = jax.random.normal(xkey, (2, IN_SIZE, IMG, IMG), jnp.float32)  # NCHW like PyTorch

    out = jax.jit(cnn_forward)(x, fused)
    out = jax.block_until_ready(out)
    assert out.shape == (2, OUT_SIZE), out.shape

    ref = reference_forward(x, params)
    np.testing.assert_allclose(np.asarray(out), np.asarray(ref), rtol=2e-3, atol=2e-3)

    print("KERNEL_OK")
</pallas_src>

<mosaic_0001>
module attributes {stable_mosaic.version = 11 : i64} {
  func.func @_fused_cnn_kernel(%arg0: memref<64x32xf32, #tpu.memory_space<vmem>>, %arg1: memref<5x32x224xf32, #tpu.memory_space<vmem>>, %arg2: memref<5x32x224xf32, #tpu.memory_space<vmem>>, %arg3: memref<1x224xf32, #tpu.memory_space<vmem>>, %arg4: memref<5x224x160xf32, #tpu.memory_space<vmem>>, %arg5: memref<5x224x160xf32, #tpu.memory_space<vmem>>, %arg6: memref<1x160xf32, #tpu.memory_space<vmem>>, %arg7: memref<5x160x128xf32, #tpu.memory_space<vmem>>, %arg8: memref<1x128xf32, #tpu.memory_space<vmem>>, %arg9: memref<2x128xf32, #tpu.memory_space<vmem>>, %arg10: memref<56x224xf32, #tpu.memory_space<vmem>>, %arg11: memref<28x224xf32, #tpu.memory_space<vmem>>, %arg12: memref<20x160xf32, #tpu.memory_space<vmem>>, %arg13: memref<10x160xf32, #tpu.memory_space<vmem>>) attributes {dimension_semantics = [], scalar_prefetch = 0 : i64, scratch_operands = 4 : i64, tpu.core_type = #tpu.core_type<tc>} {
    %cst = arith.constant 0.000000e+00 : f32
    %0 = vector.broadcast %cst : f32 to vector<28x224xf32>
    %cst_0 = arith.constant 0.000000e+00 : f32
    %1 = vector.broadcast %cst_0 : f32 to vector<28x224xf32>
    %c0 = arith.constant 0 : index
    %c0_1 = arith.constant 0 : index
    %2 = vector.load %arg0[%c0, %c0_1] : memref<64x32xf32, #tpu.memory_space<vmem>>, vector<28x32xf32>
    %c0_2 = arith.constant 0 : index
    %c0_3 = arith.constant 0 : index
    %c0_4 = arith.constant 0 : index
    %3 = vector.load %arg1[%c0_2, %c0_3, %c0_4] : memref<5x32x224xf32, #tpu.memory_space<vmem>>, vector<1x32x224xf32>
    %4 = vector.shape_cast %3 : vector<1x32x224xf32> to vector<32x224xf32>
    %cst_5 = arith.constant dense<0.000000e+00> : vector<28x224xf32>
    %5 = tpu.matmul %2, %4, %cst_5 {dimension_numbers = #tpu.dot_dimension_numbers<[1], [0], [0], [1], [0, 0, 1, 1], [], []>} : vector<28x32xf32>, vector<32x224xf32>, vector<28x224xf32> -> vector<28x224xf32>
    %6 = arith.addf %0, %5 : vector<28x224xf32>
    %c0_6 = arith.constant 0 : index
    %c0_7 = arith.constant 0 : index
    %c0_8 = arith.constant 0 : index
    %7 = vector.load %arg2[%c0_6, %c0_7, %c0_8] : memref<5x32x224xf32, #tpu.memory_space<vmem>>, vector<1x32x224xf32>
    %8 = vector.shape_cast %7 : vector<1x32x224xf32> to vector<32x224xf32>
    %cst_9 = arith.constant dense<0.000000e+00> : vector<28x224xf32>
    %9 = tpu.matmul %2, %8, %cst_9 {dimension_numbers = #tpu.dot_dimension_numbers<[1], [0], [0], [1], [0, 0, 1, 1], [], []>} : vector<28x32xf32>, vector<32x224xf32>, vector<28x224xf32> -> vector<28x224xf32>
    %10 = arith.addf %1, %9 : vector<28x224xf32>
    %c1 = arith.constant 1 : index
    %c0_10 = arith.constant 0 : index
    %11 = vector.load %arg0[%c1, %c0_10] : memref<64x32xf32, #tpu.memory_space<vmem>>, vector<28x32xf32>
    %c1_11 = arith.constant 1 : index
    %c0_12 = arith.constant 0 : index
    %c0_13 = arith.constant 0 : index
    %12 = vector.load %arg1[%c1_11, %c0_12, %c0_13] : memref<5x32x224xf32, #tpu.memory_space<vmem>>, vector<1x32x224xf32>
    %13 = vector.shape_cast %12 : vector<1x32x224xf32> to vector<32x224xf32>
    %cst_14 = arith.constant dense<0.000000e+00> : vector<28x224xf32>
    %14 = tpu.matmul %11, %13, %cst_14 {dimension_numbers = #tpu.dot_dimension_numbers<[1], [0], [0], [1], [0, 0, 1, 1], [], []>} : vector<28x32xf32>, vector<32x224xf32>, vector<28x224xf32> -> vector<28x224xf32>
    %15 = arith.addf %6, %14 : vector<28x224xf32>
    %c1_15 = arith.constant 1 : index
    %c0_16 = arith.constant 0 : index
    %c0_17 = arith.constant 0 : index
    %16 = vector.load %arg2[%c1_15, %c0_16, %c0_17] : memref<5x32x224xf32, #tpu.memory_space<vmem>>, vector<1x32x224xf32>
    %17 = vector.shape_cast %16 : vector<1x32x224xf32> to vector<32x224xf32>
    %cst_18 = arith.constant dense<0.000000e+00> : vector<28x224xf32>
    %18 = tpu.matmul %11, %17, %cst_18 {dimension_numbers = #tpu.dot_dimension_numbers<[1], [0], [0], [1], [0, 0, 1, 1], [], []>} : vector<28x32xf32>, vector<32x224xf32>, vector<28x224xf32> -> vector<28x224xf32>
    %19 = arith.addf %10, %18 : vector<28x224xf32>
    %c2 = arith.constant 2 : index
    %c0_19 = arith.constant 0 : index
    %20 = vector.load %arg0[%c2, %c0_19] : memref<64x32xf32, #tpu.memory_space<vmem>>, vector<28x32xf32>
    %c2_20 = arith.constant 2 : index
    %c0_21 = arith.constant 0 : index
    %c0_22 = arith.constant 0 : index
    %21 = vector.load %arg1[%c2_20, %c0_21, %c0_22] : memref<5x32x224xf32, #tpu.memory_space<vmem>>, vector<1x32x224xf32>
    %22 = vector.shape_cast %21 : vector<1x32x224xf32> to vector<32x224xf32>
    %cst_23 = arith.constant dense<0.000000e+00> : vector<28x224xf32>
    %23 = tpu.matmul %20, %22, %cst_23 {dimension_numbers = #tpu.dot_dimension_numbers<[1], [0], [0], [1], [0, 0, 1, 1], [], []>} : vector<28x32xf32>, vector<32x224xf32>, vector<28x224xf32> -> vector<28x224xf32>
    %24 = arith.addf %15, %23 : vector<28x224xf32>
    %c2_24 = arith.constant 2 : index
    %c0_25 = arith.constant 0 : index
    %c0_26 = arith.constant 0 : index
    %25 = vector.load %arg2[%c2_24, %c0_25, %c0_26] : memref<5x32x224xf32, #tpu.memory_space<vmem>>, vector<1x32x224xf32>
    %26 = vector.shape_cast %25 : vector<1x32x224xf32> to vector<32x224xf32>
    %cst_27 = arith.constant dense<0.000000e+00> : vector<28x224xf32>
    %27 = tpu.matmul %20, %26, %cst_27 {dimension_numbers = #tpu.dot_dimension_numbers<[1], [0], [0], [1], [0, 0, 1, 1], [], []>} : vector<28x32xf32>, vector<32x224xf32>, vector<28x224xf32> -> vector<28x224xf32>
    %28 = arith.addf %19, %27 : vector<28x224xf32>
    %c3 = arith.constant 3 : index
    %c0_28 = arith.constant 0 : index
    %29 = vector.load %arg0[%c3, %c0_28] : memref<64x32xf32, #tpu.memory_space<vmem>>, vector<28x32xf32>
    %c3_29 = arith.constant 3 : index
    %c0_30 = arith.constant 0 : index
    %c0_31 = arith.constant 0 : index
    %30 = vector.load %arg1[%c3_29, %c0_30, %c0_31] : memref<5x32x224xf32, #tpu.memory_space<vmem>>, vector<1x32x224xf32>
    %31 = vector.shape_cast %30 : vector<1x32x224xf32> to vector<32x224xf32>
    %cst_32 = arith.constant dense<0.000000e+00> : vector<28x224xf32>
    %32 = tpu.matmul %29, %31, %cst_32 {dimension_numbers = #tpu.dot_dimension_numbers<[1], [0], [0], [1], [0, 0, 1, 1], [], []>} : vector<28x32xf32>, vector<32x224xf32>, vector<28x224xf32> -> vector<28x224xf32>
    %33 = arith.addf %24, %32 : vector<28x224xf32>
    %c3_33 = arith.constant 3 : index
    %c0_34 = arith.constant 0 : index
    %c0_35 = arith.constant 0 : index
    %34 = vector.load %arg2[%c3_33, %c0_34, %c0_35] : memref<5x32x224xf32, #tpu.memory_space<vmem>>, vector<1x32x224xf32>
    %35 = vector.shape_cast %34 : vector<1x32x224xf32> to vector<32x224xf32>
    %cst_36 = arith.constant dense<0.000000e+00> : vector<28x224xf32>
    %36 = tpu.matmul %29, %35, %cst_36 {dimension_numbers = #tpu.dot_dimension_numbers<[1], [0], [0], [1], [0, 0, 1, 1], [], []>} : vector<28x32xf32>, vector<32x224xf32>, vector<28x224xf32> -> vector<28x224xf32>
    %37 = arith.addf %28, %36 : vector<28x224xf32>
    %c4 = arith.constant 4 : index
    %c0_37 = arith.constant 0 : index
    %38 = vector.load %arg0[%c4, %c0_37] : memref<64x32xf32, #tpu.memory_space<vmem>>, vector<28x32xf32>
    %c4_38 = arith.constant 4 : index
    %c0_39 = arith.constant 0 : index
    %c0_40 = arith.constant 0 : index
    %39 = vector.load %arg1[%c4_38, %c0_39, %c0_40] : memref<5x32x224xf32, #tpu.memory_space<vmem>>, vector<1x32x224xf32>
    %40 = vector.shape_cast %39 : vector<1x32x224xf32> to vector<32x224xf32>
    %cst_41 = arith.constant dense<0.000000e+00> : vector<28x224xf32>
    %41 = tpu.matmul %38, %40, %cst_41 {dimension_numbers = #tpu.dot_dimension_numbers<[1], [0], [0], [1], [0, 0, 1, 1], [], []>} : vector<28x32xf32>, vector<32x224xf32>, vector<28x224xf32> -> vector<28x224xf32>
    %42 = arith.addf %33, %41 : vector<28x224xf32>
    %c4_42 = arith.constant 4 : index
    %c0_43 = arith.constant 0 : index
    %c0_44 = arith.constant 0 : index
    %43 = vector.load %arg2[%c4_42, %c0_43, %c0_44] : memref<5x32x224xf32, #tpu.memory_space<vmem>>, vector<1x32x224xf32>
    %44 = vector.shape_cast %43 : vector<1x32x224xf32> to vector<32x224xf32>
    %cst_45 = arith.constant dense<0.000000e+00> : vector<28x224xf32>
    %45 = tpu.matmul %38, %44, %cst_45 {dimension_numbers = #tpu.dot_dimension_numbers<[1], [0], [0], [1], [0, 0, 1, 1], [], []>} : vector<28x32xf32>, vector<32x224xf32>, vector<28x224xf32> -> vector<28x224xf32>
    %46 = arith.addf %37, %45 : vector<28x224xf32>
    %c0_46 = arith.constant 0 : index
    %c0_47 = arith.constant 0 : index
    %47 = vector.load %arg3[%c0_46, %c0_47] : memref<1x224xf32, #tpu.memory_space<vmem>>, vector<1x224xf32>
    %48 = vector.broadcast %47 : vector<1x224xf32> to vector<28x224xf32>
    %49 = arith.addf %42, %48 : vector<28x224xf32>
    %50 = vector.broadcast %47 : vector<1x224xf32> to vector<28x224xf32>
    %51 = arith.addf %46, %50 : vector<28x224xf32>
    %52 = arith.maximumf %49, %51 : vector<28x224xf32>
    %cst_48 = arith.constant 0.000000e+00 : f32
    %53 = vector.broadcast %cst_48 : f32 to vector<28x224xf32>
    %54 = arith.maximumf %52, %53 : vector<28x224xf32>
    %c0_49 = arith.constant 0 : index
    %c0_50 = arith.constant 0 : index
    %55 = vector.load %arg10[%c0_49, %c0_50] : memref<56x224xf32, #tpu.memory_space<vmem>>, vector<28x224xf32>
    tpu.vector_store %arg10[%c0_49, %c0_50], %54 {strides = array<i32>} : memref<56x224xf32, #tpu.memory_space<vmem>>, vector<28x224xf32>,
    %cst_51 = arith.constant 0.000000e+00 : f32
    %56 = vector.broadcast %cst_51 : f32 to vector<28x224xf32>
    %cst_52 = arith.constant 0.000000e+00 : f32
    %57 = vector.broadcast %cst_52 : f32 to vector<28x224xf32>
    %c32 = arith.constant 32 : index
    %c0_53 = arith.constant 0 : index
    %58 = vector.load %arg0[%c32, %c0_53] : memref<64x32xf32, #tpu.memory_space<vmem>>, vector<28x32xf32>
    %c0_54 = arith.constant 0 : index
    %c0_55 = arith.constant 0 : index
    %c0_56 = arith.constant 0 : index
    %59 = vector.load %arg1[%c0_54, %c0_55, %c0_56] : memref<5x32x224xf32, #tpu.memory_space<vmem>>, vector<1x32x224xf32>
    %60 = vector.shape_cast %59 : vector<1x32x224xf32> to vector<32x224xf32>
    %cst_57 = arith.constant dense<0.000000e+00> : vector<28x224xf32>
    %61 = tpu.matmul %58, %60, %cst_57 {dimension_numbers = #tpu.dot_dimension_numbers<[1], [0], [0], [1], [0, 0, 1, 1], [], []>} : vector<28x32xf32>, vector<32x224xf32>, vector<28x224xf32> -> vector<28x224xf32>
    %62 = arith.addf %56, %61 : vector<28x224xf32>
    %c0_58 = arith.constant 0 : index
    %c0_59 = arith.constant 0 : index
    %c0_60 = arith.constant 0 : index
    %63 = vector.load %arg2[%c0_58, %c0_59, %c0_60] : memref<5x32x224xf32, #tpu.memory_space<vmem>>, vector<1x32x224xf32>
    %64 = vector.shape_cast %63 : vector<1x32x224xf32> to vector<32x224xf32>
    %cst_61 = arith.constant dense<0.000000e+00> : vector<28x224xf32>
    %65 = tpu.matmul %58, %64, %cst_61 {dimension_numbers = #tpu.dot_dimension_numbers<[1], [0], [0], [1], [0, 0, 1, 1], [], []>} : vector<28x32xf32>, vector<32x224xf32>, vector<28x224xf32> -> vector<28x224xf32>
    %66 = arith.addf %57, %65 : vector<28x224xf32>
    %c33 = arith.constant 33 : index
    %c0_62 = arith.constant 0 : index
    %67 = vector.load %arg0[%c33, %c0_62] : memref<64x32xf32, #tpu.memory_space<vmem>>, vector<28x32xf32>
    %c1_63 = arith.constant 1 : index
    %c0_64 = arith.constant 0 : index
    %c0_65 = arith.constant 0 : index
    %68 = vector.load %arg1[%c1_63, %c0_64, %c0_65] : memref<5x32x224xf32, #tpu.memory_space<vmem>>, vector<1x32x224xf32>
    %69 = vector.shape_cast %68 : vector<1x32x224xf32> to vector<32x224xf32>
    %cst_66 = arith.constant dense<0.000000e+00> : vector<28x224xf32>
    %70 = tpu.matmul %67, %69, %cst_66 {dimension_numbers = #tpu.dot_dimension_numbers<[1], [0], [0], [1], [0, 0, 1, 1], [], []>} : vector<28x32xf32>, vector<32x224xf32>, vector<28x224xf32> -> vector<28x224xf32>
    %71 = arith.addf %62, %70 : vector<28x224xf32>
    %c1_67 = arith.constant 1 : index
    %c0_68 = arith.constant 0 : index
    %c0_69 = arith.constant 0 : index
    %72 = vector.load %arg2[%c1_67, %c0_68, %c0_69] : memref<5x32x224xf32, #tpu.memory_space<vmem>>, vector<1x32x224xf32>
    %73 = vector.shape_cast %72 : vector<1x32x224xf32> to vector<32x224xf32>
    %cst_70 = arith.constant dense<0.000000e+00> : vector<28x224xf32>
    %74 = tpu.matmul %67, %73, %cst_70 {dimension_numbers = #tpu.dot_dimension_numbers<[1], [0], [0], [1], [0, 0, 1, 1], [], []>} : vector<28x32xf32>, vector<32x224xf32>, vector<28x224xf32> -> vector<28x224xf32>
    %75 = arith.addf %66, %74 : vector<28x224xf32>
    %c34 = arith.constant 34 : index
    %c0_71 = arith.constant 0 : index
    %76 = vector.load %arg0[%c34, %c0_71] : memref<64x32xf32, #tpu.memory_space<vmem>>, vector<28x32xf32>
    %c2_72 = arith.constant 2 : index
    %c0_73 = arith.constant 0 : index
    %c0_74 = arith.constant 0 : index
    %77 = vector.load %arg1[%c2_72, %c0_73, %c0_74] : memref<5x32x224xf32, #tpu.memory_space<vmem>>, vector<1x32x224xf32>
    %78 = vector.shape_cast %77 : vector<1x32x224xf32> to vector<32x224xf32>
    %cst_75 = arith.constant dense<0.000000e+00> : vector<28x224xf32>
    %79 = tpu.matmul %76, %78, %cst_75 {dimension_numbers = #tpu.dot_dimension_numbers<[1], [0], [0], [1], [0, 0, 1, 1], [], []>} : vector<28x32xf32>, vector<32x224xf32>, vector<28x224xf32> -> vector<28x224xf32>
    %80 = arith.addf %71, %79 : vector<28x224xf32>
    %c2_76 = arith.constant 2 : index
    %c0_77 = arith.constant 0 : index
    %c0_78 = arith.constant 0 : index
    %81 = vector.load %arg2[%c2_76, %c0_77, %c0_78] : memref<5x32x224xf32, #tpu.memory_space<vmem>>, vector<1x32x224xf32>
    %82 = vector.shape_cast %81 : vector<1x32x224xf32> to vector<32x224xf32>
    %cst_79 = arith.constant dense<0.000000e+00> : vector<28x224xf32>
    %83 = tpu.matmul %76, %82, %cst_79 {dimension_numbers = #tpu.dot_dimension_numbers<[1], [0], [0], [1], [0, 0, 1, 1], [], []>} : vector<28x32xf32>, vector<32x224xf32>, vector<28x224xf32> -> vector<28x224xf32>
    %84 = arith.addf %75, %83 : vector<28x224xf32>
    %c35 = arith.constant 35 : index
    %c0_80 = arith.constant 0 : index
    %85 = vector.load %arg0[%c35, %c0_80] : memref<64x32xf32, #tpu.memory_space<vmem>>, vector<28x32xf32>
    %c3_81 = arith.constant 3 : index
    %c0_82 = arith.constant 0 : index
    %c0_83 = arith.constant 0 : index
    %86 = vector.load %arg1[%c3_81, %c0_82, %c0_83] : memref<5x32x224xf32, #tpu.memory_space<vmem>>, vector<1x32x224xf32>
    %87 = vector.shape_cast %86 : vector<1x32x224xf32> to vector<32x224xf32>
    %cst_84 = arith.constant dense<0.000000e+00> : vector<28x224xf32>
    %88 = tpu.matmul %85, %87, %cst_84 {dimension_numbers = #tpu.dot_dimension_numbers<[1], [0], [0], [1], [0, 0, 1, 1], [], []>} : vector<28x32xf32>, vector<32x224xf32>, vector<28x224xf32> -> vector<28x224xf32>
    %89 = arith.addf %80, %88 : vector<28x224xf32>
    %c3_85 = arith.constant 3 : index
    %c0_86 = arith.constant 0 : index
    %c0_87 = arith.constant 0 : index
    %90 = vector.load %arg2[%c3_85, %c0_86, %c0_87] : memref<5x32x224xf32, #tpu.memory_space<vmem>>, vector<1x32x224xf32>
    %91 = vector.shape_cast %90 : vector<1x32x224xf32> to vector<32x224xf32>
    %cst_88 = arith.constant dense<0.000000e+00> : vector<28x224xf32>
    %92 = tpu.matmul %85, %91, %cst_88 {dimension_numbers = #tpu.dot_dimension_numbers<[1], [0], [0], [1], [0, 0, 1, 1], [], []>} : vector<28x32xf32>, vector<32x224xf32>, vector<28x224xf32> -> vector<28x224xf32>
    %93 = arith.addf %84, %92 : vector<28x224xf32>
    %c36 = arith.constant 36 : index
    %c0_89 = arith.constant 0 : index
    %94 = vector.load %arg0[%c36, %c0_89] : memref<64x32xf32, #tpu.memory_space<vmem>>, vector<28x32xf32>
    %c4_90 = arith.constant 4 : index
    %c0_91 = arith.constant 0 : index
    %c0_92 = arith.constant 0 : index
    %95 = vector.load %arg1[%c4_90, %c0_91, %c0_92] : memref<5x32x224xf32, #tpu.memory_space<vmem>>, vector<1x32x224xf32>
    %96 = vector.shape_cast %95 : vector<1x32x224xf32> to vector<32x224xf32>
    %cst_93 = arith.constant dense<0.000000e+00> : vector<28x224xf32>
    %97 = tpu.matmul %94, %96, %cst_93 {dimension_numbers = #tpu.dot_dimension_numbers<[1], [0], [0], [1], [0, 0, 1, 1], [], []>} : vector<28x32xf32>, vector<32x224xf32>, vector<28x224xf32> -> vector<28x224xf32>
    %98 = arith.addf %89, %97 : vector<28x224xf32>
    %c4_94 = arith.constant 4 : index
    %c0_95 = arith.constant 0 : index
    %c0_96 = arith.constant 0 : index
    %99 = vector.load %arg2[%c4_94, %c0_95, %c0_96] : memref<5x32x224xf32, #tpu.memory_space<vmem>>, vector<1x32x224xf32>
    %100 = vector.shape_cast %99 : vector<1x32x224xf32> to vector<32x224xf32>
    %cst_97 = arith.constant dense<0.000000e+00> : vector<28x224xf32>
    %101 = tpu.matmul %94, %100, %cst_97 {dimension_numbers = #tpu.dot_dimension_numbers<[1], [0], [0], [1], [0, 0, 1, 1], [], []>} : vector<28x32xf32>, vector<32x224xf32>, vector<28x224xf32> -> vector<28x224xf32>
    %102 = arith.addf %93, %101 : vector<28x224xf32>
    %c0_98 = arith.constant 0 : index
    %c0_99 = arith.constant 0 : index
    %103 = vector.load %arg3[%c0_98, %c0_99] : memref<1x224xf32, #tpu.memory_space<vmem>>, vector<1x224xf32>
    %104 = vector.broadcast %103 : vector<1x224xf32> to vector<28x224xf32>
    %105 = arith.addf %98, %104 : vector<28x224xf32>
    %106 = vector.broadcast %103 : vector<1x224xf32> to vector<28x224xf32>
    %107 = arith.addf %102, %106 : vector<28x224xf32>
    %108 = arith.maximumf %105, %107 : vector<28x224xf32>
    %cst_100 = arith.constant 0.000000e+00 : f32
    %109 = vector.broadcast %cst_100 : f32 to vector<28x224xf32>
    %110 = arith.maximumf %108, %109 : vector<28x224xf32>
    %c28 = arith.constant 28 : index
    %c0_101 = arith.constant 0 : index
    %111 = vector.load %arg10[%c28, %c0_101] : memref<56x224xf32, #tpu.memory_space<vmem>>, vector<28x224xf32>
    tpu.vector_store %arg10[%c28, %c0_101], %110 {strides = array<i32>} : memref<56x224xf32, #tpu.memory_space<vmem>>, vector<28x224xf32>,
    %c0_102 = arith.constant 0 : index
    %c0_103 = arith.constant 0 : index
    %112 = vector.load %arg10[%c0_102, %c0_103] : memref<56x224xf32, #tpu.memory_space<vmem>>, vector<1x224xf32>
    %c1_104 = arith.constant 1 : index
    %c0_105 = arith.constant 0 : index
    %113 = vector.load %arg10[%c1_104, %c0_105] : memref<56x224xf32, #tpu.memory_space<vmem>>, vector<1x224xf32>
    %114 = arith.maximumf %112, %113 : vector<1x224xf32>
    %c0_106 = arith.constant 0 : index
    %c0_107 = arith.constant 0 : index
    %115 = vector.load %arg11[%c0_106, %c0_107] : memref<28x224xf32, #tpu.memory_space<vmem>>, vector<1x224xf32>
    tpu.vector_store %arg11[%c0_106, %c0_107], %114 {strides = array<i32>} : memref<28x224xf32, #tpu.memory_space<vmem>>, vector<1x224xf32>,
    %c2_108 = arith.constant 2 : index
    %c0_109 = arith.constant 0 : index
    %116 = vector.load %arg10[%c2_108, %c0_109] : memref<56x224xf32, #tpu.memory_space<vmem>>, vector<1x224xf32>
    %c3_110 = arith.constant 3 : index
    %c0_111 = arith.constant 0 : index
    %117 = vector.load %arg10[%c3_110, %c0_111] : memref<56x224xf32, #tpu.memory_space<vmem>>, vector<1x224xf32>
    %118 = arith.maximumf %116, %117 : vector<1x224xf32>
    %c1_112 = arith.constant 1 : index
    %c0_113 = arith.constant 0 : index
    %119 = vector.load %arg11[%c1_112, %c0_113] : memref<28x224xf32, #tpu.memory_space<vmem>>, vector<1x224xf32>
    tpu.vector_store %arg11[%c1_112, %c0_113], %118 {strides = array<i32>} : memref<28x224xf32, #tpu.memory_space<vmem>>, vector<1x224xf32>,
    %c4_114 = arith.constant 4 : index
    %c0_115 = arith.constant 0 : index
    %120 = vector.load %arg10[%c4_114, %c0_115] : memref<56x224xf32, #tpu.memory_space<vmem>>, vector<1x224xf32>
    %c5 = arith.constant 5 : index
    %c0_116 = arith.constant 0 : index
    %121 = vector.load %arg10[%c5, %c0_116] : memref<56x224xf32, #tpu.memory_space<vmem>>, vector<1x224xf32>
    %122 = arith.maximumf %120, %121 : vector<1x224xf32>
    %c2_117 = arith.constant 2 : index
    %c0_118 = arith.constant 0 : index
    %123 = vector.load %arg11[%c2_117, %c0_118] : memref<28x224xf32, #tpu.memory_space<vmem>>, vector<1x224xf32>
    tpu.vector_store %arg11[%c2_117, %c0_118], %122 {strides = array<i32>} : memref<28x224xf32, #tpu.memory_space<vmem>>, vector<1x224xf32>,
    %c6 = arith.constant 6 : index
    %c0_119 = arith.constant 0 : index
    %124 = vector.load %arg10[%c6, %c0_119] : memref<56x224xf32, #tpu.memory_space<vmem>>, vector<1x224xf32>
    %c7 = arith.constant 7 : index
    %c0_120 = arith.constant 0 : index
    %125 = vector.load %arg10[%c7, %c0_120] : memref<56x224xf32, #tpu.memory_space<vmem>>, vector<1x224xf32>
    %126 = arith.maximumf %124, %125 : vector<1x224xf32>
    %c3_121 = arith.constant 3 : index
    %c0_122 = arith.constant 0 : index
    %127 = vector.load %arg11[%c3_121, %c0_122] : memref<28x224xf32, #tpu.memory_space<vmem>>, vector<1x224xf32>
    tpu.vector_store %arg11[%c3_121, %c0_122], %126 {strides = array<i32>} : memref<28x224xf32, #tpu.memory_space<vmem>>, vector<1x224xf32>,
    %c8 = arith.constant 8 : index
    %c0_123 = arith.constant 0 : index
    %128 = vector.load %arg10[%c8, %c0_123] : memref<56x224xf32, #tpu.memory_space<vmem>>, vector<1x224xf32>
    %c9 = arith.constant 9 : index
    %c0_124 = arith.constant 0 : index
    %129 = vector.load %arg10[%c9, %c0_124] : memref<56x224xf32, #tpu.memory_space<vmem>>, vector<1x224xf32>
    %130 = arith.maximumf %128, %129 : vector<1x224xf32>
    %c4_125 = arith.constant 4 : index
    %c0_126 = arith.constant 0 : index
    %131 = vector.load %arg11[%c4_125, %c0_126] : memref<28x224xf32, #tpu.memory_space<vmem>>, vector<1x224xf32>
    tpu.vector_store %arg11[%c4_125, %c0_126], %130 {strides = array<i32>} : memref<28x224xf32, #tpu.memory_space<vmem>>, vector<1x224xf32>,
    %c10 = arith.constant 10 : index
    %c0_127 = arith.constant 0 : index
    %132 = vector.load %arg10[%c10, %c0_127] : memref<56x224xf32, #tpu.memory_space<vmem>>, vector<1x224xf32>
    %c11 = arith.constant 11 : index
    %c0_128 = arith.constant 0 : index
    %133 = vector.load %arg10[%c11, %c0_128] : memref<56x224xf32, #tpu.memory_space<vmem>>, vector<1x224xf32>
    %134 = arith.maximumf %132, %133 : vector<1x224xf32>
    %c5_129 = arith.constant 5 : index
    %c0_130 = arith.constant 0 : index
    %135 = vector.load %arg11[%c5_129, %c0_130] : memref<28x224xf32, #tpu.memory_space<vmem>>, vector<1x224xf32>
    tpu.vector_store %arg11[%c5_129, %c0_130], %134 {strides = array<i32>} : memref<28x224xf32, #tpu.memory_space<vmem>>, vector<1x224xf32>,
    %c12 = arith.constant 12 : index
    %c0_131 = arith.constant 0 : index
    %136 = vector.load %arg10[%c12, %c0_131] : memref<56x224xf32, #tpu.memory_space<vmem>>, vector<1x224xf32>
    %c13 = arith.constant 13 : index
    %c0_132 = arith.constant 0 : index
    %137 = vector.load %arg10[%c13, %c0_132] : memref<56x224xf32, #tpu.memory_space<vmem>>, vector<1x224xf32>
    %138 = arith.maximumf %136, %137 : vector<1x224xf32>
    %c6_133 = arith.constant 6 : index
    %c0_134 = arith.constant 0 : index
    %139 = vector.load %arg11[%c6_133, %c0_134] : memref<28x224xf32, #tpu.memory_space<vmem>>, vector<1x224xf32>
    tpu.vector_store %arg11[%c6_133, %c0_134], %138 {strides = array<i32>} : memref<28x224xf32, #tpu.memory_space<vmem>>, vector<1x224xf32>,
    %c14 = arith.constant 14 : index
    %c0_135 = arith.constant 0 : index
    %140 = vector.load %arg10[%c14, %c0_135] : memref<56x224xf32, #tpu.memory_space<vmem>>, vector<1x224xf32>
    %c15 = arith.constant 15 : index
    %c0_136 = arith.constant 0 : index
    %141 = vector.load %arg10[%c15, %c0_136] : memref<56x224xf32, #tpu.memory_space<vmem>>, vector<1x224xf32>
    %142 = arith.maximumf %140, %141 : vector<1x224xf32>
    %c7_137 = arith.constant 7 : index
    %c0_138 = arith.constant 0 : index
    %143 = vector.load %arg11[%c7_137, %c0_138] : memref<28x224xf32, #tpu.memory_space<vmem>>, vector<1x224xf32>
    tpu.vector_store %arg11[%c7_137, %c0_138], %142 {strides = array<i32>} : memref<28x224xf32, #tpu.memory_space<vmem>>, vector<1x224xf32>,
    %c16 = arith.constant 16 : index
    %c0_139 = arith.constant 0 : index
    %144 = vector.load %arg10[%c16, %c0_139] : memref<56x224xf32, #tpu.memory_space<vmem>>, vector<1x224xf32>
    %c17 = arith.constant 17 : index
    %c0_140 = arith.constant 0 : index
    %145 = vector.load %arg10[%c17, %c0_140] : memref<56x224xf32, #tpu.memory_space<vmem>>, vector<1x224xf32>
    %146 = arith.maximumf %144, %145 : vector<1x224xf32>
    %c8_141 = arith.constant 8 : index
    %c0_142 = arith.constant 0 : index
    %147 = vector.load %arg11[%c8_141, %c0_142] : memref<28x224xf32, #tpu.memory_space<vmem>>, vector<1x224xf32>
    tpu.vector_store %arg11[%c8_141, %c0_142], %146 {strides = array<i32>} : memref<28x224xf32, #tpu.memory_space<vmem>>, vector<1x224xf32>,
    %c18 = arith.constant 18 : index
    %c0_143 = arith.constant 0 : index
    %148 = vector.load %arg10[%c18, %c0_143] : memref<56x224xf32, #tpu.memory_space<vmem>>, vector<1x224xf32>
    %c19 = arith.constant 19 : index
    %c0_144 = arith.constant 0 : index
    %149 = vector.load %arg10[%c19, %c0_144] : memref<56x224xf32, #tpu.memory_space<vmem>>, vector<1x224xf32>
    %150 = arith.maximumf %148, %149 : vector<1x224xf32>
    %c9_145 = arith.constant 9 : index
    %c0_146 = arith.constant 0 : index
    %151 = vector.load %arg11[%c9_145, %c0_146] : memref<28x224xf32, #tpu.memory_space<vmem>>, vector<1x224xf32>
    tpu.vector_store %arg11[%c9_145, %c0_146], %150 {strides = array<i32>} : memref<28x224xf32, #tpu.memory_space<vmem>>, vector<1x224xf32>,
    %c20 = arith.constant 20 : index
    %c0_147 = arith.constant 0 : index
    %152 = vector.load %arg10[%c20, %c0_147] : memref<56x224xf32, #tpu.memory_space<vmem>>, vector<1x224xf32>
    %c21 = arith.constant 21 : index
    %c0_148 = arith.constant 0 : index
    %153 = vector.load %arg10[%c21, %c0_148] : memref<56x224xf32, #tpu.memory_space<vmem>>, vector<1x224xf32>
    %154 = arith.maximumf %152, %153 : vector<1x224xf32>
    %c10_149 = arith.constant 10 : index
    %c0_150 = arith.constant 0 : index
    %155 = vector.load %arg11[%c10_149, %c0_150] : memref<28x224xf32, #tpu.memory_space<vmem>>, vector<1x224xf32>
    tpu.vector_store %arg11[%c10_149, %c0_150], %154 {strides = array<i32>} : memref<28x224xf32, #tpu.memory_space<vmem>>, vector<1x224xf32>,
    %c22 = arith.constant 22 : index
    %c0_151 = arith.constant 0 : index
    %156 = vector.load %arg10[%c22, %c0_151] : memref<56x224xf32, #tpu.memory_space<vmem>>, vector<1x224xf32>
    %c23 = arith.constant 23 : index
    %c0_152 = arith.constant 0 : index
    %157 = vector.load %arg10[%c23, %c0_152] : memref<56x224xf32, #tpu.memory_space<vmem>>, vector<1x224xf32>
    %158 = arith.maximumf %156, %157 : vector<1x224xf32>
    %c11_153 = arith.constant 11 : index
    %c0_154 = arith.constant 0 : index
    %159 = vector.load %arg11[%c11_153, %c0_154] : memref<28x224xf32, #tpu.memory_space<vmem>>, vector<1x224xf32>
    tpu.vector_store %arg11[%c11_153, %c0_154], %158 {strides = array<i32>} : memref<28x224xf32, #tpu.memory_space<vmem>>, vector<1x224xf32>,
    %c24 = arith.constant 24 : index
    %c0_155 = arith.constant 0 : index
    %160 = vector.load %arg10[%c24, %c0_155] : memref<56x224xf32, #tpu.memory_space<vmem>>, vector<1x224xf32>
    %c25 = arith.constant 25 : index
    %c0_156 = arith.constant 0 : index
    %161 = vector.load %arg10[%c25, %c0_156] : memref<56x224xf32, #tpu.memory_space<vmem>>, vector<1x224xf32>
    %162 = arith.maximumf %160, %161 : vector<1x224xf32>
    %c12_157 = arith.constant 12 : index
    %c0_158 = arith.constant 0 : index
    %163 = vector.load %arg11[%c12_157, %c0_158] : memref<28x224xf32, #tpu.memory_space<vmem>>, vector<1x224xf32>
    tpu.vector_store %arg11[%c12_157, %c0_158], %162 {strides = array<i32>} : memref<28x224xf32, #tpu.memory_space<vmem>>, vector<1x224xf32>,
    %c26 = arith.constant 26 : index
    %c0_159 = arith.constant 0 : index
    %164 = vector.load %arg10[%c26, %c0_159] : memref<56x224xf32, #tpu.memory_space<vmem>>, vector<1x224xf32>
    %c27 = arith.constant 27 : index
    %c0_160 = arith.constant 0 : index
    %165 = vector.load %arg10[%c27, %c0_160] : memref<56x224xf32, #tpu.memory_space<vmem>>, vector<1x224xf32>
    %166 = arith.maximumf %164, %165 : vector<1x224xf32>
    %c13_161 = arith.constant 13 : index
    %c0_162 = arith.constant 0 : index
    %167 = vector.load %arg11[%c13_161, %c0_162] : memref<28x224xf32, #tpu.memory_space<vmem>>, vector<1x224xf32>
    tpu.vector_store %arg11[%c13_161, %c0_162], %166 {strides = array<i32>} : memref<28x224xf32, #tpu.memory_space<vmem>>, vector<1x224xf32>,
    %c28_163 = arith.constant 28 : index
    %c0_164 = arith.constant 0 : index
    %168 = vector.load %arg10[%c28_163, %c0_164] : memref<56x224xf32, #tpu.memory_space<vmem>>, vector<1x224xf32>
    %c29 = arith.constant 29 : index
    %c0_165 = arith.constant 0 : index
    %169 = vector.load %arg10[%c29, %c0_165] : memref<56x224xf32, #tpu.memory_space<vmem>>, vector<1x224xf32>
    %170 = arith.maximumf %168, %169 : vector<1x224xf32>
    %c14_166 = arith.constant 14 : index
    %c0_167 = arith.constant 0 : index
    %171 = vector.load %arg11[%c14_166, %c0_167] : memref<28x224xf32, #tpu.memory_space<vmem>>, vector<1x224xf32>
    tpu.vector_store %arg11[%c14_166, %c0_167], %170 {strides = array<i32>} : memref<28x224xf32, #tpu.memory_space<vmem>>, vector<1x224xf32>,
    %c30 = arith.constant 30 : index
    %c0_168 = arith.constant 0 : index
    %172 = vector.load %arg10[%c30, %c0_168] : memref<56x224xf32, #tpu.memory_space<vmem>>, vector<1x224xf32>
    %c31 = arith.constant 31 : index
    %c0_169 = arith.constant 0 : index
    %173 = vector.load %arg10[%c31, %c0_169] : memref<56x224xf32, #tpu.memory_space<vmem>>, vector<1x224xf32>
    %174 = arith.maximumf %172, %173 : vector<1x224xf32>
    %c15_170 = arith.constant 15 : index
    %c0_171 = arith.constant 0 : index
    %175 = vector.load %arg11[%c15_170, %c0_171] : memref<28x224xf32, #tpu.memory_space<vmem>>, vector<1x224xf32>
    tpu.vector_store %arg11[%c15_170, %c0_171], %174 {strides = array<i32>} : memref<28x224xf32, #tpu.memory_space<vmem>>, vector<1x224xf32>,
    %c32_172 = arith.constant 32 : index
    %c0_173 = arith.constant 0 : index
    %176 = vector.load %arg10[%c32_172, %c0_173] : memref<56x224xf32, #tpu.memory_space<vmem>>, vector<1x224xf32>
    %c33_174 = arith.constant 33 : index
    %c0_175 = arith.constant 0 : index
    %177 = vector.load %arg10[%c33_174, %c0_175] : memref<56x224xf32, #tpu.memory_space<vmem>>, vector<1x224xf32>
    %178 = arith.maximumf %176, %177 : vector<1x224xf32>
    %c16_176 = arith.constant 16 : index
    %c0_177 = arith.constant 0 : index
    %179 = vector.load %arg11[%c16_176, %c0_177] : memref<28x224xf32, #tpu.memory_space<vmem>>, vector<1x224xf32>
    tpu.vector_store %arg11[%c16_176, %c0_177], %178 {strides = array<i32>} : memref<28x224xf32, #tpu.memory_space<vmem>>, vector<1x224xf32>,
    %c34_178 = arith.constant 34 : index
    %c0_179 = arith.constant 0 : index
    %180 = vector.load %arg10[%c34_178, %c0_179] : memref<56x224xf32, #tpu.memory_space<vmem>>, vector<1x224xf32>
    %c35_180 = arith.constant 35 : index
    %c0_181 = arith.constant 0 : index
    %181 = vector.load %arg10[%c35_180, %c0_181] : memref<56x224xf32, #tpu.memory_space<vmem>>, vector<1x224xf32>
    %182 = arith.maximumf %180, %181 : vector<1x224xf32>
    %c17_182 = arith.constant 17 : index
    %c0_183 = arith.constant 0 : index
    %183 = vector.load %arg11[%c17_182, %c0_183] : memref<28x224xf32, #tpu.memory_space<vmem>>, vector<1x224xf32>
    tpu.vector_store %arg11[%c17_182, %c0_183], %182 {strides = array<i32>} : memref<28x224xf32, #tpu.memory_space<vmem>>, vector<1x224xf32>,
    %c36_184 = arith.constant 36 : index
    %c0_185 = arith.constant 0 : index
    %184 = vector.load %arg10[%c36_184, %c0_185] : memref<56x224xf32, #tpu.memory_space<vmem>>, vector<1x224xf32>
    %c37 = arith.constant 37 : index
    %c0_186 = arith.constant 0 : index
    %185 = vector.load %arg10[%c37, %c0_186] : memref<56x224xf32, #tpu.memory_space<vmem>>, vector<1x224xf32>
    %186 = arith.maximumf %184, %185 : vector<1x224xf32>
    %c18_187 = arith.constant 18 : index
    %c0_188 = arith.constant 0 : index
    %187 = vector.load %arg11[%c18_187, %c0_188] : memref<28x224xf32, #tpu.memory_space<vmem>>, vector<1x224xf32>
    tpu.vector_store %arg11[%c18_187, %c0_188], %186 {strides = array<i32>} : memref<28x224xf32, #tpu.memory_space<vmem>>, vector<1x224xf32>,
    %c38 = arith.constant 38 : index
    %c0_189 = arith.constant 0 : index
    %188 = vector.load %arg10[%c38, %c0_189] : memref<56x224xf32, #tpu.memory_space<vmem>>, vector<1x224xf32>
    %c39 = arith.constant 39 : index
    %c0_190 = arith.constant 0 : index
    %189 = vector.load %arg10[%c39, %c0_190] : memref<56x224xf32, #tpu.memory_space<vmem>>, vector<1x224xf32>
    %190 = arith.maximumf %188, %189 : vector<1x224xf32>
    %c19_191 = arith.constant 19 : index
    %c0_192 = arith.constant 0 : index
    %191 = vector.load %arg11[%c19_191, %c0_192] : memref<28x224xf32, #tpu.memory_space<vmem>>, vector<1x224xf32>
    tpu.vector_store %arg11[%c19_191, %c0_192], %190 {strides = array<i32>} : memref<28x224xf32, #tpu.memory_space<vmem>>, vector<1x224xf32>,
    %c40 = arith.constant 40 : index
    %c0_193 = arith.constant 0 : index
    %192 = vector.load %arg10[%c40, %c0_193] : memref<56x224xf32, #tpu.memory_space<vmem>>, vector<1x224xf32>
    %c41 = arith.constant 41 : index
    %c0_194 = arith.constant 0 : index
    %193 = vector.load %arg10[%c41, %c0_194] : memref<56x224xf32, #tpu.memory_space<vmem>>, vector<1x224xf32>
    %194 = arith.maximumf %192, %193 : vector<1x224xf32>
    %c20_195 = arith.constant 20 : index
    %c0_196 = arith.constant 0 : index
    %195 = vector.load %arg11[%c20_195, %c0_196] : memref<28x224xf32, #tpu.memory_space<vmem>>, vector<1x224xf32>
    tpu.vector_store %arg11[%c20_195, %c0_196], %194 {strides = array<i32>} : memref<28x224xf32, #tpu.memory_space<vmem>>, vector<1x224xf32>,
    %c42 = arith.constant 42 : index
    %c0_197 = arith.constant 0 : index
    %196 = vector.load %arg10[%c42, %c0_197] : memref<56x224xf32, #tpu.memory_space<vmem>>, vector<1x224xf32>
    %c43 = arith.constant 43 : index
    %c0_198 = arith.constant 0 : index
    %197 = vector.load %arg10[%c43, %c0_198] : memref<56x224xf32, #tpu.memory_space<vmem>>, vector<1x224xf32>
    %198 = arith.maximumf %196, %197 : vector<1x224xf32>
    %c21_199 = arith.constant 21 : index
    %c0_200 = arith.constant 0 : index
    %199 = vector.load %arg11[%c21_199, %c0_200] : memref<28x224xf32, #tpu.memory_space<vmem>>, vector<1x224xf32>
    tpu.vector_store %arg11[%c21_199, %c0_200], %198 {strides = array<i32>} : memref<28x224xf32, #tpu.memory_space<vmem>>, vector<1x224xf32>,
    %c44 = arith.constant 44 : index
    %c0_201 = arith.constant 0 : index
    %200 = vector.load %arg10[%c44, %c0_201] : memref<56x224xf32, #tpu.memory_space<vmem>>, vector<1x224xf32>
    %c45 = arith.constant 45 : index
    %c0_202 = arith.constant 0 : index
    %201 = vector.load %arg10[%c45, %c0_202] : memref<56x224xf32, #tpu.memory_space<vmem>>, vector<1x224xf32>
    %202 = arith.maximumf %200, %201 : vector<1x224xf32>
    %c22_203 = arith.constant 22 : index
    %c0_204 = arith.constant 0 : index
    %203 = vector.load %arg11[%c22_203, %c0_204] : memref<28x224xf32, #tpu.memory_space<vmem>>, vector<1x224xf32>
    tpu.vector_store %arg11[%c22_203, %c0_204], %202 {strides = array<i32>} : memref<28x224xf32, #tpu.memory_space<vmem>>, vector<1x224xf32>,
    %c46 = arith.constant 46 : index
    %c0_205 = arith.constant 0 : index
    %204 = vector.load %arg10[%c46, %c0_205] : memref<56x224xf32, #tpu.memory_space<vmem>>, vector<1x224xf32>
    %c47 = arith.constant 47 : index
    %c0_206 = arith.constant 0 : index
    %205 = vector.load %arg10[%c47, %c0_206] : memref<56x224xf32, #tpu.memory_space<vmem>>, vector<1x224xf32>
    %206 = arith.maximumf %204, %205 : vector<1x224xf32>
    %c23_207 = arith.constant 23 : index
    %c0_208 = arith.constant 0 : index
    %207 = vector.load %arg11[%c23_207, %c0_208] : memref<28x224xf32, #tpu.memory_space<vmem>>, vector<1x224xf32>
    tpu.vector_store %arg11[%c23_207, %c0_208], %206 {strides = array<i32>} : memref<28x224xf32, #tpu.memory_space<vmem>>, vector<1x224xf32>,
    %c48 = arith.constant 48 : index
    %c0_209 = arith.constant 0 : index
    %208 = vector.load %arg10[%c48, %c0_209] : memref<56x224xf32, #tpu.memory_space<vmem>>, vector<1x224xf32>
    %c49 = arith.constant 49 : index
    %c0_210 = arith.constant 0 : index
    %209 = vector.load %arg10[%c49, %c0_210] : memref<56x224xf32, #tpu.memory_space<vmem>>, vector<1x224xf32>
    %210 = arith.maximumf %208, %209 : vector<1x224xf32>
    %c24_211 = arith.constant 24 : index
    %c0_212 = arith.constant 0 : index
    %211 = vector.load %arg11[%c24_211, %c0_212] : memref<28x224xf32, #tpu.memory_space<vmem>>, vector<1x224xf32>
    tpu.vector_store %arg11[%c24_211, %c0_212], %210 {strides = array<i32>} : memref<28x224xf32, #tpu.memory_space<vmem>>, vector<1x224xf32>,
    %c50 = arith.constant 50 : index
    %c0_213 = arith.constant 0 : index
    %212 = vector.load %arg10[%c50, %c0_213] : memref<56x224xf32, #tpu.memory_space<vmem>>, vector<1x224xf32>
    %c51 = arith.constant 51 : index
    %c0_214 = arith.constant 0 : index
    %213 = vector.load %arg10[%c51, %c0_214] : memref<56x224xf32, #tpu.memory_space<vmem>>, vector<1x224xf32>
    %214 = arith.maximumf %212, %213 : vector<1x224xf32>
    %c25_215 = arith.constant 25 : index
    %c0_216 = arith.constant 0 : index
    %215 = vector.load %arg11[%c25_215, %c0_216] : memref<28x224xf32, #tpu.memory_space<vmem>>, vector<1x224xf32>
    tpu.vector_store %arg11[%c25_215, %c0_216], %214 {strides = array<i32>} : memref<28x224xf32, #tpu.memory_space<vmem>>, vector<1x224xf32>,
    %c52 = arith.constant 52 : index
    %c0_217 = arith.constant 0 : index
    %216 = vector.load %arg10[%c52, %c0_217] : memref<56x224xf32, #tpu.memory_space<vmem>>, vector<1x224xf32>
    %c53 = arith.constant 53 : index
    %c0_218 = arith.constant 0 : index
    %217 = vector.load %arg10[%c53, %c0_218] : memref<56x224xf32, #tpu.memory_space<vmem>>, vector<1x224xf32>
    %218 = arith.maximumf %216, %217 : vector<1x224xf32>
    %c26_219 = arith.constant 26 : index
    %c0_220 = arith.constant 0 : index
    %219 = vector.load %arg11[%c26_219, %c0_220] : memref<28x224xf32, #tpu.memory_space<vmem>>, vector<1x224xf32>
    tpu.vector_store %arg11[%c26_219, %c0_220], %218 {strides = array<i32>} : memref<28x224xf32, #tpu.memory_space<vmem>>, vector<1x224xf32>,
    %c54 = arith.constant 54 : index
    %c0_221 = arith.constant 0 : index
    %220 = vector.load %arg10[%c54, %c0_221] : memref<56x224xf32, #tpu.memory_space<vmem>>, vector<1x224xf32>
    %c55 = arith.constant 55 : index
    %c0_222 = arith.constant 0 : index
    %221 = vector.load %arg10[%c55, %c0_222] : memref<56x224xf32, #tpu.memory_space<vmem>>, vector<1x224xf32>
    %222 = arith.maximumf %220, %221 : vector<1x224xf32>
    %c27_223 = arith.constant 27 : index
    %c0_224 = arith.constant 0 : index
    %223 = vector.load %arg11[%c27_223, %c0_224] : memref<28x224xf32, #tpu.memory_space<vmem>>, vector<1x224xf32>
    tpu.vector_store %arg11[%c27_223, %c0_224], %222 {strides = array<i32>} : memref<28x224xf32, #tpu.memory_space<vmem>>, vector<1x224xf32>,
    %cst_225 = arith.constant 0.000000e+00 : f32
    %224 = vector.broadcast %cst_225 : f32 to vector<10x160xf32>
    %cst_226 = arith.constant 0.000000e+00 : f32
    %225 = vector.broadcast %cst_226 : f32 to vector<10x160xf32>
    %c0_227 = arith.constant 0 : index
    %c0_228 = arith.constant 0 : index
    %226 = vector.load %arg11[%c0_227, %c0_228] : memref<28x224xf32, #tpu.memory_space<vmem>>, vector<10x224xf32>
    %c0_229 = arith.constant 0 : index
    %c0_230 = arith.constant 0 : index
    %c0_231 = arith.constant 0 : index
    %227 = vector.load %arg4[%c0_229, %c0_230, %c0_231] : memref<5x224x160xf32, #tpu.memory_space<vmem>>, vector<1x224x160xf32>
    %228 = vector.shape_cast %227 : vector<1x224x160xf32> to vector<224x160xf32>
    %cst_232 = arith.constant dense<0.000000e+00> : vector<10x160xf32>
    %229 = tpu.matmul %226, %228, %cst_232 {dimension_numbers = #tpu.dot_dimension_numbers<[1], [0], [0], [1], [0, 0, 1, 1], [], []>} : vector<10x224xf32>, vector<224x160xf32>, vector<10x160xf32> -> vector<10x160xf32>
    %230 = arith.addf %224, %229 : vector<10x160xf32>
    %c0_233 = arith.constant 0 : index
    %c0_234 = arith.constant 0 : index
    %c0_235 = arith.constant 0 : index
    %231 = vector.load %arg5[%c0_233, %c0_234, %c0_235] : memref<5x224x160xf32, #tpu.memory_space<vmem>>, vector<1x224x160xf32>
    %232 = vector.shape_cast %231 : vector<1x224x160xf32> to vector<224x160xf32>
    %cst_236 = arith.constant dense<0.000000e+00> : vector<10x160xf32>
    %233 = tpu.matmul %226, %232, %cst_236 {dimension_numbers = #tpu.dot_dimension_numbers<[1], [0], [0], [1], [0, 0, 1, 1], [], []>} : vector<10x224xf32>, vector<224x160xf32>, vector<10x160xf32> -> vector<10x160xf32>
    %234 = arith.addf %225, %233 : vector<10x160xf32>
    %c1_237 = arith.constant 1 : index
    %c0_238 = arith.constant 0 : index
    %235 = vector.load %arg11[%c1_237, %c0_238] : memref<28x224xf32, #tpu.memory_space<vmem>>, vector<10x224xf32>
    %c1_239 = arith.constant 1 : index
    %c0_240 = arith.constant 0 : index
    %c0_241 = arith.constant 0 : index
    %236 = vector.load %arg4[%c1_239, %c0_240, %c0_241] : memref<5x224x160xf32, #tpu.memory_space<vmem>>, vector<1x224x160xf32>
    %237 = vector.shape_cast %236 : vector<1x224x160xf32> to vector<224x160xf32>
    %cst_242 = arith.constant dense<0.000000e+00> : vector<10x160xf32>
    %238 = tpu.matmul %235, %237, %cst_242 {dimension_numbers = #tpu.dot_dimension_numbers<[1], [0], [0], [1], [0, 0, 1, 1], [], []>} : vector<10x224xf32>, vector<224x160xf32>, vector<10x160xf32> -> vector<10x160xf32>
    %239 = arith.addf %230, %238 : vector<10x160xf32>
    %c1_243 = arith.constant 1 : index
    %c0_244 = arith.constant 0 : index
    %c0_245 = arith.constant 0 : index
    %240 = vector.load %arg5[%c1_243, %c0_244, %c0_245] : memref<5x224x160xf32, #tpu.memory_space<vmem>>, vector<1x224x160xf32>
    %241 = vector.shape_cast %240 : vector<1x224x160xf32> to vector<224x160xf32>
    %cst_246 = arith.constant dense<0.000000e+00> : vector<10x160xf32>
    %242 = tpu.matmul %235, %241, %cst_246 {dimension_numbers = #tpu.dot_dimension_numbers<[1], [0], [0], [1], [0, 0, 1, 1], [], []>} : vector<10x224xf32>, vector<224x160xf32>, vector<10x160xf32> -> vector<10x160xf32>
    %243 = arith.addf %234, %242 : vector<10x160xf32>
    %c2_247 = arith.constant 2 : index
    %c0_248 = arith.constant 0 : index
    %244 = vector.load %arg11[%c2_247, %c0_248] : memref<28x224xf32, #tpu.memory_space<vmem>>, vector<10x224xf32>
    %c2_249 = arith.constant 2 : index
    %c0_250 = arith.constant 0 : index
    %c0_251 = arith.constant 0 : index
    %245 = vector.load %arg4[%c2_249, %c0_250, %c0_251] : memref<5x224x160xf32, #tpu.memory_space<vmem>>, vector<1x224x160xf32>
    %246 = vector.shape_cast %245 : vector<1x224x160xf32> to vector<224x160xf32>
    %cst_252 = arith.constant dense<0.000000e+00> : vector<10x160xf32>
    %247 = tpu.matmul %244, %246, %cst_252 {dimension_numbers = #tpu.dot_dimension_numbers<[1], [0], [0], [1], [0, 0, 1, 1], [], []>} : vector<10x224xf32>, vector<224x160xf32>, vector<10x160xf32> -> vector<10x160xf32>
    %248 = arith.addf %239, %247 : vector<10x160xf32>
    %c2_253 = arith.constant 2 : index
    %c0_254 = arith.constant 0 : index
    %c0_255 = arith.constant 0 : index
    %249 = vector.load %arg5[%c2_253, %c0_254, %c0_255] : memref<5x224x160xf32, #tpu.memory_space<vmem>>, vector<1x224x160xf32>
    %250 = vector.shape_cast %249 : vector<1x224x160xf32> to vector<224x160xf32>
    %cst_256 = arith.constant dense<0.000000e+00> : vector<10x160xf32>
    %251 = tpu.matmul %244, %250, %cst_256 {dimension_numbers = #tpu.dot_dimension_numbers<[1], [0], [0], [1], [0, 0, 1, 1], [], []>} : vector<10x224xf32>, vector<224x160xf32>, vector<10x160xf32> -> vector<10x160xf32>
    %252 = arith.addf %243, %251 : vector<10x160xf32>
    %c3_257 = arith.constant 3 : index
    %c0_258 = arith.constant 0 : index
    %253 = vector.load %arg11[%c3_257, %c0_258] : memref<28x224xf32, #tpu.memory_space<vmem>>, vector<10x224xf32>
    %c3_259 = arith.constant 3 : index
    %c0_260 = arith.constant 0 : index
    %c0_261 = arith.constant 0 : index
    %254 = vector.load %arg4[%c3_259, %c0_260, %c0_261] : memref<5x224x160xf32, #tpu.memory_space<vmem>>, vector<1x224x160xf32>
    %255 = vector.shape_cast %254 : vector<1x224x160xf32> to vector<224x160xf32>
    %cst_262 = arith.constant dense<0.000000e+00> : vector<10x160xf32>
    %256 = tpu.matmul %253, %255, %cst_262 {dimension_numbers = #tpu.dot_dimension_numbers<[1], [0], [0], [1], [0, 0, 1, 1], [], []>} : vector<10x224xf32>, vector<224x160xf32>, vector<10x160xf32> -> vector<10x160xf32>
    %257 = arith.addf %248, %256 : vector<10x160xf32>
    %c3_263 = arith.constant 3 : index
    %c0_264 = arith.constant 0 : index
    %c0_265 = arith.constant 0 : index
    %258 = vector.load %arg5[%c3_263, %c0_264, %c0_265] : memref<5x224x160xf32, #tpu.memory_space<vmem>>, vector<1x224x160xf32>
    %259 = vector.shape_cast %258 : vector<1x224x160xf32> to vector<224x160xf32>
    %cst_266 = arith.constant dense<0.000000e+00> : vector<10x160xf32>
    %260 = tpu.matmul %253, %259, %cst_266 {dimension_numbers = #tpu.dot_dimension_numbers<[1], [0], [0], [1], [0, 0, 1, 1], [], []>} : vector<10x224xf32>, vector<224x160xf32>, vector<10x160xf32> -> vector<10x160xf32>
    %261 = arith.addf %252, %260 : vector<10x160xf32>
    %c4_267 = arith.constant 4 : index
    %c0_268 = arith.constant 0 : index
    %262 = vector.load %arg11[%c4_267, %c0_268] : memref<28x224xf32, #tpu.memory_space<vmem>>, vector<10x224xf32>
    %c4_269 = arith.constant 4 : index
    %c0_270 = arith.constant 0 : index
    %c0_271 = arith.constant 0 : index
    %263 = vector.load %arg4[%c4_269, %c0_270, %c0_271] : memref<5x224x160xf32, #tpu.memory_space<vmem>>, vector<1x224x160xf32>
    %264 = vector.shape_cast %263 : vector<1x224x160xf32> to vector<224x160xf32>
    %cst_272 = arith.constant dense<0.000000e+00> : vector<10x160xf32>
    %265 = tpu.matmul %262, %264, %cst_272 {dimension_numbers = #tpu.dot_dimension_numbers<[1], [0], [0], [1], [0, 0, 1, 1], [], []>} : vector<10x224xf32>, vector<224x160xf32>, vector<10x160xf32> -> vector<10x160xf32>
    %266 = arith.addf %257, %265 : vector<10x160xf32>
    %c4_273 = arith.constant 4 : index
    %c0_274 = arith.constant 0 : index
    %c0_275 = arith.constant 0 : index
    %267 = vector.load %arg5[%c4_273, %c0_274, %c0_275] : memref<5x224x160xf32, #tpu.memory_space<vmem>>, vector<1x224x160xf32>
    %268 = vector.shape_cast %267 : vector<1x224x160xf32> to vector<224x160xf32>
    %cst_276 = arith.constant dense<0.000000e+00> : vector<10x160xf32>
    %269 = tpu.matmul %262, %268, %cst_276 {dimension_numbers = #tpu.dot_dimension_numbers<[1], [0], [0], [1], [0, 0, 1, 1], [], []>} : vector<10x224xf32>, vector<224x160xf32>, vector<10x160xf32> -> vector<10x160xf32>
    %270 = arith.addf %261, %269 : vector<10x160xf32>
    %c0_277 = arith.constant 0 : index
    %c0_278 = arith.constant 0 : index
    %271 = vector.load %arg6[%c0_277, %c0_278] : memref<1x160xf32, #tpu.memory_space<vmem>>, vector<1x160xf32>
    %272 = vector.broadcast %271 : vector<1x160xf32> to vector<10x160xf32>
    %273 = arith.addf %266, %272 : vector<10x160xf32>
    %274 = vector.broadcast %271 : vector<1x160xf32> to vector<10x160xf32>
    %275 = arith.addf %270, %274 : vector<10x160xf32>
    %276 = arith.maximumf %273, %275 : vector<10x160xf32>
    %cst_279 = arith.constant 0.000000e+00 : f32
    %277 = vector.broadcast %cst_279 : f32 to vector<10x160xf32>
    %278 = arith.maximumf %276, %277 : vector<10x160xf32>
    %c0_280 = arith.constant 0 : index
    %c0_281 = arith.constant 0 : index
    %279 = vector.load %arg12[%c0_280, %c0_281] : memref<20x160xf32, #tpu.memory_space<vmem>>, vector<10x160xf32>
    tpu.vector_store %arg12[%c0_280, %c0_281], %278 {strides = array<i32>} : memref<20x160xf32, #tpu.memory_space<vmem>>, vector<10x160xf32>,
    %cst_282 = arith.constant 0.000000e+00 : f32
    %280 = vector.broadcast %cst_282 : f32 to vector<10x160xf32>
    %cst_283 = arith.constant 0.000000e+00 : f32
    %281 = vector.broadcast %cst_283 : f32 to vector<10x160xf32>
    %c14_284 = arith.constant 14 : index
    %c0_285 = arith.constant 0 : index
    %282 = vector.load %arg11[%c14_284, %c0_285] : memref<28x224xf32, #tpu.memory_space<vmem>>, vector<10x224xf32>
    %c0_286 = arith.constant 0 : index
    %c0_287 = arith.constant 0 : index
    %c0_288 = arith.constant 0 : index
    %283 = vector.load %arg4[%c0_286, %c0_287, %c0_288] : memref<5x224x160xf32, #tpu.memory_space<vmem>>, vector<1x224x160xf32>
    %284 = vector.shape_cast %283 : vector<1x224x160xf32> to vector<224x160xf32>
    %cst_289 = arith.constant dense<0.000000e+00> : vector<10x160xf32>
    %285 = tpu.matmul %282, %284, %cst_289 {dimension_numbers = #tpu.dot_dimension_numbers<[1], [0], [0], [1], [0, 0, 1, 1], [], []>} : vector<10x224xf32>, vector<224x160xf32>, vector<10x160xf32> -> vector<10x160xf32>
    %286 = arith.addf %280, %285 : vector<10x160xf32>
    %c0_290 = arith.constant 0 : index
    %c0_291 = arith.constant 0 : index
    %c0_292 = arith.constant 0 : index
    %287 = vector.load %arg5[%c0_290, %c0_291, %c0_292] : memref<5x224x160xf32, #tpu.memory_space<vmem>>, vector<1x224x160xf32>
    %288 = vector.shape_cast %287 : vector<1x224x160xf32> to vector<224x160xf32>
    %cst_293 = arith.constant dense<0.000000e+00> : vector<10x160xf32>
    %289 = tpu.matmul %282, %288, %cst_293 {dimension_numbers = #tpu.dot_dimension_numbers<[1], [0], [0], [1], [0, 0, 1, 1], [], []>} : vector<10x224xf32>, vector<224x160xf32>, vector<10x160xf32> -> vector<10x160xf32>
    %290 = arith.addf %281, %289 : vector<10x160xf32>
    %c15_294 = arith.constant 15 : index
    %c0_295 = arith.constant 0 : index
    %291 = vector.load %arg11[%c15_294, %c0_295] : memref<28x224xf32, #tpu.memory_space<vmem>>, vector<10x224xf32>
    %c1_296 = arith.constant 1 : index
    %c0_297 = arith.constant 0 : index
    %c0_298 = arith.constant 0 : index
    %292 = vector.load %arg4[%c1_296, %c0_297, %c0_298] : memref<5x224x160xf32, #tpu.memory_space<vmem>>, vector<1x224x160xf32>
    %293 = vector.shape_cast %292 : vector<1x224x160xf32> to vector<224x160xf32>
    %cst_299 = arith.constant dense<0.000000e+00> : vector<10x160xf32>
    %294 = tpu.matmul %291, %293, %cst_299 {dimension_numbers = #tpu.dot_dimension_numbers<[1], [0], [0], [1], [0, 0, 1, 1], [], []>} : vector<10x224xf32>, vector<224x160xf32>, vector<10x160xf32> -> vector<10x160xf32>
    %295 = arith.addf %286, %294 : vector<10x160xf32>
    %c1_300 = arith.constant 1 : index
    %c0_301 = arith.constant 0 : index
    %c0_302 = arith.constant 0 : index
    %296 = vector.load %arg5[%c1_300, %c0_301, %c0_302] : memref<5x224x160xf32, #tpu.memory_space<vmem>>, vector<1x224x160xf32>
    %297 = vector.shape_cast %296 : vector<1x224x160xf32> to vector<224x160xf32>
    %cst_303 = arith.constant dense<0.000000e+00> : vector<10x160xf32>
    %298 = tpu.matmul %291, %297, %cst_303 {dimension_numbers = #tpu.dot_dimension_numbers<[1], [0], [0], [1], [0, 0, 1, 1], [], []>} : vector<10x224xf32>, vector<224x160xf32>, vector<10x160xf32> -> vector<10x160xf32>
    %299 = arith.addf %290, %298 : vector<10x160xf32>
    %c16_304 = arith.constant 16 : index
    %c0_305 = arith.constant 0 : index
    %300 = vector.load %arg11[%c16_304, %c0_305] : memref<28x224xf32, #tpu.memory_space<vmem>>, vector<10x224xf32>
    %c2_306 = arith.constant 2 : index
    %c0_307 = arith.constant 0 : index
    %c0_308 = arith.constant 0 : index
    %301 = vector.load %arg4[%c2_306, %c0_307, %c0_308] : memref<5x224x160xf32, #tpu.memory_space<vmem>>, vector<1x224x160xf32>
    %302 = vector.shape_cast %301 : vector<1x224x160xf32> to vector<224x160xf32>
    %cst_309 = arith.constant dense<0.000000e+00> : vector<10x160xf32>
    %303 = tpu.matmul %300, %302, %cst_309 {dimension_numbers = #tpu.dot_dimension_numbers<[1], [0], [0], [1], [0, 0, 1, 1], [], []>} : vector<10x224xf32>, vector<224x160xf32>, vector<10x160xf32> -> vector<10x160xf32>
    %304 = arith.addf %295, %303 : vector<10x160xf32>
    %c2_310 = arith.constant 2 : index
    %c0_311 = arith.constant 0 : index
    %c0_312 = arith.constant 0 : index
    %305 = vector.load %arg5[%c2_310, %c0_311, %c0_312] : memref<5x224x160xf32, #tpu.memory_space<vmem>>, vector<1x224x160xf32>
    %306 = vector.shape_cast %305 : vector<1x224x160xf32> to vector<224x160xf32>
    %cst_313 = arith.constant dense<0.000000e+00> : vector<10x160xf32>
    %307 = tpu.matmul %300, %306, %cst_313 {dimension_numbers = #tpu.dot_dimension_numbers<[1], [0], [0], [1], [0, 0, 1, 1], [], []>} : vector<10x224xf32>, vector<224x160xf32>, vector<10x160xf32> -> vector<10x160xf32>
    %308 = arith.addf %299, %307 : vector<10x160xf32>
    %c17_314 = arith.constant 17 : index
    %c0_315 = arith.constant 0 : index
    %309 = vector.load %arg11[%c17_314, %c0_315] : memref<28x224xf32, #tpu.memory_space<vmem>>, vector<10x224xf32>
    %c3_316 = arith.constant 3 : index
    %c0_317 = arith.constant 0 : index
    %c0_318 = arith.constant 0 : index
    %310 = vector.load %arg4[%c3_316, %c0_317, %c0_318] : memref<5x224x160xf32, #tpu.memory_space<vmem>>, vector<1x224x160xf32>
    %311 = vector.shape_cast %310 : vector<1x224x160xf32> to vector<224x160xf32>
    %cst_319 = arith.constant dense<0.000000e+00> : vector<10x160xf32>
    %312 = tpu.matmul %309, %311, %cst_319 {dimension_numbers = #tpu.dot_dimension_numbers<[1], [0], [0], [1], [0, 0, 1, 1], [], []>} : vector<10x224xf32>, vector<224x160xf32>, vector<10x160xf32> -> vector<10x160xf32>
    %313 = arith.addf %304, %312 : vector<10x160xf32>
    %c3_320 = arith.constant 3 : index
    %c0_321 = arith.constant 0 : index
    %c0_322 = arith.constant 0 : index
    %314 = vector.load %arg5[%c3_320, %c0_321, %c0_322] : memref<5x224x160xf32, #tpu.memory_space<vmem>>, vector<1x224x160xf32>
    %315 = vector.shape_cast %314 : vector<1x224x160xf32> to vector<224x160xf32>
    %cst_323 = arith.constant dense<0.000000e+00> : vector<10x160xf32>
    %316 = tpu.matmul %309, %315, %cst_323 {dimension_numbers = #tpu.dot_dimension_numbers<[1], [0], [0], [1], [0, 0, 1, 1], [], []>} : vector<10x224xf32>, vector<224x160xf32>, vector<10x160xf32> -> vector<10x160xf32>
    %317 = arith.addf %308, %316 : vector<10x160xf32>
    %c18_324 = arith.constant 18 : index
    %c0_325 = arith.constant 0 : index
    %318 = vector.load %arg11[%c18_324, %c0_325] : memref<28x224xf32, #tpu.memory_space<vmem>>, vector<10x224xf32>
    %c4_326 = arith.constant 4 : index
    %c0_327 = arith.constant 0 : index
    %c0_328 = arith.constant 0 : index
    %319 = vector.load %arg4[%c4_326, %c0_327, %c0_328] : memref<5x224x160xf32, #tpu.memory_space<vmem>>, vector<1x224x160xf32>
    %320 = vector.shape_cast %319 : vector<1x224x160xf32> to vector<224x160xf32>
    %cst_329 = arith.constant dense<0.000000e+00> : vector<10x160xf32>
    %321 = tpu.matmul %318, %320, %cst_329 {dimension_numbers = #tpu.dot_dimension_numbers<[1], [0], [0], [1], [0, 0, 1, 1], [], []>} : vector<10x224xf32>, vector<224x160xf32>, vector<10x160xf32> -> vector<10x160xf32>
    %322 = arith.addf %313, %321 : vector<10x160xf32>
    %c4_330 = arith.constant 4 : index
    %c0_331 = arith.constant 0 : index
    %c0_332 = arith.constant 0 : index
    %323 = vector.load %arg5[%c4_330, %c0_331, %c0_332] : memref<5x224x160xf32, #tpu.memory_space<vmem>>, vector<1x224x160xf32>
    %324 = vector.shape_cast %323 : vector<1x224x160xf32> to vector<224x160xf32>
    %cst_333 = arith.constant dense<0.000000e+00> : vector<10x160xf32>
    %325 = tpu.matmul %318, %324, %cst_333 {dimension_numbers = #tpu.dot_dimension_numbers<[1], [0], [0], [1], [0, 0, 1, 1], [], []>} : vector<10x224xf32>, vector<224x160xf32>, vector<10x160xf32> -> vector<10x160xf32>
    %326 = arith.addf %317, %325 : vector<10x160xf32>
    %c0_334 = arith.constant 0 : index
    %c0_335 = arith.constant 0 : index
    %327 = vector.load %arg6[%c0_334, %c0_335] : memref<1x160xf32, #tpu.memory_space<vmem>>, vector<1x160xf32>
    %328 = vector.broadcast %327 : vector<1x160xf32> to vector<10x160xf32>
    %329 = arith.addf %322, %328 : vector<10x160xf32>
    %330 = vector.broadcast %327 : vector<1x160xf32> to vector<10x160xf32>
    %331 = arith.addf %326, %330 : vector<10x160xf32>
    %332 = arith.maximumf %329, %331 : vector<10x160xf32>
    %cst_336 = arith.constant 0.000000e+00 : f32
    %333 = vector.broadcast %cst_336 : f32 to vector<10x160xf32>
    %334 = arith.maximumf %332, %333 : vector<10x160xf32>
    %c10_337 = arith.constant 10 : index
    %c0_338 = arith.constant 0 : index
    %335 = vector.load %arg12[%c10_337, %c0_338] : memref<20x160xf32, #tpu.memory_space<vmem>>, vector<10x160xf32>
    tpu.vector_store %arg12[%c10_337, %c0_338], %334 {strides = array<i32>} : memref<20x160xf32, #tpu.memory_space<vmem>>, vector<10x160xf32>,
    %c0_339 = arith.constant 0 : index
    %c0_340 = arith.constant 0 : index
    %336 = vector.load %arg12[%c0_339, %c0_340] : memref<20x160xf32, #tpu.memory_space<vmem>>, vector<1x160xf32>
    %c1_341 = arith.constant 1 : index
    %c0_342 = arith.constant 0 : index
    %337 = vector.load %arg12[%c1_341, %c0_342] : memref<20x160xf32, #tpu.memory_space<vmem>>, vector<1x160xf32>
    %338 = arith.maximumf %336, %337 : vector<1x160xf32>
    %c0_343 = arith.constant 0 : index
    %c0_344 = arith.constant 0 : index
    %339 = vector.load %arg13[%c0_343, %c0_344] : memref<10x160xf32, #tpu.memory_space<vmem>>, vector<1x160xf32>
    tpu.vector_store %arg13[%c0_343, %c0_344], %338 {strides = array<i32>} : memref<10x160xf32, #tpu.memory_space<vmem>>, vector<1x160xf32>,
    %c2_345 = arith.constant 2 : index
    %c0_346 = arith.constant 0 : index
    %340 = vector.load %arg12[%c2_345, %c0_346] : memref<20x160xf32, #tpu.memory_space<vmem>>, vector<1x160xf32>
    %c3_347 = arith.constant 3 : index
    %c0_348 = arith.constant 0 : index
    %341 = vector.load %arg12[%c3_347, %c0_348] : memref<20x160xf32, #tpu.memory_space<vmem>>, vector<1x160xf32>
    %342 = arith.maximumf %340, %341 : vector<1x160xf32>
    %c1_349 = arith.constant 1 : index
    %c0_350 = arith.constant 0 : index
    %343 = vector.load %arg13[%c1_349, %c0_350] : memref<10x160xf32, #tpu.memory_space<vmem>>, vector<1x160xf32>
    tpu.vector_store %arg13[%c1_349, %c0_350], %342 {strides = array<i32>} : memref<10x160xf32, #tpu.memory_space<vmem>>, vector<1x160xf32>,
    %c4_351 = arith.constant 4 : index
    %c0_352 = arith.constant 0 : index
    %344 = vector.load %arg12[%c4_351, %c0_352] : memref<20x160xf32, #tpu.memory_space<vmem>>, vector<1x160xf32>
    %c5_353 = arith.constant 5 : index
    %c0_354 = arith.constant 0 : index
    %345 = vector.load %arg12[%c5_353, %c0_354] : memref<20x160xf32, #tpu.memory_space<vmem>>, vector<1x160xf32>
    %346 = arith.maximumf %344, %345 : vector<1x160xf32>
    %c2_355 = arith.constant 2 : index
    %c0_356 = arith.constant 0 : index
    %347 = vector.load %arg13[%c2_355, %c0_356] : memref<10x160xf32, #tpu.memory_space<vmem>>, vector<1x160xf32>
    tpu.vector_store %arg13[%c2_355, %c0_356], %346 {strides = array<i32>} : memref<10x160xf32, #tpu.memory_space<vmem>>, vector<1x160xf32>,
    %c6_357 = arith.constant 6 : index
    %c0_358 = arith.constant 0 : index
    %348 = vector.load %arg12[%c6_357, %c0_358] : memref<20x160xf32, #tpu.memory_space<vmem>>, vector<1x160xf32>
    %c7_359 = arith.constant 7 : index
    %c0_360 = arith.constant 0 : index
    %349 = vector.load %arg12[%c7_359, %c0_360] : memref<20x160xf32, #tpu.memory_space<vmem>>, vector<1x160xf32>
    %350 = arith.maximumf %348, %349 : vector<1x160xf32>
    %c3_361 = arith.constant 3 : index
    %c0_362 = arith.constant 0 : index
    %351 = vector.load %arg13[%c3_361, %c0_362] : memref<10x160xf32, #tpu.memory_space<vmem>>, vector<1x160xf32>
    tpu.vector_store %arg13[%c3_361, %c0_362], %350 {strides = array<i32>} : memref<10x160xf32, #tpu.memory_space<vmem>>, vector<1x160xf32>,
    %c8_363 = arith.constant 8 : index
    %c0_364 = arith.constant 0 : index
    %352 = vector.load %arg12[%c8_363, %c0_364] : memref<20x160xf32, #tpu.memory_space<vmem>>, vector<1x160xf32>
    %c9_365 = arith.constant 9 : index
    %c0_366 = arith.constant 0 : index
    %353 = vector.load %arg12[%c9_365, %c0_366] : memref<20x160xf32, #tpu.memory_space<vmem>>, vector<1x160xf32>
    %354 = arith.maximumf %352, %353 : vector<1x160xf32>
    %c4_367 = arith.constant 4 : index
    %c0_368 = arith.constant 0 : index
    %355 = vector.load %arg13[%c4_367, %c0_368] : memref<10x160xf32, #tpu.memory_space<vmem>>, vector<1x160xf32>
    tpu.vector_store %arg13[%c4_367, %c0_368], %354 {strides = array<i32>} : memref<10x160xf32, #tpu.memory_space<vmem>>, vector<1x160xf32>,
    %c10_369 = arith.constant 10 : index
    %c0_370 = arith.constant 0 : index
    %356 = vector.load %arg12[%c10_369, %c0_370] : memref<20x160xf32, #tpu.memory_space<vmem>>, vector<1x160xf32>
    %c11_371 = arith.constant 11 : index
    %c0_372 = arith.constant 0 : index
    %357 = vector.load %arg12[%c11_371, %c0_372] : memref<20x160xf32, #tpu.memory_space<vmem>>, vector<1x160xf32>
    %358 = arith.maximumf %356, %357 : vector<1x160xf32>
    %c5_373 = arith.constant 5 : index
    %c0_374 = arith.constant 0 : index
    %359 = vector.load %arg13[%c5_373, %c0_374] : memref<10x160xf32, #tpu.memory_space<vmem>>, vector<1x160xf32>
    tpu.vector_store %arg13[%c5_373, %c0_374], %358 {strides = array<i32>} : memref<10x160xf32, #tpu.memory_space<vmem>>, vector<1x160xf32>,
    %c12_375 = arith.constant 12 : index
    %c0_376 = arith.constant 0 : index
    %360 = vector.load %arg12[%c12_375, %c0_376] : memref<20x160xf32, #tpu.memory_space<vmem>>, vector<1x160xf32>
    %c13_377 = arith.constant 13 : index
    %c0_378 = arith.constant 0 : index
    %361 = vector.load %arg12[%c13_377, %c0_378] : memref<20x160xf32, #tpu.memory_space<vmem>>, vector<1x160xf32>
    %362 = arith.maximumf %360, %361 : vector<1x160xf32>
    %c6_379 = arith.constant 6 : index
    %c0_380 = arith.constant 0 : index
    %363 = vector.load %arg13[%c6_379, %c0_380] : memref<10x160xf32, #tpu.memory_space<vmem>>, vector<1x160xf32>
    tpu.vector_store %arg13[%c6_379, %c0_380], %362 {strides = array<i32>} : memref<10x160xf32, #tpu.memory_space<vmem>>, vector<1x160xf32>,
    %c14_381 = arith.constant 14 : index
    %c0_382 = arith.constant 0 : index
    %364 = vector.load %arg12[%c14_381, %c0_382] : memref<20x160xf32, #tpu.memory_space<vmem>>, vector<1x160xf32>
    %c15_383 = arith.constant 15 : index
    %c0_384 = arith.constant 0 : index
    %365 = vector.load %arg12[%c15_383, %c0_384] : memref<20x160xf32, #tpu.memory_space<vmem>>, vector<1x160xf32>
    %366 = arith.maximumf %364, %365 : vector<1x160xf32>
    %c7_385 = arith.constant 7 : index
    %c0_386 = arith.constant 0 : index
    %367 = vector.load %arg13[%c7_385, %c0_386] : memref<10x160xf32, #tpu.memory_space<vmem>>, vector<1x160xf32>
    tpu.vector_store %arg13[%c7_385, %c0_386], %366 {strides = array<i32>} : memref<10x160xf32, #tpu.memory_space<vmem>>, vector<1x160xf32>,
    %c16_387 = arith.constant 16 : index
    %c0_388 = arith.constant 0 : index
    %368 = vector.load %arg12[%c16_387, %c0_388] : memref<20x160xf32, #tpu.memory_space<vmem>>, vector<1x160xf32>
    %c17_389 = arith.constant 17 : index
    %c0_390 = arith.constant 0 : index
    %369 = vector.load %arg12[%c17_389, %c0_390] : memref<20x160xf32, #tpu.memory_space<vmem>>, vector<1x160xf32>
    %370 = arith.maximumf %368, %369 : vector<1x160xf32>
    %c8_391 = arith.constant 8 : index
    %c0_392 = arith.constant 0 : index
    %371 = vector.load %arg13[%c8_391, %c0_392] : memref<10x160xf32, #tpu.memory_space<vmem>>, vector<1x160xf32>
    tpu.vector_store %arg13[%c8_391, %c0_392], %370 {strides = array<i32>} : memref<10x160xf32, #tpu.memory_space<vmem>>, vector<1x160xf32>,
    %c18_393 = arith.constant 18 : index
    %c0_394 = arith.constant 0 : index
    %372 = vector.load %arg12[%c18_393, %c0_394] : memref<20x160xf32, #tpu.memory_space<vmem>>, vector<1x160xf32>
    %c19_395 = arith.constant 19 : index
    %c0_396 = arith.constant 0 : index
    %373 = vector.load %arg12[%c19_395, %c0_396] : memref<20x160xf32, #tpu.memory_space<vmem>>, vector<1x160xf32>
    %374 = arith.maximumf %372, %373 : vector<1x160xf32>
    %c9_397 = arith.constant 9 : index
    %c0_398 = arith.constant 0 : index
    %375 = vector.load %arg13[%c9_397, %c0_398] : memref<10x160xf32, #tpu.memory_space<vmem>>, vector<1x160xf32>
    tpu.vector_store %arg13[%c9_397, %c0_398], %374 {strides = array<i32>} : memref<10x160xf32, #tpu.memory_space<vmem>>, vector<1x160xf32>,
    %c0_399 = arith.constant 0 : index
    %c0_400 = arith.constant 0 : index
    %376 = vector.load %arg8[%c0_399, %c0_400] : memref<1x128xf32, #tpu.memory_space<vmem>>, vector<1x128xf32>
    %c0_401 = arith.constant 0 : index
    %c0_402 = arith.constant 0 : index
    %377 = vector.load %arg13[%c0_401, %c0_402] : memref<10x160xf32, #tpu.memory_space<vmem>>, vector<1x160xf32>
    %c0_403 = arith.constant 0 : index
    %c0_404 = arith.constant 0 : index
    %c0_405 = arith.constant 0 : index
    %378 = vector.load %arg7[%c0_403, %c0_404, %c0_405] : memref<5x160x128xf32, #tpu.memory_space<vmem>>, vector<1x160x128xf32>
    %379 = vector.shape_cast %378 : vector<1x160x128xf32> to vector<160x128xf32>
    %cst_406 = arith.constant dense<0.000000e+00> : vector<1x128xf32>
    %380 = tpu.matmul %377, %379, %cst_406 {dimension_numbers = #tpu.dot_dimension_numbers<[1], [0], [0], [1], [0, 0, 1, 1], [], []>} : vector<1x160xf32>, vector<160x128xf32>, vector<1x128xf32> -> vector<1x128xf32>
    %381 = arith.addf %376, %380 : vector<1x128xf32>
    %c1_407 = arith.constant 1 : index
    %c0_408 = arith.constant 0 : index
    %382 = vector.load %arg13[%c1_407, %c0_408] : memref<10x160xf32, #tpu.memory_space<vmem>>, vector<1x160xf32>
    %c1_409 = arith.constant 1 : index
    %c0_410 = arith.constant 0 : index
    %c0_411 = arith.constant 0 : index
    %383 = vector.load %arg7[%c1_409, %c0_410, %c0_411] : memref<5x160x128xf32, #tpu.memory_space<vmem>>, vector<1x160x128xf32>
    %384 = vector.shape_cast %383 : vector<1x160x128xf32> to vector<160x128xf32>
    %cst_412 = arith.constant dense<0.000000e+00> : vector<1x128xf32>
    %385 = tpu.matmul %382, %384, %cst_412 {dimension_numbers = #tpu.dot_dimension_numbers<[1], [0], [0], [1], [0, 0, 1, 1], [], []>} : vector<1x160xf32>, vector<160x128xf32>, vector<1x128xf32> -> vector<1x128xf32>
    %386 = arith.addf %381, %385 : vector<1x128xf32>
    %c2_413 = arith.constant 2 : index
    %c0_414 = arith.constant 0 : index
    %387 = vector.load %arg13[%c2_413, %c0_414] : memref<10x160xf32, #tpu.memory_space<vmem>>, vector<1x160xf32>
    %c2_415 = arith.constant 2 : index
    %c0_416 = arith.constant 0 : index
    %c0_417 = arith.constant 0 : index
    %388 = vector.load %arg7[%c2_415, %c0_416, %c0_417] : memref<5x160x128xf32, #tpu.memory_space<vmem>>, vector<1x160x128xf32>
    %389 = vector.shape_cast %388 : vector<1x160x128xf32> to vector<160x128xf32>
    %cst_418 = arith.constant dense<0.000000e+00> : vector<1x128xf32>
    %390 = tpu.matmul %387, %389, %cst_418 {dimension_numbers = #tpu.dot_dimension_numbers<[1], [0], [0], [1], [0, 0, 1, 1], [], []>} : vector<1x160xf32>, vector<160x128xf32>, vector<1x128xf32> -> vector<1x128xf32>
    %391 = arith.addf %386, %390 : vector<1x128xf32>
    %c3_419 = arith.constant 3 : index
    %c0_420 = arith.constant 0 : index
    %392 = vector.load %arg13[%c3_419, %c0_420] : memref<10x160xf32, #tpu.memory_space<vmem>>, vector<1x160xf32>
    %c3_421 = arith.constant 3 : index
    %c0_422 = arith.constant 0 : index
    %c0_423 = arith.constant 0 : index
    %393 = vector.load %arg7[%c3_421, %c0_422, %c0_423] : memref<5x160x128xf32, #tpu.memory_space<vmem>>, vector<1x160x128xf32>
    %394 = vector.shape_cast %393 : vector<1x160x128xf32> to vector<160x128xf32>
    %cst_424 = arith.constant dense<0.000000e+00> : vector<1x128xf32>
    %395 = tpu.matmul %392, %394, %cst_424 {dimension_numbers = #tpu.dot_dimension_numbers<[1], [0], [0], [1], [0, 0, 1, 1], [], []>} : vector<1x160xf32>, vector<160x128xf32>, vector<1x128xf32> -> vector<1x128xf32>
    %396 = arith.addf %391, %395 : vector<1x128xf32>
    %c4_425 = arith.constant 4 : index
    %c0_426 = arith.constant 0 : index
    %397 = vector.load %arg13[%c4_425, %c0_426] : memref<10x160xf32, #tpu.memory_space<vmem>>, vector<1x160xf32>
    %c4_427 = arith.constant 4 : index
    %c0_428 = arith.constant 0 : index
    %c0_429 = arith.constant 0 : index
    %398 = vector.load %arg7[%c4_427, %c0_428, %c0_429] : memref<5x160x128xf32, #tpu.memory_space<vmem>>, vector<1x160x128xf32>
    %399 = vector.shape_cast %398 : vector<1x160x128xf32> to vector<160x128xf32>
    %cst_430 = arith.constant dense<0.000000e+00> : vector<1x128xf32>
    %400 = tpu.matmul %397, %399, %cst_430 {dimension_numbers = #tpu.dot_dimension_numbers<[1], [0], [0], [1], [0, 0, 1, 1], [], []>} : vector<1x160xf32>, vector<160x128xf32>, vector<1x128xf32> -> vector<1x128xf32>
    %401 = arith.addf %396, %400 : vector<1x128xf32>
    %c0_431 = arith.constant 0 : index
    %c0_432 = arith.constant 0 : index
    %402 = vector.load %arg9[%c0_431, %c0_432] : memref<2x128xf32, #tpu.memory_space<vmem>>, vector<1x128xf32>
    tpu.vector_store %arg9[%c0_431, %c0_432], %401 {strides = array<i32>} : memref<2x128xf32, #tpu.memory_space<vmem>>, vector<1x128xf32>,
    %c0_433 = arith.constant 0 : index
    %c0_434 = arith.constant 0 : index
    %403 = vector.load %arg8[%c0_433, %c0_434] : memref<1x128xf32, #tpu.memory_space<vmem>>, vector<1x128xf32>
    %c5_435 = arith.constant 5 : index
    %c0_436 = arith.constant 0 : index
    %404 = vector.load %arg13[%c5_435, %c0_436] : memref<10x160xf32, #tpu.memory_space<vmem>>, vector<1x160xf32>
    %c0_437 = arith.constant 0 : index
    %c0_438 = arith.constant 0 : index
    %c0_439 = arith.constant 0 : index
    %405 = vector.load %arg7[%c0_437, %c0_438, %c0_439] : memref<5x160x128xf32, #tpu.memory_space<vmem>>, vector<1x160x128xf32>
    %406 = vector.shape_cast %405 : vector<1x160x128xf32> to vector<160x128xf32>
    %cst_440 = arith.constant dense<0.000000e+00> : vector<1x128xf32>
    %407 = tpu.matmul %404, %406, %cst_440 {dimension_numbers = #tpu.dot_dimension_numbers<[1], [0], [0], [1], [0, 0, 1, 1], [], []>} : vector<1x160xf32>, vector<160x128xf32>, vector<1x128xf32> -> vector<1x128xf32>
    %408 = arith.addf %403, %407 : vector<1x128xf32>
    %c6_441 = arith.constant 6 : index
    %c0_442 = arith.constant 0 : index
    %409 = vector.load %arg13[%c6_441, %c0_442] : memref<10x160xf32, #tpu.memory_space<vmem>>, vector<1x160xf32>
    %c1_443 = arith.constant 1 : index
    %c0_444 = arith.constant 0 : index
    %c0_445 = arith.constant 0 : index
    %410 = vector.load %arg7[%c1_443, %c0_444, %c0_445] : memref<5x160x128xf32, #tpu.memory_space<vmem>>, vector<1x160x128xf32>
    %411 = vector.shape_cast %410 : vector<1x160x128xf32> to vector<160x128xf32>
    %cst_446 = arith.constant dense<0.000000e+00> : vector<1x128xf32>
    %412 = tpu.matmul %409, %411, %cst_446 {dimension_numbers = #tpu.dot_dimension_numbers<[1], [0], [0], [1], [0, 0, 1, 1], [], []>} : vector<1x160xf32>, vector<160x128xf32>, vector<1x128xf32> -> vector<1x128xf32>
    %413 = arith.addf %408, %412 : vector<1x128xf32>
    %c7_447 = arith.constant 7 : index
    %c0_448 = arith.constant 0 : index
    %414 = vector.load %arg13[%c7_447, %c0_448] : memref<10x160xf32, #tpu.memory_space<vmem>>, vector<1x160xf32>
    %c2_449 = arith.constant 2 : index
    %c0_450 = arith.constant 0 : index
    %c0_451 = arith.constant 0 : index
    %415 = vector.load %arg7[%c2_449, %c0_450, %c0_451] : memref<5x160x128xf32, #tpu.memory_space<vmem>>, vector<1x160x128xf32>
    %416 = vector.shape_cast %415 : vector<1x160x128xf32> to vector<160x128xf32>
    %cst_452 = arith.constant dense<0.000000e+00> : vector<1x128xf32>
    %417 = tpu.matmul %414, %416, %cst_452 {dimension_numbers = #tpu.dot_dimension_numbers<[1], [0], [0], [1], [0, 0, 1, 1], [], []>} : vector<1x160xf32>, vector<160x128xf32>, vector<1x128xf32> -> vector<1x128xf32>
    %418 = arith.addf %413, %417 : vector<1x128xf32>
    %c8_453 = arith.constant 8 : index
    %c0_454 = arith.constant 0 : index
    %419 = vector.load %arg13[%c8_453, %c0_454] : memref<10x160xf32, #tpu.memory_space<vmem>>, vector<1x160xf32>
    %c3_455 = arith.constant 3 : index
    %c0_456 = arith.constant 0 : index
    %c0_457 = arith.constant 0 : index
    %420 = vector.load %arg7[%c3_455, %c0_456, %c0_457] : memref<5x160x128xf32, #tpu.memory_space<vmem>>, vector<1x160x128xf32>
    %421 = vector.shape_cast %420 : vector<1x160x128xf32> to vector<160x128xf32>
    %cst_458 = arith.constant dense<0.000000e+00> : vector<1x128xf32>
    %422 = tpu.matmul %419, %421, %cst_458 {dimension_numbers = #tpu.dot_dimension_numbers<[1], [0], [0], [1], [0, 0, 1, 1], [], []>} : vector<1x160xf32>, vector<160x128xf32>, vector<1x128xf32> -> vector<1x128xf32>
    %423 = arith.addf %418, %422 : vector<1x128xf32>
    %c9_459 = arith.constant 9 : index
    %c0_460 = arith.constant 0 : index
    %424 = vector.load %arg13[%c9_459, %c0_460] : memref<10x160xf32, #tpu.memory_space<vmem>>, vector<1x160xf32>
    %c4_461 = arith.constant 4 : index
    %c0_462 = arith.constant 0 : index
    %c0_463 = arith.constant 0 : index
    %425 = vector.load %arg7[%c4_461, %c0_462, %c0_463] : memref<5x160x128xf32, #tpu.memory_space<vmem>>, vector<1x160x128xf32>
    %426 = vector.shape_cast %425 : vector<1x160x128xf32> to vector<160x128xf32>
    %cst_464 = arith.constant dense<0.000000e+00> : vector<1x128xf32>
    %427 = tpu.matmul %424, %426, %cst_464 {dimension_numbers = #tpu.dot_dimension_numbers<[1], [0], [0], [1], [0, 0, 1, 1], [], []>} : vector<1x160xf32>, vector<160x128xf32>, vector<1x128xf32> -> vector<1x128xf32>
    %428 = arith.addf %423, %427 : vector<1x128xf32>
    %c1_465 = arith.constant 1 : index
    %c0_466 = arith.constant 0 : index
    %429 = vector.load %arg9[%c1_465, %c0_466] : memref<2x128xf32, #tpu.memory_space<vmem>>, vector<1x128xf32>
    tpu.vector_store %arg9[%c1_465, %c0_466], %428 {strides = array<i32>} : memref<2x128xf32, #tpu.memory_space<vmem>>, vector<1x128xf32>,
    return
  }
}

</mosaic_0001>

<bundles_post_ra>
// kernel: cnn_forward.1
= control target key start
LH: loop header
LB: loop body
LE: loop exit
PB: predicated region body
PF: predicated region fallthrough
CT: control target
= control target key end

     0   :  { %vm66_vm0 = vcmask 261120   ;;  %v14115_v18 = vmov 0.0   ;;  %s14103_s0 = inlined_call_operand.vmem [shape: f32[64,32], index: 0, kind: input, shape index: {}]   ;;  %s14104_s1 = inlined_call_operand.vmem [shape: f32[5,32,224], index: 1, kind: input, shape index: {}]   ;;  %s14105_s2 = inlined_call_operand.vmem [shape: f32[5,32,224], index: 2, kind: input, shape index: {}]   ;;  %s14106_s3 = inlined_call_operand.vmem [shape: f32[1,224], index: 3, kind: input, shape index: {}]   ;;  %s14107_s4 = inlined_call_operand.vmem [shape: f32[5,224,160], index: 4, kind: input, shape index: {}]   ;;  %s14108_s5 = inlined_call_operand.vmem [shape: f32[5,224,160], index: 5, kind: input, shape index: {}]   ;;  %s14109_s6 = inlined_call_operand.vmem [shape: f32[1,160], index: 6, kind: input, shape index: {}]   ;;  %s14110_s7 = inlined_call_operand.vmem [shape: f32[5,160,128], index: 7, kind: input, shape index: {}]   ;;  %s14111_s8 = inlined_call_operand.vmem [shape: f32[1,128], index: 8, kind: input, shape index: {}]   ;;  %s14112_s9 = inlined_call_operand.hbm [shape: f32[2,128], index: 9, kind: output, shape index: {}]  }
   0x1   :  { %v8122_v0 = vld [vmem:[%s14104_s1 + $0x78] sm:$0xff]  ;;  %v8132_v2 = vld [vmem:[%s14104_s1 + $0x70] sm:$0xff]  ;;  %v8144_v4 = vld [vmem:[%s14104_s1 + $0x68] sm:$0xff]  ;;  %143 = vmatprep.mubr.f32.mxu0 %v14115_v18  ;;  %244 = vmatprep.mubr.f32.mxu1 %v14115_v18 }
   0x2   :  { %v8127_v1 = vld [vmem:[%s14104_s1 + $0x38] sm:$0xff]  ;;  %103 = vmatprep.subr.mxu0 %v8122_v0  ;;  %v8139_v3 = vld [vmem:[%s14104_s1 + $0x30] sm:$0xff]  ;;  %v8149_v5 = vld [vmem:[%s14104_s1 + $0x28] sm:$0xff] }
   0x3   :  { %204 = vmatprep.subr.mxu1 %v8127_v1  ;;  %104 = vmatpush1.msra.mxu0 %v8132_v2  ;;  %v8156_v6 = vld [vmem:[%s14104_s1 + $0x60] sm:$0xff]  ;;  %v8166_v8 = vld [vmem:[%s14104_s1 + $0x58] sm:$0xff]  ;;  %v8178_v10 = vld [vmem:[%s14104_s1 + $0x50] sm:$0xff] }
   0x4   :  { %205 = vmatpush1.msra.mxu1 %v8139_v3  ;;  %v8161_v7 = vld [vmem:[%s14104_s1 + $0x20] sm:$0xff]  ;;  %105 = vmatprep.subr.mxu0 %v8144_v4  ;;  %v8173_v9 = vld [vmem:[%s14104_s1 + $0x18] sm:$0xff]  ;;  %v8183_v11 = vld [vmem:[%s14104_s1 + $0x10] sm:$0xff] }
   0x5   :  { %206 = vmatprep.subr.mxu1 %v8149_v5  ;;  %106 = vmatpush1.msra.mxu0 %v8156_v6  ;;  %v8190_v12 = vld [vmem:[%s14104_s1 + $0x48] sm:$0xff]  ;;  %v8202_v14 = vld [vmem:[%s14104_s1 + $0x40] sm:$0xff]  ;;  %v8228_v19 = vld [vmem:[%s14105_s2 + $0x78] sm:$0xff] }
   0x6   :  { %207 = vmatpush1.msra.mxu1 %v8161_v7  ;;  %v8195_v13 = vld [vmem:[%s14104_s1 + $0x8] sm:$0xff]  ;;  %107 = vmatprep.subr.mxu0 %v8166_v8  ;;  %v8209_v15 = vld [vmem:[%s14104_s1] sm:$0xff]  ;;  %v8233_v20 = vld [vmem:[%s14105_s2 + $0x38] sm:$0xff] }
   0x7   :  { %208 = vmatprep.subr.mxu1 %v8173_v9  ;;  %108 = vmatpush1.msra.mxu0 %v8178_v10  ;;  %v8216_v16 = vld [vmem:[%s14103_s0 + $0x1] sm:$0xff]  ;;  %v8240_v21 = vld [vmem:[%s14105_s2 + $0x70] sm:$0xff]  ;;  %v8298_v31 = vld [vmem:[%s14105_s2 + $0x58] sm:$0xff] }
   0x8   :  { %209 = vmatpush1.msra.mxu1 %v8183_v11  ;;  %109 = vmatprep.subr.mxu0 %v8190_v12  ;;  %v8221_v17 = vld [vmem:[%s14103_s0] sm:$0xff]  ;;  %v8245_v22 = vld [vmem:[%s14105_s2 + $0x30] sm:$0xff]  ;;  %v34_v24 = vld [vmem:[%s14103_s0 + $0x8] sm:$0xff] }
   0x9   :  { %210 = vmatprep.subr.mxu1 %v8195_v13  ;;  %110 = vmatpush1.msra.mxu0 %v8202_v14  ;;  %v54_v23 = vld [vmem:[%s14103_s0 + $0x9] sm:$0xff]  ;;  %v8276_v27 = vld [vmem:[%s14105_s2 + $0x60] sm:$0xff]  ;;  %v55_v29 = vld [vmem:[%s14103_s0 + $0x11] sm:$0xff] }
   0xa   :  { %211 = vmatpush1.msra.mxu1 %v8209_v15  ;;  %6735 = vmatmul.mubr.msk.f32.vlgmr.msra.gmra.mxu0 %vm66_vm0, %v8216_v16  ;;  %v8264_v25 = vld [vmem:[%s14105_s2 + $0x68] sm:$0xff]  ;;  %v8281_v28 = vld [vmem:[%s14105_s2 + $0x20] sm:$0xff]  ;;  %v35_v30 = vld [vmem:[%s14103_s0 + $0x10] sm:$0xff] }
   0xb   :  { %6739 = vmatmul.mubr.msk.f32.vlgmr.msra.gmra.mxu1 %vm66_vm0, %v8221_v17  ;;  %302 = vmatprep.subr.mxu0 %v8228_v19  ;;  %v8269_v26 = vld [vmem:[%s14105_s2 + $0x28] sm:$0xff]  ;;  %v8303_v32 = vld [vmem:[%s14105_s2 + $0x18] sm:$0xff]  ;;  %v8310_v33 = vld [vmem:[%s14105_s2 + $0x50] sm:$0xff] }
   0xc   :  { %391 = vmatprep.subr.mxu1 %v8233_v20  ;;  %303 = vmatpush1.msra.mxu0 %v8240_v21  ;;  %v8315_v34 = vld [vmem:[%s14105_s2 + $0x10] sm:$0xff]  ;;  %v56_v35 = vld [vmem:[%s14103_s0 + $0x19] sm:$0xf]  ;;  %v8332_v37 = vld [vmem:[%s14105_s2 + $0x48] sm:$0xff] }
   0xd   :  { %392 = vmatpush1.msra.mxu1 %v8245_v22  ;;  %149 = vmatprep.mubr.f32.mxu0 %v14115_v18  ;;  %v36_v36 = vld [vmem:[%s14103_s0 + $0x18] sm:$0xf]  ;;  %v8337_v38 = vld [vmem:[%s14105_s2 + $0x8] sm:$0xff]  ;;  %v8344_v39 = vld [vmem:[%s14105_s2 + $0x40] sm:$0xff] }
   0xe   :  { %250 = vmatprep.mubr.f32.mxu1 %v14115_v18  ;;  %6736 = vmatmul.mubr.msk.f32.gmra.mxu0 %vm66_vm0, %v54_v23  ;;  %v8349_v40 = vld [vmem:[%s14105_s2] sm:$0xff]  ;;  %v8360_v41 = vld [vmem:[%s14104_s1 + $0xb8] sm:$0xff]  ;;  %v8372_v43 = vld [vmem:[%s14104_s1 + $0xb0] sm:$0xff] }
   0xf   :  { %6740 = vmatmul.mubr.msk.f32.gmra.mxu1 %vm66_vm0, %v34_v24  ;;  %304 = vmatprep.subr.mxu0 %v8264_v25  ;;  %v8365_v42 = vld [vmem:[%s14105_s2 + $0xb8] sm:$0xff]  ;;  %v8377_v44 = vld [vmem:[%s14105_s2 + $0xb0] sm:$0xff]  ;;  %v8390_v45 = vld [vmem:[%s14104_s1 + $0xa8] sm:$0xff] }
  0x10   :  { %393 = vmatprep.subr.mxu1 %v8269_v26  ;;  %305 = vmatpush1.msra.mxu0 %v8276_v27  ;;  %v8395_v46 = vld [vmem:[%s14105_s2 + $0xa8] sm:$0xff]  ;;  %v8402_v47 = vld [vmem:[%s14104_s1 + $0xa0] sm:$0xff]  ;;  %v8418_v49 = vld [vmem:[%s14104_s1 + $0x98] sm:$0xff] }
  0x11   :  { %394 = vmatpush1.msra.mxu1 %v8281_v28  ;;  %155 = vmatprep.mubr.f32.mxu0 %v14115_v18  ;;  %v8407_v48 = vld [vmem:[%s14105_s2 + $0xa0] sm:$0xff]  ;;  %v8423_v50 = vld [vmem:[%s14105_s2 + $0x98] sm:$0xff]  ;;  %v8430_v51 = vld [vmem:[%s14104_s1 + $0x90] sm:$0xff] }
  0x12   :  { %256 = vmatprep.mubr.f32.mxu1 %v14115_v18  ;;  %6737 = vmatmul.mubr.msk.f32.gmra.mxu0 %vm66_vm0, %v55_v29  ;;  %v8435_v52 = vld [vmem:[%s14105_s2 + $0x90] sm:$0xff]  ;;  %v8446_v53 = vld [vmem:[%s14104_s1 + $0x88] sm:$0xff]  ;;  %v8458_v55 = vld [vmem:[%s14104_s1 + $0x80] sm:$0xff] }
  0x13   :  { %6741 = vmatmul.mubr.msk.f32.gmra.mxu1 %vm66_vm0, %v35_v30  ;;  %306 = vmatprep.subr.mxu0 %v8298_v31  ;;  %v8451_v54 = vld [vmem:[%s14105_s2 + $0x88] sm:$0xff]  ;;  %v8463_v56 = vld [vmem:[%s14105_s2 + $0x80] sm:$0xff]  ;;  %v8477_v58 = vld [vmem:[%s14104_s1 + $0xf8] sm:$0xff] }
  0x14   :  { %395 = vmatprep.subr.mxu1 %v8303_v32  ;;  %307 = vmatpush1.msra.mxu0 %v8310_v33  ;;  %v456_v57 = vld [vmem:[%s14103_s0 + $0x2] sm:$0xff]  ;;  %v8482_v59 = vld [vmem:[%s14105_s2 + $0xf8] sm:$0xff] }
  0x15   :  { %396 = vmatpush1.msra.mxu1 %v8315_v34  ;;  %161 = vmatprep.mubr.f32.mxu0 %v14115_v18 }
  0x16   :  { %262 = vmatprep.mubr.f32.mxu1 %v14115_v18  ;;  %6738 = vmatmul.mubr.msk.f32.gmra.mxu0 %vm66_vm0, %v56_v35 }
  0x17   :  { %6742 = vmatmul.mubr.msk.f32.gmra.mxu1 %vm66_vm0, %v36_v36  ;;  %308 = vmatprep.subr.mxu0 %v8332_v37 }
  0x18   :  { %397 = vmatprep.subr.mxu1 %v8337_v38  ;;  %309 = vmatpush1.msra.mxu0 %v8344_v39 }
  0x19   :  { %398 = vmatpush1.msra.mxu1 %v8349_v40  ;;  %342 = vmatprep.mubr.f32.mxu0 %v14115_v18 }
  0x1a   :  { %431 = vmatprep.mubr.f32.mxu1 %v14115_v18  ;;  %6751 = vmatmul.mubr.msk.f32.vlgmr.msra.gmra.mxu0 %vm66_vm0, %v8216_v16 }
  0x1b   :  { %6755 = vmatmul.mubr.msk.f32.vlgmr.msra.gmra.mxu1 %vm66_vm0, %v8221_v17  ;;  %505 = vmatprep.subr.mxu0 %v8360_v41 }
  0x1c   :  { %611 = vmatprep.subr.mxu1 %v8365_v42  ;;  %506 = vmatpush1.msra.mxu0 %v8372_v43 }
  0x1d   :  { %612 = vmatpush1.msra.mxu1 %v8377_v44  ;;  %348 = vmatprep.mubr.f32.mxu0 %v14115_v18 }
  0x1e   :  { %437 = vmatprep.mubr.f32.mxu1 %v14115_v18  ;;  %6752 = vmatmul.mubr.msk.f32.gmra.mxu0 %vm66_vm0, %v54_v23 }
  0x1f   :  { %6756 = vmatmul.mubr.msk.f32.gmra.mxu1 %vm66_vm0, %v34_v24  ;;  %507 = vmatprep.subr.mxu0 %v8390_v45 }
  0x20   :  { %613 = vmatprep.subr.mxu1 %v8395_v46  ;;  %508 = vmatpush1.msra.mxu0 %v8402_v47 }
  0x21   :  { %614 = vmatpush1.msra.mxu1 %v8407_v48  ;;  %354 = vmatprep.mubr.f32.mxu0 %v14115_v18 }
  0x22   :  { %443 = vmatprep.mubr.f32.mxu1 %v14115_v18  ;;  %6753 = vmatmul.mubr.msk.f32.gmra.mxu0 %vm66_vm0, %v55_v29 }
  0x23   :  { %6757 = vmatmul.mubr.msk.f32.gmra.mxu1 %vm66_vm0, %v35_v30  ;;  %509 = vmatprep.subr.mxu0 %v8418_v49 }
  0x24   :  { %615 = vmatprep.subr.mxu1 %v8423_v50  ;;  %510 = vmatpush1.msra.mxu0 %v8430_v51 }
  0x25   :  { %616 = vmatpush1.msra.mxu1 %v8435_v52  ;;  %360 = vmatprep.mubr.f32.mxu0 %v14115_v18 }
  0x26   :  { %449 = vmatprep.mubr.f32.mxu1 %v14115_v18  ;;  %6754 = vmatmul.mubr.msk.f32.gmra.mxu0 %vm66_vm0, %v56_v35 }
  0x27   :  { %6758 = vmatmul.mubr.msk.f32.gmra.mxu1 %vm66_vm0, %v36_v36  ;;  %511 = vmatprep.subr.mxu0 %v8446_v53 }
  0x28   :  { %617 = vmatprep.subr.mxu1 %v8451_v54  ;;  %512 = vmatpush1.msra.mxu0 %v8458_v55 }
  0x29   :  { %618 = vmatpush1.msra.mxu1 %v8463_v56 }
  0x2a   :  { %14 = vsyncpa [#allocation7], 0  ;;  %545 = vmatprep.mubr.f32.mxu0 %v14115_v18  ;;  %651 = vmatprep.mubr.f32.mxu1 %v14115_v18  ;;  %v8489_v60 = vld [vmem:[%s14104_s1 + $0xf0] sm:$0xff]  ;;  %v8508_v63 = vld [vmem:[%s14104_s1 + $0xe8] sm:$0xff]  ;;  %vm1185_vm1 = vcmask 785408   ;;  %vm1192_vm3 = vcmask 781312  }
  0x2b   :  { %v8494_v61 = vld [vmem:[%s14105_s2 + $0xf0] sm:$0xff]  ;;  %6767 = vmatmul.mubr.msk.f32.vlgmr.msra.gmra.mxu0 %vm66_vm0, %v456_v57  ;;  %6779 = vmatmul.mubr.msk.f32.vlgmr.msra.gmra.mxu1 %vm66_vm0, %v456_v57  ;;  %v8513_v16 = vld [vmem:[%s14105_s2 + $0xe8] sm:$0xff]  ;;  %v8520_v17 = vld [vmem:[%s14104_s1 + $0xe0] sm:$0xff]  ;;  %vm2783_vm4 = vcmask 1046528   ;;  %vm2368_vm5 = vcmask 785412   ;;  %vm2344_vm6 = vcmask 1043456  }
  0x2c   :  { %733 = vmatprep.subr.mxu0 %v8477_v58  ;;  %839 = vmatprep.subr.mxu1 %v8482_v59  ;;  %v457_v62 = vld [vmem:[%s14103_s0 + $0xa] sm:$0xff]  ;;  %v8525_v23 = vld [vmem:[%s14105_s2 + $0xe0] sm:$0xff]  ;;  %v458_v24 = vld [vmem:[%s14103_s0 + $0x12] sm:$0xff]  ;;  %vm3232_vm7 = vcmask 1045504   ;;  %vm3529_vm8 = vcmask 1044480   ;;  %vm4368_vm9 = vcmask 1041408  }
  0x2d   :  { %734 = vmatpush1.msra.mxu0 %v8489_v60  ;;  %840 = vmatpush1.msra.mxu1 %v8494_v61  ;;  %v8539_v29 = vld [vmem:[%s14104_s1 + $0xd8] sm:$0xff]  ;;  %v8551_v35 = vld [vmem:[%s14104_s1 + $0xd0] sm:$0xff]  ;;  %vm4272_vm10 = vcmask 1040384   ;;  %vm4088_vm11 = vcmask 254976   ;;  %vm5580_vm13 = vcmask 261122   ;;  %vm5583_vm14 = vcmask 257024  }
  0x2e   :  { %551 = vmatprep.mubr.f32.mxu0 %v14115_v18  ;;  %657 = vmatprep.mubr.f32.mxu1 %v14115_v18  ;;  %14198 = vst [vmem:[#allocation9_spill] sm:$0xff] %v8539_v29  ;;  %v8544_v30 = vld [vmem:[%s14105_s2 + $0xd8] sm:$0xff]  ;;  %14200 = vst [vmem:[#allocation11_spill] sm:$0xff] %v8551_v35  ;;  %v8556_v36 = vld [vmem:[%s14105_s2 + $0xd0] sm:$0xff]  ;;  %s8068_s12 = smov [#allocation6]  }
  0x2f   :  { %6768 = vmatmul.mubr.msk.f32.gmra.mxu0 %vm66_vm0, %v457_v62  ;;  %6780 = vmatmul.mubr.msk.f32.gmra.mxu1 %vm66_vm0, %v457_v62  ;;  %14199 = vst [vmem:[#allocation10_spill] sm:$0xff] %v8544_v30  ;;  %14201 = vst [vmem:[#allocation12_spill] sm:$0xff] %v8556_v36  ;;  %v459_v57 = vld [vmem:[%s14103_s0 + $0x1a] sm:$0xf]  ;;  %v8570_v62 = vld [vmem:[%s14104_s1 + $0xc8] sm:$0xff]  ;;  %s6719_s13 = sshll.u32 %s8068_s12, 4  ;;  %s6720_s13 = int_to_ptr.vmem [resolvable:$true] %s6719_s13 }
  0x30   :  { %735 = vmatprep.subr.mxu0 %v8508_v63  ;;  %841 = vmatprep.subr.mxu1 %v8513_v16  ;;  %14202 = vst [vmem:[#allocation13_spill] sm:$0xff] %v8570_v62  ;;  %p8050_p1 = scmp.lt.s32.totalorder %s6720_s13, %s6720_s13 }
  0x31   :  { %736 = vmatpush1.msra.mxu0 %v8520_v17  ;;  %842 = vmatpush1.msra.mxu1 %v8525_v23 }
  0x32   :  { %557 = vmatprep.mubr.f32.mxu0 %v14115_v18  ;;  %663 = vmatprep.mubr.f32.mxu1 %v14115_v18 }
  0x33   :  { %6769 = vmatmul.mubr.msk.f32.gmra.mxu0 %vm66_vm0, %v458_v24  ;;  %6781 = vmatmul.mubr.msk.f32.gmra.mxu1 %vm66_vm0, %v458_v24  ;;  %v8575_v24 = vld [vmem:[%s14105_s2 + $0xc8] sm:$0xff] }
  0x34   :  { %737 = vmatprep.subr.mxu0 %v8539_v29  ;;  %843 = vmatprep.subr.mxu1 %v8544_v30  ;;  %14203 = vst [vmem:[#allocation14_spill] sm:$0xff] %v8575_v24  ;;  %v8601_v30 = vld [vmem:[%s14104_s1 + $0x138] sm:$0xff]  ;;  %v8632_v29 = vld [vmem:[%s14104_s1 + $0x128] sm:$0xff] }
  0x35   :  { %738 = vmatpush1.msra.mxu0 %v8551_v35  ;;  %844 = vmatpush1.msra.mxu1 %v8556_v36  ;;  %v8582_v35 = vld [vmem:[%s14104_s1 + $0xc0] sm:$0xff]  ;;  %14206 = vst [vmem:[#allocation17_spill] sm:$0xff] %v8601_v30  ;;  %14211 = vst [vmem:[#allocation21_spill] sm:$0xff] %v8632_v29 }
  0x36   :  { %563 = vmatprep.mubr.f32.mxu0 %v14115_v18  ;;  %669 = vmatprep.mubr.f32.mxu1 %v14115_v18  ;;  %14204 = vst [vmem:[#allocation15_spill] sm:$0xff] %v8582_v35  ;;  %v8587_v36 = vld [vmem:[%s14105_s2 + $0xc0] sm:$0xff] }
  0x37   :  { %14205 = vst [vmem:[#allocation16_spill] sm:$0xff] %v8587_v36  ;;  %6770 = vmatmul.mubr.msk.f32.gmra.mxu0 %vm66_vm0, %v459_v57  ;;  %6782 = vmatmul.mubr.msk.f32.gmra.mxu1 %vm66_vm0, %v459_v57  ;;  %v684_v18 = vld [vmem:[%s14103_s0 + $0x3] sm:$0xff]  ;;  %v8606_v57 = vld [vmem:[%s14105_s2 + $0x138] sm:$0xff] }
  0x38   :  { %739 = vmatprep.subr.mxu0 %v8570_v62  ;;  %845 = vmatprep.subr.mxu1 %v8575_v24  ;;  %14207 = vst [vmem:[#allocation18_spill] sm:$0xff] %v8606_v57  ;;  %v14208_v62 = vmov 0.0   ;;  %v685_v24 = vld [vmem:[%s14103_s0 + $0xb] sm:$0xff] }
  0x39   :  { %740 = vmatpush1.msra.mxu0 %v8582_v35  ;;  %846 = vmatpush1.msra.mxu1 %v8587_v36  ;;  %v8613_v35 = vld [vmem:[%s14104_s1 + $0x130] sm:$0xff] }
  0x3a   :  { %773 = vmatprep.mubr.f32.mxu0 %v14208_v62  ;;  %879 = vmatprep.mubr.f32.mxu1 %v14208_v62  ;;  %14209 = vst [vmem:[#allocation19_spill] sm:$0xff] %v8613_v35  ;;  %v8618_v36 = vld [vmem:[%s14105_s2 + $0x130] sm:$0xff] }
  0x3b   :  { %14210 = vst [vmem:[#allocation20_spill] sm:$0xff] %v8618_v36  ;;  %6791 = vmatmul.mubr.msk.f32.vlgmr.msra.gmra.mxu0 %vm66_vm0, %v684_v18  ;;  %6803 = vmatmul.mubr.msk.f32.vlgmr.msra.gmra.mxu1 %vm66_vm0, %v684_v18  ;;  %v8637_v18 = vld [vmem:[%s14105_s2 + $0x128] sm:$0xff] }
  0x3c   :  { %961 = vmatprep.subr.mxu0 %v8601_v30  ;;  %1067 = vmatprep.subr.mxu1 %v8606_v57  ;;  %14212 = vst [vmem:[#allocation22_spill] sm:$0xff] %v8637_v18  ;;  %v686_v57 = vld [vmem:[%s14103_s0 + $0x13] sm:$0xff] }
  0x3d   :  { %962 = vmatpush1.msra.mxu0 %v8613_v35  ;;  %1068 = vmatpush1.msra.mxu1 %v8618_v36  ;;  %v8644_v35 = vld [vmem:[%s14104_s1 + $0x120] sm:$0xff]  ;;  %v8663_v30 = vld [vmem:[%s14104_s1 + $0x118] sm:$0xff] }
  0x3e   :  { %779 = vmatprep.mubr.f32.mxu0 %v14208_v62  ;;  %885 = vmatprep.mubr.f32.mxu1 %v14208_v62  ;;  %14213 = vst [vmem:[#allocation23_spill] sm:$0xff] %v8644_v35  ;;  %v8649_v36 = vld [vmem:[%s14105_s2 + $0x120] sm:$0xff] }
  0x3f   :  { %14214 = vst [vmem:[#allocation24_spill] sm:$0xff] %v8649_v36  ;;  %6792 = vmatmul.mubr.msk.f32.gmra.mxu0 %vm66_vm0, %v685_v24  ;;  %6804 = vmatmul.mubr.msk.f32.gmra.mxu1 %vm66_vm0, %v685_v24  ;;  %v8668_v24 = vld [vmem:[%s14105_s2 + $0x118] sm:$0xff] }
  0x40   :  { %963 = vmatprep.subr.mxu0 %v8632_v29  ;;  %1069 = vmatprep.subr.mxu1 %v8637_v18  ;;  %14215 = vst [vmem:[#allocation25_spill] sm:$0xff] %v8668_v24  ;;  %v687_v18 = vld [vmem:[%s14103_s0 + $0x1b] sm:$0xf]  ;;  %v8694_v29 = vld [vmem:[%s14104_s1 + $0x108] sm:$0xff] }
  0x41   :  { %964 = vmatpush1.msra.mxu0 %v8644_v35  ;;  %1070 = vmatpush1.msra.mxu1 %v8649_v36  ;;  %v8675_v35 = vld [vmem:[%s14104_s1 + $0x110] sm:$0xff] }
  0x42   :  { %785 = vmatprep.mubr.f32.mxu0 %v14208_v62  ;;  %891 = vmatprep.mubr.f32.mxu1 %v14208_v62  ;;  %14216 = vst [vmem:[#allocation26_spill] sm:$0xff] %v8675_v35  ;;  %v8680_v36 = vld [vmem:[%s14105_s2 + $0x110] sm:$0xff] }
  0x43   :  { %14217 = vst [vmem:[#allocation27_spill] sm:$0xff] %v8680_v36  ;;  %6793 = vmatmul.mubr.msk.f32.gmra.mxu0 %vm66_vm0, %v686_v57  ;;  %6805 = vmatmul.mubr.msk.f32.gmra.mxu1 %vm66_vm0, %v686_v57  ;;  %v8699_v57 = vld [vmem:[%s14105_s2 + $0x108] sm:$0xff] }
  0x44   :  { %965 = vmatprep.subr.mxu0 %v8663_v30  ;;  %1071 = vmatprep.subr.mxu1 %v8668_v24  ;;  %v912_v24 = vld [vmem:[%s14103_s0 + $0x4] sm:$0xff] }
  0x45   :  { %966 = vmatpush1.msra.mxu0 %v8675_v35  ;;  %1072 = vmatpush1.msra.mxu1 %v8680_v36  ;;  %v8706_v35 = vld [vmem:[%s14104_s1 + $0x100] sm:$0xff] }
  0x46   :  { %791 = vmatprep.mubr.f32.mxu0 %v14208_v62  ;;  %897 = vmatprep.mubr.f32.mxu1 %v14208_v62  ;;  %v8711_v36 = vld [vmem:[%s14105_s2 + $0x100] sm:$0xff] }
  0x47   :  { %6794 = vmatmul.mubr.msk.f32.gmra.mxu0 %vm66_vm0, %v687_v18  ;;  %6806 = vmatmul.mubr.msk.f32.gmra.mxu1 %vm66_vm0, %v687_v18  ;;  %v913_v18 = vld [vmem:[%s14103_s0 + $0xc] sm:$0xff] }
  0x48   :  { %967 = vmatprep.subr.mxu0 %v8694_v29  ;;  %1073 = vmatprep.subr.mxu1 %v8699_v57 }
  0x49   :  { %968 = vmatpush1.msra.mxu0 %v8706_v35  ;;  %1074 = vmatpush1.msra.mxu1 %v8711_v36 }
  0x4a   :  { %1001 = vmatprep.mubr.f32.mxu0 %v14208_v62  ;;  %1107 = vmatprep.mubr.f32.mxu1 %v14208_v62 }
  0x4b   :  { %6815 = vmatmul.mubr.msk.f32.vlgmr.msra.gmra.mxu0 %vm66_vm0, %v912_v24  ;;  %6827 = vmatmul.mubr.msk.f32.vlgmr.msra.gmra.mxu1 %vm66_vm0, %v912_v24  ;;  %v914_v24 = vld [vmem:[%s14103_s0 + $0x14] sm:$0xff] }
  0x4c   :  { %1007 = vmatprep.mubr.f32.mxu0 %v14208_v62  ;;  %1113 = vmatprep.mubr.f32.mxu1 %v14208_v62 }
  0x4d   :  { %1262 = vmatprep.subr.mxu0 %v8122_v0  ;;  %1363 = vmatprep.subr.mxu1 %v8127_v1  ;;  %v915_v0 = vld [vmem:[%s14103_s0 + $0x1c] sm:$0xf]  ;;  %v1214_v1 = vld [vmem:[%s14103_s0 + $0x21] sm:$0xff] }
  0x4e   :  { %1263 = vmatpush1.msra.mxu0 %v8132_v2  ;;  %1364 = vmatpush1.msra.mxu1 %v8139_v3  ;;  %v1194_v2 = vld [vmem:[%s14103_s0 + $0x20] sm:$0xff]  ;;  %v1215_v3 = vld [vmem:[%s14103_s0 + $0x29] sm:$0xff] }
  0x4f   :  { %6816 = vmatmul.mubr.msk.f32.gmra.mxu0 %vm66_vm0, %v913_v18  ;;  %6828 = vmatmul.mubr.msk.f32.gmra.mxu1 %vm66_vm0, %v913_v18  ;;  %v6956_v18 = vld [vmem:[%s14107_s4 + $0x268] sm:$0xff] }
  0x50   :  { %1013 = vmatprep.mubr.f32.mxu0 %v14208_v62  ;;  %1119 = vmatprep.mubr.f32.mxu1 %v14208_v62 }
  0x51   :  { %1264 = vmatprep.subr.mxu0 %v8144_v4  ;;  %1365 = vmatprep.subr.mxu1 %v8149_v5  ;;  %v1195_v4 = vld [vmem:[%s14103_s0 + $0x28] sm:$0xff]  ;;  %v1216_v5 = vld [vmem:[%s14103_s0 + $0x31] sm:$0xff] }
  0x52   :  { %1265 = vmatpush1.msra.mxu0 %v8156_v6  ;;  %1366 = vmatpush1.msra.mxu1 %v8161_v7  ;;  %v1196_v6 = vld [vmem:[%s14103_s0 + $0x30] sm:$0xff]  ;;  %v1217_v7 = vld [vmem:[%s14103_s0 + $0x39] sm:$0xf] }
  0x53   :  { %6817 = vmatmul.mubr.msk.f32.gmra.mxu0 %vm66_vm0, %v914_v24  ;;  %6829 = vmatmul.mubr.msk.f32.gmra.mxu1 %vm66_vm0, %v914_v24  ;;  %v2626_v24 = vld [vmem:[%s14107_s4 + $0xa0] sm:$0xff] }
  0x54   :  { %1019 = vmatprep.mubr.f32.mxu0 %v14208_v62  ;;  %1125 = vmatprep.mubr.f32.mxu1 %v14208_v62 }
  0x55   :  { %1266 = vmatprep.subr.mxu0 %v8166_v8  ;;  %1367 = vmatprep.subr.mxu1 %v8173_v9  ;;  %v1197_v8 = vld [vmem:[%s14103_s0 + $0x38] sm:$0xf]  ;;  %v1614_v9 = vld [vmem:[%s14103_s0 + $0x22] sm:$0xff] }
  0x56   :  { %1267 = vmatpush1.msra.mxu0 %v8178_v10  ;;  %1368 = vmatpush1.msra.mxu1 %v8183_v11  ;;  %v1615_v10 = vld [vmem:[%s14103_s0 + $0x2a] sm:$0xff]  ;;  %v1616_v11 = vld [vmem:[%s14103_s0 + $0x32] sm:$0xff] }
  0x57   :  { %6818 = vmatmul.mubr.msk.f32.gmra.mxu0 %vm66_vm0, %v915_v0  ;;  %6830 = vmatmul.mubr.msk.f32.gmra.mxu1 %vm66_vm0, %v915_v0  ;;  %v6955_v0 = vld [vmem:[%s14107_s4 + $0x260] sm:$0xff] }
  0x58   :  { %1268 = vmatprep.subr.mxu0 %v8190_v12  ;;  %1369 = vmatprep.subr.mxu1 %v8195_v13  ;;  %v1617_v12 = vld [vmem:[%s14103_s0 + $0x3a] sm:$0xf]  ;;  %v14218_v13 = vld [vmem:[#allocation9_spill] sm:$0xff] }
  0x59   :  { %1269 = vmatpush1.msra.mxu0 %v8202_v14  ;;  %1302 = vmatprep.mubr.f32.mxu0 %v14208_v62  ;;  %v14219_v14 = vld [vmem:[#allocation10_spill] sm:$0xff] }
  0x5a   :  { %1370 = vmatpush1.msra.mxu1 %v8209_v15  ;;  %1403 = vmatprep.mubr.f32.mxu1 %v14208_v62  ;;  %v14220_v15 = vld [vmem:[#allocation11_spill] sm:$0xff] }
  0x5b   :  { %6839 = vmatmul.mubr.msk.f32.vlgmr.msra.gmra.mxu0 %vm66_vm0, %v1214_v1  ;;  %6843 = vmatmul.mubr.msk.f32.vlgmr.msra.gmra.mxu1 %vm66_vm0, %v1194_v2 }
  0x5c   :  { %1308 = vmatprep.mubr.f32.mxu0 %v14208_v62  ;;  %1409 = vmatprep.mubr.f32.mxu1 %v14208_v62 }
  0x5d   :  { %1460 = vmatprep.subr.mxu0 %v8228_v19  ;;  %1549 = vmatprep.subr.mxu1 %v8233_v20  ;;  %v14221_v19 = vld [vmem:[#allocation12_spill] sm:$0xff]  ;;  %v14222_v20 = vld [vmem:[#allocation13_spill] sm:$0xff] }
  0x5e   :  { %1461 = vmatpush1.msra.mxu0 %v8240_v21  ;;  %1550 = vmatpush1.msra.mxu1 %v8245_v22  ;;  %v14223_v21 = vld [vmem:[#allocation14_spill] sm:$0xff] }
  0x5f   :  { %6840 = vmatmul.mubr.msk.f32.gmra.mxu0 %vm66_vm0, %v1215_v3  ;;  %6844 = vmatmul.mubr.msk.f32.gmra.mxu1 %vm66_vm0, %v1195_v4  ;;  %v1840_v22 = vld [vmem:[%s14103_s0 + $0x23] sm:$0xff] }
  0x60   :  { %1314 = vmatprep.mubr.f32.mxu0 %v14208_v62  ;;  %1415 = vmatprep.mubr.f32.mxu1 %v14208_v62 }
  0x61   :  { %1462 = vmatprep.subr.mxu0 %v8264_v25  ;;  %1551 = vmatprep.subr.mxu1 %v8269_v26  ;;  %v14224_v25 = vld [vmem:[#allocation15_spill] sm:$0xff]  ;;  %v14225_v26 = vld [vmem:[#allocation16_spill] sm:$0xff] }
  0x62   :  { %1463 = vmatpush1.msra.mxu0 %v8276_v27  ;;  %1552 = vmatpush1.msra.mxu1 %v8281_v28  ;;  %v1841_v27 = vld [vmem:[%s14103_s0 + $0x2b] sm:$0xff]  ;;  %v14226_v28 = vld [vmem:[#allocation17_spill] sm:$0xff] }
  0x63   :  { %6841 = vmatmul.mubr.msk.f32.gmra.mxu0 %vm66_vm0, %v1216_v5  ;;  %6845 = vmatmul.mubr.msk.f32.gmra.mxu1 %vm66_vm0, %v1196_v6 }
  0x64   :  { %1320 = vmatprep.mubr.f32.mxu0 %v14208_v62  ;;  %1421 = vmatprep.mubr.f32.mxu1 %v14208_v62 }
  0x65   :  { %1464 = vmatprep.subr.mxu0 %v8298_v31  ;;  %1553 = vmatprep.subr.mxu1 %v8303_v32  ;;  %v14227_v31 = vld [vmem:[#allocation18_spill] sm:$0xff]  ;;  %v14228_v32 = vld [vmem:[#allocation19_spill] sm:$0xff] }
  0x66   :  { %1465 = vmatpush1.msra.mxu0 %v8310_v33  ;;  %1554 = vmatpush1.msra.mxu1 %v8315_v34  ;;  %v14229_v33 = vld [vmem:[#allocation20_spill] sm:$0xff] }
  0x67   :  { %6842 = vmatmul.mubr.msk.f32.gmra.mxu0 %vm66_vm0, %v1217_v7  ;;  %6846 = vmatmul.mubr.msk.f32.gmra.mxu1 %vm66_vm0, %v1197_v8  ;;  %v1842_v34 = vld [vmem:[%s14103_s0 + $0x33] sm:$0xff] }
  0x68   :  { %1466 = vmatprep.subr.mxu0 %v8332_v37  ;;  %1555 = vmatprep.subr.mxu1 %v8337_v38  ;;  %v14230_v37 = vld [vmem:[#allocation21_spill] sm:$0xff]  ;;  %v14231_v38 = vld [vmem:[#allocation22_spill] sm:$0xff] }
  0x69   :  { %1467 = vmatpush1.msra.mxu0 %v8344_v39  ;;  %1500 = vmatprep.mubr.f32.mxu0 %v14208_v62  ;;  %v14232_v39 = vld [vmem:[#allocation23_spill] sm:$0xff] }
  0x6a   :  { %1556 = vmatpush1.msra.mxu1 %v8349_v40  ;;  %1589 = vmatprep.mubr.f32.mxu1 %v14208_v62  ;;  %v14233_v40 = vld [vmem:[#allocation24_spill] sm:$0xff] }
  0x6b   :  { %6855 = vmatmul.mubr.msk.f32.vlgmr.msra.gmra.mxu0 %vm66_vm0, %v1214_v1  ;;  %6859 = vmatmul.mubr.msk.f32.vlgmr.msra.gmra.mxu1 %vm66_vm0, %v1194_v2  ;;  %v2625_v1 = vld [vmem:[%s14107_s4 + $0x98] sm:$0xff] }
  0x6c   :  { %1506 = vmatprep.mubr.f32.mxu0 %v14208_v62  ;;  %1595 = vmatprep.mubr.f32.mxu1 %v14208_v62  ;;  %v6954_v2 = vld [vmem:[%s14107_s4 + $0x258] sm:$0xff] }
  0x6d   :  { %1662 = vmatprep.subr.mxu0 %v8360_v41  ;;  %1767 = vmatprep.subr.mxu1 %v8365_v42  ;;  %v1843_v41 = vld [vmem:[%s14103_s0 + $0x3b] sm:$0xf]  ;;  %v14234_v42 = vld [vmem:[#allocation25_spill] sm:$0xff] }
  0x6e   :  { %1663 = vmatpush1.msra.mxu0 %v8372_v43  ;;  %1768 = vmatpush1.msra.mxu1 %v8377_v44  ;;  %v14235_v43 = vld [vmem:[#allocation26_spill] sm:$0xff]  ;;  %v14236_v44 = vld [vmem:[#allocation27_spill] sm:$0xff] }
  0x6f   :  { %6856 = vmatmul.mubr.msk.f32.gmra.mxu0 %vm66_vm0, %v1215_v3  ;;  %6860 = vmatmul.mubr.msk.f32.gmra.mxu1 %vm66_vm0, %v1195_v4  ;;  %v2624_v3 = vld [vmem:[%s14107_s4 + $0x90] sm:$0xff] }
  0x70   :  { %1512 = vmatprep.mubr.f32.mxu0 %v14208_v62  ;;  %1601 = vmatprep.mubr.f32.mxu1 %v14208_v62  ;;  %v6953_v4 = vld [vmem:[%s14107_s4 + $0x250] sm:$0xff] }
  0x71   :  { %1664 = vmatprep.subr.mxu0 %v8390_v45  ;;  %1769 = vmatprep.subr.mxu1 %v8395_v46  ;;  %v2066_v45 = vld [vmem:[%s14103_s0 + $0x24] sm:$0xff]  ;;  %v2637_v46 = vld [vmem:[%s14107_s4 + $0xf8] sm:$0xff] }
  0x72   :  { %1665 = vmatpush1.msra.mxu0 %v8402_v47  ;;  %1770 = vmatpush1.msra.mxu1 %v8407_v48  ;;  %v6966_v47 = vld [vmem:[%s14107_s4 + $0x2b8] sm:$0xff]  ;;  %v2636_v48 = vld [vmem:[%s14107_s4 + $0xf0] sm:$0xff] }
  0x73   :  { %6857 = vmatmul.mubr.msk.f32.gmra.mxu0 %vm66_vm0, %v1216_v5  ;;  %6861 = vmatmul.mubr.msk.f32.gmra.mxu1 %vm66_vm0, %v1196_v6  ;;  %v2623_v5 = vld [vmem:[%s14107_s4 + $0x88] sm:$0xff] }
  0x74   :  { %1518 = vmatprep.mubr.f32.mxu0 %v14208_v62  ;;  %1607 = vmatprep.mubr.f32.mxu1 %v14208_v62  ;;  %v6952_v6 = vld [vmem:[%s14107_s4 + $0x248] sm:$0xff] }
  0x75   :  { %1666 = vmatprep.subr.mxu0 %v8418_v49  ;;  %1771 = vmatprep.subr.mxu1 %v8423_v50  ;;  %v6965_v49 = vld [vmem:[%s14107_s4 + $0x2b0] sm:$0xff] }
  0x76   :  { %1667 = vmatpush1.msra.mxu0 %v8430_v51  ;;  %1772 = vmatpush1.msra.mxu1 %v8435_v52  ;;  %v2067_v50 = vld [vmem:[%s14103_s0 + $0x2c] sm:$0xff] }
  0x77   :  { %6858 = vmatmul.mubr.msk.f32.gmra.mxu0 %vm66_vm0, %v1217_v7  ;;  %6862 = vmatmul.mubr.msk.f32.gmra.mxu1 %vm66_vm0, %v1197_v8  ;;  %v2635_v51 = vld [vmem:[%s14107_s4 + $0xe8] sm:$0xff]  ;;  %v2622_v7 = vld [vmem:[%s14107_s4 + $0x80] sm:$0xff] }
  0x78   :  { %1668 = vmatprep.subr.mxu0 %v8446_v53  ;;  %1773 = vmatprep.subr.mxu1 %v8451_v54  ;;  %v6964_v52 = vld [vmem:[%s14107_s4 + $0x2a8] sm:$0xff]  ;;  %v2634_v53 = vld [vmem:[%s14107_s4 + $0xe0] sm:$0xff] }
  0x79   :  { %1669 = vmatpush1.msra.mxu0 %v8458_v55  ;;  %1702 = vmatprep.mubr.f32.mxu0 %v14208_v62  ;;  %v6963_v54 = vld [vmem:[%s14107_s4 + $0x2a0] sm:$0xff]  ;;  %v2068_v55 = vld [vmem:[%s14103_s0 + $0x34] sm:$0xff] }
  0x7a   :  { %1774 = vmatpush1.msra.mxu1 %v8463_v56  ;;  %1807 = vmatprep.mubr.f32.mxu1 %v14208_v62  ;;  %v2633_v56 = vld [vmem:[%s14107_s4 + $0xd8] sm:$0xff]  ;;  %v6951_v8 = vld [vmem:[%s14107_s4 + $0x240] sm:$0xff] }
  0x7b   :  { %6871 = vmatmul.mubr.msk.f32.vlgmr.msra.gmra.mxu0 %vm66_vm0, %v1614_v9  ;;  %6883 = vmatmul.mubr.msk.f32.vlgmr.msra.gmra.mxu1 %vm66_vm0, %v1614_v9  ;;  %v2621_v9 = vld [vmem:[%s14107_s4 + $0x78] sm:$0xff] }
  0x7c   :  { %1708 = vmatprep.mubr.f32.mxu0 %v14208_v62  ;;  %1813 = vmatprep.mubr.f32.mxu1 %v14208_v62 }
  0x7d   :  { %1888 = vmatprep.subr.mxu0 %v8477_v58  ;;  %1993 = vmatprep.subr.mxu1 %v8482_v59  ;;  %v6962_v58 = vld [vmem:[%s14107_s4 + $0x298] sm:$0xff]  ;;  %v2632_v59 = vld [vmem:[%s14107_s4 + $0xd0] sm:$0xff] }
  0x7e   :  { %1889 = vmatpush1.msra.mxu0 %v8489_v60  ;;  %1994 = vmatpush1.msra.mxu1 %v8494_v61  ;;  %v6961_v60 = vld [vmem:[%s14107_s4 + $0x290] sm:$0xff]  ;;  %v2069_v61 = vld [vmem:[%s14103_s0 + $0x3c] sm:$0xf] }
  0x7f   :  { %6872 = vmatmul.mubr.msk.f32.gmra.mxu0 %vm66_vm0, %v1615_v10  ;;  %6884 = vmatmul.mubr.msk.f32.gmra.mxu1 %vm66_vm0, %v1615_v10  ;;  %v6950_v10 = vld [vmem:[%s14107_s4 + $0x238] sm:$0xff] }
  0x80   :  { %1714 = vmatprep.mubr.f32.mxu0 %v14208_v62  ;;  %1819 = vmatprep.mubr.f32.mxu1 %v14208_v62 }
  0x81   :  { %1890 = vmatprep.subr.mxu0 %v8508_v63  ;;  %1995 = vmatprep.subr.mxu1 %v8513_v16  ;;  %v2631_v63 = vld [vmem:[%s14107_s4 + $0xc8] sm:$0xff] }
  0x82   :  { %1891 = vmatpush1.msra.mxu0 %v8520_v17  ;;  %1996 = vmatpush1.msra.mxu1 %v8525_v23  ;;  %v6960_v16 = vld [vmem:[%s14107_s4 + $0x288] sm:$0xff]  ;;  %v2630_v17 = vld [vmem:[%s14107_s4 + $0xc0] sm:$0xff] }
  0x83   :  { %6873 = vmatmul.mubr.msk.f32.gmra.mxu0 %vm66_vm0, %v1616_v11  ;;  %6885 = vmatmul.mubr.msk.f32.gmra.mxu1 %vm66_vm0, %v1616_v11  ;;  %v6959_v23 = vld [vmem:[%s14107_s4 + $0x280] sm:$0xff]  ;;  %v2620_v11 = vld [vmem:[%s14107_s4 + $0x70] sm:$0xff] }
  0x84   :  { %1720 = vmatprep.mubr.f32.mxu0 %v14208_v62  ;;  %1825 = vmatprep.mubr.f32.mxu1 %v14208_v62 }
  0x85   :  { %1892 = vmatprep.subr.mxu0 %v14218_v13  ;;  %1997 = vmatprep.subr.mxu1 %v14219_v14  ;;  %v2619_v13 = vld [vmem:[%s14107_s4 + $0x68] sm:$0xff] }
  0x86   :  { %1893 = vmatpush1.msra.mxu0 %v14220_v15  ;;  %1998 = vmatpush1.msra.mxu1 %v14221_v19  ;;  %v6948_v14 = vld [vmem:[%s14107_s4 + $0x228] sm:$0xff]  ;;  %v2618_v15 = vld [vmem:[%s14107_s4 + $0x60] sm:$0xff] }
  0x87   :  { %6874 = vmatmul.mubr.msk.f32.gmra.mxu0 %vm66_vm0, %v1617_v12  ;;  %6886 = vmatmul.mubr.msk.f32.gmra.mxu1 %vm66_vm0, %v1617_v12  ;;  %v6949_v12 = vld [vmem:[%s14107_s4 + $0x230] sm:$0xff]  ;;  %v6947_v19 = vld [vmem:[%s14107_s4 + $0x220] sm:$0xff] }
  0x88   :  { %1894 = vmatprep.subr.mxu0 %v14222_v20  ;;  %1999 = vmatprep.subr.mxu1 %v14223_v21  ;;  %v2617_v20 = vld [vmem:[%s14107_s4 + $0x58] sm:$0xff] }
  0x89   :  { %1895 = vmatpush1.msra.mxu0 %v14224_v25  ;;  %1928 = vmatprep.mubr.f32.mxu0 %v14208_v62  ;;  %v6946_v21 = vld [vmem:[%s14107_s4 + $0x218] sm:$0xff]  ;;  %v6945_v25 = vld [vmem:[%s14107_s4 + $0x210] sm:$0xff] }
  0x8a   :  { %2000 = vmatpush1.msra.mxu1 %v14225_v26  ;;  %2033 = vmatprep.mubr.f32.mxu1 %v14208_v62  ;;  %v2615_v26 = vld [vmem:[%s14107_s4 + $0x48] sm:$0xff] }
  0x8b   :  { %6895 = vmatmul.mubr.msk.f32.vlgmr.msra.gmra.mxu0 %vm66_vm0, %v1840_v22  ;;  %6907 = vmatmul.mubr.msk.f32.vlgmr.msra.gmra.mxu1 %vm66_vm0, %v1840_v22  ;;  %v2616_v22 = vld [vmem:[%s14107_s4 + $0x50] sm:$0xff] }
  0x8c   :  { %1934 = vmatprep.mubr.f32.mxu0 %v14208_v62  ;;  %2039 = vmatprep.mubr.f32.mxu1 %v14208_v62 }
  0x8d   :  { %2114 = vmatprep.subr.mxu0 %v14226_v28  ;;  %2219 = vmatprep.subr.mxu1 %v14227_v31  ;;  %v2614_v28 = vld [vmem:[%s14107_s4 + $0x40] sm:$0xff] }
  0x8e   :  { %2115 = vmatpush1.msra.mxu0 %v14228_v32  ;;  %2220 = vmatpush1.msra.mxu1 %v14229_v33  ;;  %v6943_v31 = vld [vmem:[%s14107_s4 + $0x200] sm:$0xff]  ;;  %v2613_v32 = vld [vmem:[%s14107_s4 + $0x38] sm:$0xff] }
  0x8f   :  { %6896 = vmatmul.mubr.msk.f32.gmra.mxu0 %vm66_vm0, %v1841_v27  ;;  %6908 = vmatmul.mubr.msk.f32.gmra.mxu1 %vm66_vm0, %v1841_v27  ;;  %v6944_v27 = vld [vmem:[%s14107_s4 + $0x208] sm:$0xff]  ;;  %v6942_v33 = vld [vmem:[%s14107_s4 + $0x1f8] sm:$0xff] }
  0x90   :  { %1940 = vmatprep.mubr.f32.mxu0 %v14208_v62  ;;  %2045 = vmatprep.mubr.f32.mxu1 %v14208_v62 }
  0x91   :  { %2116 = vmatprep.subr.mxu0 %v14230_v37  ;;  %2221 = vmatprep.subr.mxu1 %v14231_v38  ;;  %v6941_v37 = vld [vmem:[%s14107_s4 + $0x1f0] sm:$0xff]  ;;  %v2611_v38 = vld [vmem:[%s14107_s4 + $0x28] sm:$0xff] }
  0x92   :  { %2117 = vmatpush1.msra.mxu0 %v14232_v39  ;;  %2222 = vmatpush1.msra.mxu1 %v14233_v40  ;;  %v6940_v39 = vld [vmem:[%s14107_s4 + $0x1e8] sm:$0xff]  ;;  %v2610_v40 = vld [vmem:[%s14107_s4 + $0x20] sm:$0xff] }
  0x93   :  { %6897 = vmatmul.mubr.msk.f32.gmra.mxu0 %vm66_vm0, %v1842_v34  ;;  %6909 = vmatmul.mubr.msk.f32.gmra.mxu1 %vm66_vm0, %v1842_v34  ;;  %v2612_v34 = vld [vmem:[%s14107_s4 + $0x30] sm:$0xff] }
  0x94   :  { %1946 = vmatprep.mubr.f32.mxu0 %v14208_v62  ;;  %2051 = vmatprep.mubr.f32.mxu1 %v14208_v62 }
  0x95   :  { %2118 = vmatprep.subr.mxu0 %v8663_v30  ;;  %2223 = vmatprep.subr.mxu1 %v14234_v42  ;;  %v6958_v30 = vld [vmem:[%s14107_s4 + $0x278] sm:$0xff] }
  0x96   :  { %2119 = vmatpush1.msra.mxu0 %v14235_v43  ;;  %2224 = vmatpush1.msra.mxu1 %v14236_v44  ;;  %v2609_v42 = vld [vmem:[%s14107_s4 + $0x18] sm:$0xff]  ;;  %v2608_v44 = vld [vmem:[%s14107_s4 + $0x10] sm:$0xff] }
  0x97   :  { %6898 = vmatmul.mubr.msk.f32.gmra.mxu0 %vm66_vm0, %v1843_v41  ;;  %6910 = vmatmul.mubr.msk.f32.gmra.mxu1 %vm66_vm0, %v1843_v41  ;;  %v6939_v41 = vld [vmem:[%s14107_s4 + $0x1e0] sm:$0xff]  ;;  %v6938_v43 = vld [vmem:[%s14107_s4 + $0x1d8] sm:$0xff] }
  0x98   :  { %2120 = vmatprep.subr.mxu0 %v8694_v29  ;;  %2225 = vmatprep.subr.mxu1 %v8699_v57  ;;  %v2629_v29 = vld [vmem:[%s14107_s4 + $0xb8] sm:$0xff]  ;;  %v2627_v57 = vld [vmem:[%s14107_s4 + $0xa8] sm:$0xff] }
  0x99   :  { %2121 = vmatpush1.msra.mxu0 %v8706_v35  ;;  %2154 = vmatprep.mubr.f32.mxu0 %v14208_v62  ;;  %v2628_v35 = vld [vmem:[%s14107_s4 + $0xb0] sm:$0xff] }
  0x9a   :  { %2226 = vmatpush1.msra.mxu1 %v8711_v36  ;;  %2259 = vmatprep.mubr.f32.mxu1 %v14208_v62  ;;  %v6957_v36 = vld [vmem:[%s14107_s4 + $0x270] sm:$0xff] }
  0x9b   :  { %6919 = vmatmul.mubr.msk.f32.vlgmr.msra.gmra.mxu0 %vm66_vm0, %v2066_v45  ;;  %6931 = vmatmul.mubr.msk.f32.vlgmr.msra.gmra.mxu1 %vm66_vm0, %v2066_v45  ;;  %v6937_v45 = vld [vmem:[%s14107_s4 + $0x1d0] sm:$0xff] }
  0x9c   :  { %2160 = vmatprep.mubr.f32.mxu0 %v14208_v62  ;;  %2265 = vmatprep.mubr.f32.mxu1 %v14208_v62 }
  0x9d   :  { %2879 = vmatprep.subr.mxu1 %v2637_v46  ;;  %2796 = vmatprep.subr.mxu0 %v6966_v47  ;;  %v2607_v46 = vld [vmem:[%s14107_s4 + $0x8] sm:$0xff] }
  0x9e   :  { %2880 = vmatpush1.msra.mxu1 %v2636_v48  ;;  %2797 = vmatpush1.msra.mxu0 %v6965_v49  ;;  %v6936_v47 = vld [vmem:[%s14107_s4 + $0x1c8] sm:$0xff]  ;;  %v2606_v48 = vld [vmem:[%s14107_s4] sm:$0xff] }
  0x9f   :  { %6920 = vmatmul.mubr.msk.f32.gmra.mxu0 %vm66_vm0, %v2067_v50  ;;  %6932 = vmatmul.mubr.msk.f32.gmra.mxu1 %vm66_vm0, %v2067_v50  ;;  %v6935_v49 = vld [vmem:[%s14107_s4 + $0x1c0] sm:$0xff]  ;;  %v2661_v50 = vld [vmem:[%s14107_s4 + $0x1b8] sm:$0xff] }
  0xa0   :  { %2166 = vmatprep.mubr.f32.mxu0 %v14208_v62  ;;  %2271 = vmatprep.mubr.f32.mxu1 %v14208_v62 }
  0xa1   :  { %2881 = vmatprep.subr.mxu1 %v2635_v51  ;;  %2798 = vmatprep.subr.mxu0 %v6964_v52  ;;  %v6990_v51 = vld [vmem:[%s14107_s4 + $0x378] sm:$0xff]  ;;  %v2660_v52 = vld [vmem:[%s14107_s4 + $0x1b0] sm:$0xff] }
  0xa2   :  { %2882 = vmatpush1.msra.mxu1 %v2634_v53  ;;  %2799 = vmatpush1.msra.mxu0 %v6963_v54  ;;  %v6989_v53 = vld [vmem:[%s14107_s4 + $0x370] sm:$0xff]  ;;  %v2659_v54 = vld [vmem:[%s14107_s4 + $0x1a8] sm:$0xff] }
  0xa3   :  { %6921 = vmatmul.mubr.msk.f32.gmra.mxu0 %vm66_vm0, %v2068_v55  ;;  %6933 = vmatmul.mubr.msk.f32.gmra.mxu1 %vm66_vm0, %v2068_v55  ;;  %v6988_v55 = vld [vmem:[%s14107_s4 + $0x368] sm:$0xff] }
  0xa4   :  { %2172 = vmatprep.mubr.f32.mxu0 %v14208_v62  ;;  %2277 = vmatprep.mubr.f32.mxu1 %v14208_v62 }
  0xa5   :  { %2883 = vmatprep.subr.mxu1 %v2633_v56  ;;  %2800 = vmatprep.subr.mxu0 %v6962_v58  ;;  %v2658_v56 = vld [vmem:[%s14107_s4 + $0x1a0] sm:$0xff] }
  0xa6   :  { %2884 = vmatpush1.msra.mxu1 %v2632_v59  ;;  %2801 = vmatpush1.msra.mxu0 %v6961_v60  ;;  %v6987_v58 = vld [vmem:[%s14107_s4 + $0x360] sm:$0xff]  ;;  %v2657_v59 = vld [vmem:[%s14107_s4 + $0x198] sm:$0xff] }
  0xa7   :  { %6922 = vmatmul.mubr.msk.f32.gmra.mxu0 %vm66_vm0, %v2069_v61  ;;  %6934 = vmatmul.mubr.msk.f32.gmra.mxu1 %vm66_vm0, %v2069_v61  ;;  %v6986_v60 = vld [vmem:[%s14107_s4 + $0x358] sm:$0xff]  ;;  %v2656_v61 = vld [vmem:[%s14107_s4 + $0x190] sm:$0xff] }
  0xa8   :  { %2885 = vmatprep.subr.mxu1 %v2631_v63  ;;  %2802 = vmatprep.subr.mxu0 %v6960_v16  ;;  %v6985_v63 = vld [vmem:[%s14107_s4 + $0x350] sm:$0xff]  ;;  %v2655_v16 = vld [vmem:[%s14107_s4 + $0x188] sm:$0xff] }
  0xa9   :  { %2886 = vmatpush1.msra.mxu1 %v2630_v17  ;;  %2803 = vmatpush1.msra.mxu0 %v6959_v23  ;;  %v6984_v17 = vld [vmem:[%s14107_s4 + $0x348] sm:$0xff]  ;;  %v2654_v23 = vld [vmem:[%s14107_s4 + $0x180] sm:$0xff] }
  0xaa   :  { %2887 = vmatprep.subr.mxu1 %v2629_v29  ;;  %2804 = vmatprep.subr.mxu0 %v6958_v30  ;;  %v6983_v29 = vld [vmem:[%s14107_s4 + $0x340] sm:$0xff]  ;;  %v2653_v30 = vld [vmem:[%s14107_s4 + $0x178] sm:$0xff] }
  0xab   :  { %2888 = vmatpush1.msra.mxu1 %v2628_v35  ;;  %2805 = vmatpush1.msra.mxu0 %v6957_v36  ;;  %v6982_v35 = vld [vmem:[%s14107_s4 + $0x338] sm:$0xff]  ;;  %v2652_v36 = vld [vmem:[%s14107_s4 + $0x170] sm:$0xff] }
  0xac   :  { %2889 = vmatprep.subr.mxu1 %v2627_v57  ;;  %2806 = vmatprep.subr.mxu0 %v6956_v18  ;;  %v6981_v57 = vld [vmem:[%s14107_s4 + $0x330] sm:$0xff]  ;;  %v2651_v18 = vld [vmem:[%s14107_s4 + $0x168] sm:$0xff] }
  0xad   :  { %2890 = vmatpush1.msra.mxu1 %v2626_v24  ;;  %2807 = vmatpush1.msra.mxu0 %v6955_v0  ;;  %v6980_v24 = vld [vmem:[%s14107_s4 + $0x328] sm:$0xff]  ;;  %v2650_v0 = vld [vmem:[%s14107_s4 + $0x160] sm:$0xff] }
  0xae   :  { %2891 = vmatprep.subr.mxu1 %v2625_v1  ;;  %2808 = vmatprep.subr.mxu0 %v6954_v2  ;;  %v6979_v1 = vld [vmem:[%s14107_s4 + $0x320] sm:$0xff] }
  0xaf   :  { %2892 = vmatpush1.msra.mxu1 %v2624_v3  ;;  %2809 = vmatpush1.msra.mxu0 %v6953_v4  ;;  %v2649_v4 = vld [vmem:[%s14107_s4 + $0x158] sm:$0xff] }
  0xb0   :  { %2893 = vmatprep.subr.mxu1 %v2623_v5  ;;  %2810 = vmatprep.subr.mxu0 %v6952_v6  ;;  %v6978_v5 = vld [vmem:[%s14107_s4 + $0x318] sm:$0xff]  ;;  %v2648_v6 = vld [vmem:[%s14107_s4 + $0x150] sm:$0xff] }
  0xb1   :  { %2894 = vmatpush1.msra.mxu1 %v2622_v7  ;;  %2811 = vmatpush1.msra.mxu0 %v6951_v8  ;;  %v6977_v7 = vld [vmem:[%s14107_s4 + $0x310] sm:$0xff] }
  0xb2   :  { %2895 = vmatprep.subr.mxu1 %v2621_v9  ;;  %2812 = vmatprep.subr.mxu0 %v6950_v10  ;;  %v2647_v10 = vld [vmem:[%s14107_s4 + $0x148] sm:$0xff] }
  0xb3   :  { %2896 = vmatpush1.msra.mxu1 %v2620_v11  ;;  %2813 = vmatpush1.msra.mxu0 %v6949_v12  ;;  %v6976_v11 = vld [vmem:[%s14107_s4 + $0x308] sm:$0xff]  ;;  %v2646_v12 = vld [vmem:[%s14107_s4 + $0x140] sm:$0xff] }
  0xb4   :  { %2897 = vmatprep.subr.mxu1 %v2619_v13  ;;  %2814 = vmatprep.subr.mxu0 %v6948_v14  ;;  %v6975_v13 = vld [vmem:[%s14107_s4 + $0x300] sm:$0xff] }
  0xb5   :  { %2898 = vmatpush1.msra.mxu1 %v2618_v15  ;;  %2815 = vmatpush1.msra.mxu0 %v6947_v19  ;;  %v2645_v19 = vld [vmem:[%s14107_s4 + $0x138] sm:$0xff] }
  0xb6   :  { %2899 = vmatprep.subr.mxu1 %v2617_v20  ;;  %2816 = vmatprep.subr.mxu0 %v6946_v21  ;;  %v6974_v20 = vld [vmem:[%s14107_s4 + $0x2f8] sm:$0xff]  ;;  %v2644_v21 = vld [vmem:[%s14107_s4 + $0x130] sm:$0xff] }
  0xb7   :  { %2900 = vmatpush1.msra.mxu1 %v2616_v22  ;;  %2817 = vmatpush1.msra.mxu0 %v6945_v25  ;;  %v6973_v22 = vld [vmem:[%s14107_s4 + $0x2f0] sm:$0xff] }
  0xb8   :  { %2901 = vmatprep.subr.mxu1 %v2615_v26  ;;  %2818 = vmatprep.subr.mxu0 %v6944_v27  ;;  %v2643_v27 = vld [vmem:[%s14107_s4 + $0x128] sm:$0xff] }
  0xb9   :  { %2902 = vmatpush1.msra.mxu1 %v2614_v28  ;;  %2819 = vmatpush1.msra.mxu0 %v6943_v31  ;;  %v6972_v28 = vld [vmem:[%s14107_s4 + $0x2e8] sm:$0xff]  ;;  %v2642_v31 = vld [vmem:[%s14107_s4 + $0x120] sm:$0xff] }
  0xba   :  { %2903 = vmatprep.subr.mxu1 %v2613_v32  ;;  %2820 = vmatprep.subr.mxu0 %v6942_v33  ;;  %v6971_v32 = vld [vmem:[%s14107_s4 + $0x2e0] sm:$0xff] }
  0xbb   :  { %2904 = vmatpush1.msra.mxu1 %v2612_v34  ;;  %2821 = vmatpush1.msra.mxu0 %v6941_v37  ;;  %v2641_v37 = vld [vmem:[%s14107_s4 + $0x118] sm:$0xff] }
  0xbc   :  { %2905 = vmatprep.subr.mxu1 %v2611_v38  ;;  %2822 = vmatprep.subr.mxu0 %v6940_v39  ;;  %v6970_v38 = vld [vmem:[%s14107_s4 + $0x2d8] sm:$0xff]  ;;  %v2640_v39 = vld [vmem:[%s14107_s4 + $0x110] sm:$0xff] }
  0xbd   :  { %2906 = vmatpush1.msra.mxu1 %v2610_v40  ;;  %2823 = vmatpush1.msra.mxu0 %v6939_v41  ;;  %v6969_v40 = vld [vmem:[%s14107_s4 + $0x2d0] sm:$0xff] }
  0xbe   :  { %2907 = vmatprep.subr.mxu1 %v2609_v42  ;;  %2824 = vmatprep.subr.mxu0 %v6938_v43  ;;  %v2639_v43 = vld [vmem:[%s14107_s4 + $0x108] sm:$0xff] }
  0xbf   :  { %2908 = vmatpush1.msra.mxu1 %v2608_v44  ;;  %2825 = vmatpush1.msra.mxu0 %v6937_v45  ;;  %v6968_v44 = vld [vmem:[%s14107_s4 + $0x2c8] sm:$0xff]  ;;  %v2638_v45 = vld [vmem:[%s14107_s4 + $0x100] sm:$0xff] }
  0xc0   :  { %2909 = vmatprep.subr.mxu1 %v2607_v46  ;;  %2826 = vmatprep.subr.mxu0 %v6936_v47  ;;  %v6967_v46 = vld [vmem:[%s14107_s4 + $0x2c0] sm:$0xff] }
  0xc1   :  { %2910 = vmatpush1.msra.mxu1 %v2606_v48  ;;  %2827 = vmatpush1.msra.mxu0 %v6935_v49  ;;  %v2693_v49 = vld [vmem:[%s14108_s5 + $0xf8] sm:$0xff] }
  0xc2   :  { %2919 = vmatprep.subr.mxu1 %v2661_v50  ;;  %2836 = vmatprep.subr.mxu0 %v6990_v51  ;;  %v7026_v50 = vld [vmem:[%s14108_s5 + $0x2b8] sm:$0xff] }
  0xc3   :  { %2920 = vmatpush2.msra.mxu1 %v2660_v52  ;;  %2837 = vmatpush2.msra.mxu0 %v6989_v53 }
  0xc4   :  { %2921 = vmatprep.subr.mxu1 %v2659_v54  ;;  %2838 = vmatprep.subr.mxu0 %v6988_v55 }
  0xc5   :  { %2922 = vmatpush2.msra.mxu1 %v2658_v56  ;;  %2839 = vmatpush2.msra.mxu0 %v6987_v58 }
  0xc6   :  { %2923 = vmatprep.subr.mxu1 %v2657_v59  ;;  %2840 = vmatprep.subr.mxu0 %v6986_v60 }
  0xc7   :  { %2924 = vmatpush2.msra.mxu1 %v2656_v61  ;;  %2841 = vmatpush2.msra.mxu0 %v6985_v63 }
  0xc8   :  { %2925 = vmatprep.subr.mxu1 %v2655_v16  ;;  %2842 = vmatprep.subr.mxu0 %v6984_v17 }
  0xc9   :  { %2926 = vmatpush2.msra.mxu1 %v2654_v23  ;;  %2843 = vmatpush2.msra.mxu0 %v6983_v29 }
  0xca   :  { %2927 = vmatprep.subr.mxu1 %v2653_v30  ;;  %2844 = vmatprep.subr.mxu0 %v6982_v35  ;;  %v9231_v2 = vpop.f32.mrf.mxu0 }
  0xcb   :  { %v9233_v3 = vpop.f32.mrf.mxu1  ;;  %2928 = vmatpush2.msra.mxu1 %v2652_v36  ;;  %2845 = vmatpush2.msra.mxu0 %v6981_v57 }
  0xcc   :  { %2929 = vmatprep.subr.mxu1 %v2651_v18  ;;  %2846 = vmatprep.subr.mxu0 %v6980_v24  ;;  %v9247_v8 = vpop.f32.mrf.mxu0 }
  0xcd   :  { %v9249_v9 = vpop.f32.mrf.mxu1  ;;  %2930 = vmatpush2.msra.mxu1 %v2650_v0  ;;  %2847 = vmatpush2.msra.mxu0 %v6979_v1 }
  0xce   :  { %2931 = vmatprep.subr.mxu1 %v2649_v4  ;;  %2848 = vmatprep.subr.mxu0 %v6978_v5  ;;  %v9263_v14 = vpop.f32.mrf.mxu0 }
  0xcf   :  { %v9265_v15 = vpop.f32.mrf.mxu1  ;;  %2932 = vmatpush2.msra.mxu1 %v2648_v6  ;;  %2849 = vmatpush2.msra.mxu0 %v6977_v7 }
  0xd0   :  { %2933 = vmatprep.subr.mxu1 %v2647_v10  ;;  %2850 = vmatprep.subr.mxu0 %v6976_v11  ;;  %v9279_v25 = vpop.f32.mrf.mxu0 }
  0xd1   :  { %v9281_v26 = vpop.f32.mrf.mxu1  ;;  %2934 = vmatpush2.msra.mxu1 %v2646_v12  ;;  %2851 = vmatpush2.msra.mxu0 %v6975_v13 }
  0xd2   :  { %2935 = vmatprep.subr.mxu1 %v2645_v19  ;;  %2852 = vmatprep.subr.mxu0 %v6974_v20  ;;  %v9295_v33 = vpop.f32.mrf.mxu0  ;;  %v14134_v20 = vlaneseq }
  0xd3   :  { %v9297_v34 = vpop.f32.mrf.mxu1  ;;  %2936 = vmatpush2.msra.mxu1 %v2644_v21  ;;  %2853 = vmatpush2.msra.mxu0 %v6973_v22 }
  0xd4   :  { %2937 = vmatprep.subr.mxu1 %v2643_v27  ;;  %2854 = vmatprep.subr.mxu0 %v6972_v28  ;;  %v9311_v41 = vpop.f32.mrf.mxu0 }
  0xd5   :  { %v9313_v42 = vpop.f32.mrf.mxu1  ;;  %2938 = vmatpush2.msra.mxu1 %v2642_v31  ;;  %2855 = vmatpush2.msra.mxu0 %v6971_v32  ;;  %v1143_v31 = vshrl.u32 %v14134_v20, 7 }
  0xd6   :  { %2939 = vmatprep.subr.mxu1 %v2641_v37  ;;  %2856 = vmatprep.subr.mxu0 %v6970_v38  ;;  %v9327_v47 = vpop.f32.mrf.mxu0 }
  0xd7   :  { %v9329_v48 = vpop.f32.mrf.mxu1  ;;  %2940 = vmatpush2.msra.mxu1 %v2640_v39  ;;  %2857 = vmatpush2.msra.mxu0 %v6969_v40  ;;  %v9356_v40 = vsub.s32 0, %v1143_v31 }
  0xd8   :  { %2941 = vmatprep.subr.mxu1 %v2639_v43  ;;  %2858 = vmatprep.subr.mxu0 %v6968_v44  ;;  %v9337_v51 = vpop.f32.mrf.mxu0  ;;  %v9358_v43 = vsub.s32 1, %v1143_v31  ;;  %v247_v31 = vadd.f32 %v9233_v3, %v9231_v2  ;;  %v265_v2 = vadd.f32 %v9329_v48, %v9327_v47 }
  0xd9   :  { %v9339_v52 = vpop.f32.mrf.mxu1  ;;  %2942 = vmatpush2.msra.mxu1 %v2638_v45  ;;  %2859 = vmatpush2.msra.mxu0 %v6967_v46  ;;  %14239 = vst [vmem:[#allocation11_spill] sm:$0xff] %v9356_v40  ;;  %v1140_v46 = vld [vmem:[%s14106_s3] sm:$0x3] }
  0xda   :  { %3090 = vmatprep.subr.mxu1 %v2693_v49  ;;  %3013 = vmatprep.subr.mxu0 %v7026_v50  ;;  %v344_v53 = vpop.f32.mrf.mxu0  ;;  %14240 = vst [vmem:[#allocation12_spill] sm:$0xff] %v9358_v43  ;;  %v9370_v20 = vrot.slane %v1140_v46, %v9356_v40  ;;  %v9373_v62 = vrot.slane %v1140_v46, %v9358_v43 }
  0xdb   :  { %v433_v54 = vpop.f32.mrf.mxu1  ;;  %v259_v46 = vadd.f32 %v9297_v34, %v9295_v33  ;;  %v261_v43 = vadd.f32 %v9313_v42, %v9311_v41 }
  0xdc   :  { %v346_v55 = vpop.f32.mrf.mxu0  ;;  %14244 = vst [vmem:[#allocation16_spill] sm:$0xff] %v9373_v62  ;;  %v434_v3 = vadd.f32 %v433_v54, %v344_v53 }
  0xdd   :  { %v435_v56 = vpop.f32.mrf.mxu1 }
  0xde   :  { %v350_v58 = vpop.f32.mrf.mxu0 }
  0xdf   :  { %v439_v59 = vpop.f32.mrf.mxu1 }
  0xe0   :  { %v352_v60 = vpop.f32.mrf.mxu0 }
  0xe1   :  { %v441_v61 = vpop.f32.mrf.mxu1 }
  0xe2   :  { %v356_v63 = vpop.f32.mrf.mxu0 }
  0xe3   :  { %v445_v16 = vpop.f32.mrf.mxu1 }
  0xe4   :  { %v358_v17 = vpop.f32.mrf.mxu0  ;;  %v446_v40 = vadd.f32 %v445_v16, %v356_v63 }
  0xe5   :  { %v447_v23 = vpop.f32.mrf.mxu1 }
  0xe6   :  { %v362_v29 = vpop.f32.mrf.mxu0 }
  0xe7   :  { %v451_v30 = vpop.f32.mrf.mxu1 }
  0xe8   :  { %v364_v35 = vpop.f32.mrf.mxu0 }
  0xe9   :  { %v453_v36 = vpop.f32.mrf.mxu1 }
  0xea   :  { %v454_v41 = vadd.f32 %v453_v36, %v364_v35 }
  0xeb   :  { %v547_v57 = vpop.f32.mrf.mxu0  ;;  %v653_v18 = vpop.f32.mrf.mxu1 }
  0xec   :  { %v570_v33 = vadd.f32 %v547_v57, %v247_v31  ;;  %v676_v34 = vadd.f32 %v653_v18, %v434_v3 }
  0xed   :  { %v549_v24 = vpop.f32.mrf.mxu0  ;;  %v655_v0 = vpop.f32.mrf.mxu1 }
  0xef   :  { %v553_v1 = vpop.f32.mrf.mxu0  ;;  %v659_v4 = vpop.f32.mrf.mxu1 }
  0xf1   :  { %v555_v5 = vpop.f32.mrf.mxu0  ;;  %v661_v6 = vpop.f32.mrf.mxu1 }
  0xf3   :  { %v559_v7 = vpop.f32.mrf.mxu0  ;;  %v665_v10 = vpop.f32.mrf.mxu1 }
  0xf5   :  { %v9341_v11 = vpop.f32.mrf.mxu0  ;;  %v9343_v12 = vpop.f32.mrf.mxu1 }
  0xf7   :  { %v9345_v13 = vpop.f32.mrf.mxu0  ;;  %v9347_v19 = vpop.f32.mrf.mxu1 }
  0xf8   :  { %v576_v35 = vadd.f32 %v9345_v13, %v265_v2  ;;  %v14248_v13 = vld [vmem:[#allocation16_spill] sm:$0xff] }
  0xf9   :  { %v9349_v21 = vpop.f32.mrf.mxu0  ;;  %v9351_v22 = vpop.f32.mrf.mxu1 }
  0xfa   :  { %14237 = vst [vmem:[#allocation9_spill] sm:$0xff] %v9351_v22  ;;  %v249_v22 = vadd.f32 %v9249_v9, %v9247_v8  ;;  %v267_v8 = vadd.f32 %v9339_v52, %v9337_v51  ;;  %v436_v9 = vadd.f32 %v435_v56, %v346_v55 }
  0xfb   :  { %v775_v27 = vpop.f32.mrf.mxu0  ;;  %v881_v28 = vpop.f32.mrf.mxu1 }
  0xfc   :  { %v571_v42 = vadd.f32 %v549_v24, %v249_v22  ;;  %v677_v62 = vadd.f32 %v655_v0, %v436_v9  ;;  %v798_v53 = vadd.f32 %v775_v27, %v570_v33  ;;  %v904_v54 = vadd.f32 %v881_v28, %v676_v34 }
  0xfd   :  { %v777_v32 = vpop.f32.mrf.mxu0  ;;  %v883_v37 = vpop.f32.mrf.mxu1 }
  0xfe   :  { %v799_v63 = vadd.f32 %v777_v32, %v571_v42  ;;  %v905_v16 = vadd.f32 %v883_v37, %v677_v62  ;;  %v577_v62 = vadd.f32 %v9349_v21, %v267_v8 }
  0xff   :  { %v781_v38 = vpop.f32.mrf.mxu0  ;;  %v9354_v39 = vpop.f32.mrf.mxu1 }
 0x100   :  { %14238 = vst [vmem:[#allocation10_spill] sm:$0xff] %v9354_v39 }
 0x101   :  { %v783_v44 = vpop.f32.mrf.mxu0  ;;  %v9360_v45 = vpop.f32.mrf.mxu1 }
 0x102   :  { %14241 = vst [vmem:[#allocation13_spill] sm:$0xff] %v9360_v45  ;;  %v253_v45 = vadd.f32 %v9265_v15, %v9263_v14  ;;  %v440_v14 = vadd.f32 %v439_v59, %v350_v58  ;;  %v442_v15 = vadd.f32 %v441_v61, %v352_v60  ;;  %v574_v58 = vadd.f32 %v559_v7, %v259_v46 }
 0x103   :  { %v9365_v49 = vpop.f32.mrf.mxu0  ;;  %v9367_v50 = vpop.f32.mrf.mxu1  ;;  %v680_v59 = vadd.f32 %v665_v10, %v446_v40 }
 0x104   :  { %14242 = vst [vmem:[#allocation14_spill] sm:$0xff] %v9365_v49  ;;  %14243 = vst [vmem:[#allocation15_spill] sm:$0xff] %v9367_v50  ;;  %v255_v49 = vadd.f32 %v9281_v26, %v9279_v25  ;;  %v572_v51 = vadd.f32 %v553_v1, %v253_v45  ;;  %v678_v52 = vadd.f32 %v659_v4, %v440_v14 }
 0x105   :  { %v9383_v39 = vpop.f32.mrf.mxu0  ;;  %v9385_v50 = vpop.f32.mrf.mxu1  ;;  %v679_v56 = vadd.f32 %v661_v6, %v442_v15 }
 0x106   :  { %14245 = vst [vmem:[#allocation17_spill] sm:$0xff] %v9383_v39  ;;  %14246 = vst [vmem:[#allocation18_spill] sm:$0xff] %v9385_v50  ;;  %v448_v50 = vadd.f32 %v447_v23, %v358_v17  ;;  %v452_v39 = vadd.f32 %v451_v30, %v362_v29  ;;  %v573_v55 = vadd.f32 %v555_v5, %v255_v49 }
 0x107   :  { %v9395_v25 = vpop.f32.mrf.mxu0  ;;  %v9397_v26 = vpop.f32.mrf.mxu1  ;;  %v575_v29 = vadd.f32 %v9341_v11, %v261_v43  ;;  %v800_v36 = vadd.f32 %v781_v38, %v572_v51  ;;  %v14247_v6 = vld [vmem:[#allocation10_spill] sm:$0xff] }
 0x108   :  { %v681_v30 = vadd.f32 %v9343_v12, %v448_v50  ;;  %v682_v5 = vadd.f32 %v9347_v19, %v452_v39  ;;  %v906_v7 = vadd.f32 %v14247_v6, %v678_v52  ;;  %v801_v10 = vadd.f32 %v783_v44, %v573_v55 }
 0x109   :  { %v9399_v47 = vpop.f32.mrf.mxu0  ;;  %v9401_v48 = vpop.f32.mrf.mxu1  ;;  %v14249_v37 = vld [vmem:[#allocation13_spill] sm:$0xff] }
 0x10a   :  { %v907_v38 = vadd.f32 %v14249_v37, %v679_v56  ;;  %v804_v56 = vadd.f32 %v9395_v25, %v576_v35 }
 0x10b   :  { %v1003_v60 = vpop.f32.mrf.mxu0  ;;  %v1109_v61 = vpop.f32.mrf.mxu1  ;;  %v14250_v40 = vld [vmem:[#allocation14_spill] sm:$0xff]  ;;  %v14251_v45 = vld [vmem:[#allocation15_spill] sm:$0xff] }
 0x10c   :  { %v1026_v17 = vadd.f32 %v1003_v60, %v798_v53  ;;  %v1132_v23 = vadd.f32 %v1109_v61, %v904_v54  ;;  %v802_v43 = vadd.f32 %v14250_v40, %v574_v58  ;;  %v908_v49 = vadd.f32 %v14251_v45, %v680_v59  ;;  %v14254_v54 = vld [vmem:[#allocation9_spill] sm:$0xff] }
 0x10d   :  { %v1005_v57 = vpop.f32.mrf.mxu0  ;;  %v1111_v18 = vpop.f32.mrf.mxu1  ;;  %v14252_v2 = vld [vmem:[#allocation17_spill] sm:$0xff]  ;;  %v14253_v8 = vld [vmem:[#allocation18_spill] sm:$0xff]  ;;  %v683_v55 = vadd.f32 %v14254_v54, %v454_v41 }
 0x10e   :  { %v1152_v24 = vadd.f32 %v9370_v20, %v1026_v17  ;;  %v1160_v0 = vadd.f32 %v9370_v20, %v1132_v23  ;;  %v1027_v1 = vadd.f32 %v1005_v57, %v799_v63  ;;  %v1133_v4 = vadd.f32 %v1111_v18, %v905_v16 }
 0x10f   :  { %v1009_v11 = vpop.f32.mrf.mxu0  ;;  %v1115_v12 = vpop.f32.mrf.mxu1  ;;  %v803_v3 = vadd.f32 %v14252_v2, %v575_v29  ;;  %v909_v9 = vadd.f32 %v14253_v8, %v681_v30  ;;  %v910_v29 = vadd.f32 %v9397_v26, %v682_v5  ;;  %v805_v30 = vadd.f32 %v9399_v47, %v577_v62 }
 0x110   :  { %v1168_v22 = vmax.f32 %v1152_v24, %v1160_v0  ;;  %v1153_v27 = vadd.f32 %v14248_v13, %v1027_v1  ;;  %v1161_v28 = vadd.f32 %v14248_v13, %v1133_v4  ;;  %v1028_v32 = vadd.f32 %v1009_v11, %v800_v36 }
 0x111   :  { %v1134_v19 = vadd.f32 %v1115_v12, %v906_v7  ;;  %v1011_v39 = vpop.f32.mrf.mxu0  ;;  %v1117_v21 = vpop.f32.mrf.mxu1  ;;  %v911_v1 = vadd.f32 %v9401_v48, %v683_v55  ;;  %v14255_v48 = vlaneseq }
 0x112   :  { %v1176_v50 = vmax.f32 %v1168_v22, 0.0  ;;  %v1169_v31 = vmax.f32 %v1153_v27, %v1161_v28  ;;  %v1154_v44 = vadd.f32 %v9370_v20, %v1028_v32  ;;  %v1029_v46 = vadd.f32 %v1011_v39, %v801_v10 }
 0x113   :  { %v1162_v14 = vadd.f32 %v9370_v20, %v1134_v19  ;;  %v1135_v15 = vadd.f32 %v1117_v21, %v907_v38  ;;  %v1015_v33 = vpop.f32.mrf.mxu0  ;;  %v1121_v34 = vpop.f32.mrf.mxu1  ;;  %vm9440_vm2 = vcmp.lt.s32.totalorder %v14255_v48, 224  ;;  %v14256_v28 = vmov 0  ;;  %v7007_v48 = vld [vmem:[%s14108_s5 + $0x220] sm:$0xff] }
 0x114   :  { %1184 = vst [vmem:[#allocation2] sm:$0xff] %v1176_v50  ;;  %v1177_v42 = vmax.f32 %v1169_v31, 0.0  ;;  %v1155_v51 = vadd.f32 %v14248_v13, %v1029_v46  ;;  %v1030_v52 = vadd.f32 %v1015_v33, %v802_v43  ;;  %v1136_v53 = vadd.f32 %v1121_v34, %v908_v49 }
 0x115   :  { %v1170_v58 = vmax.f32 %v1154_v44, %v1162_v14  ;;  %v1163_v59 = vadd.f32 %v14248_v13, %v1135_v15  ;;  %v1017_v60 = vpop.f32.mrf.mxu0  ;;  %v1123_v61 = vpop.f32.mrf.mxu1  ;;  %v14257_v28 = vsel %vm9440_vm2, 4294967295, %v14256_v28 }
 0x116   :  { %1186 = vst.msk [vmem:[#allocation2 + $0x8] sm:$0xff] %vm1185_vm1, %v1177_v42  ;;  %v1156_v63 = vadd.f32 %v9370_v20, %v1030_v52  ;;  %v1164_v16 = vadd.f32 %v9370_v20, %v1136_v53  ;;  %v1031_v17 = vadd.f32 %v1017_v60, %v803_v3  ;;  %v1137_v23 = vadd.f32 %v1123_v61, %v909_v9 }
 0x117   :  { %v1178_v41 = vmax.f32 %v1170_v58, 0.0  ;;  %v1171_v36 = vmax.f32 %v1155_v51, %v1163_v59  ;;  %v1021_v25 = vpop.f32.mrf.mxu0  ;;  %v1127_v35 = vpop.f32.mrf.mxu1  ;;  %14258 = vst [vmem:[#allocation19_spill] sm:$0xff] %v14257_v28  ;;  %v2665_v28 = vld [vmem:[%s14108_s5 + $0x18] sm:$0xff] }
 0x118   :  { %v1172_v57 = vmax.f32 %v1156_v63, %v1164_v16  ;;  %v1157_v18 = vadd.f32 %v14248_v13, %v1031_v17  ;;  %v1165_v24 = vadd.f32 %v14248_v13, %v1137_v23  ;;  %v1032_v0 = vadd.f32 %v1021_v25, %v804_v56 }
 0x119   :  { %1187 = vst [vmem:[#allocation2 + $0x10] sm:$0xff] %v1178_v41  ;;  %v1179_v4 = vmax.f32 %v1171_v36, 0.0  ;;  %v1138_v6 = vadd.f32 %v1127_v35, %v910_v29  ;;  %v1023_v7 = vpop.f32.mrf.mxu0  ;;  %v1129_v10 = vpop.f32.mrf.mxu1 }
 0x11a   :  { %v1180_v26 = vmax.f32 %v1172_v57, 0.0  ;;  %v1173_v5 = vmax.f32 %v1157_v18, %v1165_v24  ;;  %v1158_v47 = vadd.f32 %v9370_v20, %v1032_v0  ;;  %v1033_v62 = vadd.f32 %v1023_v7, %v805_v30 }
 0x11b   :  { %1188 = vst.msk [vmem:[#allocation2 + $0x18] sm:$0xff] %vm1185_vm1, %v1179_v4  ;;  %v1166_v11 = vadd.f32 %v9370_v20, %v1138_v6  ;;  %v1139_v12 = vadd.f32 %v1129_v10, %v911_v1  ;;  %v9435_v22 = vpop.f32.mrf.mxu0  ;;  %v9437_v27 = vpop.f32.mrf.mxu1 }
 0x11c   :  { %1189 = vst [vmem:[#allocation2 + $0x20] sm:$0xff] %v1180_v26  ;;  %v1181_v32 = vmax.f32 %v1173_v5, 0.0  ;;  %v1159_v37 = vadd.f32 %v14248_v13, %v1033_v62 }
 0x11d   :  { %v1174_v38 = vmax.f32 %v1158_v47, %v1166_v11  ;;  %v1167_v40 = vadd.f32 %v14248_v13, %v1139_v12  ;;  %v2376_v43 = vld [vmem:[#allocation2] ss:$8 sm:$0x3]  ;;  %v2378_v45 = vld [vmem:[#allocation2 + $0x1] ss:$8 sm:$0x3]  ;;  %v9446_v20 = vpop.f32.mrf.mxu0  ;;  %v9448_v49 = vpop.f32.mrf.mxu1 }
 0x11e   :  { %1190 = vst.msk [vmem:[#allocation2 + $0x28] sm:$0xff] %vm1185_vm1, %v1181_v32  ;;  %v2379_v19 = vmax.f32 %v2376_v43, %v2378_v45  ;;  %v2387_v39 = vld [vmem:[#allocation2 + $0x2] ss:$8 sm:$0x3] }
 0x11f   :  { %v2389_v21 = vld [vmem:[#allocation2 + $0x3] ss:$8 sm:$0x3]  ;;  %v1182_v50 = vmax.f32 %v1174_v38, 0.0  ;;  %v1175_v31 = vmax.f32 %v1159_v37, %v1167_v40  ;;  %v9451_v2 = vpop.f32.mrf.mxu0  ;;  %v9453_v3 = vpop.f32.mrf.mxu1 }
 0x120   :  { %v2390_v44 = vmax.f32 %v2387_v39, %v2389_v21  ;;  %v2395_v46 = vld [vmem:[#allocation2 + $0x4] ss:$8 sm:$0x3]  ;;  %2384 = vst.msk [vmem:[#allocation3] ss:$8 sm:$0x3] %vm9440_vm2, %v2379_v19 }
 0x121   :  { %v2397_v13 = vld [vmem:[#allocation2 + $0x5] ss:$8 sm:$0x3]  ;;  %v2403_v8 = vld [vmem:[#allocation2 + $0x6] ss:$8 sm:$0x3]  ;;  %v9459_v33 = vpop.f32.mrf.mxu0  ;;  %v9461_v34 = vpop.f32.mrf.mxu1 }
 0x122   :  { %1191 = vst [vmem:[#allocation2 + $0x30] sm:$0xf] %v1182_v50  ;;  %v1183_v9 = vmax.f32 %v1175_v31, 0.0  ;;  %2392 = vst.msk [vmem:[#allocation3 + $0x1] ss:$8 sm:$0x3] %vm9440_vm2, %v2390_v44  ;;  %v2398_v14 = vmax.f32 %v2395_v46, %v2397_v13 }
 0x123   :  { %v2405_v15 = vld [vmem:[#allocation2 + $0x7] ss:$8 sm:$0x3]  ;;  %v2411_v51 = vld [vmem:[#allocation2 + $0x10] ss:$8 sm:$0x3]  ;;  %v9466_v56 = vpop.f32.mrf.mxu0  ;;  %v9468_v58 = vpop.f32.mrf.mxu1 }
 0x124   :  { %v2406_v42 = vmax.f32 %v2403_v8, %v2405_v15  ;;  %v2413_v52 = vld [vmem:[#allocation2 + $0x11] ss:$8 sm:$0x3]  ;;  %1193 = vst.msk [vmem:[#allocation2 + $0x38] sm:$0xf] %vm1192_vm3, %v1183_v9  ;;  %v2690_v15 = vld [vmem:[%s14108_s5 + $0xe0] sm:$0xff] }
 0x125   :  { %2400 = vst.msk [vmem:[#allocation3 + $0x2] ss:$8 sm:$0x3] %vm9440_vm2, %v2398_v14  ;;  %v2414_v53 = vmax.f32 %v2411_v51, %v2413_v52  ;;  %v2419_v54 = vld [vmem:[#allocation2 + $0x12] ss:$8 sm:$0x3]  ;;  %v9474_v23 = vpop.f32.mrf.mxu0  ;;  %v9476_v29 = vpop.f32.mrf.mxu1 }
 0x126   :  { %v2421_v55 = vld [vmem:[#allocation2 + $0x13] ss:$8 sm:$0x3]  ;;  %2408 = vst.msk [vmem:[#allocation3 + $0x3] ss:$8 sm:$0x3] %vm9440_vm2, %v2406_v42 }
 0x127   :  { %v2422_v59 = vmax.f32 %v2419_v54, %v2421_v55  ;;  %v2427_v60 = vld [vmem:[#allocation2 + $0x14] ss:$8 sm:$0x3]  ;;  %v2429_v61 = vld [vmem:[#allocation2 + $0x15] ss:$8 sm:$0x3]  ;;  %v9482_v18 = vpop.f32.mrf.mxu0  ;;  %v9484_v24 = vpop.f32.mrf.mxu1 }
 0x128   :  { %v2459_v63 = vld [vmem:[#allocation2 + $0x24] ss:$8 sm:$0x3]  ;;  %v2461_v16 = vld [vmem:[#allocation2 + $0x25] ss:$8 sm:$0x3]  ;;  %v2430_v17 = vmax.f32 %v2427_v60, %v2429_v61 }
 0x129   :  { %2416 = vst.msk [vmem:[#allocation3 + $0x4] ss:$8 sm:$0x3] %vm9440_vm2, %v2414_v53  ;;  %v2462_v30 = vmax.f32 %v2459_v63, %v2461_v16  ;;  %v2467_v41 = vld [vmem:[#allocation2 + $0x26] ss:$8 sm:$0x3]  ;;  %v1324_v26 = vpop.f32.mrf.mxu0  ;;  %v1425_v5 = vpop.f32.mrf.mxu1 }
 0x12a   :  { %v2469_v36 = vld [vmem:[#allocation2 + $0x27] ss:$8 sm:$0x3]  ;;  %2424 = vst.msk [vmem:[#allocation3 + $0x5] ss:$8 sm:$0x3] %vm9440_vm2, %v2422_v59  ;;  %v9492_v12 = vadd.f32 %v1425_v5, %v1324_v26 }
 0x12b   :  { %v2470_v25 = vmax.f32 %v2467_v41, %v2469_v36  ;;  %2432 = vst.msk [vmem:[#allocation3 + $0x6] ss:$8 sm:$0x3] %vm9440_vm2, %v2430_v17  ;;  %v2435_v35 = vld [vmem:[#allocation2 + $0x16] ss:$8 sm:$0x3]  ;;  %v9496_v40 = vpop.f32.mrf.mxu0  ;;  %v9498_v43 = vpop.f32.mrf.mxu1 }
 0x12c   :  { %v2437_v57 = vld [vmem:[#allocation2 + $0x17] ss:$8 sm:$0x3]  ;;  %2464 = vst.msk [vmem:[#allocation3 + $0x12] ss:$8 sm:$0x3] %vm9440_vm2, %v2462_v30 }
 0x12d   :  { %v2438_v0 = vmax.f32 %v2435_v35, %v2437_v57  ;;  %v2443_v1 = vld [vmem:[#allocation2 + $0x20] ss:$8 sm:$0x3]  ;;  %v2445_v4 = vld [vmem:[#allocation2 + $0x21] ss:$8 sm:$0x3]  ;;  %v9504_v19 = vpop.f32.mrf.mxu0  ;;  %v9506_v39 = vpop.f32.mrf.mxu1 }
 0x12e   :  { %2472 = vst.msk [vmem:[#allocation3 + $0x13] ss:$8 sm:$0x3] %vm9440_vm2, %v2470_v25  ;;  %v2446_v6 = vmax.f32 %v2443_v1, %v2445_v4  ;;  %v2451_v7 = vld [vmem:[#allocation2 + $0x22] ss:$8 sm:$0x3] }
 0x12f   :  { %v2453_v10 = vld [vmem:[#allocation2 + $0x23] ss:$8 sm:$0x3]  ;;  %v2475_v47 = vld [vmem:[#allocation2 + $0x30] ss:$8 sm:$0x3]  ;;  %v9510_v21 = vpop.f32.mrf.mxu0  ;;  %v9512_v50 = vpop.f32.mrf.mxu1 }
 0x130   :  { %v2477_v62 = vld [vmem:[#allocation2 + $0x31] ss:$8 sm:$0x3]  ;;  %2440 = vst.msk [vmem:[#allocation3 + $0x7] ss:$8 sm:$0x3] %vm9440_vm2, %v2438_v0  ;;  %v2454_v11 = vmax.f32 %v2451_v7, %v2453_v10 }
 0x131   :  { %v2478_v32 = vmax.f32 %v2475_v47, %v2477_v62  ;;  %v2483_v37 = vld [vmem:[#allocation2 + $0x32] ss:$8 sm:$0x3]  ;;  %v2485_v38 = vld [vmem:[#allocation2 + $0x33] ss:$8 sm:$0x3]  ;;  %v9519_v8 = vpop.f32.mrf.mxu0  ;;  %v9521_v9 = vpop.f32.mrf.mxu1 }
 0x132   :  { %2448 = vst.msk [vmem:[#allocation3 + $0x10] ss:$8 sm:$0x3] %vm9440_vm2, %v2446_v6  ;;  %v2486_v45 = vmax.f32 %v2483_v37, %v2485_v38  ;;  %2456 = vst.msk [vmem:[#allocation3 + $0x11] ss:$8 sm:$0x3] %vm9440_vm2, %v2454_v11 }
 0x133   :  { %2480 = vst.msk [vmem:[#allocation3 + $0x14] ss:$8 sm:$0x3] %vm9440_vm2, %v2478_v32  ;;  %v2692_v31 = vld [vmem:[%s14108_s5 + $0xf0] sm:$0xff]  ;;  %v2691_v14 = vld [vmem:[%s14108_s5 + $0xe8] sm:$0xff]  ;;  %v2689_v52 = vld [vmem:[%s14108_s5 + $0xd8] sm:$0xff]  ;;  %v9536_v54 = vpop.f32.mrf.mxu0  ;;  %v9538_v55 = vpop.f32.mrf.mxu1 }
 0x134   :  { %2488 = vst.msk [vmem:[#allocation3 + $0x15] ss:$8 sm:$0x3] %vm9440_vm2, %v2486_v45  ;;  %v2688_v16 = vld [vmem:[%s14108_s5 + $0xd0] sm:$0xff]  ;;  %v2687_v25 = vld [vmem:[%s14108_s5 + $0xc8] sm:$0xff]  ;;  %v2686_v57 = vld [vmem:[%s14108_s5 + $0xc0] sm:$0xff] }
 0x135   :  { %v9551_v41 = vpop.f32.mrf.mxu0  ;;  %v9553_v36 = vpop.f32.mrf.mxu1  ;;  %v7025_v6 = vld [vmem:[%s14108_s5 + $0x2b0] sm:$0xff]  ;;  %v2685_v7 = vld [vmem:[%s14108_s5 + $0xb8] sm:$0xff]  ;;  %v7024_v10 = vld [vmem:[%s14108_s5 + $0x2a8] sm:$0xff] }
 0x136   :  { %v2684_v47 = vld [vmem:[%s14108_s5 + $0xb0] sm:$0xff]  ;;  %v7023_v62 = vld [vmem:[%s14108_s5 + $0x2a0] sm:$0xff]  ;;  %v2683_v11 = vld [vmem:[%s14108_s5 + $0xa8] sm:$0xff] }
 0x137   :  { %v2603_v44 = vld [vmem:[#allocation3 + $0x8] sm:$0xff]  ;;  %v9517_v46 = vld [vmem:[#allocation3] sm:$0xff]  ;;  %v9568_v1 = vpop.f32.mrf.mxu0  ;;  %v9570_v4 = vpop.f32.mrf.mxu1  ;;  %v2682_v45 = vld [vmem:[%s14108_s5 + $0xa0] sm:$0xff] }
 0x138   :  { %14259 = vst [vmem:[#allocation20_spill] sm:$0xff] %v9517_v46  ;;  %v2719_v13 = vld [vmem:[#allocation3 + $0x8] sm:$0xfe]  ;;  %6993 = vmatprep.mubr.msk.f32.mxu1 %vm1185_vm1, %v2603_v44  ;;  %v2718_v42 = vld [vmem:[#allocation3] sm:$0xfe] }
 0x139   :  { %2944 = vmatmul.mubr.f32.vlgmr.msra.gmra.mxu1 %v9517_v46  ;;  %v9531_v51 = vld [vmem:[#allocation3 + $0x18] sm:$0x3]  ;;  %v9542_v59 = vld [vmem:[#allocation3 + $0x10] sm:$0x3]  ;;  %v2787_v60 = vrot.slane %v2719_v13, 1  ;;  %v2784_v17 = vrot.slane %v2718_v42, 1  ;;  %v9583_v26 = vpop.f32.mrf.mxu0  ;;  %v9585_v5 = vpop.f32.mrf.mxu1  ;;  %v1408_v46 = vadd.f32 %v9448_v49, %v9446_v20  ;;  %v1592_v20 = vadd.f32 %v9498_v43, %v9496_v40 }
 0x13a   :  { %14260 = vst [vmem:[#allocation21_spill] sm:$0xff] %v9531_v51  ;;  %v2721_v53 = vld [vmem:[#allocation3 + $0x18] sm:$0x7]  ;;  %3091 = vmatpush1.msra.mxu1 %v2692_v31  ;;  %6994 = vmatprep.mubr.msk.f32.mxu1 %vm1185_vm1, %v9531_v51  ;;  %14261 = vst [vmem:[#allocation22_spill] sm:$0xff] %v9542_v59  ;;  %v2720_v63 = vld [vmem:[#allocation3 + $0x10] sm:$0x7]  ;;  %v1406_v51 = vadd.f32 %v9437_v27, %v9435_v22  ;;  %v1412_v22 = vadd.f32 %v9453_v3, %v9451_v2 }
 0x13b   :  { %v9544_v61 = vrot.slane %v2721_v53, 1  ;;  %3092 = vmatprep.subr.mxu1 %v2691_v14  ;;  %v9549_v30 = vrot.slane %v2720_v63, 1  ;;  %v7022_v32 = vld [vmem:[%s14108_s5 + $0x298] sm:$0xff]  ;;  %v9600_v37 = vpop.f32.mrf.mxu0  ;;  %v9602_v38 = vpop.f32.mrf.mxu1  ;;  %v7021_v31 = vld [vmem:[%s14108_s5 + $0x290] sm:$0xff]  ;;  %v2679_v63 = vld [vmem:[%s14108_s5 + $0x88] sm:$0xff]  ;;  %v1414_v27 = vadd.f32 %v9461_v34, %v9459_v33  ;;  %v1420_v2 = vadd.f32 %v9476_v29, %v9474_v23 }
 0x13c   :  { %3093 = vmatpush1.msra.mxu1 %v2690_v15  ;;  %v7020_v15 = vld [vmem:[%s14108_s5 + $0x288] sm:$0xff]  ;;  %v2680_v42 = vld [vmem:[%s14108_s5 + $0x90] sm:$0xff]  ;;  %v1594_v3 = vadd.f32 %v9506_v39, %v9504_v19  ;;  %v2662_v33 = vld [vmem:[%s14108_s5] sm:$0xff]  ;;  %v1606_v39 = vadd.f32 %v9553_v36, %v9551_v41  ;;  %v1832_v41 = vadd.f32 %v9602_v38, %v1592_v20 }
 0x13d   :  { %14262 = vst [vmem:[#allocation23_spill] sm:$0xff] %v9544_v61  ;;  %14263 = vst [vmem:[#allocation24_spill] sm:$0xff] %v9549_v30  ;;  %v2789_v35 = vsel %vm2783_vm4, %v2787_v60, %v9544_v61  ;;  %3094 = vmatprep.subr.mxu1 %v2689_v52  ;;  %2950 = vmatmul.mubr.f32.gmra.mxu1 %v9542_v59  ;;  %v9566_v0 = vsel %vm2783_vm4, %v2784_v17, %v9549_v30  ;;  %v9615_v13 = vpop.f32.mrf.mxu0  ;;  %v9617_v14 = vpop.f32.mrf.mxu1  ;;  %v7019_v52 = vld [vmem:[%s14108_s5 + $0x280] sm:$0xff]  ;;  %v2663_v49 = vld [vmem:[%s14108_s5 + $0x8] sm:$0xff] }
 0x13e   :  { %14264 = vst [vmem:[#allocation25_spill] sm:$0xff] %v9566_v0  ;;  %3095 = vmatpush1.msra.mxu1 %v2688_v16  ;;  %7053 = vmatprep.mubr.msk.f32.mxu1 %vm1185_vm1, %v2603_v44  ;;  %v2681_v44 = vld [vmem:[%s14108_s5 + $0x98] sm:$0xff]  ;;  %v2678_v17 = vld [vmem:[%s14108_s5 + $0x80] sm:$0xff]  ;;  %v7001_v34 = vld [vmem:[%s14108_s5 + $0x1f0] sm:$0xff] }
 0x13f   :  { %3096 = vmatprep.subr.mxu1 %v2687_v25  ;;  %6991 = vmatprep.mubr.msk.f32.mxu0 %vm1185_vm1, %v2789_v35  ;;  %v9629_v53 = vpop.f32.mrf.mxu0  ;;  %v9631_v60 = vpop.f32.mrf.mxu1  ;;  %v7018_v16 = vld [vmem:[%s14108_s5 + $0x278] sm:$0xff]  ;;  %v7017_v25 = vld [vmem:[%s14108_s5 + $0x270] sm:$0xff]  ;;  %v7000_v29 = vld [vmem:[%s14108_s5 + $0x1e8] sm:$0xff] }
 0x140   :  { %3097 = vmatpush1.msra.mxu1 %v2686_v57  ;;  %2861 = vmatmul.mubr.f32.vlgmr.msra.gmra.mxu0 %v9566_v0  ;;  %v7005_v0 = vld [vmem:[%s14108_s5 + $0x210] sm:$0xff]  ;;  %v2717_v23 = vld [vmem:[%s14108_s5 + $0x1b8] sm:$0xff]  ;;  %v6999_v19 = vld [vmem:[%s14108_s5 + $0x1e0] sm:$0xff] }
 0x141   :  { %3014 = vmatpush1.msra.mxu0 %v7025_v6  ;;  %3098 = vmatprep.subr.mxu1 %v2685_v7  ;;  %v9646_v57 = vpop.f32.mrf.mxu0  ;;  %v9648_v6 = vpop.f32.mrf.mxu1  ;;  %v2677_v7 = vld [vmem:[%s14108_s5 + $0x78] sm:$0xff]  ;;  %v2714_v36 = vld [vmem:[%s14108_s5 + $0x1a0] sm:$0xff]  ;;  %v6996_v38 = vld [vmem:[%s14108_s5 + $0x1c8] sm:$0xff] }
 0x142   :  { %6992 = vmatprep.mubr.msk.f32.mxu0 %vm1185_vm1, %v9544_v61  ;;  %3015 = vmatprep.subr.mxu0 %v7024_v10  ;;  %v2676_v10 = vld [vmem:[%s14108_s5 + $0x70] sm:$0xff]  ;;  %v2666_v61 = vld [vmem:[%s14108_s5 + $0x20] sm:$0xff] }
 0x143   :  { %3099 = vmatpush1.msra.mxu1 %v2684_v47  ;;  %3016 = vmatpush1.msra.mxu0 %v7023_v62  ;;  %v7015_v47 = vld [vmem:[%s14108_s5 + $0x260] sm:$0xff]  ;;  %v9662_v62 = vpop.f32.mrf.mxu0  ;;  %v7049_v20 = vld [vmem:[%s14108_s5 + $0x370] sm:$0xff] }
 0x144   :  { %3100 = vmatprep.subr.mxu1 %v2683_v11  ;;  %3017 = vmatprep.subr.mxu0 %v7022_v32  ;;  %v9664_v11 = vpop.f32.mrf.mxu1  ;;  %v2675_v32 = vld [vmem:[%s14108_s5 + $0x68] sm:$0xff] }
 0x145   :  { %3101 = vmatpush1.msra.mxu1 %v2682_v45  ;;  %2867 = vmatmul.mubr.f32.gmra.mxu0 %v9549_v30  ;;  %v7014_v45 = vld [vmem:[%s14108_s5 + $0x258] sm:$0xff]  ;;  %v2292_v30 = vld [vmem:[%s14106_s3] sm:$0x3] }
 0x146   :  { %3018 = vmatpush1.msra.mxu0 %v7021_v31  ;;  %3102 = vmatprep.subr.mxu1 %v2681_v44  ;;  %v2674_v31 = vld [vmem:[%s14108_s5 + $0x60] sm:$0xff]  ;;  %v7013_v44 = vld [vmem:[%s14108_s5 + $0x250] sm:$0xff] }
 0x147   :  { %3019 = vmatprep.subr.mxu0 %v7020_v15  ;;  %7051 = vmatprep.mubr.msk.f32.mxu0 %vm1185_vm1, %v2789_v35  ;;  %v7016_v35 = vld [vmem:[%s14108_s5 + $0x268] sm:$0xff]  ;;  %v9678_v15 = vpop.f32.mrf.mxu0 }
 0x148   :  { %3103 = vmatpush1.msra.mxu1 %v2680_v42  ;;  %3020 = vmatpush1.msra.mxu0 %v7019_v52  ;;  %v9680_v42 = vpop.f32.mrf.mxu1  ;;  %v2673_v52 = vld [vmem:[%s14108_s5 + $0x58] sm:$0xff] }
 0x149   :  { %3104 = vmatprep.subr.mxu1 %v2679_v63  ;;  %3021 = vmatprep.subr.mxu0 %v7018_v16  ;;  %v7012_v63 = vld [vmem:[%s14108_s5 + $0x248] sm:$0xff]  ;;  %v2672_v16 = vld [vmem:[%s14108_s5 + $0x50] sm:$0xff] }
 0x14a   :  { %3105 = vmatpush1.msra.mxu1 %v2678_v17  ;;  %3022 = vmatpush1.msra.mxu0 %v7017_v25  ;;  %v7011_v17 = vld [vmem:[%s14108_s5 + $0x240] sm:$0xff]  ;;  %v9694_v25 = vpop.f32.mrf.mxu0 }
 0x14b   :  { %3106 = vmatprep.subr.mxu1 %v2677_v7  ;;  %3023 = vmatprep.subr.mxu0 %v7016_v35  ;;  %v9696_v7 = vpop.f32.mrf.mxu1  ;;  %v2671_v35 = vld [vmem:[%s14108_s5 + $0x48] sm:$0xff] }
 0x14c   :  { %3107 = vmatpush1.msra.mxu1 %v2676_v10  ;;  %3024 = vmatpush1.msra.mxu0 %v7015_v47  ;;  %v7010_v10 = vld [vmem:[%s14108_s5 + $0x238] sm:$0xff]  ;;  %v2670_v47 = vld [vmem:[%s14108_s5 + $0x40] sm:$0xff] }
 0x14d   :  { %3108 = vmatprep.subr.mxu1 %v2675_v32  ;;  %3025 = vmatprep.subr.mxu0 %v7014_v45  ;;  %v7009_v32 = vld [vmem:[%s14108_s5 + $0x230] sm:$0xff]  ;;  %v9710_v45 = vpop.f32.mrf.mxu0 }
 0x14e   :  { %3109 = vmatpush1.msra.mxu1 %v2674_v31  ;;  %3026 = vmatpush1.msra.mxu0 %v7013_v44  ;;  %v9712_v31 = vpop.f32.mrf.mxu1  ;;  %v2669_v44 = vld [vmem:[%s14108_s5 + $0x38] sm:$0xff] }
 0x14f   :  { %3110 = vmatprep.subr.mxu1 %v2673_v52  ;;  %3027 = vmatprep.subr.mxu0 %v7012_v63  ;;  %v7008_v52 = vld [vmem:[%s14108_s5 + $0x228] sm:$0xff]  ;;  %v2668_v63 = vld [vmem:[%s14108_s5 + $0x30] sm:$0xff] }
 0x150   :  { %3111 = vmatpush1.msra.mxu1 %v2672_v16  ;;  %3028 = vmatpush1.msra.mxu0 %v7011_v17  ;;  %v9726_v16 = vpop.f32.mrf.mxu0  ;;  %v9728_v17 = vpop.f32.mrf.mxu1 }
 0x151   :  { %3112 = vmatprep.subr.mxu1 %v2671_v35  ;;  %3029 = vmatprep.subr.mxu0 %v7010_v10  ;;  %v2667_v35 = vld [vmem:[%s14108_s5 + $0x28] sm:$0xff]  ;;  %v7006_v10 = vld [vmem:[%s14108_s5 + $0x218] sm:$0xff] }
 0x152   :  { %3113 = vmatpush1.msra.mxu1 %v2670_v47  ;;  %3030 = vmatpush1.msra.mxu0 %v7009_v32  ;;  %v9745_v47 = vpop.f32.mrf.mxu0  ;;  %v9747_v32 = vpop.f32.mrf.mxu1 }
 0x153   :  { %3114 = vmatprep.subr.mxu1 %v2669_v44  ;;  %3031 = vmatprep.subr.mxu0 %v7008_v52  ;;  %14265 = vst [vmem:[#allocation26_spill] sm:$0xff] %v9745_v47  ;;  %14266 = vst [vmem:[#allocation27_spill] sm:$0xff] %v9747_v32  ;;  %v7004_v44 = vld [vmem:[%s14108_s5 + $0x208] sm:$0xff]  ;;  %v14267_v52 = vld [vmem:[#allocation11_spill] sm:$0xff] }
 0x154   :  { %3115 = vmatpush1.msra.mxu1 %v2668_v63  ;;  %3032 = vmatpush1.msra.mxu0 %v7007_v48  ;;  %v9756_v59 = vrot.slane %v2292_v30, %v14267_v52  ;;  %v2664_v48 = vld [vmem:[%s14108_s5 + $0x10] sm:$0xff]  ;;  %v7003_v63 = vld [vmem:[%s14108_s5 + $0x200] sm:$0xff]  ;;  %v9768_v32 = vpop.f32.mrf.mxu0  ;;  %v9770_v52 = vpop.f32.mrf.mxu1 }
 0x155   :  { %3116 = vmatprep.subr.mxu1 %v2667_v35  ;;  %3033 = vmatprep.subr.mxu0 %v7006_v10  ;;  %v1418_v35 = vadd.f32 %v9468_v58, %v9466_v56  ;;  %v1424_v56 = vadd.f32 %v9484_v24, %v9482_v18  ;;  %v1598_v58 = vadd.f32 %v9512_v50, %v9510_v21  ;;  %v2716_v24 = vld [vmem:[%s14108_s5 + $0x1b0] sm:$0xff]  ;;  %v6995_v10 = vld [vmem:[%s14108_s5 + $0x1c0] sm:$0xff] }
 0x156   :  { %14268 = vst [vmem:[#allocation10_spill] sm:$0xff] %v9756_v59  ;;  %v14269_v59 = vld [vmem:[#allocation12_spill] sm:$0xff]  ;;  %3117 = vmatpush1.msra.mxu1 %v2666_v61  ;;  %3034 = vmatpush1.msra.mxu0 %v7005_v0  ;;  %v9799_v40 = vpop.f32.mrf.mxu0  ;;  %v9801_v43 = vpop.f32.mrf.mxu1  ;;  %v1604_v18 = vadd.f32 %v9538_v55, %v9536_v54  ;;  %v1610_v21 = vadd.f32 %v9570_v4, %v9568_v1  ;;  %v6997_v0 = vld [vmem:[%s14108_s5 + $0x1d0] sm:$0xff] }
 0x157   :  { %v9773_v47 = vrot.slane %v2292_v30, %v14269_v59  ;;  %v7002_v30 = vld [vmem:[%s14108_s5 + $0x1f8] sm:$0xff]  ;;  %3118 = vmatprep.subr.mxu1 %v2665_v28  ;;  %3035 = vmatprep.subr.mxu0 %v7004_v44  ;;  %v1600_v28 = vadd.f32 %v9521_v9, %v9519_v8  ;;  %v2715_v9 = vld [vmem:[%s14108_s5 + $0x1a8] sm:$0xff]  ;;  %v1612_v55 = vadd.f32 %v9585_v5, %v9583_v26 }
 0x158   :  { %3119 = vmatpush1.msra.mxu1 %v2664_v48  ;;  %3036 = vmatpush1.msra.mxu0 %v7003_v63  ;;  %v9827_v50 = vpop.f32.mrf.mxu0  ;;  %v9829_v8 = vpop.f32.mrf.mxu1  ;;  %v6998_v54 = vld [vmem:[%s14108_s5 + $0x1d8] sm:$0xff]  ;;  %v1727_v61 = vadd.f32 %v9600_v37, %v1406_v51  ;;  %v1728_v1 = vadd.f32 %v9615_v13, %v1408_v46  ;;  %v1833_v4 = vadd.f32 %v9617_v14, %v1594_v3 }
 0x159   :  { %3120 = vmatprep.subr.mxu1 %v2663_v49  ;;  %3037 = vmatprep.subr.mxu0 %v7002_v30  ;;  %v1729_v26 = vadd.f32 %v9629_v53, %v1412_v22  ;;  %v2713_v37 = vld [vmem:[%s14108_s5 + $0x198] sm:$0xff]  ;;  %v1834_v46 = vadd.f32 %v9631_v60, %v1598_v58  ;;  %v1730_v13 = vadd.f32 %v9646_v57, %v1414_v27  ;;  %v2712_v53 = vld [vmem:[%s14108_s5 + $0x190] sm:$0xff] }
 0x15a   :  { %3121 = vmatpush1.msra.mxu1 %v2662_v33  ;;  %3038 = vmatpush1.msra.mxu0 %v7001_v34  ;;  %v9850_v5 = vpop.f32.mrf.mxu0  ;;  %v9852_v51 = vpop.f32.mrf.mxu1  ;;  %v1835_v14 = vadd.f32 %v9648_v6, %v1600_v28  ;;  %v1731_v44 = vadd.f32 %v9662_v62, %v1418_v35  ;;  %v1836_v48 = vadd.f32 %v9664_v11, %v1604_v18  ;;  %v2711_v6 = vld [vmem:[%s14108_s5 + $0x188] sm:$0xff]  ;;  %v7050_v22 = vld [vmem:[%s14108_s5 + $0x378] sm:$0xff]  ;;  %v2708_v33 = vld [vmem:[%s14108_s5 + $0x170] sm:$0xff] }
 0x15b   :  { %3130 = vmatprep.subr.mxu1 %v2717_v23  ;;  %3039 = vmatprep.subr.mxu0 %v7000_v29  ;;  %v1732_v60 = vadd.f32 %v9678_v15, %v1420_v2  ;;  %v1837_v27 = vadd.f32 %v9680_v42, %v1606_v39  ;;  %v1953_v62 = vadd.f32 %v9726_v16, %v1727_v61  ;;  %v2710_v15 = vld [vmem:[%s14108_s5 + $0x180] sm:$0xff]  ;;  %v2709_v35 = vld [vmem:[%s14108_s5 + $0x178] sm:$0xff]  ;;  %v14270_v2 = vld [vmem:[#allocation26_spill] sm:$0xff] }
 0x15c   :  { %3131 = vmatpush2.msra.mxu1 %v2716_v24  ;;  %3040 = vmatpush1.msra.mxu0 %v6999_v19  ;;  %v1948_v63 = vpop.f32.mrf.mxu0  ;;  %v9872_v57 = vpop.f32.mrf.mxu1  ;;  %v2058_v11 = vadd.f32 %v9728_v17, %v1832_v41  ;;  %v1733_v49 = vadd.f32 %v9694_v25, %v1424_v56  ;;  %v9891_v30 = vadd.f32 %v9696_v7, %v1610_v21  ;;  %v7048_v25 = vld [vmem:[%s14108_s5 + $0x368] sm:$0xff]  ;;  %v7047_v34 = vld [vmem:[%s14108_s5 + $0x360] sm:$0xff]  ;;  %v7046_v18 = vld [vmem:[%s14108_s5 + $0x358] sm:$0xff] }
 0x15d   :  { %3132 = vmatprep.subr.mxu1 %v2715_v9  ;;  %3041 = vmatprep.subr.mxu0 %v6998_v54  ;;  %v9895_v42 = vadd.f32 %v9710_v45, %v9492_v12  ;;  %v9908_v7 = vadd.f32 %v9712_v31, %v1612_v55  ;;  %v1954_v12 = vadd.f32 %v14270_v2, %v1728_v1  ;;  %v14271_v45 = vld [vmem:[#allocation27_spill] sm:$0xff]  ;;  %v2707_v29 = vld [vmem:[%s14108_s5 + $0x168] sm:$0xff]  ;;  %v7043_v1 = vld [vmem:[%s14108_s5 + $0x340] sm:$0xff] }
 0x15e   :  { %3133 = vmatpush2.msra.mxu1 %v2714_v36  ;;  %3042 = vmatpush1.msra.mxu0 %v6997_v0  ;;  %v9897_v16 = vpop.f32.mrf.mxu0  ;;  %v9899_v17 = vpop.f32.mrf.mxu1  ;;  %v2059_v3 = vadd.f32 %v14271_v45, %v1833_v4  ;;  %v1955_v56 = vadd.f32 %v9768_v32, %v1729_v26  ;;  %v2060_v58 = vadd.f32 %v9770_v52, %v1834_v46  ;;  %v2706_v52 = vld [vmem:[%s14108_s5 + $0x160] sm:$0xff]  ;;  %v2705_v55 = vld [vmem:[%s14108_s5 + $0x158] sm:$0xff]  ;;  %v7044_v61 = vld [vmem:[%s14108_s5 + $0x348] sm:$0xff] }
 0x15f   :  { %3134 = vmatprep.subr.mxu1 %v2713_v37  ;;  %3043 = vmatprep.subr.mxu0 %v6996_v38  ;;  %v1956_v31 = vadd.f32 %v9799_v40, %v1730_v13  ;;  %v2061_v24 = vadd.f32 %v9801_v43, %v1835_v14  ;;  %v7045_v40 = vld [vmem:[%s14108_s5 + $0x350] sm:$0xff]  ;;  %v1957_v39 = vadd.f32 %v9827_v50, %v1731_v44  ;;  %v2703_v46 = vld [vmem:[%s14108_s5 + $0x148] sm:$0xff]  ;;  %v7042_v13 = vld [vmem:[%s14108_s5 + $0x338] sm:$0xff] }
 0x160   :  { %3135 = vmatpush2.msra.mxu1 %v2712_v53  ;;  %3044 = vmatpush1.msra.mxu0 %v6995_v10  ;;  %v2156_v28 = vpop.f32.mrf.mxu0  ;;  %v2261_v23 = vpop.f32.mrf.mxu1  ;;  %v9936_v21 = vadd.f32 %v9829_v8, %v1836_v48  ;;  %v9939_v9 = vadd.f32 %v9850_v5, %v1732_v60  ;;  %v14272_v41 = vld [vmem:[#allocation10_spill] sm:$0xff]  ;;  %v9956_v4 = vadd.f32 %v9852_v51, %v1837_v27  ;;  %v2702_v10 = vld [vmem:[%s14108_s5 + $0x140] sm:$0xff]  ;;  %v2701_v27 = vld [vmem:[%s14108_s5 + $0x138] sm:$0xff] }
 0x161   :  { %3136 = vmatprep.subr.mxu1 %v2711_v6  ;;  %3053 = vmatprep.subr.mxu0 %v7050_v22  ;;  %v2179_v19 = vadd.f32 %v2156_v28, %v1953_v62  ;;  %v2284_v32 = vadd.f32 %v2261_v23, %v2058_v11  ;;  %v2704_v0 = vld [vmem:[%s14108_s5 + $0x150] sm:$0xff]  ;;  %v9958_v26 = vadd.f32 %v1948_v63, %v1733_v49  ;;  %v7040_v62 = vld [vmem:[%s14108_s5 + $0x328] sm:$0xff] }
 0x162   :  { %3137 = vmatpush2.msra.mxu1 %v2710_v15  ;;  %3054 = vmatpush2.msra.mxu0 %v7049_v20  ;;  %v2158_v43 = vpop.f32.mrf.mxu0  ;;  %v2263_v54 = vpop.f32.mrf.mxu1  ;;  %v7041_v44 = vld [vmem:[%s14108_s5 + $0x330] sm:$0xff]  ;;  %v9975_v48 = vadd.f32 %v9872_v57, %v9891_v30  ;;  %v7039_v30 = vld [vmem:[%s14108_s5 + $0x320] sm:$0xff]  ;;  %v2065_v28 = vadd.f32 %v9899_v17, %v9908_v7 }
 0x163   :  { %3138 = vmatprep.subr.mxu1 %v2709_v35  ;;  %3055 = vmatprep.subr.mxu0 %v7048_v25  ;;  %v2304_v50 = vadd.f32 %v14272_v41, %v2179_v19  ;;  %v2312_v8 = vadd.f32 %v14272_v41, %v2284_v32  ;;  %v2180_v36 = vadd.f32 %v2158_v43, %v1954_v12  ;;  %v2700_v49 = vld [vmem:[%s14108_s5 + $0x130] sm:$0xff]  ;;  %v2697_v32 = vld [vmem:[%s14108_s5 + $0x118] sm:$0xff] }
 0x164   :  { %3139 = vmatpush2.msra.mxu1 %v2708_v33  ;;  %3056 = vmatpush2.msra.mxu0 %v7047_v34  ;;  %v2285_v5 = vadd.f32 %v2263_v54, %v2059_v3  ;;  %v2162_v37 = vpop.f32.mrf.mxu0  ;;  %v2267_v38 = vpop.f32.mrf.mxu1  ;;  %v9995_v35 = vadd.f32 %v9897_v16, %v9895_v42  ;;  %v2699_v3 = vld [vmem:[%s14108_s5 + $0x128] sm:$0xff]  ;;  %v7038_v33 = vld [vmem:[%s14108_s5 + $0x318] sm:$0xff] }
 0x165   :  { %3140 = vmatprep.subr.mxu1 %v2707_v29  ;;  %3057 = vmatprep.subr.mxu0 %v7046_v18  ;;  %v2320_v14 = vmax.f32 %v2304_v50, %v2312_v8  ;;  %v2305_v53 = vadd.f32 %v9773_v47, %v2180_v36  ;;  %v2181_v51 = vadd.f32 %v2162_v37, %v1955_v56  ;;  %v2695_v8 = vld [vmem:[%s14108_s5 + $0x108] sm:$0xff]  ;;  %v7034_v36 = vld [vmem:[%s14108_s5 + $0x2f8] sm:$0xff]  ;;  %v2694_v37 = vld [vmem:[%s14108_s5 + $0x100] sm:$0xff] }
 0x166   :  { %3141 = vmatpush2.msra.mxu1 %v2706_v52  ;;  %3058 = vmatpush2.msra.mxu0 %v7045_v40  ;;  %v2313_v60 = vadd.f32 %v9773_v47, %v2285_v5  ;;  %v2286_v63 = vadd.f32 %v2267_v38, %v2060_v58  ;;  %v2164_v6 = vpop.f32.mrf.mxu0  ;;  %v2269_v22 = vpop.f32.mrf.mxu1  ;;  %v2698_v58 = vld [vmem:[%s14108_s5 + $0x120] sm:$0xff]  ;;  %v7036_v52 = vld [vmem:[%s14108_s5 + $0x308] sm:$0xff]  ;;  %v7033_v38 = vld [vmem:[%s14108_s5 + $0x2f0] sm:$0xff] }
 0x167   :  { %3142 = vmatprep.subr.mxu1 %v2705_v55  ;;  %3059 = vmatprep.subr.mxu0 %v7044_v61  ;;  %v9984_v11 = vmax.f32 %v2320_v14, 0.0  ;;  %v2306_v57 = vadd.f32 %v14272_v41, %v2181_v51  ;;  %v2182_v15 = vadd.f32 %v2164_v6, %v1956_v31  ;;  %v2287_v20 = vadd.f32 %v2269_v22, %v2061_v24  ;;  %v7037_v31 = vld [vmem:[%s14108_s5 + $0x310] sm:$0xff]  ;;  %v7144_v51 = vld [vmem:[%s14108_s5 + $0x478] sm:$0xff] }
 0x168   :  { %3143 = vmatpush2.msra.mxu1 %v2704_v0  ;;  %3060 = vmatpush2.msra.mxu0 %v7043_v1  ;;  %v2321_v25 = vmax.f32 %v2305_v53, %v2313_v60  ;;  %v2314_v2 = vadd.f32 %v14272_v41, %v2286_v63  ;;  %v2168_v12 = vpop.f32.mrf.mxu0  ;;  %v2273_v45 = vpop.f32.mrf.mxu1  ;;  %v7032_v63 = vld [vmem:[%s14108_s5 + $0x2e8] sm:$0xff]  ;;  %v3168_v6 = vld [vmem:[#allocation3 + $0x8] sm:$0xfc] }
 0x169   :  { %3144 = vmatprep.subr.mxu1 %v2703_v46  ;;  %3061 = vmatprep.subr.mxu0 %v7042_v13  ;;  %v2345_v34 = vrot.slane %v9984_v11, 4  ;;  %v2307_v42 = vadd.f32 %v9773_v47, %v2182_v15  ;;  %v2315_v16 = vadd.f32 %v9773_v47, %v2287_v20  ;;  %v2183_v56 = vadd.f32 %v2168_v12, %v1957_v39  ;;  %v2696_v39 = vld [vmem:[%s14108_s5 + $0x110] sm:$0xff]  ;;  %v7031_v15 = vld [vmem:[%s14108_s5 + $0x2e0] sm:$0xff]  ;;  %v3170_v20 = vld [vmem:[#allocation3 + $0x18] sm:$0xf] }
 0x16a   :  { %3145 = vmatpush2.msra.mxu1 %v2702_v10  ;;  %3062 = vmatpush2.msra.mxu0 %v7041_v44  ;;  %v10015_v23 = vmax.f32 %v2321_v25, 0.0  ;;  %v2322_v29 = vmax.f32 %v2306_v57, %v2314_v2  ;;  %v2288_v18 = vadd.f32 %v2273_v45, %v9936_v21  ;;  %v2170_v24 = vpop.f32.mrf.mxu0  ;;  %v2275_v19 = vpop.f32.mrf.mxu1  ;;  %v7035_v21 = vld [vmem:[%s14108_s5 + $0x300] sm:$0xff]  ;;  %v7142_v25 = vld [vmem:[%s14108_s5 + $0x468] sm:$0xff]  ;;  %v7030_v2 = vld [vmem:[%s14108_s5 + $0x2d8] sm:$0xff] }
 0x16b   :  { %3146 = vmatprep.subr.mxu1 %v2701_v27  ;;  %3063 = vmatprep.subr.mxu0 %v7040_v62  ;;  %2367 = vst [vmem:[#allocation2 + $0x30] sm:$0xf0] %v2345_v34  ;;  %v2323_v17 = vmax.f32 %v2307_v42, %v2315_v16  ;;  %v2308_v7 = vadd.f32 %v14272_v41, %v2183_v56  ;;  %v7029_v42 = vld [vmem:[%s14108_s5 + $0x2d0] sm:$0xff]  ;;  %v7140_v16 = vld [vmem:[%s14108_s5 + $0x458] sm:$0xff]  ;;  %v3236_v56 = vrot.slane %v3168_v6, 2 }
 0x16c   :  { %3147 = vmatpush2.msra.mxu1 %v2700_v49  ;;  %3064 = vmatpush2.msra.mxu0 %v7039_v30  ;;  %v2184_v40 = vadd.f32 %v2170_v24, %v9939_v9  ;;  %v2346_v43 = vrot.slane %v10015_v23, 4  ;;  %v10035_v54 = vmax.f32 %v2322_v29, 0.0  ;;  %v2316_v55 = vadd.f32 %v14272_v41, %v2288_v18  ;;  %v2174_v50 = vpop.f32.mrf.mxu0  ;;  %v2279_v9 = vpop.f32.mrf.mxu1  ;;  %v7027_v23 = vld [vmem:[%s14108_s5 + $0x2c0] sm:$0xff]  ;;  %v14278_v6 = vld [vmem:[#allocation23_spill] sm:$0xff] }
 0x16d   :  { %3148 = vmatprep.subr.mxu1 %v2699_v3  ;;  %3065 = vmatprep.subr.mxu0 %v7038_v33  ;;  %v2289_v61 = vadd.f32 %v2275_v19, %v9956_v4  ;;  %v10045_v0 = vmax.f32 %v2323_v17, 0.0  ;;  %v2185_v5 = vadd.f32 %v2174_v50, %v9958_v26  ;;  %v2290_v4 = vadd.f32 %v2279_v9, %v9975_v48  ;;  %v14274_v33 = vld [vmem:[#allocation21_spill] sm:$0xff]  ;;  %v7085_v9 = vld [vmem:[%s14107_s4 + $0x470] sm:$0xff] }
 0x16e   :  { %3149 = vmatpush2.msra.mxu1 %v2698_v58  ;;  %3066 = vmatpush2.msra.mxu0 %v7037_v31  ;;  %v2309_v1 = vadd.f32 %v9773_v47, %v2184_v40  ;;  %2369 = vst.msk [vmem:[#allocation2 + $0x38] sm:$0xf0] %vm2368_vm5, %v2346_v43  ;;  %v2347_v46 = vrot.slane %v10035_v54, 4  ;;  %v2324_v13 = vmax.f32 %v2308_v7, %v2316_v55  ;;  %v2176_v14 = vpop.f32.mrf.mxu0  ;;  %v2281_v53 = vpop.f32.mrf.mxu1  ;;  %v7139_v31 = vld [vmem:[%s14108_s5 + $0x450] sm:$0xff]  ;;  %v7137_v54 = vld [vmem:[%s14108_s5 + $0x440] sm:$0xff] }
 0x16f   :  { %3150 = vmatprep.subr.mxu1 %v2697_v32  ;;  %3067 = vmatprep.subr.mxu0 %v7036_v52  ;;  %v2317_v26 = vadd.f32 %v9773_v47, %v2289_v61  ;;  %v2349_v10 = vrot.slane %v10045_v0, 4  ;;  %v2310_v44 = vadd.f32 %v14272_v41, %v2185_v5  ;;  %v2318_v48 = vadd.f32 %v14272_v41, %v2290_v4  ;;  %v7143_v41 = vld [vmem:[%s14108_s5 + $0x470] sm:$0xff]  ;;  %v7083_v4 = vld [vmem:[%s14107_s4 + $0x460] sm:$0xff] }
 0x170   :  { %3151 = vmatpush2.msra.mxu1 %v2696_v39  ;;  %3068 = vmatpush2.msra.mxu0 %v7035_v21  ;;  %v2186_v60 = vadd.f32 %v2176_v14, %v9995_v35  ;;  %v2348_v22 = vsel %vm2344_vm6, %v2345_v34, %v2347_v46  ;;  %v10072_v27 = vmax.f32 %v2324_v13, 0.0  ;;  %v2291_v57 = vadd.f32 %v2281_v53, %v2065_v28  ;;  %v14273_v35 = vld [vmem:[#allocation20_spill] sm:$0xff]  ;;  %v14275_v39 = vld [vmem:[#allocation22_spill] sm:$0xff]  ;;  %v14277_v13 = vld [vmem:[#allocation25_spill] sm:$0xff] }
 0x171   :  { %3152 = vmatprep.subr.mxu1 %v2695_v8  ;;  %3069 = vmatprep.subr.mxu0 %v7034_v36  ;;  %v2325_v62 = vmax.f32 %v2309_v1, %v2317_v26  ;;  %2370 = vst [vmem:[#allocation2 + $0x40] sm:$0xff] %v2348_v22  ;;  %v2350_v11 = vsel %vm2344_vm6, %v2346_v43, %v2349_v10  ;;  %v7141_v34 = vld [vmem:[%s14108_s5 + $0x460] sm:$0xff]  ;;  %v10111_v28 = vrot.slane %v3170_v20, 2  ;;  %v7138_v21 = vld [vmem:[%s14108_s5 + $0x448] sm:$0xff]  ;;  %v7086_v43 = vld [vmem:[%s14107_s4 + $0x478] sm:$0xff] }
 0x172   :  { %3153 = vmatpush2.msra.mxu1 %v2694_v37  ;;  %3070 = vmatpush2.msra.mxu0 %v7033_v38  ;;  %v2326_v49 = vmax.f32 %v2310_v44, %v2318_v48  ;;  %v2311_v30 = vadd.f32 %v9773_v47, %v2186_v60  ;;  %2371 = vst.msk [vmem:[#allocation2 + $0x48] sm:$0xff] %vm1185_vm1, %v2350_v11  ;;  %v2351_v12 = vrot.slane %v10072_v27, 4  ;;  %v7136_v8 = vld [vmem:[%s14108_s5 + $0x438] sm:$0xff]  ;;  %v7084_v36 = vld [vmem:[%s14107_s4 + $0x468] sm:$0xff]  ;;  %v7135_v5 = vld [vmem:[%s14108_s5 + $0x430] sm:$0xff] }
 0x173   :  { %3155 = vmatmul.mubr.f32.vlgmr.msra.gmra.mxu1 %v14273_v35  ;;  %3383 = vmatprep.subr.mxu1 %v7144_v51  ;;  %v10091_v45 = vmax.f32 %v2325_v62, 0.0  ;;  %v2319_v3 = vadd.f32 %v9773_v47, %v2291_v57  ;;  %v7028_v47 = vld [vmem:[%s14108_s5 + $0x2c8] sm:$0xff]  ;;  %v10134_v50 = vsel %vm3232_vm7, %v3236_v56, %v10111_v28  ;;  %v7133_v44 = vld [vmem:[%s14108_s5 + $0x420] sm:$0xff]  ;;  %v7081_v57 = vld [vmem:[%s14107_s4 + $0x450] sm:$0xff] }
 0x174   :  { %3071 = vmatprep.subr.mxu0 %v7032_v63  ;;  %7054 = vmatprep.mubr.msk.f32.mxu1 %vm1185_vm1, %v14274_v33  ;;  %v2334_v58 = vmax.f32 %v2326_v49, 0.0  ;;  %v2352_v29 = vsel %vm2344_vm6, %v2347_v46, %v2351_v12  ;;  %v7134_v26 = vld [vmem:[%s14108_s5 + $0x428] sm:$0xff]  ;;  %v7131_v49 = vld [vmem:[%s14108_s5 + $0x410] sm:$0xff]  ;;  %v7095_v0 = vld [vmem:[%s14107_s4 + $0x4c0] sm:$0xff] }
 0x175   :  { %3384 = vmatpush1.msra.mxu1 %v7143_v41  ;;  %3072 = vmatpush2.msra.mxu0 %v7031_v15  ;;  %v2353_v18 = vrot.slane %v10091_v45, 4  ;;  %v2327_v24 = vmax.f32 %v2311_v30, %v2319_v3  ;;  %v2491_v19 = vld [vmem:[#allocation2 + $0x34] ss:$8 sm:$0x3]  ;;  %2372 = vst [vmem:[#allocation2 + $0x50] sm:$0xff] %v2352_v29  ;;  %v7080_v15 = vld [vmem:[%s14107_s4 + $0x448] sm:$0xff] }
 0x176   :  { %3385 = vmatprep.subr.mxu1 %v7142_v25  ;;  %3073 = vmatprep.subr.mxu0 %v7030_v2  ;;  %v2493_v32 = vld [vmem:[#allocation2 + $0x35] ss:$8 sm:$0x3]  ;;  %v2499_v17 = vld [vmem:[#allocation2 + $0x36] ss:$8 sm:$0x3] }
 0x177   :  { %3386 = vmatpush1.msra.mxu1 %v7141_v34  ;;  %3074 = vmatpush2.msra.mxu0 %v7029_v42  ;;  %v2494_v52 = vmax.f32 %v2491_v19, %v2493_v32  ;;  %v2501_v7 = vld [vmem:[#allocation2 + $0x37] ss:$8 sm:$0x3]  ;;  %v2354_v40 = vsel %vm2344_vm6, %v2349_v10, %v2353_v18  ;;  %v2355_v61 = vrot.slane %v2334_v58, 4  ;;  %v2335_v1 = vmax.f32 %v2327_v24, 0.0  ;;  %v7079_v30 = vld [vmem:[%s14107_s4 + $0x440] sm:$0xff] }
 0x178   :  { %3161 = vmatmul.mubr.f32.gmra.mxu1 %v14275_v39  ;;  %3387 = vmatprep.subr.mxu1 %v7140_v16  ;;  %v2502_v55 = vmax.f32 %v2499_v17, %v2501_v7  ;;  %2373 = vst.msk [vmem:[#allocation2 + $0x58] sm:$0xff] %vm1185_vm1, %v2354_v40  ;;  %v7082_v10 = vld [vmem:[%s14107_s4 + $0x458] sm:$0xff]  ;;  %v7129_v45 = vld [vmem:[%s14108_s5 + $0x400] sm:$0xff]  ;;  %v7076_v32 = vld [vmem:[%s14107_s4 + $0x428] sm:$0xff] }
 0x179   :  { %3075 = vmatprep.subr.mxu0 %v7028_v47  ;;  %3388 = vmatpush1.msra.mxu1 %v7139_v31  ;;  %2496 = vst.msk [vmem:[#allocation3 + $0x16] ss:$8 sm:$0x3] %vm9440_vm2, %v2494_v52  ;;  %v2507_v37 = vld [vmem:[#allocation2 + $0x40] ss:$8 sm:$0x3]  ;;  %v2356_v46 = vsel %vm2344_vm6, %v2351_v12, %v2355_v61 }
 0x17a   :  { %7169 = vmatprep.mubr.msk.f32.mxu1 %vm1185_vm1, %v10134_v50  ;;  %3076 = vmatpush2.msra.mxu0 %v7027_v23  ;;  %2504 = vst.msk [vmem:[#allocation3 + $0x17] ss:$8 sm:$0x3] %vm9440_vm2, %v2502_v55  ;;  %v2509_v38 = vld [vmem:[#allocation2 + $0x41] ss:$8 sm:$0x3] }
 0x17b   :  { %3389 = vmatprep.subr.mxu1 %v7138_v21  ;;  %3078 = vmatmul.mubr.f32.vlgmr.msra.gmra.mxu0 %v14277_v13  ;;  %v2510_v14 = vmax.f32 %v2507_v37, %v2509_v38  ;;  %v2515_v53 = vld [vmem:[#allocation2 + $0x42] ss:$8 sm:$0x3]  ;;  %v2517_v51 = vld [vmem:[#allocation2 + $0x43] ss:$8 sm:$0x3] }
 0x17c   :  { %2374 = vst [vmem:[#allocation2 + $0x60] sm:$0xff] %v2356_v46  ;;  %3245 = vmatprep.subr.mxu0 %v7086_v43  ;;  %3390 = vmatpush1.msra.mxu1 %v7137_v54  ;;  %v2518_v48 = vmax.f32 %v2515_v53, %v2517_v51  ;;  %v2523_v60 = vld [vmem:[#allocation2 + $0x44] ss:$8 sm:$0x3]  ;;  %v7132_v41 = vld [vmem:[%s14108_s5 + $0x418] sm:$0xff]  ;;  %v2357_v11 = vrot.slane %v2335_v1, 4 }
 0x17d   :  { %v2525_v63 = vld [vmem:[#allocation2 + $0x45] ss:$8 sm:$0x3]  ;;  %7052 = vmatprep.mubr.msk.f32.mxu0 %vm1185_vm1, %v14278_v6  ;;  %3246 = vmatpush1.msra.mxu0 %v7085_v9  ;;  %v2531_v27 = vld [vmem:[#allocation2 + $0x46] ss:$8 sm:$0x3] }
 0x17e   :  { %v2526_v22 = vmax.f32 %v2523_v60, %v2525_v63  ;;  %v2533_v62 = vld [vmem:[#allocation2 + $0x47] ss:$8 sm:$0x3]  ;;  %2512 = vst.msk [vmem:[#allocation3 + $0x20] ss:$8 sm:$0x3] %vm9440_vm2, %v2510_v14  ;;  %3391 = vmatprep.subr.mxu1 %v7136_v8  ;;  %3247 = vmatprep.subr.mxu0 %v7084_v36  ;;  %v2358_v16 = vsel %vm2344_vm6, %v2353_v18, %v2357_v11 }
 0x17f   :  { %v2534_v20 = vmax.f32 %v2531_v27, %v2533_v62  ;;  %2520 = vst.msk [vmem:[#allocation3 + $0x21] ss:$8 sm:$0x3] %vm9440_vm2, %v2518_v48  ;;  %3392 = vmatpush1.msra.mxu1 %v7135_v5  ;;  %3248 = vmatpush1.msra.mxu0 %v7083_v4  ;;  %v2539_v35 = vld [vmem:[#allocation2 + $0x50] ss:$8 sm:$0x3] }
 0x180   :  { %2528 = vst.msk [vmem:[#allocation3 + $0x22] ss:$8 sm:$0x3] %vm9440_vm2, %v2526_v22  ;;  %v2541_v25 = vld [vmem:[#allocation2 + $0x51] ss:$8 sm:$0x3]  ;;  %3393 = vmatprep.subr.mxu1 %v7134_v26  ;;  %3249 = vmatprep.subr.mxu0 %v7082_v10 }
 0x181   :  { %v14279_v2 = vld [vmem:[#allocation24_spill] sm:$0xff]  ;;  %v7130_v12 = vld [vmem:[%s14108_s5 + $0x408] sm:$0xff]  ;;  %2536 = vst.msk [vmem:[#allocation3 + $0x23] ss:$8 sm:$0x3] %vm9440_vm2, %v2534_v20  ;;  %v2542_v33 = vmax.f32 %v2539_v35, %v2541_v25  ;;  %3394 = vmatpush1.msra.mxu1 %v7133_v44  ;;  %3250 = vmatpush1.msra.mxu0 %v7081_v57  ;;  %v7077_v18 = vld [vmem:[%s14107_s4 + $0x430] sm:$0xff] }
 0x182   :  { %3084 = vmatmul.mubr.f32.gmra.mxu0 %v14279_v2  ;;  %v7078_v3 = vld [vmem:[%s14107_s4 + $0x438] sm:$0xff]  ;;  %2375 = vst.msk [vmem:[#allocation2 + $0x68] sm:$0xff] %vm1185_vm1, %v2358_v16  ;;  %3395 = vmatprep.subr.mxu1 %v7132_v41  ;;  %v7127_v52 = vld [vmem:[%s14108_s5 + $0x3f0] sm:$0xff]  ;;  %v7075_v17 = vld [vmem:[%s14107_s4 + $0x420] sm:$0xff] }
 0x183   :  { %v2547_v34 = vld [vmem:[#allocation2 + $0x52] ss:$8 sm:$0x3]  ;;  %v2549_v42 = vld [vmem:[#allocation2 + $0x53] ss:$8 sm:$0x3]  ;;  %7111 = vmatprep.mubr.msk.f32.mxu0 %vm1185_vm1, %v10134_v50  ;;  %3251 = vmatprep.subr.mxu0 %v7080_v15 }
 0x184   :  { %v2550_v56 = vmax.f32 %v2547_v34, %v2549_v42  ;;  %v2555_v58 = vld [vmem:[#allocation2 + $0x54] ss:$8 sm:$0x3]  ;;  %v2557_v47 = vld [vmem:[#allocation2 + $0x55] ss:$8 sm:$0x3]  ;;  %3396 = vmatpush1.msra.mxu1 %v7131_v49  ;;  %3252 = vmatpush1.msra.mxu0 %v7079_v30 }
 0x185   :  { %v2558_v31 = vmax.f32 %v2555_v58, %v2557_v47  ;;  %v2563_v23 = vld [vmem:[#allocation2 + $0x56] ss:$8 sm:$0x3]  ;;  %v2565_v29 = vld [vmem:[#allocation2 + $0x57] ss:$8 sm:$0x3]  ;;  %3397 = vmatprep.subr.mxu1 %v7130_v12  ;;  %3253 = vmatprep.subr.mxu0 %v7078_v3 }
 0x186   :  { %2544 = vst.msk [vmem:[#allocation3 + $0x24] ss:$8 sm:$0x3] %vm9440_vm2, %v2542_v33  ;;  %v2566_v24 = vmax.f32 %v2563_v23, %v2565_v29  ;;  %2552 = vst.msk [vmem:[#allocation3 + $0x25] ss:$8 sm:$0x3] %vm9440_vm2, %v2550_v56  ;;  %3398 = vmatpush1.msra.mxu1 %v7129_v45  ;;  %3254 = vmatpush1.msra.mxu0 %v7077_v18 }
 0x187   :  { %v7128_v19 = vld [vmem:[%s14108_s5 + $0x3f8] sm:$0xff]  ;;  %2560 = vst.msk [vmem:[#allocation3 + $0x26] ss:$8 sm:$0x3] %vm9440_vm2, %v2558_v31  ;;  %v7126_v7 = vld [vmem:[%s14108_s5 + $0x3e8] sm:$0xff]  ;;  %v7125_v39 = vld [vmem:[%s14108_s5 + $0x3e0] sm:$0xff]  ;;  %3255 = vmatprep.subr.mxu0 %v7076_v32 }
 0x188   :  { %v7074_v40 = vld [vmem:[%s14107_s4 + $0x418] sm:$0xff]  ;;  %2568 = vst.msk [vmem:[#allocation3 + $0x27] ss:$8 sm:$0x3] %vm9440_vm2, %v2566_v24  ;;  %v7073_v21 = vld [vmem:[%s14107_s4 + $0x410] sm:$0xff]  ;;  %3399 = vmatprep.subr.mxu1 %v7128_v19  ;;  %v7072_v54 = vld [vmem:[%s14107_s4 + $0x408] sm:$0xff]  ;;  %3256 = vmatpush1.msra.mxu0 %v7075_v17 }
 0x189   :  { %v7124_v43 = vld [vmem:[%s14108_s5 + $0x3d8] sm:$0xff]  ;;  %v7123_v55 = vld [vmem:[%s14108_s5 + $0x3d0] sm:$0xff]  ;;  %v7071_v61 = vld [vmem:[%s14107_s4 + $0x400] sm:$0xff]  ;;  %3400 = vmatpush1.msra.mxu1 %v7127_v52  ;;  %3257 = vmatprep.subr.mxu0 %v7074_v40 }
 0x18a   :  { %v7122_v50 = vld [vmem:[%s14108_s5 + $0x3c8] sm:$0xff]  ;;  %v7070_v9 = vld [vmem:[%s14107_s4 + $0x3f8] sm:$0xff]  ;;  %3401 = vmatprep.subr.mxu1 %v7126_v7  ;;  %3258 = vmatpush1.msra.mxu0 %v7073_v21  ;;  %v7121_v13 = vld [vmem:[%s14108_s5 + $0x3c0] sm:$0xff] }
 0x18b   :  { %v2571_v8 = vld [vmem:[#allocation2 + $0x60] ss:$8 sm:$0x3]  ;;  %v2573_v36 = vld [vmem:[#allocation2 + $0x61] ss:$8 sm:$0x3]  ;;  %3402 = vmatpush1.msra.mxu1 %v7125_v39  ;;  %3259 = vmatprep.subr.mxu0 %v7072_v54 }
 0x18c   :  { %v2587_v1 = vld [vmem:[#allocation2 + $0x64] ss:$8 sm:$0x3]  ;;  %v2589_v5 = vld [vmem:[#allocation2 + $0x65] ss:$8 sm:$0x3]  ;;  %v2574_v4 = vmax.f32 %v2571_v8, %v2573_v36  ;;  %3403 = vmatprep.subr.mxu1 %v7124_v43  ;;  %3260 = vmatpush1.msra.mxu0 %v7071_v61 }
 0x18d   :  { %v2595_v37 = vld [vmem:[#allocation2 + $0x66] ss:$8 sm:$0x3]  ;;  %v2597_v38 = vld [vmem:[#allocation2 + $0x67] ss:$8 sm:$0x3]  ;;  %v2590_v46 = vmax.f32 %v2587_v1, %v2589_v5  ;;  %3404 = vmatpush1.msra.mxu1 %v7123_v55  ;;  %3261 = vmatprep.subr.mxu0 %v7070_v9 }
 0x18e   :  { %v7069_v26 = vld [vmem:[%s14107_s4 + $0x3f0] sm:$0xff]  ;;  %2576 = vst.msk [vmem:[#allocation3 + $0x30] ss:$8 sm:$0x3] %vm9440_vm2, %v2574_v4  ;;  %v2598_v14 = vmax.f32 %v2595_v37, %v2597_v38  ;;  %v7120_v53 = vld [vmem:[%s14108_s5 + $0x3b8] sm:$0xff]  ;;  %v7068_v51 = vld [vmem:[%s14107_s4 + $0x3e8] sm:$0xff]  ;;  %3405 = vmatprep.subr.mxu1 %v7122_v50 }
 0x18f   :  { %2592 = vst.msk [vmem:[#allocation3 + $0x32] ss:$8 sm:$0x3] %vm9440_vm2, %v2590_v46  ;;  %v7119_v10 = vld [vmem:[%s14108_s5 + $0x3b0] sm:$0xff]  ;;  %v7067_v44 = vld [vmem:[%s14107_s4 + $0x3e0] sm:$0xff]  ;;  %3406 = vmatpush1.msra.mxu1 %v7121_v13  ;;  %3262 = vmatpush1.msra.mxu0 %v7069_v26  ;;  %v7118_v48 = vld [vmem:[%s14108_s5 + $0x3a8] sm:$0xff] }
 0x190   :  { %2600 = vst.msk [vmem:[#allocation3 + $0x33] ss:$8 sm:$0x3] %vm9440_vm2, %v2598_v14  ;;  %v7066_v60 = vld [vmem:[%s14107_s4 + $0x3d8] sm:$0xff]  ;;  %3407 = vmatprep.subr.mxu1 %v7120_v53  ;;  %3263 = vmatprep.subr.mxu0 %v7068_v51  ;;  %v7117_v63 = vld [vmem:[%s14108_s5 + $0x3a0] sm:$0xff]  ;;  %v7065_v6 = vld [vmem:[%s14107_s4 + $0x3d0] sm:$0xff] }
 0x191   :  { %3408 = vmatpush1.msra.mxu1 %v7119_v10  ;;  %3264 = vmatpush1.msra.mxu0 %v7067_v44  ;;  %v7116_v22 = vld [vmem:[%s14108_s5 + $0x398] sm:$0xff]  ;;  %v7064_v27 = vld [vmem:[%s14107_s4 + $0x3c8] sm:$0xff]  ;;  %v7115_v62 = vld [vmem:[%s14108_s5 + $0x390] sm:$0xff] }
 0x192   :  { %3409 = vmatprep.subr.mxu1 %v7118_v48  ;;  %3265 = vmatprep.subr.mxu0 %v7066_v60  ;;  %v7063_v57 = vld [vmem:[%s14107_s4 + $0x3c0] sm:$0xff]  ;;  %v7114_v41 = vld [vmem:[%s14108_s5 + $0x388] sm:$0xff]  ;;  %v7062_v15 = vld [vmem:[%s14107_s4 + $0x3b8] sm:$0xff] }
 0x193   :  { %3410 = vmatpush1.msra.mxu1 %v7117_v63  ;;  %3266 = vmatpush1.msra.mxu0 %v7065_v6  ;;  %v7113_v20 = vld [vmem:[%s14108_s5 + $0x380] sm:$0xff]  ;;  %v7061_v11 = vld [vmem:[%s14107_s4 + $0x3b0] sm:$0xff]  ;;  %v7168_v49 = vld [vmem:[%s14108_s5 + $0x538] sm:$0xff] }
 0x194   :  { %3411 = vmatprep.subr.mxu1 %v7116_v22  ;;  %3267 = vmatprep.subr.mxu0 %v7064_v27  ;;  %v7060_v30 = vld [vmem:[%s14107_s4 + $0x3a8] sm:$0xff]  ;;  %v7167_v35 = vld [vmem:[%s14108_s5 + $0x530] sm:$0xff]  ;;  %v7059_v25 = vld [vmem:[%s14107_s4 + $0x3a0] sm:$0xff] }
 0x195   :  { %3412 = vmatpush1.msra.mxu1 %v7115_v62  ;;  %3268 = vmatpush1.msra.mxu0 %v7063_v57  ;;  %v7166_v2 = vld [vmem:[%s14108_s5 + $0x528] sm:$0xff]  ;;  %v7058_v12 = vld [vmem:[%s14107_s4 + $0x398] sm:$0xff]  ;;  %v7165_v3 = vld [vmem:[%s14108_s5 + $0x520] sm:$0xff] }
 0x196   :  { %3413 = vmatprep.subr.mxu1 %v7114_v41  ;;  %3269 = vmatprep.subr.mxu0 %v7062_v15  ;;  %v7057_v33 = vld [vmem:[%s14107_s4 + $0x390] sm:$0xff]  ;;  %v7164_v34 = vld [vmem:[%s14108_s5 + $0x518] sm:$0xff]  ;;  %v7056_v42 = vld [vmem:[%s14107_s4 + $0x388] sm:$0xff] }
 0x197   :  { %3414 = vmatpush1.msra.mxu1 %v7113_v20  ;;  %3270 = vmatpush1.msra.mxu0 %v7061_v11  ;;  %v7163_v16 = vld [vmem:[%s14108_s5 + $0x510] sm:$0xff]  ;;  %v7055_v56 = vld [vmem:[%s14107_s4 + $0x380] sm:$0xff]  ;;  %v7162_v58 = vld [vmem:[%s14108_s5 + $0x508] sm:$0xff] }
 0x198   :  { %3423 = vmatprep.subr.mxu1 %v7168_v49  ;;  %3271 = vmatprep.subr.mxu0 %v7060_v30  ;;  %v7110_v47 = vld [vmem:[%s14107_s4 + $0x538] sm:$0xff]  ;;  %v7161_v31 = vld [vmem:[%s14108_s5 + $0x500] sm:$0xff]  ;;  %v7109_v23 = vld [vmem:[%s14107_s4 + $0x530] sm:$0xff] }
 0x199   :  { %3424 = vmatpush2.msra.mxu1 %v7167_v35  ;;  %3272 = vmatpush1.msra.mxu0 %v7059_v25  ;;  %v7160_v29 = vld [vmem:[%s14108_s5 + $0x4f8] sm:$0xff]  ;;  %v7108_v45 = vld [vmem:[%s14107_s4 + $0x528] sm:$0xff]  ;;  %v7159_v18 = vld [vmem:[%s14108_s5 + $0x4f0] sm:$0xff] }
 0x19a   :  { %3425 = vmatprep.subr.mxu1 %v7166_v2  ;;  %3273 = vmatprep.subr.mxu0 %v7058_v12  ;;  %v7107_v24 = vld [vmem:[%s14107_s4 + $0x520] sm:$0xff]  ;;  %v7158_v19 = vld [vmem:[%s14108_s5 + $0x4e8] sm:$0xff]  ;;  %v7106_v32 = vld [vmem:[%s14107_s4 + $0x518] sm:$0xff] }
 0x19b   :  { %3426 = vmatpush2.msra.mxu1 %v7165_v3  ;;  %3274 = vmatpush1.msra.mxu0 %v7057_v33  ;;  %v7157_v52 = vld [vmem:[%s14108_s5 + $0x4e0] sm:$0xff]  ;;  %v7105_v17 = vld [vmem:[%s14107_s4 + $0x510] sm:$0xff]  ;;  %v7156_v7 = vld [vmem:[%s14108_s5 + $0x4d8] sm:$0xff] }
 0x19c   :  { %3427 = vmatprep.subr.mxu1 %v7164_v34  ;;  %3275 = vmatprep.subr.mxu0 %v7056_v42  ;;  %v7104_v40 = vld [vmem:[%s14107_s4 + $0x508] sm:$0xff]  ;;  %v7155_v39 = vld [vmem:[%s14108_s5 + $0x4d0] sm:$0xff]  ;;  %v7103_v21 = vld [vmem:[%s14107_s4 + $0x500] sm:$0xff] }
 0x19d   :  { %3428 = vmatpush2.msra.mxu1 %v7163_v16  ;;  %3276 = vmatpush1.msra.mxu0 %v7055_v56  ;;  %v7154_v43 = vld [vmem:[%s14108_s5 + $0x4c8] sm:$0xff]  ;;  %v7102_v54 = vld [vmem:[%s14107_s4 + $0x4f8] sm:$0xff]  ;;  %v7153_v55 = vld [vmem:[%s14108_s5 + $0x4c0] sm:$0xff] }
 0x19e   :  { %3429 = vmatprep.subr.mxu1 %v7162_v58  ;;  %3285 = vmatprep.subr.mxu0 %v7110_v47  ;;  %v7101_v61 = vld [vmem:[%s14107_s4 + $0x4f0] sm:$0xff]  ;;  %v2579_v50 = vld [vmem:[#allocation2 + $0x62] ss:$8 sm:$0x3]  ;;  %v7152_v9 = vld [vmem:[%s14108_s5 + $0x4b8] sm:$0xff] }
 0x19f   :  { %3430 = vmatpush2.msra.mxu1 %v7161_v31  ;;  %3286 = vmatpush2.msra.mxu0 %v7109_v23  ;;  %v7100_v8 = vld [vmem:[%s14107_s4 + $0x4e8] sm:$0xff]  ;;  %v7151_v1 = vld [vmem:[%s14108_s5 + $0x4b0] sm:$0xff]  ;;  %v7099_v5 = vld [vmem:[%s14107_s4 + $0x4e0] sm:$0xff] }
 0x1a0   :  { %3431 = vmatprep.subr.mxu1 %v7160_v29  ;;  %3287 = vmatprep.subr.mxu0 %v7108_v45  ;;  %v2581_v36 = vld [vmem:[#allocation2 + $0x63] ss:$8 sm:$0x3]  ;;  %v7098_v38 = vld [vmem:[%s14107_s4 + $0x4d8] sm:$0xff]  ;;  %v7097_v13 = vld [vmem:[%s14107_s4 + $0x4d0] sm:$0xff] }
 0x1a1   :  { %3432 = vmatpush2.msra.mxu1 %v7159_v18  ;;  %3288 = vmatpush2.msra.mxu0 %v7107_v24  ;;  %v2582_v4 = vmax.f32 %v2579_v50, %v2581_v36  ;;  %v7150_v37 = vld [vmem:[%s14108_s5 + $0x4a8] sm:$0xff]  ;;  %v7149_v46 = vld [vmem:[%s14108_s5 + $0x4a0] sm:$0xff]  ;;  %v7148_v14 = vld [vmem:[%s14108_s5 + $0x498] sm:$0xff] }
 0x1a2   :  { %3433 = vmatprep.subr.mxu1 %v7158_v19  ;;  %3289 = vmatprep.subr.mxu0 %v7106_v32  ;;  %v3169_v26 = vld [vmem:[#allocation3 + $0x10] sm:$0xf]  ;;  %v7096_v53 = vld [vmem:[%s14107_s4 + $0x4c8] sm:$0xff]  ;;  %v7147_v51 = vld [vmem:[%s14108_s5 + $0x490] sm:$0xff] }
 0x1a3   :  { %3434 = vmatpush2.msra.mxu1 %v7157_v52  ;;  %3290 = vmatpush2.msra.mxu0 %v7105_v17  ;;  %2584 = vst.msk [vmem:[#allocation3 + $0x31] ss:$8 sm:$0x3] %vm9440_vm2, %v2582_v4  ;;  %v3167_v10 = vld [vmem:[#allocation3] sm:$0xfc]  ;;  %v7146_v44 = vld [vmem:[%s14108_s5 + $0x488] sm:$0xff] }
 0x1a4   :  { %3435 = vmatprep.subr.mxu1 %v7156_v7  ;;  %3291 = vmatprep.subr.mxu0 %v7104_v40  ;;  %v7094_v48 = vld [vmem:[%s14107_s4 + $0x4b8] sm:$0xff]  ;;  %v10462_v60 = vrot.slane %v3169_v26, 2  ;;  %v7145_v63 = vld [vmem:[%s14108_s5 + $0x480] sm:$0xff]  ;;  %v7093_v6 = vld [vmem:[%s14107_s4 + $0x4b0] sm:$0xff]  ;;  %v3233_v22 = vrot.slane %v3167_v10, 2 }
 0x1a5   :  { %3436 = vmatpush2.msra.mxu1 %v7155_v39  ;;  %3292 = vmatpush2.msra.mxu0 %v7103_v21  ;;  %v7260_v27 = vld [vmem:[%s14108_s5 + $0x638] sm:$0xff]  ;;  %v7092_v62 = vld [vmem:[%s14107_s4 + $0x4a8] sm:$0xff]  ;;  %v7259_v41 = vld [vmem:[%s14108_s5 + $0x630] sm:$0xff] }
 0x1a6   :  { %3437 = vmatprep.subr.mxu1 %v7154_v43  ;;  %3293 = vmatprep.subr.mxu0 %v7102_v54  ;;  %v3235_v57 = vsel %vm3232_vm7, %v3233_v22, %v10462_v60  ;;  %v7091_v15 = vld [vmem:[%s14107_s4 + $0x4a0] sm:$0xff]  ;;  %v3467_v20 = vld [vmem:[#allocation3 + $0x18] sm:$0x1f]  ;;  %v7090_v49 = vld [vmem:[%s14107_s4 + $0x498] sm:$0xff] }
 0x1a7   :  { %3438 = vmatpush2.msra.mxu1 %v7153_v55  ;;  %3294 = vmatpush2.msra.mxu0 %v7101_v61  ;;  %v7258_v11 = vld [vmem:[%s14108_s5 + $0x628] sm:$0xff]  ;;  %v7257_v30 = vld [vmem:[%s14108_s5 + $0x620] sm:$0xff]  ;;  %v7089_v35 = vld [vmem:[%s14107_s4 + $0x490] sm:$0xff]  ;;  %v10501_v12 = vrot.slane %v3467_v20, 3 }
 0x1a8   :  { %3439 = vmatprep.subr.mxu1 %v7152_v9  ;;  %3295 = vmatprep.subr.mxu0 %v7100_v8  ;;  %v3465_v25 = vld [vmem:[#allocation3 + $0x8] sm:$0xf8]  ;;  %v7088_v3 = vld [vmem:[%s14107_s4 + $0x488] sm:$0xff]  ;;  %v7255_v33 = vld [vmem:[%s14108_s5 + $0x610] sm:$0xff] }
 0x1a9   :  { %3440 = vmatpush2.msra.mxu1 %v7151_v1  ;;  %3296 = vmatpush2.msra.mxu0 %v7099_v5  ;;  %v7256_v2 = vld [vmem:[%s14108_s5 + $0x618] sm:$0xff]  ;;  %v3533_v34 = vrot.slane %v3465_v25, 3  ;;  %v7087_v42 = vld [vmem:[%s14107_s4 + $0x480] sm:$0xff]  ;;  %v7254_v16 = vld [vmem:[%s14108_s5 + $0x608] sm:$0xff] }
 0x1aa   :  { %3441 = vmatprep.subr.mxu1 %v7150_v37  ;;  %3297 = vmatprep.subr.mxu0 %v7098_v38  ;;  %v7202_v58 = vld [vmem:[%s14107_s4 + $0x638] sm:$0xff]  ;;  %v7253_v47 = vld [vmem:[%s14108_s5 + $0x600] sm:$0xff]  ;;  %v7201_v31 = vld [vmem:[%s14107_s4 + $0x630] sm:$0xff] }
 0x1ab   :  { %3442 = vmatpush2.msra.mxu1 %v7149_v46  ;;  %3298 = vmatpush2.msra.mxu0 %v7097_v13  ;;  %v3535_v56 = vsel %vm3529_vm8, %v3533_v34, %v10501_v12  ;;  %v7252_v23 = vld [vmem:[%s14108_s5 + $0x5f8] sm:$0xff]  ;;  %v7200_v29 = vld [vmem:[%s14107_s4 + $0x628] sm:$0xff]  ;;  %v7251_v45 = vld [vmem:[%s14108_s5 + $0x5f0] sm:$0xff] }
 0x1ac   :  { %3443 = vmatprep.subr.mxu1 %v7148_v14  ;;  %3299 = vmatprep.subr.mxu0 %v7096_v53  ;;  %v7199_v18 = vld [vmem:[%s14107_s4 + $0x620] sm:$0xff]  ;;  %v7250_v24 = vld [vmem:[%s14108_s5 + $0x5e8] sm:$0xff]  ;;  %v7198_v19 = vld [vmem:[%s14107_s4 + $0x618] sm:$0xff] }
 0x1ad   :  { %3444 = vmatpush2.msra.mxu1 %v7147_v51  ;;  %3300 = vmatpush2.msra.mxu0 %v7095_v0  ;;  %v7249_v32 = vld [vmem:[%s14108_s5 + $0x5e0] sm:$0xff]  ;;  %v7248_v52 = vld [vmem:[%s14108_s5 + $0x5d8] sm:$0xff]  ;;  %v7196_v17 = vld [vmem:[%s14107_s4 + $0x608] sm:$0xff] }
 0x1ae   :  { %3445 = vmatprep.subr.mxu1 %v7146_v44  ;;  %3301 = vmatprep.subr.mxu0 %v7094_v48  ;;  %v7247_v7 = vld [vmem:[%s14108_s5 + $0x5d0] sm:$0xff]  ;;  %v7195_v40 = vld [vmem:[%s14107_s4 + $0x600] sm:$0xff]  ;;  %v7246_v39 = vld [vmem:[%s14108_s5 + $0x5c8] sm:$0xff] }
 0x1af   :  { %3446 = vmatpush2.msra.mxu1 %v7145_v63  ;;  %3302 = vmatpush2.msra.mxu0 %v7093_v6  ;;  %v7194_v21 = vld [vmem:[%s14107_s4 + $0x5f8] sm:$0xff]  ;;  %v7245_v43 = vld [vmem:[%s14108_s5 + $0x5c0] sm:$0xff]  ;;  %v7193_v54 = vld [vmem:[%s14107_s4 + $0x5f0] sm:$0xff] }
 0x1b0   :  { %3448 = vmatmul.mubr.f32.vlgmr.msra.gmra.mxu1 %v3235_v57  ;;  %3680 = vmatprep.subr.mxu1 %v7260_v27  ;;  %v7244_v55 = vld [vmem:[%s14108_s5 + $0x5b8] sm:$0xff]  ;;  %v7192_v61 = vld [vmem:[%s14107_s4 + $0x5e8] sm:$0xff]  ;;  %v7243_v50 = vld [vmem:[%s14108_s5 + $0x5b0] sm:$0xff] }
 0x1b1   :  { %3303 = vmatprep.subr.mxu0 %v7092_v62  ;;  %7170 = vmatprep.mubr.msk.f32.mxu1 %vm1185_vm1, %v10111_v28  ;;  %v7191_v9 = vld [vmem:[%s14107_s4 + $0x5e0] sm:$0xff]  ;;  %v7242_v8 = vld [vmem:[%s14108_s5 + $0x5a8] sm:$0xff]  ;;  %v7190_v36 = vld [vmem:[%s14107_s4 + $0x5d8] sm:$0xff] }
 0x1b2   :  { %3681 = vmatpush1.msra.mxu1 %v7259_v41  ;;  %3304 = vmatpush2.msra.mxu0 %v7091_v15  ;;  %v7241_v1 = vld [vmem:[%s14108_s5 + $0x5a0] sm:$0xff]  ;;  %v7189_v5 = vld [vmem:[%s14107_s4 + $0x5d0] sm:$0xff]  ;;  %v7240_v4 = vld [vmem:[%s14108_s5 + $0x598] sm:$0xff] }
 0x1b3   :  { %3682 = vmatprep.subr.mxu1 %v7258_v11  ;;  %3305 = vmatprep.subr.mxu0 %v7090_v49  ;;  %v7188_v37 = vld [vmem:[%s14107_s4 + $0x5c8] sm:$0xff]  ;;  %v7239_v38 = vld [vmem:[%s14108_s5 + $0x590] sm:$0xff]  ;;  %v7187_v46 = vld [vmem:[%s14107_s4 + $0x5c0] sm:$0xff] }
 0x1b4   :  { %3683 = vmatpush1.msra.mxu1 %v7257_v30  ;;  %3306 = vmatpush2.msra.mxu0 %v7089_v35  ;;  %v7238_v13 = vld [vmem:[%s14108_s5 + $0x588] sm:$0xff]  ;;  %v7186_v26 = vld [vmem:[%s14107_s4 + $0x5b8] sm:$0xff]  ;;  %v7237_v14 = vld [vmem:[%s14108_s5 + $0x580] sm:$0xff] }
 0x1b5   :  { %3454 = vmatmul.mubr.f32.gmra.mxu1 %v10462_v60  ;;  %3684 = vmatprep.subr.mxu1 %v7256_v2  ;;  %v7185_v53 = vld [vmem:[%s14107_s4 + $0x5b0] sm:$0xff]  ;;  %v7236_v51 = vld [vmem:[%s14108_s5 + $0x578] sm:$0xff]  ;;  %v7184_v0 = vld [vmem:[%s14107_s4 + $0x5a8] sm:$0xff] }
 0x1b6   :  { %3307 = vmatprep.subr.mxu0 %v7088_v3  ;;  %3685 = vmatpush1.msra.mxu1 %v7255_v33  ;;  %v7235_v10 = vld [vmem:[%s14108_s5 + $0x570] sm:$0xff]  ;;  %v7183_v44 = vld [vmem:[%s14107_s4 + $0x5a0] sm:$0xff]  ;;  %v7234_v48 = vld [vmem:[%s14108_s5 + $0x568] sm:$0xff] }
 0x1b7   :  { %7285 = vmatprep.mubr.msk.f32.mxu1 %vm1185_vm1, %v3535_v56  ;;  %3308 = vmatpush2.msra.mxu0 %v7087_v42  ;;  %v7233_v63 = vld [vmem:[%s14108_s5 + $0x560] sm:$0xff]  ;;  %v7181_v6 = vld [vmem:[%s14107_s4 + $0x590] sm:$0xff]  ;;  %v7232_v22 = vld [vmem:[%s14108_s5 + $0x558] sm:$0xff] }
 0x1b8   :  { %3686 = vmatprep.subr.mxu1 %v7254_v16  ;;  %3310 = vmatmul.mubr.f32.vlgmr.msra.gmra.mxu0 %v3235_v57  ;;  %v7180_v27 = vld [vmem:[%s14107_s4 + $0x588] sm:$0xff]  ;;  %v7231_v62 = vld [vmem:[%s14108_s5 + $0x550] sm:$0xff]  ;;  %v7179_v57 = vld [vmem:[%s14107_s4 + $0x580] sm:$0xff] }
 0x1b9   :  { %3542 = vmatprep.subr.mxu0 %v7202_v58  ;;  %3687 = vmatpush1.msra.mxu1 %v7253_v47  ;;  %v7230_v41 = vld [vmem:[%s14108_s5 + $0x548] sm:$0xff]  ;;  %v7178_v15 = vld [vmem:[%s14107_s4 + $0x578] sm:$0xff]  ;;  %v7229_v20 = vld [vmem:[%s14108_s5 + $0x540] sm:$0xff] }
 0x1ba   :  { %7112 = vmatprep.mubr.msk.f32.mxu0 %vm1185_vm1, %v10111_v28  ;;  %3543 = vmatpush1.msra.mxu0 %v7201_v31  ;;  %v7197_v28 = vld [vmem:[%s14107_s4 + $0x610] sm:$0xff]  ;;  %v7284_v49 = vld [vmem:[%s14108_s5 + $0x6f8] sm:$0xff]  ;;  %v7176_v30 = vld [vmem:[%s14107_s4 + $0x568] sm:$0xff] }
 0x1bb   :  { %3688 = vmatprep.subr.mxu1 %v7252_v23  ;;  %3544 = vmatprep.subr.mxu0 %v7200_v29  ;;  %v7177_v11 = vld [vmem:[%s14107_s4 + $0x570] sm:$0xff]  ;;  %v7175_v25 = vld [vmem:[%s14107_s4 + $0x560] sm:$0xff]  ;;  %v7282_v2 = vld [vmem:[%s14108_s5 + $0x6e8] sm:$0xff] }
 0x1bc   :  { %3689 = vmatpush1.msra.mxu1 %v7251_v45  ;;  %3545 = vmatpush1.msra.mxu0 %v7199_v18  ;;  %v7283_v35 = vld [vmem:[%s14108_s5 + $0x6f0] sm:$0xff]  ;;  %v7174_v3 = vld [vmem:[%s14107_s4 + $0x558] sm:$0xff]  ;;  %v7281_v33 = vld [vmem:[%s14108_s5 + $0x6e0] sm:$0xff] }
 0x1bd   :  { %3690 = vmatprep.subr.mxu1 %v7250_v24  ;;  %3316 = vmatmul.mubr.f32.gmra.mxu0 %v10462_v60  ;;  %v7182_v60 = vld [vmem:[%s14107_s4 + $0x598] sm:$0xff]  ;;  %v7173_v34 = vld [vmem:[%s14107_s4 + $0x550] sm:$0xff]  ;;  %v7172_v16 = vld [vmem:[%s14107_s4 + $0x548] sm:$0xff] }
 0x1be   :  { %3546 = vmatprep.subr.mxu0 %v7198_v19  ;;  %3691 = vmatpush1.msra.mxu1 %v7249_v32  ;;  %v7280_v42 = vld [vmem:[%s14108_s5 + $0x6d8] sm:$0xff]  ;;  %v7171_v58 = vld [vmem:[%s14107_s4 + $0x540] sm:$0xff]  ;;  %v7278_v47 = vld [vmem:[%s14108_s5 + $0x6c8] sm:$0xff] }
 0x1bf   :  { %3547 = vmatpush1.msra.mxu0 %v7197_v28  ;;  %7227 = vmatprep.mubr.msk.f32.mxu0 %vm1185_vm1, %v3535_v56  ;;  %v7279_v56 = vld [vmem:[%s14108_s5 + $0x6d0] sm:$0xff]  ;;  %v7226_v31 = vld [vmem:[%s14107_s4 + $0x6f8] sm:$0xff]  ;;  %v7277_v23 = vld [vmem:[%s14108_s5 + $0x6c0] sm:$0xff] }
 0x1c0   :  { %3692 = vmatprep.subr.mxu1 %v7248_v52  ;;  %3548 = vmatprep.subr.mxu0 %v7196_v17  ;;  %v7225_v29 = vld [vmem:[%s14107_s4 + $0x6f0] sm:$0xff]  ;;  %v7276_v45 = vld [vmem:[%s14108_s5 + $0x6b8] sm:$0xff]  ;;  %v7224_v18 = vld [vmem:[%s14107_s4 + $0x6e8] sm:$0xff] }
 0x1c1   :  { %3693 = vmatpush1.msra.mxu1 %v7247_v7  ;;  %3549 = vmatpush1.msra.mxu0 %v7195_v40  ;;  %v7275_v24 = vld [vmem:[%s14108_s5 + $0x6b0] sm:$0xff]  ;;  %v7223_v19 = vld [vmem:[%s14107_s4 + $0x6e0] sm:$0xff]  ;;  %v7274_v32 = vld [vmem:[%s14108_s5 + $0x6a8] sm:$0xff] }
 0x1c2   :  { %3694 = vmatprep.subr.mxu1 %v7246_v39  ;;  %3550 = vmatprep.subr.mxu0 %v7194_v21  ;;  %v7222_v28 = vld [vmem:[%s14107_s4 + $0x6d8] sm:$0xff]  ;;  %v7273_v52 = vld [vmem:[%s14108_s5 + $0x6a0] sm:$0xff]  ;;  %v7221_v17 = vld [vmem:[%s14107_s4 + $0x6d0] sm:$0xff] }
 0x1c3   :  { %3695 = vmatpush1.msra.mxu1 %v7245_v43  ;;  %3551 = vmatpush1.msra.mxu0 %v7193_v54  ;;  %v7272_v7 = vld [vmem:[%s14108_s5 + $0x698] sm:$0xff]  ;;  %v7220_v40 = vld [vmem:[%s14107_s4 + $0x6c8] sm:$0xff]  ;;  %v7271_v39 = vld [vmem:[%s14108_s5 + $0x690] sm:$0xff] }
 0x1c4   :  { %3696 = vmatprep.subr.mxu1 %v7244_v55  ;;  %3552 = vmatprep.subr.mxu0 %v7192_v61  ;;  %v7219_v21 = vld [vmem:[%s14107_s4 + $0x6c0] sm:$0xff]  ;;  %v7270_v43 = vld [vmem:[%s14108_s5 + $0x688] sm:$0xff]  ;;  %v7218_v54 = vld [vmem:[%s14107_s4 + $0x6b8] sm:$0xff] }
 0x1c5   :  { %3697 = vmatpush1.msra.mxu1 %v7243_v50  ;;  %3553 = vmatpush1.msra.mxu0 %v7191_v9  ;;  %v7269_v55 = vld [vmem:[%s14108_s5 + $0x680] sm:$0xff]  ;;  %v7217_v61 = vld [vmem:[%s14107_s4 + $0x6b0] sm:$0xff]  ;;  %v7268_v50 = vld [vmem:[%s14108_s5 + $0x678] sm:$0xff] }
 0x1c6   :  { %3698 = vmatprep.subr.mxu1 %v7242_v8  ;;  %3554 = vmatprep.subr.mxu0 %v7190_v36  ;;  %v7216_v9 = vld [vmem:[%s14107_s4 + $0x6a8] sm:$0xff]  ;;  %v7267_v8 = vld [vmem:[%s14108_s5 + $0x670] sm:$0xff]  ;;  %v7215_v36 = vld [vmem:[%s14107_s4 + $0x6a0] sm:$0xff] }
 0x1c7   :  { %3699 = vmatpush1.msra.mxu1 %v7241_v1  ;;  %3555 = vmatpush1.msra.mxu0 %v7189_v5  ;;  %v7266_v1 = vld [vmem:[%s14108_s5 + $0x668] sm:$0xff]  ;;  %v7214_v5 = vld [vmem:[%s14107_s4 + $0x698] sm:$0xff] }
 0x1c8   :  { %3700 = vmatprep.subr.mxu1 %v7240_v4  ;;  %3556 = vmatprep.subr.mxu0 %v7188_v37  ;;  %v7265_v4 = vld [vmem:[%s14108_s5 + $0x660] sm:$0xff]  ;;  %v7213_v37 = vld [vmem:[%s14107_s4 + $0x690] sm:$0xff] }
 0x1c9   :  { %3701 = vmatpush1.msra.mxu1 %v7239_v38  ;;  %3557 = vmatpush1.msra.mxu0 %v7187_v46  ;;  %v3466_v38 = vld [vmem:[#allocation3 + $0x10] sm:$0x1f]  ;;  %v7264_v46 = vld [vmem:[%s14108_s5 + $0x658] sm:$0xff] }
 0x1ca   :  { %3702 = vmatprep.subr.mxu1 %v7238_v13  ;;  %3558 = vmatprep.subr.mxu0 %v7186_v26  ;;  %v7212_v13 = vld [vmem:[%s14107_s4 + $0x688] sm:$0xff]  ;;  %v7263_v26 = vld [vmem:[%s14108_s5 + $0x650] sm:$0xff] }
 0x1cb   :  { %3703 = vmatpush1.msra.mxu1 %v7237_v14  ;;  %3559 = vmatpush1.msra.mxu0 %v7185_v53  ;;  %v7211_v14 = vld [vmem:[%s14107_s4 + $0x680] sm:$0xff]  ;;  %v3464_v53 = vld [vmem:[#allocation3] sm:$0xf8] }
 0x1cc   :  { %3704 = vmatprep.subr.mxu1 %v7236_v51  ;;  %3560 = vmatprep.subr.mxu0 %v7184_v0  ;;  %v7262_v51 = vld [vmem:[%s14108_s5 + $0x648] sm:$0xff]  ;;  %v7210_v0 = vld [vmem:[%s14107_s4 + $0x678] sm:$0xff] }
 0x1cd   :  { %3705 = vmatpush1.msra.mxu1 %v7235_v10  ;;  %3561 = vmatpush1.msra.mxu0 %v7183_v44  ;;  %v10814_v10 = vrot.slane %v3466_v38, 3  ;;  %v7261_v44 = vld [vmem:[%s14108_s5 + $0x640] sm:$0xff]  ;;  %v7302_v38 = vld [vmem:[%s14107_s4 + $0x778] sm:$0xff] }
 0x1ce   :  { %3706 = vmatprep.subr.mxu1 %v7234_v48  ;;  %3562 = vmatprep.subr.mxu0 %v7182_v60  ;;  %v7209_v48 = vld [vmem:[%s14107_s4 + $0x670] sm:$0xff]  ;;  %v3530_v60 = vrot.slane %v3464_v53, 3 }
 0x1cf   :  { %3707 = vmatpush1.msra.mxu1 %v7233_v63  ;;  %3563 = vmatpush1.msra.mxu0 %v7181_v6  ;;  %v7376_v63 = vld [vmem:[%s14108_s5 + $0x7f8] sm:$0xff]  ;;  %v7208_v6 = vld [vmem:[%s14107_s4 + $0x668] sm:$0xff]  ;;  %v7351_v53 = vld [vmem:[%s14108_s5 + $0x730] sm:$0xff] }
 0x1d0   :  { %3708 = vmatprep.subr.mxu1 %v7232_v22  ;;  %3564 = vmatprep.subr.mxu0 %v7180_v27  ;;  %v3532_v22 = vsel %vm3529_vm8, %v3530_v60, %v10814_v10  ;;  %v7375_v27 = vld [vmem:[%s14108_s5 + $0x7f0] sm:$0xff]  ;;  %v7348_v60 = vld [vmem:[%s14108_s5 + $0x718] sm:$0xff] }
 0x1d1   :  { %3709 = vmatpush1.msra.mxu1 %v7231_v62  ;;  %3565 = vmatpush1.msra.mxu0 %v7179_v57  ;;  %v7207_v62 = vld [vmem:[%s14107_s4 + $0x660] sm:$0xff]  ;;  %v3764_v57 = vld [vmem:[#allocation3 + $0x18] sm:$0x3f] }
 0x1d2   :  { %3710 = vmatprep.subr.mxu1 %v7230_v41  ;;  %3566 = vmatprep.subr.mxu0 %v7178_v15  ;;  %v7374_v41 = vld [vmem:[%s14108_s5 + $0x7e8] sm:$0xff]  ;;  %v7206_v15 = vld [vmem:[%s14107_s4 + $0x658] sm:$0xff] }
 0x1d3   :  { %3711 = vmatpush1.msra.mxu1 %v7229_v20  ;;  %3567 = vmatpush1.msra.mxu0 %v7177_v11  ;;  %v7373_v20 = vld [vmem:[%s14108_s5 + $0x7e0] sm:$0xff]  ;;  %v7205_v11 = vld [vmem:[%s14107_s4 + $0x650] sm:$0xff] }
 0x1d4   :  { %3720 = vmatprep.subr.mxu1 %v7284_v49  ;;  %3568 = vmatprep.subr.mxu0 %v7176_v30  ;;  %v3762_v49 = vld [vmem:[#allocation3 + $0x8] sm:$0xf0] }
 0x1d5   :  { %3721 = vmatpush2.msra.mxu1 %v7283_v35  ;;  %3569 = vmatpush1.msra.mxu0 %v7175_v25  ;;  %v7372_v30 = vld [vmem:[%s14108_s5 + $0x7d8] sm:$0xff]  ;;  %v10853_v35 = vrot.slane %v3764_v57, 4  ;;  %v7204_v25 = vld [vmem:[%s14107_s4 + $0x648] sm:$0xff]  ;;  %v7345_v57 = vld [vmem:[%s14108_s5 + $0x700] sm:$0xff] }
 0x1d6   :  { %3722 = vmatprep.subr.mxu1 %v7282_v2  ;;  %3570 = vmatprep.subr.mxu0 %v7174_v3  ;;  %v7371_v2 = vld [vmem:[%s14108_s5 + $0x7d0] sm:$0xff]  ;;  %v3829_v3 = vrot.slane %v3762_v49, 4  ;;  %v7291_v49 = vld [vmem:[%s14107_s4 + $0x720] sm:$0xff] }
 0x1d7   :  { %3723 = vmatpush2.msra.mxu1 %v7281_v33  ;;  %3571 = vmatpush1.msra.mxu0 %v7173_v34  ;;  %v7203_v33 = vld [vmem:[%s14107_s4 + $0x640] sm:$0xff]  ;;  %v7370_v34 = vld [vmem:[%s14108_s5 + $0x7c8] sm:$0xff] }
 0x1d8   :  { %3724 = vmatprep.subr.mxu1 %v7280_v42  ;;  %3572 = vmatprep.subr.mxu0 %v7172_v16  ;;  %v3831_v42 = vsel %vm2344_vm6, %v3829_v3, %v10853_v35  ;;  %v7318_v16 = vld [vmem:[%s14107_s4 + $0x7f8] sm:$0xff]  ;;  %v7289_v3 = vld [vmem:[%s14107_s4 + $0x710] sm:$0xff] }
 0x1d9   :  { %3725 = vmatpush2.msra.mxu1 %v7279_v56  ;;  %3573 = vmatpush1.msra.mxu0 %v7171_v58  ;;  %v7369_v56 = vld [vmem:[%s14108_s5 + $0x7c0] sm:$0xff]  ;;  %v7317_v58 = vld [vmem:[%s14107_s4 + $0x7f0] sm:$0xff] }
 0x1da   :  { %3726 = vmatprep.subr.mxu1 %v7278_v47  ;;  %3582 = vmatprep.subr.mxu0 %v7226_v31  ;;  %v7368_v47 = vld [vmem:[%s14108_s5 + $0x7b8] sm:$0xff]  ;;  %v7316_v31 = vld [vmem:[%s14107_s4 + $0x7e8] sm:$0xff] }
 0x1db   :  { %3727 = vmatpush2.msra.mxu1 %v7277_v23  ;;  %3583 = vmatpush2.msra.mxu0 %v7225_v29  ;;  %v7367_v23 = vld [vmem:[%s14108_s5 + $0x7b0] sm:$0xff]  ;;  %v7315_v29 = vld [vmem:[%s14107_s4 + $0x7e0] sm:$0xff] }
 0x1dc   :  { %3728 = vmatprep.subr.mxu1 %v7276_v45  ;;  %3584 = vmatprep.subr.mxu0 %v7224_v18  ;;  %v7366_v45 = vld [vmem:[%s14108_s5 + $0x7a8] sm:$0xff]  ;;  %v7314_v18 = vld [vmem:[%s14107_s4 + $0x7d8] sm:$0xff] }
 0x1dd   :  { %3729 = vmatpush2.msra.mxu1 %v7275_v24  ;;  %3585 = vmatpush2.msra.mxu0 %v7223_v19  ;;  %v7365_v24 = vld [vmem:[%s14108_s5 + $0x7a0] sm:$0xff]  ;;  %v7364_v19 = vld [vmem:[%s14108_s5 + $0x798] sm:$0xff] }
 0x1de   :  { %3730 = vmatprep.subr.mxu1 %v7274_v32  ;;  %3586 = vmatprep.subr.mxu0 %v7222_v28  ;;  %v7312_v32 = vld [vmem:[%s14107_s4 + $0x7c8] sm:$0xff]  ;;  %v7363_v28 = vld [vmem:[%s14108_s5 + $0x790] sm:$0xff] }
 0x1df   :  { %3731 = vmatpush2.msra.mxu1 %v7273_v52  ;;  %3587 = vmatpush2.msra.mxu0 %v7221_v17  ;;  %v7311_v52 = vld [vmem:[%s14107_s4 + $0x7c0] sm:$0xff]  ;;  %v7362_v17 = vld [vmem:[%s14108_s5 + $0x788] sm:$0xff] }
 0x1e0   :  { %3732 = vmatprep.subr.mxu1 %v7272_v7  ;;  %3588 = vmatprep.subr.mxu0 %v7220_v40  ;;  %v7310_v7 = vld [vmem:[%s14107_s4 + $0x7b8] sm:$0xff]  ;;  %v7361_v40 = vld [vmem:[%s14108_s5 + $0x780] sm:$0xff] }
 0x1e1   :  { %3733 = vmatpush2.msra.mxu1 %v7271_v39  ;;  %3589 = vmatpush2.msra.mxu0 %v7219_v21  ;;  %v7309_v39 = vld [vmem:[%s14107_s4 + $0x7b0] sm:$0xff]  ;;  %v7360_v21 = vld [vmem:[%s14108_s5 + $0x778] sm:$0xff] }
 0x1e2   :  { %3734 = vmatprep.subr.mxu1 %v7270_v43  ;;  %3590 = vmatprep.subr.mxu0 %v7218_v54  ;;  %v7308_v43 = vld [vmem:[%s14107_s4 + $0x7a8] sm:$0xff]  ;;  %v7359_v54 = vld [vmem:[%s14108_s5 + $0x770] sm:$0xff] }
 0x1e3   :  { %3735 = vmatpush2.msra.mxu1 %v7269_v55  ;;  %3591 = vmatpush2.msra.mxu0 %v7217_v61  ;;  %v7307_v55 = vld [vmem:[%s14107_s4 + $0x7a0] sm:$0xff]  ;;  %v7358_v61 = vld [vmem:[%s14108_s5 + $0x768] sm:$0xff] }
 0x1e4   :  { %3736 = vmatprep.subr.mxu1 %v7268_v50  ;;  %3592 = vmatprep.subr.mxu0 %v7216_v9  ;;  %v7306_v50 = vld [vmem:[%s14107_s4 + $0x798] sm:$0xff]  ;;  %v7357_v9 = vld [vmem:[%s14108_s5 + $0x760] sm:$0xff] }
 0x1e5   :  { %3737 = vmatpush2.msra.mxu1 %v7267_v8  ;;  %3593 = vmatpush2.msra.mxu0 %v7215_v36  ;;  %v7305_v8 = vld [vmem:[%s14107_s4 + $0x790] sm:$0xff]  ;;  %v7356_v36 = vld [vmem:[%s14108_s5 + $0x758] sm:$0xff] }
 0x1e6   :  { %3738 = vmatprep.subr.mxu1 %v7266_v1  ;;  %3594 = vmatprep.subr.mxu0 %v7214_v5  ;;  %v7304_v1 = vld [vmem:[%s14107_s4 + $0x788] sm:$0xff]  ;;  %v7355_v5 = vld [vmem:[%s14108_s5 + $0x750] sm:$0xff] }
 0x1e7   :  { %3739 = vmatpush2.msra.mxu1 %v7265_v4  ;;  %3595 = vmatpush2.msra.mxu0 %v7213_v37  ;;  %v7303_v4 = vld [vmem:[%s14107_s4 + $0x780] sm:$0xff]  ;;  %v7354_v37 = vld [vmem:[%s14108_s5 + $0x748] sm:$0xff] }
 0x1e8   :  { %3740 = vmatprep.subr.mxu1 %v7264_v46  ;;  %3596 = vmatprep.subr.mxu0 %v7212_v13  ;;  %v7353_v46 = vld [vmem:[%s14108_s5 + $0x740] sm:$0xff]  ;;  %v7301_v13 = vld [vmem:[%s14107_s4 + $0x770] sm:$0xff] }
 0x1e9   :  { %3741 = vmatpush2.msra.mxu1 %v7263_v26  ;;  %3597 = vmatpush2.msra.mxu0 %v7211_v14  ;;  %v7352_v26 = vld [vmem:[%s14108_s5 + $0x738] sm:$0xff]  ;;  %v7300_v14 = vld [vmem:[%s14107_s4 + $0x768] sm:$0xff] }
 0x1ea   :  { %3742 = vmatprep.subr.mxu1 %v7262_v51  ;;  %3598 = vmatprep.subr.mxu0 %v7210_v0  ;;  %v7299_v51 = vld [vmem:[%s14107_s4 + $0x760] sm:$0xff]  ;;  %v7350_v0 = vld [vmem:[%s14108_s5 + $0x728] sm:$0xff] }
 0x1eb   :  { %3743 = vmatpush2.msra.mxu1 %v7261_v44  ;;  %3599 = vmatpush2.msra.mxu0 %v7209_v48  ;;  %v7349_v44 = vld [vmem:[%s14108_s5 + $0x720] sm:$0xff]  ;;  %v7297_v48 = vld [vmem:[%s14107_s4 + $0x750] sm:$0xff] }
 0x1ec   :  { %3745 = vmatmul.mubr.f32.vlgmr.msra.gmra.mxu1 %v3532_v22  ;;  %3976 = vmatprep.subr.mxu1 %v7376_v63  ;;  %v7296_v63 = vld [vmem:[%s14107_s4 + $0x748] sm:$0xff] }
 0x1ed   :  { %3600 = vmatprep.subr.mxu0 %v7208_v6  ;;  %7286 = vmatprep.mubr.msk.f32.mxu1 %vm1185_vm1, %v10501_v12  ;;  %v7347_v6 = vld [vmem:[%s14108_s5 + $0x710] sm:$0xff] }
 0x1ee   :  { %3977 = vmatpush1.msra.mxu1 %v7375_v27  ;;  %3601 = vmatpush2.msra.mxu0 %v7207_v62  ;;  %v7346_v27 = vld [vmem:[%s14108_s5 + $0x708] sm:$0xff]  ;;  %v7294_v62 = vld [vmem:[%s14107_s4 + $0x738] sm:$0xff] }
 0x1ef   :  { %3978 = vmatprep.subr.mxu1 %v7374_v41  ;;  %3602 = vmatprep.subr.mxu0 %v7206_v15  ;;  %v7293_v41 = vld [vmem:[%s14107_s4 + $0x730] sm:$0xff]  ;;  %v7400_v15 = vld [vmem:[%s14108_s5 + $0x8b8] sm:$0xff] }
 0x1f0   :  { %3979 = vmatpush1.msra.mxu1 %v7373_v20  ;;  %3603 = vmatpush2.msra.mxu0 %v7205_v11  ;;  %v7292_v20 = vld [vmem:[%s14107_s4 + $0x728] sm:$0xff]  ;;  %v7399_v11 = vld [vmem:[%s14108_s5 + $0x8b0] sm:$0xff] }
 0x1f1   :  { %3751 = vmatmul.mubr.f32.gmra.mxu1 %v10814_v10  ;;  %3980 = vmatprep.subr.mxu1 %v7372_v30  ;;  %v7398_v30 = vld [vmem:[%s14108_s5 + $0x8a8] sm:$0xff] }
 0x1f2   :  { %3604 = vmatprep.subr.mxu0 %v7204_v25  ;;  %3981 = vmatpush1.msra.mxu1 %v7371_v2  ;;  %v7290_v25 = vld [vmem:[%s14107_s4 + $0x718] sm:$0xff]  ;;  %v7397_v2 = vld [vmem:[%s14108_s5 + $0x8a0] sm:$0xff] }
 0x1f3   :  { %7401 = vmatprep.mubr.msk.f32.mxu1 %vm1185_vm1, %v3831_v42  ;;  %3605 = vmatpush2.msra.mxu0 %v7203_v33  ;;  %v7396_v33 = vld [vmem:[%s14108_s5 + $0x898] sm:$0xff] }
 0x1f4   :  { %3982 = vmatprep.subr.mxu1 %v7370_v34  ;;  %3607 = vmatmul.mubr.f32.vlgmr.msra.gmra.mxu0 %v3532_v22  ;;  %v7295_v22 = vld [vmem:[%s14107_s4 + $0x740] sm:$0xff]  ;;  %v7288_v34 = vld [vmem:[%s14107_s4 + $0x708] sm:$0xff] }
 0x1f5   :  { %3838 = vmatprep.subr.mxu0 %v7318_v16  ;;  %3983 = vmatpush1.msra.mxu1 %v7369_v56  ;;  %v7287_v16 = vld [vmem:[%s14107_s4 + $0x700] sm:$0xff]  ;;  %v7394_v56 = vld [vmem:[%s14108_s5 + $0x888] sm:$0xff] }
 0x1f6   :  { %7228 = vmatprep.mubr.msk.f32.mxu0 %vm1185_vm1, %v10501_v12  ;;  %3839 = vmatpush1.msra.mxu0 %v7317_v58  ;;  %v7313_v12 = vld [vmem:[%s14107_s4 + $0x7d0] sm:$0xff]  ;;  %v7342_v58 = vld [vmem:[%s14107_s4 + $0x8b8] sm:$0xff] }
 0x1f7   :  { %3984 = vmatprep.subr.mxu1 %v7368_v47  ;;  %3840 = vmatprep.subr.mxu0 %v7316_v31  ;;  %v7393_v47 = vld [vmem:[%s14108_s5 + $0x880] sm:$0xff]  ;;  %v7341_v31 = vld [vmem:[%s14107_s4 + $0x8b0] sm:$0xff] }
 0x1f8   :  { %3985 = vmatpush1.msra.mxu1 %v7367_v23  ;;  %3841 = vmatpush1.msra.mxu0 %v7315_v29  ;;  %v7392_v23 = vld [vmem:[%s14108_s5 + $0x878] sm:$0xff]  ;;  %v7340_v29 = vld [vmem:[%s14107_s4 + $0x8a8] sm:$0xff] }
 0x1f9   :  { %3986 = vmatprep.subr.mxu1 %v7366_v45  ;;  %3613 = vmatmul.mubr.f32.gmra.mxu0 %v10814_v10  ;;  %v7298_v10 = vld [vmem:[%s14107_s4 + $0x758] sm:$0xff]  ;;  %v7391_v45 = vld [vmem:[%s14108_s5 + $0x870] sm:$0xff] }
 0x1fa   :  { %3842 = vmatprep.subr.mxu0 %v7314_v18  ;;  %3987 = vmatpush1.msra.mxu1 %v7365_v24  ;;  %v7339_v18 = vld [vmem:[%s14107_s4 + $0x8a0] sm:$0xff]  ;;  %v7390_v24 = vld [vmem:[%s14108_s5 + $0x868] sm:$0xff] }
 0x1fb   :  { %3843 = vmatpush1.msra.mxu0 %v7313_v12  ;;  %7343 = vmatprep.mubr.msk.f32.mxu0 %vm1185_vm1, %v3831_v42  ;;  %v7395_v42 = vld [vmem:[%s14108_s5 + $0x890] sm:$0xff]  ;;  %v7338_v12 = vld [vmem:[%s14107_s4 + $0x898] sm:$0xff] }
 0x1fc   :  { %3988 = vmatprep.subr.mxu1 %v7364_v19  ;;  %3844 = vmatprep.subr.mxu0 %v7312_v32  ;;  %v7389_v19 = vld [vmem:[%s14108_s5 + $0x860] sm:$0xff]  ;;  %v7337_v32 = vld [vmem:[%s14107_s4 + $0x890] sm:$0xff] }
 0x1fd   :  { %3989 = vmatpush1.msra.mxu1 %v7363_v28  ;;  %3845 = vmatpush1.msra.mxu0 %v7311_v52  ;;  %v7388_v28 = vld [vmem:[%s14108_s5 + $0x858] sm:$0xff]  ;;  %v7336_v52 = vld [vmem:[%s14107_s4 + $0x888] sm:$0xff] }
 0x1fe   :  { %3990 = vmatprep.subr.mxu1 %v7362_v17  ;;  %3846 = vmatprep.subr.mxu0 %v7310_v7  ;;  %v7387_v17 = vld [vmem:[%s14108_s5 + $0x850] sm:$0xff]  ;;  %v7335_v7 = vld [vmem:[%s14107_s4 + $0x880] sm:$0xff] }
 0x1ff   :  { %3991 = vmatpush1.msra.mxu1 %v7361_v40  ;;  %3847 = vmatpush1.msra.mxu0 %v7309_v39  ;;  %v7386_v40 = vld [vmem:[%s14108_s5 + $0x848] sm:$0xff]  ;;  %v7334_v39 = vld [vmem:[%s14107_s4 + $0x878] sm:$0xff] }
 0x200   :  { %3992 = vmatprep.subr.mxu1 %v7360_v21  ;;  %3848 = vmatprep.subr.mxu0 %v7308_v43  ;;  %v7385_v21 = vld [vmem:[%s14108_s5 + $0x840] sm:$0xff]  ;;  %v7333_v43 = vld [vmem:[%s14107_s4 + $0x870] sm:$0xff] }
 0x201   :  { %3993 = vmatpush1.msra.mxu1 %v7359_v54  ;;  %3849 = vmatpush1.msra.mxu0 %v7307_v55  ;;  %v7384_v54 = vld [vmem:[%s14108_s5 + $0x838] sm:$0xff]  ;;  %v7332_v55 = vld [vmem:[%s14107_s4 + $0x868] sm:$0xff] }
 0x202   :  { %3994 = vmatprep.subr.mxu1 %v7358_v61  ;;  %3850 = vmatprep.subr.mxu0 %v7306_v50  ;;  %v7383_v61 = vld [vmem:[%s14108_s5 + $0x830] sm:$0xff]  ;;  %v7331_v50 = vld [vmem:[%s14107_s4 + $0x860] sm:$0xff] }
 0x203   :  { %3995 = vmatpush1.msra.mxu1 %v7357_v9  ;;  %3851 = vmatpush1.msra.mxu0 %v7305_v8  ;;  %v7382_v9 = vld [vmem:[%s14108_s5 + $0x828] sm:$0xff]  ;;  %v7330_v8 = vld [vmem:[%s14107_s4 + $0x858] sm:$0xff] }
 0x204   :  { %3996 = vmatprep.subr.mxu1 %v7356_v36  ;;  %3852 = vmatprep.subr.mxu0 %v7304_v1  ;;  %v7381_v36 = vld [vmem:[%s14108_s5 + $0x820] sm:$0xff]  ;;  %v7329_v1 = vld [vmem:[%s14107_s4 + $0x850] sm:$0xff] }
 0x205   :  { %3997 = vmatpush1.msra.mxu1 %v7355_v5  ;;  %3853 = vmatpush1.msra.mxu0 %v7303_v4  ;;  %v3763_v5 = vld [vmem:[#allocation3 + $0x10] sm:$0x3f]  ;;  %v7380_v4 = vld [vmem:[%s14108_s5 + $0x818] sm:$0xff] }
 0x206   :  { %3998 = vmatprep.subr.mxu1 %v7354_v37  ;;  %3854 = vmatprep.subr.mxu0 %v7302_v38  ;;  %v7328_v37 = vld [vmem:[%s14107_s4 + $0x848] sm:$0xff]  ;;  %v7379_v38 = vld [vmem:[%s14108_s5 + $0x810] sm:$0xff] }
 0x207   :  { %3999 = vmatpush1.msra.mxu1 %v7353_v46  ;;  %3855 = vmatpush1.msra.mxu0 %v7301_v13  ;;  %v7327_v46 = vld [vmem:[%s14107_s4 + $0x840] sm:$0xff]  ;;  %v3761_v13 = vld [vmem:[#allocation3] sm:$0xf0] }
 0x208   :  { %4000 = vmatprep.subr.mxu1 %v7352_v26  ;;  %3856 = vmatprep.subr.mxu0 %v7300_v14  ;;  %v7378_v26 = vld [vmem:[%s14108_s5 + $0x808] sm:$0xff]  ;;  %v7326_v14 = vld [vmem:[%s14107_s4 + $0x838] sm:$0xff] }
 0x209   :  { %4001 = vmatpush1.msra.mxu1 %v7351_v53  ;;  %3857 = vmatpush1.msra.mxu0 %v7299_v51  ;;  %v11166_v53 = vrot.slane %v3763_v5, 4  ;;  %v7377_v51 = vld [vmem:[%s14108_s5 + $0x800] sm:$0xff]  ;;  %v7420_v5 = vld [vmem:[%s14107_s4 + $0x248] sm:$0xff] }
 0x20a   :  { %4002 = vmatprep.subr.mxu1 %v7350_v0  ;;  %3858 = vmatprep.subr.mxu0 %v7298_v10  ;;  %v7325_v0 = vld [vmem:[%s14107_s4 + $0x830] sm:$0xff]  ;;  %v3826_v10 = vrot.slane %v3761_v13, 4  ;;  %v4102_v13 = vld [vmem:[%s14107_s4 + $0x40] sm:$0xff] }
 0x20b   :  { %4003 = vmatpush1.msra.mxu1 %v7349_v44  ;;  %3859 = vmatpush1.msra.mxu0 %v7297_v48  ;;  %v4125_v44 = vld [vmem:[%s14107_s4 + $0xf8] sm:$0xff]  ;;  %v7324_v48 = vld [vmem:[%s14107_s4 + $0x828] sm:$0xff] }
 0x20c   :  { %4004 = vmatprep.subr.mxu1 %v7348_v60  ;;  %3860 = vmatprep.subr.mxu0 %v7296_v63  ;;  %v4091_v60 = vld [vmem:[#allocation3 + $0x18] sm:$0xc0]  ;;  %v3828_v63 = vsel %vm2344_vm6, %v3826_v10, %v11166_v53 }
 0x20d   :  { %4005 = vmatpush1.msra.mxu1 %v7347_v6  ;;  %3861 = vmatpush1.msra.mxu0 %v7295_v22  ;;  %v4124_v6 = vld [vmem:[%s14107_s4 + $0xf0] sm:$0xff]  ;;  %v7323_v22 = vld [vmem:[%s14107_s4 + $0x820] sm:$0xff]  ;;  %v4099_v10 = vld [vmem:[%s14107_s4 + $0x28] sm:$0xff] }
 0x20e   :  { %4006 = vmatprep.subr.mxu1 %v7346_v27  ;;  %3862 = vmatprep.subr.mxu0 %v7294_v62  ;;  %v11188_v27 = vld [vmem:[#allocation3 + $0x28] sm:$0xff]  ;;  %v4123_v62 = vld [vmem:[%s14107_s4 + $0xe8] sm:$0xff] }
 0x20f   :  { %4007 = vmatpush1.msra.mxu1 %v7345_v57  ;;  %3863 = vmatpush1.msra.mxu0 %v7293_v41  ;;  %v7322_v57 = vld [vmem:[%s14107_s4 + $0x818] sm:$0xff]  ;;  %v4122_v41 = vld [vmem:[%s14107_s4 + $0xe0] sm:$0xff] }
 0x210   :  { %4016 = vmatprep.subr.mxu1 %v7400_v15  ;;  %3864 = vmatprep.subr.mxu0 %v7292_v20  ;;  %v7321_v15 = vld [vmem:[%s14107_s4 + $0x810] sm:$0xff]  ;;  %v4121_v20 = vld [vmem:[%s14107_s4 + $0xd8] sm:$0xff] }
 0x211   :  { %4017 = vmatpush2.msra.mxu1 %v7399_v11  ;;  %3865 = vmatpush1.msra.mxu0 %v7291_v49  ;;  %v4372_v11 = vrot.slane %v4091_v60, 6  ;;  %v11208_v49 = vrot.slane %v11188_v27, 6  ;;  %v7413_v60 = vld [vmem:[%s14107_s4 + $0x210] sm:$0xff] }
 0x212   :  { %4018 = vmatprep.subr.mxu1 %v7398_v30  ;;  %3866 = vmatprep.subr.mxu0 %v7290_v25  ;;  %v7320_v30 = vld [vmem:[%s14107_s4 + $0x808] sm:$0xff]  ;;  %v4120_v25 = vld [vmem:[%s14107_s4 + $0xd0] sm:$0xff] }
 0x213   :  { %4019 = vmatpush2.msra.mxu1 %v7397_v2  ;;  %3867 = vmatpush1.msra.mxu0 %v7289_v3  ;;  %v7319_v2 = vld [vmem:[%s14107_s4 + $0x800] sm:$0xff]  ;;  %v4119_v3 = vld [vmem:[%s14107_s4 + $0xc8] sm:$0xff] }
 0x214   :  { %4020 = vmatprep.subr.mxu1 %v7396_v33  ;;  %3868 = vmatprep.subr.mxu0 %v7288_v34  ;;  %v11225_v33 = vsel %vm4368_vm9, %v4372_v11, %v11208_v49  ;;  %v7434_v34 = vld [vmem:[%s14107_s4 + $0x2b8] sm:$0xff] }
 0x215   :  { %4021 = vmatpush2.msra.mxu1 %v7395_v42  ;;  %3869 = vmatpush1.msra.mxu0 %v7287_v16  ;;  %v4118_v42 = vld [vmem:[%s14107_s4 + $0xc0] sm:$0xff]  ;;  %v7433_v16 = vld [vmem:[%s14107_s4 + $0x2b0] sm:$0xff]  ;;  %v4149_v11 = vld [vmem:[%s14107_s4 + $0x1b8] sm:$0xff] }
 0x216   :  { %4022 = vmatprep.subr.mxu1 %v7394_v56  ;;  %3878 = vmatprep.subr.mxu0 %v7342_v58  ;;  %v4207_v56 = vld [vmem:[#allocation3 + $0x18] sm:$0x80]  ;;  %v4117_v58 = vld [vmem:[%s14107_s4 + $0xb8] sm:$0xff] }
 0x217   :  { %4023 = vmatpush2.msra.mxu1 %v7393_v47  ;;  %3879 = vmatpush2.msra.mxu0 %v7341_v31  ;;  %v7432_v47 = vld [vmem:[%s14107_s4 + $0x2a8] sm:$0xff]  ;;  %v4116_v31 = vld [vmem:[%s14107_s4 + $0xb0] sm:$0xff] }
 0x218   :  { %4024 = vmatprep.subr.mxu1 %v7392_v23  ;;  %3880 = vmatprep.subr.mxu0 %v7340_v29  ;;  %v7431_v23 = vld [vmem:[%s14107_s4 + $0x2a0] sm:$0xff]  ;;  %v4115_v29 = vld [vmem:[%s14107_s4 + $0xa8] sm:$0xff] }
 0x219   :  { %4025 = vmatpush2.msra.mxu1 %v7391_v45  ;;  %3881 = vmatpush2.msra.mxu0 %v7339_v18  ;;  %v4276_v45 = vrot.slane %v4207_v56, 7  ;;  %v4277_v18 = vrot.slane %v11188_v27, 7  ;;  %v4145_v56 = vld [vmem:[%s14107_s4 + $0x198] sm:$0xff] }
 0x21a   :  { %4026 = vmatprep.subr.mxu1 %v7390_v24  ;;  %3882 = vmatprep.subr.mxu0 %v7338_v12  ;;  %v7430_v24 = vld [vmem:[%s14107_s4 + $0x298] sm:$0xff]  ;;  %v4114_v12 = vld [vmem:[%s14107_s4 + $0xa0] sm:$0xff] }
 0x21b   :  { %4027 = vmatpush2.msra.mxu1 %v7389_v19  ;;  %3883 = vmatpush2.msra.mxu0 %v7337_v32  ;;  %v4113_v19 = vld [vmem:[%s14107_s4 + $0x98] sm:$0xff]  ;;  %v7428_v32 = vld [vmem:[%s14107_s4 + $0x288] sm:$0xff] }
 0x21c   :  { %4028 = vmatprep.subr.mxu1 %v7388_v28  ;;  %3884 = vmatprep.subr.mxu0 %v7336_v52  ;;  %v11275_v28 = vsel %vm4272_vm10, %v4276_v45, %v4277_v18  ;;  %v4112_v52 = vld [vmem:[%s14107_s4 + $0x90] sm:$0xff]  ;;  %v4142_v45 = vld [vmem:[%s14107_s4 + $0x180] sm:$0xff]  ;;  %v7490_v27 = vld [vmem:[%s14108_s5 + $0x298] sm:$0xff] }
 0x21d   :  { %4029 = vmatpush2.msra.mxu1 %v7387_v17  ;;  %3885 = vmatpush2.msra.mxu0 %v7335_v7  ;;  %v7427_v17 = vld [vmem:[%s14107_s4 + $0x280] sm:$0xff]  ;;  %v4111_v7 = vld [vmem:[%s14107_s4 + $0x88] sm:$0xff] }
 0x21e   :  { %4030 = vmatprep.subr.mxu1 %v7386_v40  ;;  %3886 = vmatprep.subr.mxu0 %v7334_v39  ;;  %v7426_v40 = vld [vmem:[%s14107_s4 + $0x278] sm:$0xff]  ;;  %v4110_v39 = vld [vmem:[%s14107_s4 + $0x80] sm:$0xff] }
 0x21f   :  { %4031 = vmatpush2.msra.mxu1 %v7385_v21  ;;  %3887 = vmatpush2.msra.mxu0 %v7333_v43  ;;  %v7425_v21 = vld [vmem:[%s14107_s4 + $0x270] sm:$0xff]  ;;  %v4109_v43 = vld [vmem:[%s14107_s4 + $0x78] sm:$0xff] }
 0x220   :  { %4032 = vmatprep.subr.mxu1 %v7384_v54  ;;  %3888 = vmatprep.subr.mxu0 %v7332_v55  ;;  %v7424_v54 = vld [vmem:[%s14107_s4 + $0x268] sm:$0xff]  ;;  %v4108_v55 = vld [vmem:[%s14107_s4 + $0x70] sm:$0xff] }
 0x221   :  { %4033 = vmatpush2.msra.mxu1 %v7383_v61  ;;  %3889 = vmatpush2.msra.mxu0 %v7331_v50  ;;  %v7423_v61 = vld [vmem:[%s14107_s4 + $0x260] sm:$0xff]  ;;  %v4107_v50 = vld [vmem:[%s14107_s4 + $0x68] sm:$0xff] }
 0x222   :  { %4034 = vmatprep.subr.mxu1 %v7382_v9  ;;  %3890 = vmatprep.subr.mxu0 %v7330_v8  ;;  %v7422_v9 = vld [vmem:[%s14107_s4 + $0x258] sm:$0xff]  ;;  %v4106_v8 = vld [vmem:[%s14107_s4 + $0x60] sm:$0xff] }
 0x223   :  { %4035 = vmatpush2.msra.mxu1 %v7381_v36  ;;  %3891 = vmatpush2.msra.mxu0 %v7329_v1  ;;  %v7421_v36 = vld [vmem:[%s14107_s4 + $0x250] sm:$0xff]  ;;  %v4105_v1 = vld [vmem:[%s14107_s4 + $0x58] sm:$0xff] }
 0x224   :  { %4036 = vmatprep.subr.mxu1 %v7380_v4  ;;  %3892 = vmatprep.subr.mxu0 %v7328_v37  ;;  %v4104_v4 = vld [vmem:[%s14107_s4 + $0x50] sm:$0xff]  ;;  %v7419_v37 = vld [vmem:[%s14107_s4 + $0x240] sm:$0xff] }
 0x225   :  { %4037 = vmatpush2.msra.mxu1 %v7379_v38  ;;  %3893 = vmatpush2.msra.mxu0 %v7327_v46  ;;  %v4103_v38 = vld [vmem:[%s14107_s4 + $0x48] sm:$0xff]  ;;  %v7418_v46 = vld [vmem:[%s14107_s4 + $0x238] sm:$0xff] }
 0x226   :  { %4038 = vmatprep.subr.mxu1 %v7378_v26  ;;  %3894 = vmatprep.subr.mxu0 %v7326_v14  ;;  %v7417_v26 = vld [vmem:[%s14107_s4 + $0x230] sm:$0xff]  ;;  %v4101_v14 = vld [vmem:[%s14107_s4 + $0x38] sm:$0xff] }
 0x227   :  { %4039 = vmatpush2.msra.mxu1 %v7377_v51  ;;  %3895 = vmatpush2.msra.mxu0 %v7325_v0  ;;  %v4100_v51 = vld [vmem:[%s14107_s4 + $0x30] sm:$0xff]  ;;  %v7415_v0 = vld [vmem:[%s14107_s4 + $0x220] sm:$0xff] }
 0x228   :  { %4041 = vmatmul.mubr.f32.vlgmr.msra.gmra.mxu1 %v3828_v63  ;;  %4381 = vmatprep.subr.mxu1 %v4125_v44  ;;  %v7414_v44 = vld [vmem:[%s14107_s4 + $0x218] sm:$0xff] }
 0x229   :  { %3896 = vmatprep.subr.mxu0 %v7324_v48  ;;  %7402 = vmatprep.mubr.msk.f32.mxu1 %vm1185_vm1, %v10853_v35  ;;  %v4098_v48 = vld [vmem:[%s14107_s4 + $0x20] sm:$0xff] }
 0x22a   :  { %4382 = vmatpush1.msra.mxu1 %v4124_v6  ;;  %3897 = vmatpush2.msra.mxu0 %v7323_v22  ;;  %v7412_v6 = vld [vmem:[%s14107_s4 + $0x208] sm:$0xff]  ;;  %v4096_v22 = vld [vmem:[%s14107_s4 + $0x10] sm:$0xff] }
 0x22b   :  { %4383 = vmatprep.subr.mxu1 %v4123_v62  ;;  %3898 = vmatprep.subr.mxu0 %v7322_v57  ;;  %v7411_v62 = vld [vmem:[%s14107_s4 + $0x200] sm:$0xff]  ;;  %v4095_v57 = vld [vmem:[%s14107_s4 + $0x8] sm:$0xff] }
 0x22c   :  { %4384 = vmatpush1.msra.mxu1 %v4122_v41  ;;  %3899 = vmatpush2.msra.mxu0 %v7321_v15  ;;  %v7410_v41 = vld [vmem:[%s14107_s4 + $0x1f8] sm:$0xff]  ;;  %v4094_v15 = vld [vmem:[%s14107_s4] sm:$0xff] }
 0x22d   :  { %4047 = vmatmul.mubr.f32.gmra.mxu1 %v11166_v53  ;;  %4385 = vmatprep.subr.mxu1 %v4121_v20  ;;  %v7409_v20 = vld [vmem:[%s14107_s4 + $0x1f0] sm:$0xff] }
 0x22e   :  { %3900 = vmatprep.subr.mxu0 %v7320_v30  ;;  %4386 = vmatpush1.msra.mxu1 %v4120_v25  ;;  %v7408_v30 = vld [vmem:[%s14107_s4 + $0x1e8] sm:$0xff]  ;;  %v4148_v25 = vld [vmem:[%s14107_s4 + $0x1b0] sm:$0xff] }
 0x22f   :  { %7461 = vmatprep.mubr.msk.f32.mxu1 %vm1185_vm1, %v11225_v33  ;;  %3901 = vmatpush2.msra.mxu0 %v7319_v2  ;;  %v7407_v2 = vld [vmem:[%s14107_s4 + $0x1e0] sm:$0xff] }
 0x230   :  { %4387 = vmatprep.subr.mxu1 %v4119_v3  ;;  %3903 = vmatmul.mubr.f32.vlgmr.msra.gmra.mxu0 %v3828_v63  ;;  %v4097_v63 = vld [vmem:[%s14107_s4 + $0x18] sm:$0xff]  ;;  %v4147_v3 = vld [vmem:[%s14107_s4 + $0x1a8] sm:$0xff] }
 0x231   :  { %4289 = vmatprep.subr.mxu0 %v7434_v34  ;;  %4388 = vmatpush1.msra.mxu1 %v4118_v42  ;;  %v7406_v34 = vld [vmem:[%s14107_s4 + $0x1d8] sm:$0xff]  ;;  %v4146_v42 = vld [vmem:[%s14107_s4 + $0x1a0] sm:$0xff] }
 0x232   :  { %7344 = vmatprep.mubr.msk.f32.mxu0 %vm1185_vm1, %v10853_v35  ;;  %4290 = vmatpush1.msra.mxu0 %v7433_v16  ;;  %v7429_v35 = vld [vmem:[%s14107_s4 + $0x290] sm:$0xff] }
 0x233   :  { %4389 = vmatprep.subr.mxu1 %v4117_v58  ;;  %4291 = vmatprep.subr.mxu0 %v7432_v47  ;;  %v7405_v16 = vld [vmem:[%s14107_s4 + $0x1d0] sm:$0xff]  ;;  %v7404_v58 = vld [vmem:[%s14107_s4 + $0x1c8] sm:$0xff] }
 0x234   :  { %4390 = vmatpush1.msra.mxu1 %v4116_v31  ;;  %4292 = vmatpush1.msra.mxu0 %v7431_v23  ;;  %v4144_v47 = vld [vmem:[%s14107_s4 + $0x190] sm:$0xff]  ;;  %v7403_v31 = vld [vmem:[%s14107_s4 + $0x1c0] sm:$0xff]  ;;  %v4143_v23 = vld [vmem:[%s14107_s4 + $0x188] sm:$0xff] }
 0x235   :  { %4391 = vmatprep.subr.mxu1 %v4115_v29  ;;  %3909 = vmatmul.mubr.f32.gmra.mxu0 %v11166_v53  ;;  %v7416_v53 = vld [vmem:[%s14107_s4 + $0x228] sm:$0xff]  ;;  %v7458_v29 = vld [vmem:[%s14107_s4 + $0x378] sm:$0xff] }
 0x236   :  { %4293 = vmatprep.subr.mxu0 %v7430_v24  ;;  %4392 = vmatpush1.msra.mxu1 %v4114_v12  ;;  %v7457_v24 = vld [vmem:[%s14107_s4 + $0x370] sm:$0xff]  ;;  %v4141_v12 = vld [vmem:[%s14107_s4 + $0x178] sm:$0xff] }
 0x237   :  { %4294 = vmatpush1.msra.mxu0 %v7429_v35  ;;  %7459 = vmatprep.mubr.msk.f32.mxu0 %vm1185_vm1, %v11275_v28  ;;  %v7456_v35 = vld [vmem:[%s14107_s4 + $0x368] sm:$0xff] }
 0x238   :  { %4393 = vmatprep.subr.mxu1 %v4113_v19  ;;  %4295 = vmatprep.subr.mxu0 %v7428_v32  ;;  %v4140_v19 = vld [vmem:[%s14107_s4 + $0x170] sm:$0xff]  ;;  %v7455_v32 = vld [vmem:[%s14107_s4 + $0x360] sm:$0xff] }
 0x239   :  { %4394 = vmatpush1.msra.mxu1 %v4112_v52  ;;  %4296 = vmatpush1.msra.mxu0 %v7427_v17  ;;  %v4139_v52 = vld [vmem:[%s14107_s4 + $0x168] sm:$0xff]  ;;  %v7454_v17 = vld [vmem:[%s14107_s4 + $0x358] sm:$0xff] }
 0x23a   :  { %4395 = vmatprep.subr.mxu1 %v4111_v7  ;;  %4297 = vmatprep.subr.mxu0 %v7426_v40  ;;  %v4138_v7 = vld [vmem:[%s14107_s4 + $0x160] sm:$0xff]  ;;  %v7453_v40 = vld [vmem:[%s14107_s4 + $0x350] sm:$0xff] }
 0x23b   :  { %4396 = vmatpush1.msra.mxu1 %v4110_v39  ;;  %4298 = vmatpush1.msra.mxu0 %v7425_v21  ;;  %v4137_v39 = vld [vmem:[%s14107_s4 + $0x158] sm:$0xff]  ;;  %v7452_v21 = vld [vmem:[%s14107_s4 + $0x348] sm:$0xff] }
 0x23c   :  { %4397 = vmatprep.subr.mxu1 %v4109_v43  ;;  %4299 = vmatprep.subr.mxu0 %v7424_v54  ;;  %v4136_v43 = vld [vmem:[%s14107_s4 + $0x150] sm:$0xff]  ;;  %v7451_v54 = vld [vmem:[%s14107_s4 + $0x340] sm:$0xff] }
 0x23d   :  { %4398 = vmatpush1.msra.mxu1 %v4108_v55  ;;  %4300 = vmatpush1.msra.mxu0 %v7423_v61  ;;  %v4135_v55 = vld [vmem:[%s14107_s4 + $0x148] sm:$0xff]  ;;  %v7450_v61 = vld [vmem:[%s14107_s4 + $0x338] sm:$0xff] }
 0x23e   :  { %4399 = vmatprep.subr.mxu1 %v4107_v50  ;;  %4301 = vmatprep.subr.mxu0 %v7422_v9  ;;  %v4134_v50 = vld [vmem:[%s14107_s4 + $0x140] sm:$0xff]  ;;  %v7449_v9 = vld [vmem:[%s14107_s4 + $0x330] sm:$0xff] }
 0x23f   :  { %4400 = vmatpush1.msra.mxu1 %v4106_v8  ;;  %4302 = vmatpush1.msra.mxu0 %v7421_v36  ;;  %v4133_v8 = vld [vmem:[%s14107_s4 + $0x138] sm:$0xff]  ;;  %v7448_v36 = vld [vmem:[%s14107_s4 + $0x328] sm:$0xff] }
 0x240   :  { %4401 = vmatprep.subr.mxu1 %v4105_v1  ;;  %4303 = vmatprep.subr.mxu0 %v7420_v5  ;;  %v4132_v1 = vld [vmem:[%s14107_s4 + $0x130] sm:$0xff]  ;;  %v7447_v5 = vld [vmem:[%s14107_s4 + $0x320] sm:$0xff] }
 0x241   :  { %4402 = vmatpush1.msra.mxu1 %v4104_v4  ;;  %4304 = vmatpush1.msra.mxu0 %v7419_v37  ;;  %v4131_v4 = vld [vmem:[%s14107_s4 + $0x128] sm:$0xff]  ;;  %v7446_v37 = vld [vmem:[%s14107_s4 + $0x318] sm:$0xff] }
 0x242   :  { %4403 = vmatprep.subr.mxu1 %v4103_v38  ;;  %4305 = vmatprep.subr.mxu0 %v7418_v46  ;;  %v4090_v38 = vld [vmem:[#allocation3 + $0x10] sm:$0xc0] }
 0x243   :  { %4404 = vmatpush1.msra.mxu1 %v4102_v13  ;;  %4306 = vmatpush1.msra.mxu0 %v7417_v26  ;;  %v4130_v46 = vld [vmem:[%s14107_s4 + $0x120] sm:$0xff]  ;;  %v7445_v13 = vld [vmem:[%s14107_s4 + $0x310] sm:$0xff] }
 0x244   :  { %4405 = vmatprep.subr.mxu1 %v4101_v14  ;;  %4307 = vmatprep.subr.mxu0 %v7416_v53  ;;  %v11513_v26 = vld [vmem:[#allocation3 + $0x20] sm:$0xff]  ;;  %v4129_v14 = vld [vmem:[%s14107_s4 + $0x118] sm:$0xff]  ;;  %v7444_v53 = vld [vmem:[%s14107_s4 + $0x308] sm:$0xff] }
 0x245   :  { %4406 = vmatpush1.msra.mxu1 %v4100_v51  ;;  %4308 = vmatpush1.msra.mxu0 %v7415_v0  ;;  %v4128_v51 = vld [vmem:[%s14107_s4 + $0x110] sm:$0xff]  ;;  %v7443_v0 = vld [vmem:[%s14107_s4 + $0x300] sm:$0xff] }
 0x246   :  { %4407 = vmatprep.subr.mxu1 %v4099_v10  ;;  %4309 = vmatprep.subr.mxu0 %v7414_v44  ;;  %v4127_v10 = vld [vmem:[%s14107_s4 + $0x108] sm:$0xff]  ;;  %v7442_v44 = vld [vmem:[%s14107_s4 + $0x2f8] sm:$0xff] }
 0x247   :  { %4408 = vmatpush1.msra.mxu1 %v4098_v48  ;;  %4310 = vmatpush1.msra.mxu0 %v7413_v60  ;;  %v4369_v48 = vrot.slane %v4090_v38, 6  ;;  %v11534_v60 = vrot.slane %v11513_v26, 6  ;;  %v7482_v38 = vld [vmem:[%s14108_s5 + $0x258] sm:$0xff] }
 0x248   :  { %4409 = vmatprep.subr.mxu1 %v4097_v63  ;;  %4311 = vmatprep.subr.mxu0 %v7412_v6  ;;  %v4126_v63 = vld [vmem:[%s14107_s4 + $0x100] sm:$0xff]  ;;  %v7441_v6 = vld [vmem:[%s14107_s4 + $0x2f0] sm:$0xff] }
 0x249   :  { %4410 = vmatpush1.msra.mxu1 %v4096_v22  ;;  %4312 = vmatpush1.msra.mxu0 %v7411_v62  ;;  %v4181_v22 = vld [vmem:[%s14108_s5 + $0xf8] sm:$0xff]  ;;  %v7440_v62 = vld [vmem:[%s14107_s4 + $0x2e8] sm:$0xff] }
 0x24a   :  { %4411 = vmatprep.subr.mxu1 %v4095_v57  ;;  %4313 = vmatprep.subr.mxu0 %v7410_v41  ;;  %v11550_v57 = vsel %vm4368_vm9, %v4369_v48, %v11534_v60  ;;  %v4180_v41 = vld [vmem:[%s14108_s5 + $0xf0] sm:$0xff] }
 0x24b   :  { %4412 = vmatpush1.msra.mxu1 %v4094_v15  ;;  %4314 = vmatpush1.msra.mxu0 %v7409_v20  ;;  %v7439_v15 = vld [vmem:[%s14107_s4 + $0x2e0] sm:$0xff]  ;;  %v4179_v20 = vld [vmem:[%s14108_s5 + $0xe8] sm:$0xff]  ;;  %v7477_v48 = vld [vmem:[%s14108_s5 + $0x230] sm:$0xff] }
 0x24c   :  { %4421 = vmatprep.subr.mxu1 %v4149_v11  ;;  %4315 = vmatprep.subr.mxu0 %v7408_v30  ;;  %v7438_v11 = vld [vmem:[%s14107_s4 + $0x2d8] sm:$0xff]  ;;  %v4206_v30 = vld [vmem:[#allocation3 + $0x10] sm:$0x80] }
 0x24d   :  { %4422 = vmatpush2.msra.mxu1 %v4148_v25  ;;  %4316 = vmatpush1.msra.mxu0 %v7407_v2  ;;  %v4178_v25 = vld [vmem:[%s14108_s5 + $0xe0] sm:$0xff]  ;;  %v7437_v2 = vld [vmem:[%s14107_s4 + $0x2d0] sm:$0xff] }
 0x24e   :  { %4423 = vmatprep.subr.mxu1 %v4147_v3  ;;  %4317 = vmatprep.subr.mxu0 %v7406_v34  ;;  %v4177_v3 = vld [vmem:[%s14108_s5 + $0xd8] sm:$0xff]  ;;  %v4209_v34 = vld [vmem:[#allocation3 + $0x38] sm:$0x1] }
 0x24f   :  { %4424 = vmatpush2.msra.mxu1 %v4146_v42  ;;  %4318 = vmatpush1.msra.mxu0 %v7405_v16  ;;  %v7436_v42 = vld [vmem:[%s14107_s4 + $0x2c8] sm:$0xff]  ;;  %v4176_v16 = vld [vmem:[%s14108_s5 + $0xd0] sm:$0xff] }
 0x250   :  { %4425 = vmatprep.subr.mxu1 %v4145_v56  ;;  %4319 = vmatprep.subr.mxu0 %v7404_v58  ;;  %v4273_v56 = vrot.slane %v4206_v30, 7  ;;  %v4274_v58 = vrot.slane %v11513_v26, 7  ;;  %v4161_v26 = vld [vmem:[%s14108_s5 + $0x58] sm:$0xff] }
 0x251   :  { %4426 = vmatpush2.msra.mxu1 %v4144_v47  ;;  %4320 = vmatpush1.msra.mxu0 %v7403_v31  ;;  %v7435_v47 = vld [vmem:[%s14107_s4 + $0x2c0] sm:$0xff]  ;;  %v4175_v31 = vld [vmem:[%s14108_s5 + $0xc8] sm:$0xff]  ;;  %v4153_v30 = vld [vmem:[%s14108_s5 + $0x18] sm:$0xff] }
 0x252   :  { %4427 = vmatprep.subr.mxu1 %v4143_v23  ;;  %4329 = vmatprep.subr.mxu0 %v7458_v29  ;;  %v4281_v23 = vrot.slane %v4209_v34, 7  ;;  %v4208_v29 = vld [vmem:[#allocation3 + $0x30] sm:$0x1]  ;;  %v4151_v34 = vld [vmem:[%s14108_s5 + $0x8] sm:$0xff] }
 0x253   :  { %4428 = vmatpush2.msra.mxu1 %v4142_v45  ;;  %4330 = vmatpush2.msra.mxu0 %v7457_v24  ;;  %v7494_v45 = vld [vmem:[%s14108_s5 + $0x2b8] sm:$0xff]  ;;  %v4174_v24 = vld [vmem:[%s14108_s5 + $0xc0] sm:$0xff] }
 0x254   :  { %4429 = vmatprep.subr.mxu1 %v4141_v12  ;;  %4331 = vmatprep.subr.mxu0 %v7456_v35  ;;  %v11599_v12 = vsel %vm4272_vm10, %v4273_v56, %v4274_v58  ;;  %v7493_v35 = vld [vmem:[%s14108_s5 + $0x2b0] sm:$0xff] }
 0x255   :  { %4430 = vmatpush2.msra.mxu1 %v4140_v19  ;;  %4332 = vmatpush2.msra.mxu0 %v7455_v32  ;;  %v4173_v19 = vld [vmem:[%s14108_s5 + $0xb8] sm:$0xff]  ;;  %v7492_v32 = vld [vmem:[%s14108_s5 + $0x2a8] sm:$0xff]  ;;  %v7469_v56 = vld [vmem:[%s14108_s5 + $0x1f0] sm:$0xff] }
 0x256   :  { %4431 = vmatprep.subr.mxu1 %v4139_v52  ;;  %4333 = vmatprep.subr.mxu0 %v7454_v17  ;;  %v11614_v52 = vsel %vm4272_vm10, %v4277_v18, %v4281_v23  ;;  %v4172_v17 = vld [vmem:[%s14108_s5 + $0xb0] sm:$0xff]  ;;  %v4170_v18 = vld [vmem:[%s14108_s5 + $0xa0] sm:$0xff] }
 0x257   :  { %4432 = vmatpush2.msra.mxu1 %v4138_v7  ;;  %4334 = vmatpush2.msra.mxu0 %v7453_v40  ;;  %v7491_v7 = vld [vmem:[%s14108_s5 + $0x2a0] sm:$0xff]  ;;  %v4171_v40 = vld [vmem:[%s14108_s5 + $0xa8] sm:$0xff] }
 0x258   :  { %4433 = vmatprep.subr.mxu1 %v4137_v39  ;;  %4335 = vmatprep.subr.mxu0 %v7452_v21  ;;  %v7489_v21 = vld [vmem:[%s14108_s5 + $0x290] sm:$0xff]  ;;  %v7467_v23 = vld [vmem:[%s14108_s5 + $0x1e0] sm:$0xff] }
 0x259   :  { %4434 = vmatpush2.msra.mxu1 %v4136_v43  ;;  %4336 = vmatpush2.msra.mxu0 %v7451_v54  ;;  %v4169_v43 = vld [vmem:[%s14108_s5 + $0x98] sm:$0xff]  ;;  %v7488_v54 = vld [vmem:[%s14108_s5 + $0x288] sm:$0xff] }
 0x25a   :  { %4435 = vmatprep.subr.mxu1 %v4135_v55  ;;  %4337 = vmatprep.subr.mxu0 %v7450_v61  ;;  %v4168_v55 = vld [vmem:[%s14108_s5 + $0x90] sm:$0xff]  ;;  %v7487_v61 = vld [vmem:[%s14108_s5 + $0x280] sm:$0xff] }
 0x25b   :  { %4436 = vmatpush2.msra.mxu1 %v4134_v50  ;;  %4338 = vmatpush2.msra.mxu0 %v7449_v9  ;;  %v4167_v50 = vld [vmem:[%s14108_s5 + $0x88] sm:$0xff]  ;;  %v7486_v9 = vld [vmem:[%s14108_s5 + $0x278] sm:$0xff] }
 0x25c   :  { %4437 = vmatprep.subr.mxu1 %v4133_v8  ;;  %4339 = vmatprep.subr.mxu0 %v7448_v36  ;;  %v4166_v8 = vld [vmem:[%s14108_s5 + $0x80] sm:$0xff]  ;;  %v7485_v36 = vld [vmem:[%s14108_s5 + $0x270] sm:$0xff] }
 0x25d   :  { %4438 = vmatpush2.msra.mxu1 %v4132_v1  ;;  %4340 = vmatpush2.msra.mxu0 %v7447_v5  ;;  %v7484_v1 = vld [vmem:[%s14108_s5 + $0x268] sm:$0xff]  ;;  %v4164_v5 = vld [vmem:[%s14108_s5 + $0x70] sm:$0xff] }
 0x25e   :  { %4439 = vmatprep.subr.mxu1 %v4131_v4  ;;  %4341 = vmatprep.subr.mxu0 %v7446_v37  ;;  %v7483_v4 = vld [vmem:[%s14108_s5 + $0x260] sm:$0xff]  ;;  %v4163_v37 = vld [vmem:[%s14108_s5 + $0x68] sm:$0xff] }
 0x25f   :  { %4440 = vmatpush2.msra.mxu1 %v4130_v46  ;;  %4342 = vmatpush2.msra.mxu0 %v7445_v13  ;;  %v4162_v46 = vld [vmem:[%s14108_s5 + $0x60] sm:$0xff]  ;;  %v7481_v13 = vld [vmem:[%s14108_s5 + $0x250] sm:$0xff] }
 0x260   :  { %4441 = vmatprep.subr.mxu1 %v4129_v14  ;;  %4343 = vmatprep.subr.mxu0 %v7444_v53  ;;  %v7480_v14 = vld [vmem:[%s14108_s5 + $0x248] sm:$0xff]  ;;  %v4160_v53 = vld [vmem:[%s14108_s5 + $0x50] sm:$0xff] }
 0x261   :  { %4442 = vmatpush2.msra.mxu1 %v4128_v51  ;;  %4344 = vmatpush2.msra.mxu0 %v7443_v0  ;;  %v7479_v51 = vld [vmem:[%s14108_s5 + $0x240] sm:$0xff]  ;;  %v4159_v0 = vld [vmem:[%s14108_s5 + $0x48] sm:$0xff] }
 0x262   :  { %4443 = vmatprep.subr.mxu1 %v4127_v10  ;;  %4345 = vmatprep.subr.mxu0 %v7442_v44  ;;  %v7478_v10 = vld [vmem:[%s14108_s5 + $0x238] sm:$0xff]  ;;  %v4158_v44 = vld [vmem:[%s14108_s5 + $0x40] sm:$0xff] }
 0x263   :  { %4444 = vmatpush2.msra.mxu1 %v4126_v63  ;;  %4346 = vmatpush2.msra.mxu0 %v7441_v6  ;;  %v4157_v63 = vld [vmem:[%s14108_s5 + $0x38] sm:$0xff]  ;;  %v7476_v6 = vld [vmem:[%s14108_s5 + $0x228] sm:$0xff] }
 0x264   :  { %4446 = vmatmul.mubr.f32.vlgmr.msra.gmra.mxu1 %v11550_v57  ;;  %4591 = vmatprep.subr.mxu1 %v4181_v22  ;;  %v4156_v22 = vld [vmem:[%s14108_s5 + $0x30] sm:$0xff] }
 0x265   :  { %4347 = vmatprep.subr.mxu0 %v7440_v62  ;;  %7462 = vmatprep.mubr.msk.f32.mxu1 %vm1185_vm1, %v11208_v49  ;;  %v7475_v62 = vld [vmem:[%s14108_s5 + $0x220] sm:$0xff] }
 0x266   :  { %4592 = vmatpush1.msra.mxu1 %v4180_v41  ;;  %4348 = vmatpush2.msra.mxu0 %v7439_v15  ;;  %v4155_v41 = vld [vmem:[%s14108_s5 + $0x28] sm:$0xff]  ;;  %v7474_v15 = vld [vmem:[%s14108_s5 + $0x218] sm:$0xff] }
 0x267   :  { %4593 = vmatprep.subr.mxu1 %v4179_v20  ;;  %4349 = vmatprep.subr.mxu0 %v7438_v11  ;;  %v4154_v20 = vld [vmem:[%s14108_s5 + $0x20] sm:$0xff]  ;;  %v7473_v11 = vld [vmem:[%s14108_s5 + $0x210] sm:$0xff] }
 0x268   :  { %4594 = vmatpush1.msra.mxu1 %v4178_v25  ;;  %4350 = vmatpush2.msra.mxu0 %v7437_v2  ;;  %v7472_v25 = vld [vmem:[%s14108_s5 + $0x208] sm:$0xff]  ;;  %v4152_v2 = vld [vmem:[%s14108_s5 + $0x10] sm:$0xff] }
 0x269   :  { %4452 = vmatmul.mubr.f32.gmra.mxu1 %v11534_v60  ;;  %4595 = vmatprep.subr.mxu1 %v4177_v3  ;;  %v7471_v3 = vld [vmem:[%s14108_s5 + $0x200] sm:$0xff] }
 0x26a   :  { %4351 = vmatprep.subr.mxu0 %v7436_v42  ;;  %4596 = vmatpush1.msra.mxu1 %v4176_v16  ;;  %v7470_v42 = vld [vmem:[%s14108_s5 + $0x1f8] sm:$0xff]  ;;  %v4150_v16 = vld [vmem:[%s14108_s5] sm:$0xff] }
 0x26b   :  { %7521 = vmatprep.mubr.msk.f32.mxu1 %vm1185_vm1, %v11225_v33  ;;  %4352 = vmatpush2.msra.mxu0 %v7435_v47  ;;  %v4279_v33 = vrot.slane %v4208_v29, 7  ;;  %v7468_v47 = vld [vmem:[%s14108_s5 + $0x1e8] sm:$0xff] }
 0x26c   :  { %4597 = vmatprep.subr.mxu1 %v4175_v31  ;;  %4354 = vmatmul.mubr.f32.vlgmr.msra.gmra.mxu0 %v11599_v12  ;;  %v4204_v31 = vld [vmem:[%s14108_s5 + $0x1b0] sm:$0xff]  ;;  %v4203_v29 = vld [vmem:[%s14108_s5 + $0x1a8] sm:$0xff] }
 0x26d   :  { %4514 = vmatprep.subr.mxu0 %v7494_v45  ;;  %4598 = vmatpush1.msra.mxu1 %v4174_v24  ;;  %v11634_v39 = vsel %vm4272_vm10, %v4274_v58, %v4279_v33  ;;  %v4205_v58 = vld [vmem:[%s14108_s5 + $0x1b8] sm:$0xff]  ;;  %v4202_v24 = vld [vmem:[%s14108_s5 + $0x1a0] sm:$0xff]  ;;  %v4200_v33 = vld [vmem:[%s14108_s5 + $0x190] sm:$0xff] }
 0x26e   :  { %7460 = vmatprep.mubr.msk.f32.mxu0 %vm1185_vm1, %v11614_v52  ;;  %4515 = vmatpush1.msra.mxu0 %v7493_v35  ;;  %v7466_v45 = vld [vmem:[%s14108_s5 + $0x1d8] sm:$0xff]  ;;  %v7465_v35 = vld [vmem:[%s14108_s5 + $0x1d0] sm:$0xff] }
 0x26f   :  { %4599 = vmatprep.subr.mxu1 %v4173_v19  ;;  %4516 = vmatprep.subr.mxu0 %v7492_v32  ;;  %v4201_v19 = vld [vmem:[%s14108_s5 + $0x198] sm:$0xff]  ;;  %v7464_v32 = vld [vmem:[%s14108_s5 + $0x1c8] sm:$0xff] }
 0x270   :  { %4600 = vmatpush1.msra.mxu1 %v4172_v17  ;;  %4517 = vmatpush1.msra.mxu0 %v7491_v7  ;;  %v7463_v17 = vld [vmem:[%s14108_s5 + $0x1c0] sm:$0xff]  ;;  %v4199_v7 = vld [vmem:[%s14108_s5 + $0x188] sm:$0xff] }
 0x271   :  { %4601 = vmatprep.subr.mxu1 %v4171_v40  ;;  %4360 = vmatmul.mubr.f32.gmra.mxu0 %v11634_v39  ;;  %v7518_v40 = vld [vmem:[%s14108_s5 + $0x378] sm:$0xff] }
 0x272   :  { %4518 = vmatprep.subr.mxu0 %v7490_v27  ;;  %4602 = vmatpush1.msra.mxu1 %v4170_v18  ;;  %v4198_v27 = vld [vmem:[%s14108_s5 + $0x180] sm:$0xff]  ;;  %v7517_v18 = vld [vmem:[%s14108_s5 + $0x370] sm:$0xff] }
 0x273   :  { %4519 = vmatpush1.msra.mxu0 %v7489_v21  ;;  %7519 = vmatprep.mubr.msk.f32.mxu0 %vm1185_vm1, %v11275_v28  ;;  %v4165_v28 = vld [vmem:[%s14108_s5 + $0x78] sm:$0xff] }
 0x274   :  { %4603 = vmatprep.subr.mxu1 %v4169_v43  ;;  %4520 = vmatprep.subr.mxu0 %v7488_v54  ;;  %v4197_v21 = vld [vmem:[%s14108_s5 + $0x178] sm:$0xff]  ;;  %v7516_v43 = vld [vmem:[%s14108_s5 + $0x368] sm:$0xff]  ;;  %v4196_v54 = vld [vmem:[%s14108_s5 + $0x170] sm:$0xff] }
 0x275   :  { %4604 = vmatpush1.msra.mxu1 %v4168_v55  ;;  %4521 = vmatpush1.msra.mxu0 %v7487_v61  ;;  %v7515_v55 = vld [vmem:[%s14108_s5 + $0x360] sm:$0xff]  ;;  %v4195_v61 = vld [vmem:[%s14108_s5 + $0x168] sm:$0xff] }
 0x276   :  { %4605 = vmatprep.subr.mxu1 %v4167_v50  ;;  %4522 = vmatprep.subr.mxu0 %v7486_v9  ;;  %v7514_v50 = vld [vmem:[%s14108_s5 + $0x358] sm:$0xff]  ;;  %v4194_v9 = vld [vmem:[%s14108_s5 + $0x160] sm:$0xff] }
 0x277   :  { %4606 = vmatpush1.msra.mxu1 %v4166_v8  ;;  %4523 = vmatpush1.msra.mxu0 %v7485_v36  ;;  %v7513_v8 = vld [vmem:[%s14108_s5 + $0x350] sm:$0xff]  ;;  %v4193_v36 = vld [vmem:[%s14108_s5 + $0x158] sm:$0xff] }
 0x278   :  { %4607 = vmatprep.subr.mxu1 %v4165_v28  ;;  %4524 = vmatprep.subr.mxu0 %v7484_v1  ;;  %v7512_v28 = vld [vmem:[%s14108_s5 + $0x348] sm:$0xff]  ;;  %v4192_v1 = vld [vmem:[%s14108_s5 + $0x150] sm:$0xff] }
 0x279   :  { %4608 = vmatpush1.msra.mxu1 %v4164_v5  ;;  %4525 = vmatpush1.msra.mxu0 %v7483_v4  ;;  %v7511_v5 = vld [vmem:[%s14108_s5 + $0x340] sm:$0xff]  ;;  %v4191_v4 = vld [vmem:[%s14108_s5 + $0x148] sm:$0xff] }
 0x27a   :  { %4609 = vmatprep.subr.mxu1 %v4163_v37  ;;  %4526 = vmatprep.subr.mxu0 %v7482_v38  ;;  %v7510_v37 = vld [vmem:[%s14108_s5 + $0x338] sm:$0xff]  ;;  %v4190_v38 = vld [vmem:[%s14108_s5 + $0x140] sm:$0xff] }
 0x27b   :  { %4610 = vmatpush1.msra.mxu1 %v4162_v46  ;;  %4527 = vmatpush1.msra.mxu0 %v7481_v13  ;;  %v7509_v46 = vld [vmem:[%s14108_s5 + $0x330] sm:$0xff]  ;;  %v4189_v13 = vld [vmem:[%s14108_s5 + $0x138] sm:$0xff] }
 0x27c   :  { %4611 = vmatprep.subr.mxu1 %v4161_v26  ;;  %4528 = vmatprep.subr.mxu0 %v7480_v14  ;;  %v7508_v26 = vld [vmem:[%s14108_s5 + $0x328] sm:$0xff]  ;;  %v4188_v14 = vld [vmem:[%s14108_s5 + $0x130] sm:$0xff] }
 0x27d   :  { %4612 = vmatpush1.msra.mxu1 %v4160_v53  ;;  %4529 = vmatpush1.msra.mxu0 %v7479_v51  ;;  %v7507_v53 = vld [vmem:[%s14108_s5 + $0x320] sm:$0xff]  ;;  %v4187_v51 = vld [vmem:[%s14108_s5 + $0x128] sm:$0xff] }
 0x27e   :  { %4613 = vmatprep.subr.mxu1 %v4159_v0  ;;  %4530 = vmatprep.subr.mxu0 %v7478_v10  ;;  %v7506_v0 = vld [vmem:[%s14108_s5 + $0x318] sm:$0xff]  ;;  %v4186_v10 = vld [vmem:[%s14108_s5 + $0x120] sm:$0xff] }
 0x27f   :  { %4614 = vmatpush1.msra.mxu1 %v4158_v44  ;;  %4531 = vmatpush1.msra.mxu0 %v7477_v48  ;;  %v7505_v44 = vld [vmem:[%s14108_s5 + $0x310] sm:$0xff]  ;;  %v4185_v48 = vld [vmem:[%s14108_s5 + $0x118] sm:$0xff] }
 0x280   :  { %4615 = vmatprep.subr.mxu1 %v4157_v63  ;;  %4532 = vmatprep.subr.mxu0 %v7476_v6  ;;  %v7504_v63 = vld [vmem:[%s14108_s5 + $0x308] sm:$0xff]  ;;  %v4184_v6 = vld [vmem:[%s14108_s5 + $0x110] sm:$0xff] }
 0x281   :  { %4616 = vmatpush1.msra.mxu1 %v4156_v22  ;;  %4533 = vmatpush1.msra.mxu0 %v7475_v62  ;;  %v7503_v22 = vld [vmem:[%s14108_s5 + $0x300] sm:$0xff]  ;;  %v4183_v62 = vld [vmem:[%s14108_s5 + $0x108] sm:$0xff] }
 0x282   :  { %4617 = vmatprep.subr.mxu1 %v4155_v41  ;;  %4534 = vmatprep.subr.mxu0 %v7474_v15  ;;  %v7502_v41 = vld [vmem:[%s14108_s5 + $0x2f8] sm:$0xff]  ;;  %v4182_v15 = vld [vmem:[%s14108_s5 + $0x100] sm:$0xff] }
 0x283   :  { %4618 = vmatpush1.msra.mxu1 %v4154_v20  ;;  %4535 = vmatpush1.msra.mxu0 %v7473_v11  ;;  %v7501_v20 = vld [vmem:[%s14108_s5 + $0x2f0] sm:$0xff]  ;;  %v7612_v11 = vld [vmem:[%s14108_s5 + $0x478] sm:$0xff] }
 0x284   :  { %4619 = vmatprep.subr.mxu1 %v4153_v30  ;;  %4536 = vmatprep.subr.mxu0 %v7472_v25  ;;  %v7500_v30 = vld [vmem:[%s14108_s5 + $0x2e8] sm:$0xff]  ;;  %v7611_v25 = vld [vmem:[%s14108_s5 + $0x470] sm:$0xff] }
 0x285   :  { %4620 = vmatpush1.msra.mxu1 %v4152_v2  ;;  %4537 = vmatpush1.msra.mxu0 %v7471_v3  ;;  %v7499_v2 = vld [vmem:[%s14108_s5 + $0x2e0] sm:$0xff]  ;;  %v7610_v3 = vld [vmem:[%s14108_s5 + $0x468] sm:$0xff] }
 0x286   :  { %4621 = vmatprep.subr.mxu1 %v4151_v34  ;;  %4538 = vmatprep.subr.mxu0 %v7470_v42  ;;  %v7498_v34 = vld [vmem:[%s14108_s5 + $0x2d8] sm:$0xff]  ;;  %v7609_v42 = vld [vmem:[%s14108_s5 + $0x460] sm:$0xff] }
 0x287   :  { %4622 = vmatpush1.msra.mxu1 %v4150_v16  ;;  %4539 = vmatpush1.msra.mxu0 %v7469_v56  ;;  %v7608_v16 = vld [vmem:[%s14108_s5 + $0x458] sm:$0xff]  ;;  %v7607_v56 = vld [vmem:[%s14108_s5 + $0x450] sm:$0xff] }
 0x288   :  { %4631 = vmatprep.subr.mxu1 %v4205_v58  ;;  %4540 = vmatprep.subr.mxu0 %v7468_v47  ;;  %v7495_v58 = vld [vmem:[%s14108_s5 + $0x2c0] sm:$0xff]  ;;  %v7606_v47 = vld [vmem:[%s14108_s5 + $0x448] sm:$0xff] }
 0x289   :  { %4632 = vmatpush2.msra.mxu1 %v4204_v31  ;;  %4541 = vmatpush1.msra.mxu0 %v7467_v23  ;;  %v7554_v31 = vld [vmem:[%s14107_s4 + $0x478] sm:$0xff]  ;;  %v7605_v23 = vld [vmem:[%s14108_s5 + $0x440] sm:$0xff] }
 0x28a   :  { %4633 = vmatprep.subr.mxu1 %v4203_v29  ;;  %4542 = vmatprep.subr.mxu0 %v7466_v45  ;;  %v8043_v29 = vld [vmem:[#allocation3 + $0x28] sm:$0xff] }
 0x28b   :  { %4634 = vmatpush2.msra.mxu1 %v4202_v24  ;;  %4543 = vmatpush1.msra.mxu0 %v7465_v35  ;;  %v7604_v45 = vld [vmem:[%s14108_s5 + $0x438] sm:$0xff]  ;;  %v7552_v24 = vld [vmem:[%s14107_s4 + $0x468] sm:$0xff]  ;;  %v7603_v35 = vld [vmem:[%s14108_s5 + $0x430] sm:$0xff] }
 0x28c   :  { %4635 = vmatprep.subr.mxu1 %v4201_v19  ;;  %4544 = vmatprep.subr.mxu0 %v7464_v32  ;;  %v7551_v19 = vld [vmem:[%s14107_s4 + $0x460] sm:$0xff]  ;;  %v7550_v32 = vld [vmem:[%s14107_s4 + $0x458] sm:$0xff] }
 0x28d   :  { %4636 = vmatpush2.msra.mxu1 %v4200_v33  ;;  %4545 = vmatpush1.msra.mxu0 %v7463_v17  ;;  %v7601_v33 = vld [vmem:[%s14108_s5 + $0x420] sm:$0xff]  ;;  %v7600_v17 = vld [vmem:[%s14108_s5 + $0x418] sm:$0xff] }
 0x28e   :  { %4637 = vmatprep.subr.mxu1 %v4199_v7  ;;  %4554 = vmatprep.subr.mxu0 %v7518_v40  ;;  %v7548_v7 = vld [vmem:[%s14107_s4 + $0x448] sm:$0xff]  ;;  %v7599_v40 = vld [vmem:[%s14108_s5 + $0x410] sm:$0xff] }
 0x28f   :  { %4638 = vmatpush2.msra.mxu1 %v4198_v27  ;;  %4555 = vmatpush2.msra.mxu0 %v7517_v18  ;;  %v7547_v27 = vld [vmem:[%s14107_s4 + $0x440] sm:$0xff]  ;;  %v7546_v18 = vld [vmem:[%s14107_s4 + $0x438] sm:$0xff] }
 0x290   :  { %4639 = vmatprep.subr.mxu1 %v4197_v21  ;;  %4556 = vmatprep.subr.mxu0 %v7516_v43  ;;  %v12006_v21 = vpop.f32.mrf.mxu1  ;;  %v7597_v43 = vld [vmem:[%s14108_s5 + $0x400] sm:$0xff] }
 0x291   :  { %4640 = vmatpush2.msra.mxu1 %v4196_v54  ;;  %4557 = vmatpush2.msra.mxu0 %v7515_v55  ;;  %v7545_v54 = vld [vmem:[%s14107_s4 + $0x430] sm:$0xff]  ;;  %v7596_v55 = vld [vmem:[%s14108_s5 + $0x3f8] sm:$0xff] }
 0x292   :  { %4641 = vmatprep.subr.mxu1 %v4195_v61  ;;  %4558 = vmatprep.subr.mxu0 %v7514_v50  ;;  %v7544_v61 = vld [vmem:[%s14107_s4 + $0x428] sm:$0xff]  ;;  %v7595_v50 = vld [vmem:[%s14108_s5 + $0x3f0] sm:$0xff] }
 0x293   :  { %4642 = vmatpush2.msra.mxu1 %v4194_v9  ;;  %4559 = vmatpush2.msra.mxu0 %v7513_v8  ;;  %v7543_v9 = vld [vmem:[%s14107_s4 + $0x420] sm:$0xff]  ;;  %v7594_v8 = vld [vmem:[%s14108_s5 + $0x3e8] sm:$0xff] }
 0x294   :  { %4643 = vmatprep.subr.mxu1 %v4193_v36  ;;  %4560 = vmatprep.subr.mxu0 %v7512_v28  ;;  %v7542_v36 = vld [vmem:[%s14107_s4 + $0x418] sm:$0xff]  ;;  %v12032_v28 = vpop.f32.mrf.mxu1 }
 0x295   :  { %4644 = vmatpush2.msra.mxu1 %v4192_v1  ;;  %4561 = vmatpush2.msra.mxu0 %v7511_v5  ;;  %v7593_v1 = vld [vmem:[%s14108_s5 + $0x3e0] sm:$0xff]  ;;  %v7541_v5 = vld [vmem:[%s14107_s4 + $0x410] sm:$0xff] }
 0x296   :  { %4645 = vmatprep.subr.mxu1 %v4191_v4  ;;  %4562 = vmatprep.subr.mxu0 %v7510_v37  ;;  %v7592_v4 = vld [vmem:[%s14108_s5 + $0x3d8] sm:$0xff]  ;;  %v7540_v37 = vld [vmem:[%s14107_s4 + $0x408] sm:$0xff] }
 0x297   :  { %4646 = vmatpush2.msra.mxu1 %v4190_v38  ;;  %4563 = vmatpush2.msra.mxu0 %v7509_v46  ;;  %v7591_v38 = vld [vmem:[%s14108_s5 + $0x3d0] sm:$0xff]  ;;  %v7539_v46 = vld [vmem:[%s14107_s4 + $0x400] sm:$0xff] }
 0x298   :  { %4647 = vmatprep.subr.mxu1 %v4189_v13  ;;  %4564 = vmatprep.subr.mxu0 %v7508_v26  ;;  %v7590_v13 = vld [vmem:[%s14108_s5 + $0x3c8] sm:$0xff]  ;;  %v7538_v26 = vld [vmem:[%s14107_s4 + $0x3f8] sm:$0xff] }
 0x299   :  { %4648 = vmatpush2.msra.mxu1 %v4188_v14  ;;  %4565 = vmatpush2.msra.mxu0 %v7507_v53  ;;  %v12058_v14 = vpop.f32.mrf.mxu1  ;;  %v12060_v53 = vpop.f32.mrf.mxu0 }
 0x29a   :  { %4649 = vmatprep.subr.mxu1 %v4187_v51  ;;  %4566 = vmatprep.subr.mxu0 %v7506_v0  ;;  %v7589_v51 = vld [vmem:[%s14108_s5 + $0x3c0] sm:$0xff]  ;;  %v7537_v0 = vld [vmem:[%s14107_s4 + $0x3f0] sm:$0xff] }
 0x29b   :  { %4650 = vmatpush2.msra.mxu1 %v4186_v10  ;;  %4567 = vmatpush2.msra.mxu0 %v7505_v44  ;;  %v7588_v10 = vld [vmem:[%s14108_s5 + $0x3b8] sm:$0xff]  ;;  %v7536_v44 = vld [vmem:[%s14107_s4 + $0x3e8] sm:$0xff] }
 0x29c   :  { %4651 = vmatprep.subr.mxu1 %v4185_v48  ;;  %4568 = vmatprep.subr.mxu0 %v7504_v63  ;;  %v7587_v48 = vld [vmem:[%s14108_s5 + $0x3b0] sm:$0xff]  ;;  %v7535_v63 = vld [vmem:[%s14107_s4 + $0x3e0] sm:$0xff] }
 0x29d   :  { %4652 = vmatpush2.msra.mxu1 %v4184_v6  ;;  %4569 = vmatpush2.msra.mxu0 %v7503_v22  ;;  %v7586_v6 = vld [vmem:[%s14108_s5 + $0x3a8] sm:$0xff]  ;;  %v7534_v22 = vld [vmem:[%s14107_s4 + $0x3d8] sm:$0xff] }
 0x29e   :  { %4653 = vmatprep.subr.mxu1 %v4183_v62  ;;  %4570 = vmatprep.subr.mxu0 %v7502_v41  ;;  %v12086_v62 = vpop.f32.mrf.mxu1  ;;  %v12088_v41 = vpop.f32.mrf.mxu0 }
 0x29f   :  { %4654 = vmatpush2.msra.mxu1 %v4182_v15  ;;  %4571 = vmatpush2.msra.mxu0 %v7501_v20  ;;  %v7585_v15 = vld [vmem:[%s14108_s5 + $0x3a0] sm:$0xff]  ;;  %v7533_v20 = vld [vmem:[%s14107_s4 + $0x3d0] sm:$0xff] }
 0x2a0   :  { %4656 = vmatmul.mubr.f32.vlgmr.msra.gmra.mxu1 %v11550_v57  ;;  %4868 = vmatprep.subr.mxu1 %v7612_v11  ;;  %v7497_v57 = vld [vmem:[%s14108_s5 + $0x2d0] sm:$0xff]  ;;  %v7584_v11 = vld [vmem:[%s14108_s5 + $0x398] sm:$0xff] }
 0x2a1   :  { %4572 = vmatprep.subr.mxu0 %v7500_v30  ;;  %7522 = vmatprep.mubr.msk.f32.mxu1 %vm1185_vm1, %v11208_v49  ;;  %v7496_v49 = vld [vmem:[%s14108_s5 + $0x2c8] sm:$0xff] }
 0x2a2   :  { %4869 = vmatpush1.msra.mxu1 %v7611_v25  ;;  %4573 = vmatpush2.msra.mxu0 %v7499_v2  ;;  %v7532_v30 = vld [vmem:[%s14107_s4 + $0x3c8] sm:$0xff]  ;;  %v12102_v25 = vpop.f32.mrf.mxu1  ;;  %v7583_v2 = vld [vmem:[%s14108_s5 + $0x390] sm:$0xff] }
 0x2a3   :  { %4870 = vmatprep.subr.mxu1 %v7610_v3  ;;  %4574 = vmatprep.subr.mxu0 %v7498_v34  ;;  %v7531_v3 = vld [vmem:[%s14107_s4 + $0x3c0] sm:$0xff]  ;;  %v7582_v34 = vld [vmem:[%s14108_s5 + $0x388] sm:$0xff] }
 0x2a4   :  { %4871 = vmatpush1.msra.mxu1 %v7609_v42  ;;  %4575 = vmatpush2.msra.mxu0 %v7497_v57  ;;  %v7530_v42 = vld [vmem:[%s14107_s4 + $0x3b8] sm:$0xff]  ;;  %v12116_v57 = vpop.f32.mrf.mxu0 }
 0x2a5   :  { %4662 = vmatmul.mubr.f32.gmra.mxu1 %v11534_v60  ;;  %4872 = vmatprep.subr.mxu1 %v7608_v16  ;;  %v7553_v60 = vld [vmem:[%s14107_s4 + $0x470] sm:$0xff]  ;;  %v7581_v16 = vld [vmem:[%s14108_s5 + $0x380] sm:$0xff] }
 0x2a6   :  { %4576 = vmatprep.subr.mxu0 %v7496_v49  ;;  %4873 = vmatpush1.msra.mxu1 %v7607_v56  ;;  %v7529_v49 = vld [vmem:[%s14107_s4 + $0x3b0] sm:$0xff]  ;;  %v7636_v56 = vld [vmem:[%s14108_s5 + $0x538] sm:$0xff] }
 0x2a7   :  { %7637 = vmatprep.mubr.msk.f32.mxu1 %vm1185_vm1, %v8043_v29  ;;  %4577 = vmatpush2.msra.mxu0 %v7495_v58  ;;  %v7528_v58 = vld [vmem:[%s14107_s4 + $0x3a8] sm:$0xff] }
 0x2a8   :  { %4874 = vmatprep.subr.mxu1 %v7606_v47  ;;  %4579 = vmatmul.mubr.f32.vlgmr.msra.gmra.mxu0 %v11599_v12  ;;  %v7602_v12 = vld [vmem:[%s14108_s5 + $0x428] sm:$0xff]  ;;  %v12130_v47 = vpop.f32.mrf.mxu1 }
 0x2a9   :  { %4731 = vmatprep.subr.mxu0 %v7554_v31  ;;  %4875 = vmatpush1.msra.mxu1 %v7605_v23  ;;  %v7635_v31 = vld [vmem:[%s14108_s5 + $0x530] sm:$0xff]  ;;  %v7527_v23 = vld [vmem:[%s14107_s4 + $0x3a0] sm:$0xff] }
 0x2aa   :  { %7520 = vmatprep.mubr.msk.f32.mxu0 %vm1185_vm1, %v11614_v52  ;;  %4732 = vmatpush1.msra.mxu0 %v7553_v60  ;;  %v7549_v52 = vld [vmem:[%s14107_s4 + $0x450] sm:$0xff]  ;;  %v7526_v60 = vld [vmem:[%s14107_s4 + $0x398] sm:$0xff] }
 0x2ab   :  { %4876 = vmatprep.subr.mxu1 %v7604_v45  ;;  %4733 = vmatprep.subr.mxu0 %v7552_v24  ;;  %v12144_v45 = vpop.f32.mrf.mxu0  ;;  %v7633_v24 = vld [vmem:[%s14108_s5 + $0x520] sm:$0xff] }
 0x2ac   :  { %4877 = vmatpush1.msra.mxu1 %v7603_v35  ;;  %4734 = vmatpush1.msra.mxu0 %v7551_v19  ;;  %v7525_v35 = vld [vmem:[%s14107_s4 + $0x390] sm:$0xff]  ;;  %v7632_v19 = vld [vmem:[%s14108_s5 + $0x518] sm:$0xff] }
 0x2ad   :  { %4878 = vmatprep.subr.mxu1 %v7602_v12  ;;  %4585 = vmatmul.mubr.f32.gmra.mxu0 %v11634_v39  ;;  %v7598_v39 = vld [vmem:[%s14108_s5 + $0x408] sm:$0xff] }
 0x2ae   :  { %4735 = vmatprep.subr.mxu0 %v7550_v32  ;;  %4879 = vmatpush1.msra.mxu1 %v7601_v33  ;;  %v7524_v12 = vld [vmem:[%s14107_s4 + $0x388] sm:$0xff]  ;;  %v12158_v32 = vpop.f32.mrf.mxu1  ;;  %v12160_v33 = vpop.f32.mrf.mxu0 }
 0x2af   :  { %4736 = vmatpush1.msra.mxu0 %v7549_v52  ;;  %7579 = vmatprep.mubr.msk.f32.mxu0 %vm1185_vm1, %v8043_v29  ;;  %v7634_v29 = vld [vmem:[%s14108_s5 + $0x528] sm:$0xff]  ;;  %v7631_v52 = vld [vmem:[%s14108_s5 + $0x510] sm:$0xff] }
 0x2b0   :  { %4880 = vmatprep.subr.mxu1 %v7600_v17  ;;  %4737 = vmatprep.subr.mxu0 %v7548_v7  ;;  %v7523_v17 = vld [vmem:[%s14107_s4 + $0x380] sm:$0xff]  ;;  %v7630_v7 = vld [vmem:[%s14108_s5 + $0x508] sm:$0xff] }
 0x2b1   :  { %4881 = vmatpush1.msra.mxu1 %v7599_v40  ;;  %4738 = vmatpush1.msra.mxu0 %v7547_v27  ;;  %v7578_v40 = vld [vmem:[%s14107_s4 + $0x538] sm:$0xff]  ;;  %v7629_v27 = vld [vmem:[%s14108_s5 + $0x500] sm:$0xff] }
 0x2b2   :  { %4882 = vmatprep.subr.mxu1 %v7598_v39  ;;  %4739 = vmatprep.subr.mxu0 %v7546_v18  ;;  %v7577_v39 = vld [vmem:[%s14107_s4 + $0x530] sm:$0xff]  ;;  %v7628_v18 = vld [vmem:[%s14108_s5 + $0x4f8] sm:$0xff] }
 0x2b3   :  { %4883 = vmatpush1.msra.mxu1 %v7597_v43  ;;  %4740 = vmatpush1.msra.mxu0 %v7545_v54  ;;  %v7576_v43 = vld [vmem:[%s14107_s4 + $0x528] sm:$0xff]  ;;  %v12186_v54 = vpop.f32.mrf.mxu1 }
 0x2b4   :  { %4884 = vmatprep.subr.mxu1 %v7596_v55  ;;  %4741 = vmatprep.subr.mxu0 %v7544_v61  ;;  %v12188_v55 = vpop.f32.mrf.mxu0  ;;  %v7627_v61 = vld [vmem:[%s14108_s5 + $0x4f0] sm:$0xff] }
 0x2b5   :  { %4885 = vmatpush1.msra.mxu1 %v7595_v50  ;;  %4742 = vmatpush1.msra.mxu0 %v7543_v9  ;;  %v7575_v50 = vld [vmem:[%s14107_s4 + $0x520] sm:$0xff]  ;;  %v7626_v9 = vld [vmem:[%s14108_s5 + $0x4e8] sm:$0xff] }
 0x2b6   :  { %4886 = vmatprep.subr.mxu1 %v7594_v8  ;;  %4743 = vmatprep.subr.mxu0 %v7542_v36  ;;  %v7574_v8 = vld [vmem:[%s14107_s4 + $0x518] sm:$0xff]  ;;  %v12202_v36 = vpop.f32.mrf.mxu1 }
 0x2b7   :  { %4887 = vmatpush1.msra.mxu1 %v7593_v1  ;;  %4744 = vmatpush1.msra.mxu0 %v7541_v5  ;;  %v7625_v1 = vld [vmem:[%s14108_s5 + $0x4e0] sm:$0xff]  ;;  %v7573_v5 = vld [vmem:[%s14107_s4 + $0x510] sm:$0xff] }
 0x2b8   :  { %4888 = vmatprep.subr.mxu1 %v7592_v4  ;;  %4745 = vmatprep.subr.mxu0 %v7540_v37  ;;  %v7624_v4 = vld [vmem:[%s14108_s5 + $0x4d8] sm:$0xff]  ;;  %v7572_v37 = vld [vmem:[%s14107_s4 + $0x508] sm:$0xff] }
 0x2b9   :  { %4889 = vmatpush1.msra.mxu1 %v7591_v38  ;;  %4746 = vmatpush1.msra.mxu0 %v7539_v46  ;;  %v12216_v38 = vpop.f32.mrf.mxu0  ;;  %v7623_v46 = vld [vmem:[%s14108_s5 + $0x4d0] sm:$0xff] }
 0x2ba   :  { %4890 = vmatprep.subr.mxu1 %v7590_v13  ;;  %4747 = vmatprep.subr.mxu0 %v7538_v26  ;;  %v7571_v13 = vld [vmem:[%s14107_s4 + $0x500] sm:$0xff]  ;;  %v7622_v26 = vld [vmem:[%s14108_s5 + $0x4c8] sm:$0xff] }
 0x2bb   :  { %4891 = vmatpush1.msra.mxu1 %v7589_v51  ;;  %4748 = vmatpush1.msra.mxu0 %v7537_v0  ;;  %v7570_v51 = vld [vmem:[%s14107_s4 + $0x4f8] sm:$0xff]  ;;  %v12230_v0 = vpop.f32.mrf.mxu1 }
 0x2bc   :  { %4892 = vmatprep.subr.mxu1 %v7588_v10  ;;  %4749 = vmatprep.subr.mxu0 %v7536_v44  ;;  %v7621_v10 = vld [vmem:[%s14108_s5 + $0x4c0] sm:$0xff]  ;;  %v7569_v44 = vld [vmem:[%s14107_s4 + $0x4f0] sm:$0xff] }
 0x2bd   :  { %4893 = vmatpush1.msra.mxu1 %v7587_v48  ;;  %4750 = vmatpush1.msra.mxu0 %v7535_v63  ;;  %v7620_v48 = vld [vmem:[%s14108_s5 + $0x4b8] sm:$0xff]  ;;  %v7568_v63 = vld [vmem:[%s14107_s4 + $0x4e8] sm:$0xff] }
 0x2be   :  { %4894 = vmatprep.subr.mxu1 %v7586_v6  ;;  %4751 = vmatprep.subr.mxu0 %v7534_v22  ;;  %v12244_v6 = vpop.f32.mrf.mxu0  ;;  %v7619_v22 = vld [vmem:[%s14108_s5 + $0x4b0] sm:$0xff] }
 0x2bf   :  { %4895 = vmatpush1.msra.mxu1 %v7585_v15  ;;  %4752 = vmatpush1.msra.mxu0 %v7533_v20  ;;  %v7567_v15 = vld [vmem:[%s14107_s4 + $0x4e0] sm:$0xff]  ;;  %v7618_v20 = vld [vmem:[%s14108_s5 + $0x4a8] sm:$0xff] }
 0x2c0   :  { %4896 = vmatprep.subr.mxu1 %v7584_v11  ;;  %4753 = vmatprep.subr.mxu0 %v7532_v30  ;;  %v7566_v11 = vld [vmem:[%s14107_s4 + $0x4d8] sm:$0xff]  ;;  %v12258_v30 = vpop.f32.mrf.mxu1 }
 0x2c1   :  { %4897 = vmatpush1.msra.mxu1 %v7583_v2  ;;  %4754 = vmatpush1.msra.mxu0 %v7531_v3  ;;  %v12260_v2 = vpop.f32.mrf.mxu0  ;;  %v7617_v3 = vld [vmem:[%s14108_s5 + $0x4a0] sm:$0xff] }
 0x2c2   :  { %4898 = vmatprep.subr.mxu1 %v7582_v34  ;;  %4755 = vmatprep.subr.mxu0 %v7530_v42  ;;  %v7565_v34 = vld [vmem:[%s14107_s4 + $0x4d0] sm:$0xff]  ;;  %v7616_v42 = vld [vmem:[%s14108_s5 + $0x498] sm:$0xff] }
 0x2c3   :  { %4899 = vmatpush1.msra.mxu1 %v7581_v16  ;;  %4756 = vmatpush1.msra.mxu0 %v7529_v49  ;;  %v7564_v16 = vld [vmem:[%s14107_s4 + $0x4c8] sm:$0xff]  ;;  %v7615_v49 = vld [vmem:[%s14108_s5 + $0x490] sm:$0xff] }
 0x2c4   :  { %4908 = vmatprep.subr.mxu1 %v7636_v56  ;;  %4757 = vmatprep.subr.mxu0 %v7528_v58  ;;  %v7563_v56 = vld [vmem:[%s14107_s4 + $0x4c0] sm:$0xff]  ;;  %v7614_v58 = vld [vmem:[%s14108_s5 + $0x488] sm:$0xff] }
 0x2c5   :  { %4909 = vmatpush2.msra.mxu1 %v7635_v31  ;;  %4758 = vmatpush1.msra.mxu0 %v7527_v23  ;;  %v7562_v31 = vld [vmem:[%s14107_s4 + $0x4b8] sm:$0xff]  ;;  %v12286_v23 = vpop.f32.mrf.mxu1 }
 0x2c6   :  { %4910 = vmatprep.subr.mxu1 %v7634_v29  ;;  %4759 = vmatprep.subr.mxu0 %v7526_v60  ;;  %v12288_v29 = vpop.f32.mrf.mxu0  ;;  %v7613_v60 = vld [vmem:[%s14108_s5 + $0x480] sm:$0xff] }
 0x2c7   :  { %4911 = vmatpush2.msra.mxu1 %v7633_v24  ;;  %4760 = vmatpush1.msra.mxu0 %v7525_v35  ;;  %v7561_v24 = vld [vmem:[%s14107_s4 + $0x4b0] sm:$0xff]  ;;  %v7728_v35 = vld [vmem:[%s14108_s5 + $0x638] sm:$0xff] }
 0x2c8   :  { %4912 = vmatprep.subr.mxu1 %v7632_v19  ;;  %4761 = vmatprep.subr.mxu0 %v7524_v12  ;;  %v12299_v19 = vpop.f32.mrf.mxu1  ;;  %v7560_v12 = vld [vmem:[%s14107_s4 + $0x4a8] sm:$0xff] }
 0x2c9   :  { %4913 = vmatpush2.msra.mxu1 %v7631_v52  ;;  %4762 = vmatpush1.msra.mxu0 %v7523_v17  ;;  %v4950_v52 = vld [vmem:[#allocation3 + $0x28] sm:$0xfe]  ;;  %v7727_v17 = vld [vmem:[%s14108_s5 + $0x630] sm:$0xff] }
 0x2ca   :  { %4914 = vmatprep.subr.mxu1 %v7630_v7  ;;  %4771 = vmatprep.subr.mxu0 %v7578_v40  ;;  %v7559_v7 = vld [vmem:[%s14107_s4 + $0x4a0] sm:$0xff]  ;;  %v4952_v40 = vld [vmem:[#allocation3 + $0x38] sm:$0x7] }
 0x2cb   :  { %4915 = vmatpush2.msra.mxu1 %v7629_v27  ;;  %4772 = vmatpush2.msra.mxu0 %v7577_v39  ;;  %v12310_v27 = vpop.f32.mrf.mxu0  ;;  %v8044_v39 = vld [vmem:[#allocation3 + $0x20] sm:$0xff] }
 0x2cc   :  { %4916 = vmatprep.subr.mxu1 %v7628_v18  ;;  %4773 = vmatprep.subr.mxu0 %v7576_v43  ;;  %v4669_v18 = vld [vmem:[#allocation3 + $0x38] sm:$0x3] }
 0x2cd   :  { %4917 = vmatpush2.msra.mxu1 %v7627_v61  ;;  %4774 = vmatpush2.msra.mxu0 %v7575_v50  ;;  %v7726_v43 = vld [vmem:[%s14108_s5 + $0x628] sm:$0xff]  ;;  %v7558_v61 = vld [vmem:[%s14107_s4 + $0x498] sm:$0xff]  ;;  %v7725_v50 = vld [vmem:[%s14108_s5 + $0x620] sm:$0xff] }
 0x2ce   :  { %4918 = vmatprep.subr.mxu1 %v7626_v9  ;;  %4775 = vmatprep.subr.mxu0 %v7574_v8  ;;  %v7557_v9 = vld [vmem:[%s14107_s4 + $0x490] sm:$0xff]  ;;  %v12325_v8 = vpop.f32.mrf.mxu1 }
 0x2cf   :  { %4919 = vmatpush2.msra.mxu1 %v7625_v1  ;;  %4776 = vmatpush2.msra.mxu0 %v7573_v5  ;;  %v7724_v1 = vld [vmem:[%s14108_s5 + $0x618] sm:$0xff]  ;;  %v5016_v5 = vrot.slane %v4950_v52, 1  ;;  %v7664_v52 = vld [vmem:[%s14107_s4 + $0x608] sm:$0xff] }
 0x2d0   :  { %4920 = vmatprep.subr.mxu1 %v7624_v4  ;;  %4777 = vmatprep.subr.mxu0 %v7572_v37  ;;  %v12330_v4 = vrot.slane %v4952_v40, 1  ;;  %v7556_v37 = vld [vmem:[%s14107_s4 + $0x488] sm:$0xff]  ;;  %v2948_v40 = vadd.f32 %v12032_v28, %v12088_v41  ;;  %v4057_v28 = vld [vmem:[%s14109_s6] sm:$0x3] }
 0x2d1   :  { %4921 = vmatpush2.msra.mxu1 %v7623_v46  ;;  %4778 = vmatpush2.msra.mxu0 %v7571_v13  ;;  %v7723_v46 = vld [vmem:[%s14108_s5 + $0x610] sm:$0xff]  ;;  %v12338_v13 = vpop.f32.mrf.mxu0 }
 0x2d2   :  { %4922 = vmatprep.subr.mxu1 %v7622_v26  ;;  %4779 = vmatprep.subr.mxu0 %v7570_v51  ;;  %v4668_v26 = vld [vmem:[#allocation3 + $0x30] sm:$0x3] }
 0x2d3   :  { %4923 = vmatpush2.msra.mxu1 %v7621_v10  ;;  %4780 = vmatpush2.msra.mxu0 %v7569_v44  ;;  %v7555_v51 = vld [vmem:[%s14107_s4 + $0x480] sm:$0xff]  ;;  %v7722_v10 = vld [vmem:[%s14108_s5 + $0x608] sm:$0xff]  ;;  %v12346_v44 = vpop.f32.mrf.mxu1 }
 0x2d4   :  { %4924 = vmatprep.subr.mxu1 %v7620_v48  ;;  %4781 = vmatprep.subr.mxu0 %v7568_v63  ;;  %v12348_v48 = vpop.f32.mrf.mxu0  ;;  %v5018_v63 = vsel %vm2783_vm4, %v5016_v5, %v12330_v4 }
 0x2d5   :  { %4925 = vmatpush2.msra.mxu1 %v7619_v22  ;;  %4782 = vmatpush2.msra.mxu0 %v7567_v15  ;;  %v7670_v22 = vld [vmem:[%s14107_s4 + $0x638] sm:$0xff]  ;;  %v7721_v15 = vld [vmem:[%s14108_s5 + $0x600] sm:$0xff] }
 0x2d6   :  { %4926 = vmatprep.subr.mxu1 %v7618_v20  ;;  %4783 = vmatprep.subr.mxu0 %v7566_v11  ;;  %v7669_v20 = vld [vmem:[%s14107_s4 + $0x630] sm:$0xff]  ;;  %v7720_v11 = vld [vmem:[%s14108_s5 + $0x5f8] sm:$0xff] }
 0x2d7   :  { %4927 = vmatpush2.msra.mxu1 %v7617_v3  ;;  %4784 = vmatpush2.msra.mxu0 %v7565_v34  ;;  %v7668_v3 = vld [vmem:[%s14107_s4 + $0x628] sm:$0xff]  ;;  %v7719_v34 = vld [vmem:[%s14108_s5 + $0x5f0] sm:$0xff] }
 0x2d8   :  { %4928 = vmatprep.subr.mxu1 %v7616_v42  ;;  %4785 = vmatprep.subr.mxu0 %v7564_v16  ;;  %v7667_v42 = vld [vmem:[%s14107_s4 + $0x620] sm:$0xff]  ;;  %v12374_v16 = vpop.f32.mrf.mxu1 }
 0x2d9   :  { %4929 = vmatpush2.msra.mxu1 %v7615_v49  ;;  %4786 = vmatpush2.msra.mxu0 %v7563_v56  ;;  %v12376_v49 = vpop.f32.mrf.mxu0  ;;  %v7718_v56 = vld [vmem:[%s14108_s5 + $0x5e8] sm:$0xff] }
 0x2da   :  { %4930 = vmatprep.subr.mxu1 %v7614_v58  ;;  %4787 = vmatprep.subr.mxu0 %v7562_v31  ;;  %v7666_v58 = vld [vmem:[%s14107_s4 + $0x618] sm:$0xff]  ;;  %v7717_v31 = vld [vmem:[%s14108_s5 + $0x5e0] sm:$0xff] }
 0x2db   :  { %4931 = vmatpush2.msra.mxu1 %v7613_v60  ;;  %4788 = vmatpush2.msra.mxu0 %v7561_v24  ;;  %v7665_v60 = vld [vmem:[%s14107_s4 + $0x610] sm:$0xff] }
 0x2dc   :  { %4933 = vmatmul.mubr.f32.vlgmr.msra.gmra.mxu1 %v8044_v39  ;;  %5162 = vmatprep.subr.mxu1 %v7728_v35  ;;  %v3157_v35 = vadd.f32 %v12102_v25, %v12160_v33  ;;  %v7715_v25 = vld [vmem:[%s14108_s5 + $0x5d0] sm:$0xff]  ;;  %v7663_v33 = vld [vmem:[%s14107_s4 + $0x600] sm:$0xff] }
 0x2dd   :  { %4789 = vmatprep.subr.mxu0 %v7560_v12  ;;  %7638 = vmatprep.mubr.msk.f32.mxu1 %vm1185_vm1, %v4669_v18  ;;  %v7716_v12 = vld [vmem:[%s14108_s5 + $0x5d8] sm:$0xff] }
 0x2de   :  { %5163 = vmatpush1.msra.mxu1 %v7727_v17  ;;  %4790 = vmatpush2.msra.mxu0 %v7559_v7  ;;  %v2946_v17 = vadd.f32 %v12006_v21, %v12060_v53  ;;  %v12401_v7 = vpop.f32.mrf.mxu0  ;;  %v3460_v21 = vadd.f32 %v12202_v36, %v3157_v35  ;;  %v7714_v53 = vld [vmem:[%s14108_s5 + $0x5c8] sm:$0xff]  ;;  %v3163_v36 = vadd.f32 %v12158_v32, %v12216_v38 }
 0x2df   :  { %5164 = vmatprep.subr.mxu1 %v7726_v43  ;;  %4791 = vmatprep.subr.mxu0 %v7558_v61  ;;  %v7713_v43 = vld [vmem:[%s14108_s5 + $0x5c0] sm:$0xff]  ;;  %v7661_v61 = vld [vmem:[%s14107_s4 + $0x5f0] sm:$0xff]  ;;  %v3165_v32 = vadd.f32 %v12186_v54, %v12244_v6  ;;  %v3323_v38 = vadd.f32 %v12288_v29, %v2948_v40  ;;  %v7710_v6 = vld [vmem:[%s14108_s5 + $0x5a8] sm:$0xff] }
 0x2e0   :  { %5165 = vmatpush1.msra.mxu1 %v7725_v50  ;;  %4792 = vmatpush2.msra.mxu0 %v7557_v9  ;;  %v14280_v9 = vld [vmem:[#allocation11_spill] sm:$0xff] }
 0x2e1   :  { %4939 = vmatmul.mubr.f32.gmra.mxu1 %v4668_v26  ;;  %5166 = vmatprep.subr.mxu1 %v7724_v1  ;;  %v12455_v1 = vrot.slane %v4057_v28, %v14280_v9  ;;  %v7658_v29 = vld [vmem:[%s14107_s4 + $0x5d8] sm:$0xff] }
 0x2e2   :  { %4793 = vmatprep.subr.mxu0 %v7556_v37  ;;  %5167 = vmatpush1.msra.mxu1 %v7723_v46 }
 0x2e3   :  { %7753 = vmatprep.mubr.msk.f32.mxu1 %vm1185_vm1, %v5018_v63  ;;  %4794 = vmatpush2.msra.mxu0 %v7555_v51  ;;  %v3463_v51 = vadd.f32 %v12286_v23, %v3165_v32  ;;  %v7656_v23 = vld [vmem:[%s14107_s4 + $0x5c8] sm:$0xff]  ;;  %v7700_v32 = vld [vmem:[%s14108_s5 + $0x558] sm:$0xff] }
 0x2e4   :  { %5168 = vmatprep.subr.mxu1 %v7722_v10  ;;  %4796 = vmatmul.mubr.f32.vlgmr.msra.gmra.mxu0 %v8044_v39  ;;  %v3159_v39 = vadd.f32 %v12130_v47, %v12188_v55  ;;  %v2952_v47 = vadd.f32 %v12058_v14, %v12116_v57  ;;  %v2954_v55 = vadd.f32 %v12086_v62, %v12144_v45  ;;  %v7712_v62 = vld [vmem:[%s14108_s5 + $0x5b8] sm:$0xff]  ;;  %v7660_v45 = vld [vmem:[%s14107_s4 + $0x5e8] sm:$0xff]  ;;  %v7657_v10 = vld [vmem:[%s14107_s4 + $0x5d0] sm:$0xff] }
 0x2e5   :  { %5025 = vmatprep.subr.mxu0 %v7670_v22  ;;  %5169 = vmatpush1.msra.mxu1 %v7721_v15  ;;  %v3322_v14 = vadd.f32 %v12260_v2, %v2946_v17  ;;  %v3757_v57 = vadd.f32 %v12299_v19, %v3460_v21  ;;  %v7711_v2 = vld [vmem:[%s14108_s5 + $0x5b0] sm:$0xff]  ;;  %v7659_v19 = vld [vmem:[%s14107_s4 + $0x5e0] sm:$0xff]  ;;  %v3620_v22 = vadd.f32 %v12376_v49, %v3323_v38  ;;  %v7648_v38 = vld [vmem:[%s14107_s4 + $0x588] sm:$0xff] }
 0x2e6   :  { %7580 = vmatprep.mubr.msk.f32.mxu0 %vm1185_vm1, %v4669_v18  ;;  %5026 = vmatpush1.msra.mxu0 %v7669_v20  ;;  %v7662_v18 = vld [vmem:[%s14107_s4 + $0x5f8] sm:$0xff]  ;;  %v3461_v50 = vadd.f32 %v12230_v0, %v3159_v39  ;;  %v3616_v0 = vpop.f32.mrf.mxu0  ;;  %v7655_v49 = vld [vmem:[%s14107_s4 + $0x5c0] sm:$0xff] }
 0x2e7   :  { %5170 = vmatprep.subr.mxu1 %v7720_v11  ;;  %5027 = vmatprep.subr.mxu0 %v7668_v3  ;;  %v3619_v54 = vadd.f32 %v12348_v48, %v3322_v14  ;;  %v12474_v48 = vrot.slane %v4057_v28, %v14269_v59  ;;  %v3324_v11 = vadd.f32 %v12310_v27, %v2952_v47  ;;  %v7706_v27 = vld [vmem:[%s14108_s5 + $0x588] sm:$0xff] }
 0x2e8   :  { %5171 = vmatpush1.msra.mxu1 %v7719_v34  ;;  %5028 = vmatpush1.msra.mxu0 %v7667_v42  ;;  %v4042_v24 = vpop.f32.mrf.mxu1  ;;  %v3758_v5 = vadd.f32 %v12325_v8, %v3461_v50  ;;  %v7709_v8 = vld [vmem:[%s14108_s5 + $0x5a0] sm:$0xff]  ;;  %v3325_v3 = vadd.f32 %v12338_v13, %v2954_v55  ;;  %v7707_v42 = vld [vmem:[%s14108_s5 + $0x590] sm:$0xff]  ;;  %v7654_v13 = vld [vmem:[%s14107_s4 + $0x5b8] sm:$0xff] }
 0x2e9   :  { %5172 = vmatprep.subr.mxu1 %v7718_v56  ;;  %4802 = vmatmul.mubr.f32.gmra.mxu0 %v4668_v26  ;;  %v4053_v37 = vadd.f32 %v4042_v24, %v3757_v57  ;;  %v3462_v26 = vadd.f32 %v12258_v30, %v3163_v36  ;;  %v7708_v30 = vld [vmem:[%s14108_s5 + $0x598] sm:$0xff]  ;;  %v3760_v24 = vadd.f32 %v12374_v16, %v3463_v51  ;;  %v7652_v16 = vld [vmem:[%s14107_s4 + $0x5a8] sm:$0xff]  ;;  %v7701_v50 = vld [vmem:[%s14108_s5 + $0x560] sm:$0xff] }
 0x2ea   :  { %5029 = vmatprep.subr.mxu0 %v7666_v58  ;;  %5173 = vmatpush1.msra.mxu1 %v7717_v31  ;;  %v4044_v41 = vpop.f32.mrf.mxu1  ;;  %v3621_v35 = vadd.f32 %v12401_v7, %v3324_v11  ;;  %v3622_v21 = vadd.f32 %v3616_v0, %v3325_v3  ;;  %v7702_v47 = vld [vmem:[%s14108_s5 + $0x568] sm:$0xff]  ;;  %v7650_v55 = vld [vmem:[%s14107_s4 + $0x598] sm:$0xff]  ;;  %v7649_v57 = vld [vmem:[%s14107_s4 + $0x590] sm:$0xff] }
 0x2eb   :  { %5030 = vmatpush1.msra.mxu0 %v7665_v60  ;;  %7695 = vmatprep.mubr.msk.f32.mxu0 %vm1185_vm1, %v5018_v63  ;;  %v4054_v15 = vadd.f32 %v4044_v41, %v3758_v5  ;;  %v3759_v34 = vadd.f32 %v12346_v44, %v3462_v26  ;;  %v4073_v44 = vadd.f32 %v12455_v1, %v4053_v37  ;;  %v7697_v37 = vld [vmem:[%s14108_s5 + $0x540] sm:$0xff]  ;;  %v7748_v11 = vld [vmem:[%s14108_s5 + $0x6d8] sm:$0xff]  ;;  %v7640_v3 = vld [vmem:[%s14107_s4 + $0x548] sm:$0xff] }
 0x2ec   :  { %5174 = vmatprep.subr.mxu1 %v7716_v12  ;;  %5031 = vmatprep.subr.mxu0 %v7664_v52  ;;  %v7705_v12 = vld [vmem:[%s14108_s5 + $0x580] sm:$0xff]  ;;  %v7653_v52 = vld [vmem:[%s14107_s4 + $0x5b0] sm:$0xff] }
 0x2ed   :  { %5175 = vmatpush1.msra.mxu1 %v7715_v25  ;;  %5032 = vmatpush1.msra.mxu0 %v7663_v33  ;;  %v4048_v46 = vpop.f32.mrf.mxu1  ;;  %v7704_v25 = vld [vmem:[%s14108_s5 + $0x578] sm:$0xff]  ;;  %v4074_v7 = vadd.f32 %v12474_v48, %v4054_v15  ;;  %v7749_v15 = vld [vmem:[%s14108_s5 + $0x6e0] sm:$0xff] }
 0x2ee   :  { %5176 = vmatprep.subr.mxu1 %v7714_v53  ;;  %5033 = vmatprep.subr.mxu0 %v7662_v18  ;;  %v4055_v17 = vadd.f32 %v4048_v46, %v3759_v34  ;;  %v7703_v53 = vld [vmem:[%s14108_s5 + $0x570] sm:$0xff]  ;;  %v7651_v18 = vld [vmem:[%s14107_s4 + $0x5a0] sm:$0xff] }
 0x2ef   :  { %5177 = vmatpush1.msra.mxu1 %v7713_v43  ;;  %5034 = vmatpush1.msra.mxu0 %v7661_v61  ;;  %v4050_v58 = vpop.f32.mrf.mxu1  ;;  %v7645_v46 = vld [vmem:[%s14107_s4 + $0x570] sm:$0xff] }
 0x2f0   :  { %5178 = vmatprep.subr.mxu1 %v7712_v62  ;;  %5035 = vmatprep.subr.mxu0 %v7660_v45  ;;  %v3904_v63 = vpop.f32.mrf.mxu0  ;;  %v4056_v28 = vadd.f32 %v4050_v58, %v3760_v24  ;;  %v4075_v14 = vadd.f32 %v12455_v1, %v4055_v17  ;;  %v7747_v34 = vld [vmem:[%s14108_s5 + $0x6d0] sm:$0xff]  ;;  %v7692_v17 = vld [vmem:[%s14107_s4 + $0x6e8] sm:$0xff] }
 0x2f1   :  { %5179 = vmatpush1.msra.mxu1 %v7711_v2  ;;  %5036 = vmatpush1.msra.mxu0 %v7659_v19  ;;  %v3915_v20 = vadd.f32 %v3904_v63, %v3619_v54  ;;  %v7699_v2 = vld [vmem:[%s14108_s5 + $0x550] sm:$0xff]  ;;  %v7643_v63 = vld [vmem:[%s14107_s4 + $0x560] sm:$0xff] }
 0x2f2   :  { %5180 = vmatprep.subr.mxu1 %v7710_v6  ;;  %5037 = vmatprep.subr.mxu0 %v7658_v29  ;;  %v3906_v56 = vpop.f32.mrf.mxu0  ;;  %v4076_v19 = vadd.f32 %v12474_v48, %v4056_v28  ;;  %v7698_v6 = vld [vmem:[%s14108_s5 + $0x548] sm:$0xff]  ;;  %v7646_v29 = vld [vmem:[%s14107_s4 + $0x578] sm:$0xff] }
 0x2f3   :  { %5181 = vmatpush1.msra.mxu1 %v7709_v8  ;;  %5038 = vmatpush1.msra.mxu0 %v7657_v10  ;;  %v4069_v31 = vadd.f32 %v12455_v1, %v3915_v20  ;;  %v3916_v60 = vadd.f32 %v3906_v56, %v3620_v22  ;;  %v7752_v8 = vld [vmem:[%s14108_s5 + $0x6f8] sm:$0xff]  ;;  %v7644_v10 = vld [vmem:[%s14107_s4 + $0x568] sm:$0xff]  ;;  %v7641_v20 = vld [vmem:[%s14107_s4 + $0x550] sm:$0xff] }
 0x2f4   :  { %5182 = vmatprep.subr.mxu1 %v7708_v30  ;;  %5039 = vmatprep.subr.mxu0 %v7656_v23  ;;  %v7750_v22 = vld [vmem:[%s14108_s5 + $0x6e8] sm:$0xff]  ;;  %v7642_v23 = vld [vmem:[%s14107_s4 + $0x558] sm:$0xff] }
 0x2f5   :  { %5183 = vmatpush1.msra.mxu1 %v7707_v42  ;;  %5040 = vmatpush1.msra.mxu0 %v7655_v49  ;;  %v4077_v33 = vmax.f32 %v4069_v31, %v4073_v44  ;;  %v4070_v40 = vadd.f32 %v12474_v48, %v3916_v60  ;;  %v3910_v39 = vpop.f32.mrf.mxu0  ;;  %v7639_v42 = vld [vmem:[%s14107_s4 + $0x540] sm:$0xff]  ;;  %v7746_v49 = vld [vmem:[%s14108_s5 + $0x6c8] sm:$0xff]  ;;  %v7694_v56 = vld [vmem:[%s14107_s4 + $0x6f8] sm:$0xff] }
 0x2f6   :  { %5184 = vmatprep.subr.mxu1 %v7706_v27  ;;  %5041 = vmatprep.subr.mxu0 %v7654_v13  ;;  %v3917_v41 = vadd.f32 %v3910_v39, %v3621_v35  ;;  %v14281_v27 = vlaneseq  ;;  %v7745_v31 = vld [vmem:[%s14108_s5 + $0x6c0] sm:$0xff]  ;;  %v7693_v60 = vld [vmem:[%s14107_s4 + $0x6f0] sm:$0xff]  ;;  %v7742_v28 = vld [vmem:[%s14108_s5 + $0x6a8] sm:$0xff] }
 0x2f7   :  { %5185 = vmatpush1.msra.mxu1 %v7705_v12  ;;  %5042 = vmatpush1.msra.mxu0 %v7653_v52  ;;  %v4081_v36 = vmax.f32 %v4077_v33, 0.0  ;;  %v4078_v43 = vmax.f32 %v4070_v40, %v4074_v7  ;;  %v3912_v61 = vpop.f32.mrf.mxu0  ;;  %v7744_v52 = vld [vmem:[%s14108_s5 + $0x6b8] sm:$0xff]  ;;  %v7743_v33 = vld [vmem:[%s14108_s5 + $0x6b0] sm:$0xff] }
 0x2f8   :  { %5186 = vmatprep.subr.mxu1 %v7704_v25  ;;  %5043 = vmatprep.subr.mxu0 %v7652_v16  ;;  %v4071_v62 = vadd.f32 %v12455_v1, %v3917_v41  ;;  %v3918_v45 = vadd.f32 %v3912_v61, %v3622_v21  ;;  %v7647_v1 = vld [vmem:[%s14107_s4 + $0x580] sm:$0xff]  ;;  %vm12607_vm12 = vcmp.lt.s32.totalorder %v14281_v27, 160  ;;  %v7690_v41 = vld [vmem:[%s14107_s4 + $0x6d8] sm:$0xff]  ;;  %v7689_v61 = vld [vmem:[%s14107_s4 + $0x6d0] sm:$0xff] }
 0x2f9   :  { %5187 = vmatpush1.msra.mxu1 %v7703_v53  ;;  %5044 = vmatpush1.msra.mxu0 %v7651_v18  ;;  %4085 = vst [vmem:[#allocation4] sm:$0xff] %v4081_v36  ;;  %v4082_v0 = vmax.f32 %v4078_v43, 0.0  ;;  %v7691_v18 = vld [vmem:[%s14107_s4 + $0x6e0] sm:$0xff]  ;;  %v5246_v27 = vld [vmem:[#allocation3 + $0x38] sm:$0xf] }
 0x2fa   :  { %5188 = vmatprep.subr.mxu1 %v7702_v47  ;;  %5045 = vmatprep.subr.mxu0 %v7650_v55  ;;  %v4079_v5 = vmax.f32 %v4071_v62, %v4075_v14  ;;  %v4072_v54 = vadd.f32 %v12474_v48, %v3918_v45  ;;  %v7751_v48 = vld [vmem:[%s14108_s5 + $0x6f0] sm:$0xff]  ;;  %v7741_v43 = vld [vmem:[%s14108_s5 + $0x6a0] sm:$0xff]  ;;  %v7688_v14 = vld [vmem:[%s14107_s4 + $0x6c8] sm:$0xff] }
 0x2fb   :  { %5189 = vmatpush1.msra.mxu1 %v7701_v50  ;;  %5046 = vmatpush1.msra.mxu0 %v7649_v57  ;;  %4086 = vst.msk [vmem:[#allocation4 + $0x8] sm:$0xff] %vm66_vm0, %v4082_v0  ;;  %v7740_v50 = vld [vmem:[%s14108_s5 + $0x698] sm:$0xff]  ;;  %v7739_v57 = vld [vmem:[%s14108_s5 + $0x690] sm:$0xff]  ;;  %v7687_v62 = vld [vmem:[%s14107_s4 + $0x6c0] sm:$0xff] }
 0x2fc   :  { %5190 = vmatprep.subr.mxu1 %v7700_v32  ;;  %5047 = vmatprep.subr.mxu0 %v7648_v38  ;;  %v4083_v26 = vmax.f32 %v4079_v5, 0.0  ;;  %v4080_v51 = vmax.f32 %v4072_v54, %v4076_v19  ;;  %v7738_v45 = vld [vmem:[%s14108_s5 + $0x688] sm:$0xff]  ;;  %v7686_v32 = vld [vmem:[%s14107_s4 + $0x6b8] sm:$0xff]  ;;  %v7737_v38 = vld [vmem:[%s14108_s5 + $0x680] sm:$0xff] }
 0x2fd   :  { %5191 = vmatpush1.msra.mxu1 %v7699_v2  ;;  %5048 = vmatpush1.msra.mxu0 %v7647_v1  ;;  %v7685_v0 = vld [vmem:[%s14107_s4 + $0x6b0] sm:$0xff]  ;;  %v7736_v2 = vld [vmem:[%s14108_s5 + $0x678] sm:$0xff]  ;;  %v7684_v19 = vld [vmem:[%s14107_s4 + $0x6a8] sm:$0xff] }
 0x2fe   :  { %5192 = vmatprep.subr.mxu1 %v7698_v6  ;;  %5049 = vmatprep.subr.mxu0 %v7646_v29  ;;  %4087 = vst [vmem:[#allocation4 + $0x10] sm:$0x3] %v4083_v26  ;;  %v4084_v30 = vmax.f32 %v4080_v51, 0.0  ;;  %v7735_v1 = vld [vmem:[%s14108_s5 + $0x670] sm:$0xff]  ;;  %v7683_v5 = vld [vmem:[%s14107_s4 + $0x6a0] sm:$0xff]  ;;  %v7734_v54 = vld [vmem:[%s14108_s5 + $0x668] sm:$0xff] }
 0x2ff   :  { %5193 = vmatpush1.msra.mxu1 %v7697_v37  ;;  %5050 = vmatpush1.msra.mxu0 %v7645_v46  ;;  %v7682_v6 = vld [vmem:[%s14107_s4 + $0x698] sm:$0xff]  ;;  %v4949_v29 = vld [vmem:[#allocation3 + $0x20] sm:$0xfe]  ;;  %v7733_v37 = vld [vmem:[%s14108_s5 + $0x660] sm:$0xff] }
 0x300   :  { %5202 = vmatprep.subr.mxu1 %v7752_v8  ;;  %5051 = vmatprep.subr.mxu0 %v7644_v10  ;;  %4089 = vst.msk [vmem:[#allocation4 + $0x18] sm:$0x3] %vm4088_vm11, %v4084_v30  ;;  %v7681_v46 = vld [vmem:[%s14107_s4 + $0x690] sm:$0xff]  ;;  %v4951_v26 = vld [vmem:[#allocation3 + $0x30] sm:$0x7]  ;;  %v7732_v51 = vld [vmem:[%s14108_s5 + $0x658] sm:$0xff] }
 0x301   :  { %5203 = vmatpush2.msra.mxu1 %v7751_v48  ;;  %5052 = vmatpush1.msra.mxu0 %v7643_v63  ;;  %v7680_v8 = vld [vmem:[%s14107_s4 + $0x688] sm:$0xff]  ;;  %v7731_v10 = vld [vmem:[%s14108_s5 + $0x650] sm:$0xff]  ;;  %v7679_v48 = vld [vmem:[%s14107_s4 + $0x680] sm:$0xff]  ;;  %v5013_v30 = vrot.slane %v4949_v29, 1 }
 0x302   :  { %v5585_v44 = vld [vmem:[#allocation4] ss:$8 sm:$0x3]  ;;  %v5587_v58 = vld [vmem:[#allocation4 + $0x1] ss:$8 sm:$0x3]  ;;  %5204 = vmatprep.subr.mxu1 %v7750_v22  ;;  %5053 = vmatprep.subr.mxu0 %v7642_v23 }
 0x303   :  { %v5588_v24 = vmax.f32 %v5585_v44, %v5587_v58  ;;  %v5594_v35 = vld [vmem:[#allocation4 + $0x2] ss:$8 sm:$0x3]  ;;  %v5596_v12 = vld [vmem:[#allocation4 + $0x3] ss:$8 sm:$0x3]  ;;  %5205 = vmatpush2.msra.mxu1 %v7749_v15  ;;  %5054 = vmatpush1.msra.mxu0 %v7641_v20 }
 0x304   :  { %v5597_v25 = vmax.f32 %v5594_v35, %v5596_v12  ;;  %v5602_v16 = vld [vmem:[#allocation4 + $0x4] ss:$8 sm:$0x3]  ;;  %v5604_v7 = vld [vmem:[#allocation4 + $0x5] ss:$8 sm:$0x3]  ;;  %5206 = vmatprep.subr.mxu1 %v7748_v11  ;;  %5055 = vmatprep.subr.mxu0 %v7640_v3 }
 0x305   :  { %v5605_v40 = vmax.f32 %v5602_v16, %v5604_v7  ;;  %v5610_v39 = vld [vmem:[#allocation4 + $0x6] ss:$8 sm:$0x3]  ;;  %v5612_v21 = vld [vmem:[#allocation4 + $0x7] ss:$8 sm:$0x3]  ;;  %5207 = vmatpush2.msra.mxu1 %v7747_v34  ;;  %5056 = vmatpush1.msra.mxu0 %v7639_v42 }
 0x306   :  { %5591 = vst.msk [vmem:[#allocation5] ss:$8 sm:$0x3] %vm12607_vm12, %v5588_v24  ;;  %v5613_v53 = vmax.f32 %v5610_v39, %v5612_v21  ;;  %5208 = vmatprep.subr.mxu1 %v7746_v49  ;;  %5065 = vmatprep.subr.mxu0 %v7694_v56  ;;  %5599 = vst.msk [vmem:[#allocation5 + $0x1] ss:$8 sm:$0x3] %vm12607_vm12, %v5597_v25 }
 0x307   :  { %v5618_v47 = vld [vmem:[#allocation4 + $0x10] ss:$8 sm:$0x3]  ;;  %v5620_v55 = vld [vmem:[#allocation4 + $0x11] ss:$8 sm:$0x3]  ;;  %5209 = vmatpush2.msra.mxu1 %v7745_v31  ;;  %5066 = vmatpush2.msra.mxu0 %v7693_v60 }
 0x308   :  { %5607 = vst.msk [vmem:[#allocation5 + $0x2] ss:$8 sm:$0x3] %vm12607_vm12, %v5605_v40  ;;  %v5621_v36 = vmax.f32 %v5618_v47, %v5620_v55  ;;  %5210 = vmatprep.subr.mxu1 %v7744_v52  ;;  %5067 = vmatprep.subr.mxu0 %v7692_v17  ;;  %5615 = vst.msk [vmem:[#allocation5 + $0x3] ss:$8 sm:$0x3] %vm12607_vm12, %v5613_v53 }
 0x309   :  { %5211 = vmatpush2.msra.mxu1 %v7743_v33  ;;  %5068 = vmatpush2.msra.mxu0 %v7691_v18  ;;  %v7730_v63 = vld [vmem:[%s14108_s5 + $0x648] sm:$0xff]  ;;  %v7678_v22 = vld [vmem:[%s14107_s4 + $0x678] sm:$0xff]  ;;  %v12717_v23 = vrot.slane %v4951_v26, 1  ;;  %v7729_v15 = vld [vmem:[%s14108_s5 + $0x640] sm:$0xff]  ;;  %v12756_v12 = vrot.slane %v5246_v27, 2 }
 0x30a   :  { %5212 = vmatprep.subr.mxu1 %v7742_v28  ;;  %5069 = vmatprep.subr.mxu0 %v7690_v41  ;;  %5623 = vst.msk [vmem:[#allocation5 + $0x4] ss:$8 sm:$0x3] %vm12607_vm12, %v5621_v36  ;;  %v7677_v20 = vld [vmem:[%s14107_s4 + $0x670] sm:$0xff]  ;;  %v7844_v11 = vld [vmem:[%s14108_s5 + $0x7f8] sm:$0xff]  ;;  %v7676_v3 = vld [vmem:[%s14107_s4 + $0x668] sm:$0xff] }
 0x30b   :  { %5213 = vmatpush2.msra.mxu1 %v7741_v43  ;;  %5070 = vmatpush2.msra.mxu0 %v7689_v61  ;;  %v5244_v34 = vld [vmem:[#allocation3 + $0x28] sm:$0xfc]  ;;  %v5015_v42 = vsel %vm2783_vm4, %v5013_v30, %v12717_v23  ;;  %v7843_v49 = vld [vmem:[%s14108_s5 + $0x7f0] sm:$0xff]  ;;  %v7675_v56 = vld [vmem:[%s14107_s4 + $0x660] sm:$0xff] }
 0x30c   :  { %5214 = vmatprep.subr.mxu1 %v7740_v50  ;;  %5071 = vmatprep.subr.mxu0 %v7688_v14  ;;  %v7842_v44 = vld [vmem:[%s14108_s5 + $0x7e8] sm:$0xff]  ;;  %v7674_v58 = vld [vmem:[%s14107_s4 + $0x658] sm:$0xff]  ;;  %v7841_v31 = vld [vmem:[%s14108_s5 + $0x7e0] sm:$0xff]  ;;  %v5310_v35 = vrot.slane %v5244_v34, 2 }
 0x30d   :  { %5215 = vmatpush2.msra.mxu1 %v7739_v57  ;;  %5072 = vmatpush2.msra.mxu0 %v7687_v62  ;;  %v7673_v60 = vld [vmem:[%s14107_s4 + $0x650] sm:$0xff]  ;;  %v7840_v24 = vld [vmem:[%s14108_s5 + $0x7d8] sm:$0xff]  ;;  %v7672_v52 = vld [vmem:[%s14107_s4 + $0x648] sm:$0xff] }
 0x30e   :  { %5216 = vmatprep.subr.mxu1 %v7738_v45  ;;  %5073 = vmatprep.subr.mxu0 %v7686_v32  ;;  %v7839_v17 = vld [vmem:[%s14108_s5 + $0x7d0] sm:$0xff]  ;;  %v7671_v25 = vld [vmem:[%s14107_s4 + $0x640] sm:$0xff]  ;;  %v7838_v16 = vld [vmem:[%s14108_s5 + $0x7c8] sm:$0xff]  ;;  %v5312_v7 = vsel %vm3232_vm7, %v5310_v35, %v12756_v12 }
 0x30f   :  { %5217 = vmatpush2.msra.mxu1 %v7737_v38  ;;  %5074 = vmatpush2.msra.mxu0 %v7685_v0  ;;  %v7786_v33 = vld [vmem:[%s14107_s4 + $0x7f8] sm:$0xff]  ;;  %v7837_v40 = vld [vmem:[%s14108_s5 + $0x7c0] sm:$0xff]  ;;  %v7785_v39 = vld [vmem:[%s14107_s4 + $0x7f0] sm:$0xff] }
 0x310   :  { %5218 = vmatprep.subr.mxu1 %v7736_v2  ;;  %5075 = vmatprep.subr.mxu0 %v7684_v19  ;;  %v7836_v21 = vld [vmem:[%s14108_s5 + $0x7b8] sm:$0xff]  ;;  %v7784_v53 = vld [vmem:[%s14107_s4 + $0x7e8] sm:$0xff]  ;;  %v7835_v18 = vld [vmem:[%s14108_s5 + $0x7b0] sm:$0xff] }
 0x311   :  { %5219 = vmatpush2.msra.mxu1 %v7735_v1  ;;  %5076 = vmatpush2.msra.mxu0 %v7683_v5  ;;  %v7783_v28 = vld [vmem:[%s14107_s4 + $0x7e0] sm:$0xff]  ;;  %v7834_v41 = vld [vmem:[%s14108_s5 + $0x7a8] sm:$0xff]  ;;  %v7782_v47 = vld [vmem:[%s14107_s4 + $0x7d8] sm:$0xff] }
 0x312   :  { %5220 = vmatprep.subr.mxu1 %v7734_v54  ;;  %5077 = vmatprep.subr.mxu0 %v7682_v6  ;;  %v7833_v55 = vld [vmem:[%s14108_s5 + $0x7a0] sm:$0xff]  ;;  %v7832_v36 = vld [vmem:[%s14108_s5 + $0x798] sm:$0xff]  ;;  %v7780_v43 = vld [vmem:[%s14107_s4 + $0x7c8] sm:$0xff] }
 0x313   :  { %5221 = vmatpush2.msra.mxu1 %v7733_v37  ;;  %5078 = vmatpush2.msra.mxu0 %v7681_v46  ;;  %v7831_v61 = vld [vmem:[%s14108_s5 + $0x790] sm:$0xff]  ;;  %v7779_v50 = vld [vmem:[%s14107_s4 + $0x7c0] sm:$0xff]  ;;  %v7830_v14 = vld [vmem:[%s14108_s5 + $0x788] sm:$0xff] }
 0x314   :  { %5222 = vmatprep.subr.mxu1 %v7732_v51  ;;  %5079 = vmatprep.subr.mxu0 %v7680_v8  ;;  %v7778_v57 = vld [vmem:[%s14107_s4 + $0x7b8] sm:$0xff]  ;;  %v7829_v62 = vld [vmem:[%s14108_s5 + $0x780] sm:$0xff]  ;;  %v7777_v45 = vld [vmem:[%s14107_s4 + $0x7b0] sm:$0xff] }
 0x315   :  { %5223 = vmatpush2.msra.mxu1 %v7731_v10  ;;  %5080 = vmatpush2.msra.mxu0 %v7679_v48  ;;  %v7828_v32 = vld [vmem:[%s14108_s5 + $0x778] sm:$0xff]  ;;  %v7776_v38 = vld [vmem:[%s14107_s4 + $0x7a8] sm:$0xff]  ;;  %v7827_v0 = vld [vmem:[%s14108_s5 + $0x770] sm:$0xff] }
 0x316   :  { %5224 = vmatprep.subr.mxu1 %v7730_v63  ;;  %5081 = vmatprep.subr.mxu0 %v7678_v22  ;;  %v7775_v2 = vld [vmem:[%s14107_s4 + $0x7a0] sm:$0xff]  ;;  %v7826_v19 = vld [vmem:[%s14108_s5 + $0x768] sm:$0xff]  ;;  %v7774_v1 = vld [vmem:[%s14107_s4 + $0x798] sm:$0xff] }
 0x317   :  { %5225 = vmatpush2.msra.mxu1 %v7729_v15  ;;  %5082 = vmatpush2.msra.mxu0 %v7677_v20  ;;  %v7825_v5 = vld [vmem:[%s14108_s5 + $0x760] sm:$0xff]  ;;  %v7773_v54 = vld [vmem:[%s14107_s4 + $0x790] sm:$0xff]  ;;  %v7824_v6 = vld [vmem:[%s14108_s5 + $0x758] sm:$0xff] }
 0x318   :  { %5227 = vmatmul.mubr.f32.vlgmr.msra.gmra.mxu1 %v5015_v42  ;;  %5456 = vmatprep.subr.mxu1 %v7844_v11  ;;  %v7772_v29 = vld [vmem:[%s14107_s4 + $0x788] sm:$0xff]  ;;  %v7823_v37 = vld [vmem:[%s14108_s5 + $0x750] sm:$0xff]  ;;  %v7771_v46 = vld [vmem:[%s14107_s4 + $0x780] sm:$0xff] }
 0x319   :  { %5083 = vmatprep.subr.mxu0 %v7676_v3  ;;  %7754 = vmatprep.mubr.msk.f32.mxu1 %vm1185_vm1, %v12330_v4  ;;  %v7822_v26 = vld [vmem:[%s14108_s5 + $0x748] sm:$0xff]  ;;  %v7770_v51 = vld [vmem:[%s14107_s4 + $0x778] sm:$0xff]  ;;  %v7821_v8 = vld [vmem:[%s14108_s5 + $0x740] sm:$0xff] }
 0x31a   :  { %5457 = vmatpush1.msra.mxu1 %v7843_v49  ;;  %5084 = vmatpush2.msra.mxu0 %v7675_v56  ;;  %v7769_v10 = vld [vmem:[%s14107_s4 + $0x770] sm:$0xff]  ;;  %v7820_v48 = vld [vmem:[%s14108_s5 + $0x738] sm:$0xff]  ;;  %v7768_v63 = vld [vmem:[%s14107_s4 + $0x768] sm:$0xff] }
 0x31b   :  { %5458 = vmatprep.subr.mxu1 %v7842_v44  ;;  %5085 = vmatprep.subr.mxu0 %v7674_v58  ;;  %v7819_v22 = vld [vmem:[%s14108_s5 + $0x730] sm:$0xff]  ;;  %v7767_v30 = vld [vmem:[%s14107_s4 + $0x760] sm:$0xff]  ;;  %v7766_v15 = vld [vmem:[%s14107_s4 + $0x758] sm:$0xff] }
 0x31c   :  { %5459 = vmatpush1.msra.mxu1 %v7841_v31  ;;  %5086 = vmatpush2.msra.mxu0 %v7673_v60  ;;  %v7817_v20 = vld [vmem:[%s14108_s5 + $0x720] sm:$0xff]  ;;  %v7765_v11 = vld [vmem:[%s14107_s4 + $0x750] sm:$0xff]  ;;  %v7816_v3 = vld [vmem:[%s14108_s5 + $0x718] sm:$0xff] }
 0x31d   :  { %5233 = vmatmul.mubr.f32.gmra.mxu1 %v12717_v23  ;;  %5460 = vmatprep.subr.mxu1 %v7840_v24  ;;  %v7764_v34 = vld [vmem:[%s14107_s4 + $0x748] sm:$0xff]  ;;  %v7763_v49 = vld [vmem:[%s14107_s4 + $0x740] sm:$0xff]  ;;  %v7762_v27 = vld [vmem:[%s14107_s4 + $0x738] sm:$0xff] }
 0x31e   :  { %5087 = vmatprep.subr.mxu0 %v7672_v52  ;;  %5461 = vmatpush1.msra.mxu1 %v7839_v17  ;;  %v7814_v56 = vld [vmem:[%s14108_s5 + $0x708] sm:$0xff]  ;;  %v7813_v44 = vld [vmem:[%s14108_s5 + $0x700] sm:$0xff]  ;;  %v7761_v58 = vld [vmem:[%s14107_s4 + $0x730] sm:$0xff] }
 0x31f   :  { %7869 = vmatprep.mubr.msk.f32.mxu1 %vm1185_vm1, %v5312_v7  ;;  %5088 = vmatpush2.msra.mxu0 %v7671_v25  ;;  %v7868_v31 = vld [vmem:[%s14108_s5 + $0x8b8] sm:$0xff]  ;;  %v7760_v60 = vld [vmem:[%s14107_s4 + $0x728] sm:$0xff]  ;;  %v7867_v24 = vld [vmem:[%s14108_s5 + $0x8b0] sm:$0xff] }
 0x320   :  { %5462 = vmatprep.subr.mxu1 %v7838_v16  ;;  %5090 = vmatmul.mubr.f32.vlgmr.msra.gmra.mxu0 %v5015_v42  ;;  %v7815_v42 = vld [vmem:[%s14108_s5 + $0x710] sm:$0xff]  ;;  %v7759_v35 = vld [vmem:[%s14107_s4 + $0x720] sm:$0xff]  ;;  %v7866_v52 = vld [vmem:[%s14108_s5 + $0x8a8] sm:$0xff] }
 0x321   :  { %5319 = vmatprep.subr.mxu0 %v7786_v33  ;;  %5463 = vmatpush1.msra.mxu1 %v7837_v40  ;;  %v7758_v17 = vld [vmem:[%s14107_s4 + $0x718] sm:$0xff]  ;;  %v7865_v25 = vld [vmem:[%s14108_s5 + $0x8a0] sm:$0xff]  ;;  %v7757_v16 = vld [vmem:[%s14107_s4 + $0x710] sm:$0xff] }
 0x322   :  { %7696 = vmatprep.mubr.msk.f32.mxu0 %vm1185_vm1, %v12330_v4  ;;  %5320 = vmatpush1.msra.mxu0 %v7785_v39  ;;  %v7781_v4 = vld [vmem:[%s14107_s4 + $0x7d0] sm:$0xff]  ;;  %v7756_v33 = vld [vmem:[%s14107_s4 + $0x708] sm:$0xff]  ;;  %v7755_v39 = vld [vmem:[%s14107_s4 + $0x700] sm:$0xff] }
 0x323   :  { %5464 = vmatprep.subr.mxu1 %v7836_v21  ;;  %5321 = vmatprep.subr.mxu0 %v7784_v53  ;;  %v7863_v40 = vld [vmem:[%s14108_s5 + $0x890] sm:$0xff]  ;;  %v7862_v21 = vld [vmem:[%s14108_s5 + $0x888] sm:$0xff]  ;;  %v7810_v53 = vld [vmem:[%s14107_s4 + $0x8b8] sm:$0xff] }
 0x324   :  { %5465 = vmatpush1.msra.mxu1 %v7835_v18  ;;  %5322 = vmatpush1.msra.mxu0 %v7783_v28  ;;  %v7861_v18 = vld [vmem:[%s14108_s5 + $0x880] sm:$0xff]  ;;  %v7809_v28 = vld [vmem:[%s14107_s4 + $0x8b0] sm:$0xff] }
 0x325   :  { %5466 = vmatprep.subr.mxu1 %v7834_v41  ;;  %5096 = vmatmul.mubr.f32.gmra.mxu0 %v12717_v23  ;;  %v7818_v23 = vld [vmem:[%s14108_s5 + $0x728] sm:$0xff]  ;;  %v7860_v41 = vld [vmem:[%s14108_s5 + $0x878] sm:$0xff] }
 0x326   :  { %5323 = vmatprep.subr.mxu0 %v7782_v47  ;;  %5467 = vmatpush1.msra.mxu1 %v7833_v55  ;;  %v7808_v47 = vld [vmem:[%s14107_s4 + $0x8a8] sm:$0xff]  ;;  %v7859_v55 = vld [vmem:[%s14108_s5 + $0x870] sm:$0xff] }
 0x327   :  { %5324 = vmatpush1.msra.mxu0 %v7781_v4  ;;  %7811 = vmatprep.mubr.msk.f32.mxu0 %vm1185_vm1, %v5312_v7  ;;  %v7864_v7 = vld [vmem:[%s14108_s5 + $0x898] sm:$0xff]  ;;  %v7807_v4 = vld [vmem:[%s14107_s4 + $0x8a0] sm:$0xff] }
 0x328   :  { %5468 = vmatprep.subr.mxu1 %v7832_v36  ;;  %5325 = vmatprep.subr.mxu0 %v7780_v43  ;;  %v7858_v36 = vld [vmem:[%s14108_s5 + $0x868] sm:$0xff]  ;;  %v7806_v43 = vld [vmem:[%s14107_s4 + $0x898] sm:$0xff] }
 0x329   :  { %5469 = vmatpush1.msra.mxu1 %v7831_v61  ;;  %5326 = vmatpush1.msra.mxu0 %v7779_v50  ;;  %v7857_v61 = vld [vmem:[%s14108_s5 + $0x860] sm:$0xff]  ;;  %v7805_v50 = vld [vmem:[%s14107_s4 + $0x890] sm:$0xff] }
 0x32a   :  { %5470 = vmatprep.subr.mxu1 %v7830_v14  ;;  %5327 = vmatprep.subr.mxu0 %v7778_v57  ;;  %v7856_v14 = vld [vmem:[%s14108_s5 + $0x858] sm:$0xff]  ;;  %v7804_v57 = vld [vmem:[%s14107_s4 + $0x888] sm:$0xff] }
 0x32b   :  { %5471 = vmatpush1.msra.mxu1 %v7829_v62  ;;  %5328 = vmatpush1.msra.mxu0 %v7777_v45  ;;  %v7855_v62 = vld [vmem:[%s14108_s5 + $0x850] sm:$0xff]  ;;  %v7803_v45 = vld [vmem:[%s14107_s4 + $0x880] sm:$0xff] }
 0x32c   :  { %5472 = vmatprep.subr.mxu1 %v7828_v32  ;;  %5329 = vmatprep.subr.mxu0 %v7776_v38  ;;  %v7854_v32 = vld [vmem:[%s14108_s5 + $0x848] sm:$0xff]  ;;  %v7802_v38 = vld [vmem:[%s14107_s4 + $0x878] sm:$0xff] }
 0x32d   :  { %5473 = vmatpush1.msra.mxu1 %v7827_v0  ;;  %5330 = vmatpush1.msra.mxu0 %v7775_v2  ;;  %v7853_v0 = vld [vmem:[%s14108_s5 + $0x840] sm:$0xff]  ;;  %v7801_v2 = vld [vmem:[%s14107_s4 + $0x870] sm:$0xff] }
 0x32e   :  { %5474 = vmatprep.subr.mxu1 %v7826_v19  ;;  %5331 = vmatprep.subr.mxu0 %v7774_v1  ;;  %v7852_v19 = vld [vmem:[%s14108_s5 + $0x838] sm:$0xff]  ;;  %v7800_v1 = vld [vmem:[%s14107_s4 + $0x868] sm:$0xff] }
 0x32f   :  { %5475 = vmatpush1.msra.mxu1 %v7825_v5  ;;  %5332 = vmatpush1.msra.mxu0 %v7773_v54  ;;  %v7851_v5 = vld [vmem:[%s14108_s5 + $0x830] sm:$0xff]  ;;  %v7799_v54 = vld [vmem:[%s14107_s4 + $0x860] sm:$0xff] }
 0x330   :  { %5476 = vmatprep.subr.mxu1 %v7824_v6  ;;  %5333 = vmatprep.subr.mxu0 %v7772_v29  ;;  %v7850_v6 = vld [vmem:[%s14108_s5 + $0x828] sm:$0xff]  ;;  %v7798_v29 = vld [vmem:[%s14107_s4 + $0x858] sm:$0xff] }
 0x331   :  { %5477 = vmatpush1.msra.mxu1 %v7823_v37  ;;  %5334 = vmatpush1.msra.mxu0 %v7771_v46  ;;  %v5243_v37 = vld [vmem:[#allocation3 + $0x20] sm:$0xfc]  ;;  %v7849_v46 = vld [vmem:[%s14108_s5 + $0x820] sm:$0xff] }
 0x332   :  { %5478 = vmatprep.subr.mxu1 %v7822_v26  ;;  %5335 = vmatprep.subr.mxu0 %v7770_v51  ;;  %v7797_v26 = vld [vmem:[%s14107_s4 + $0x850] sm:$0xff]  ;;  %v5245_v51 = vld [vmem:[#allocation3 + $0x30] sm:$0xf] }
 0x333   :  { %5479 = vmatpush1.msra.mxu1 %v7821_v8  ;;  %5336 = vmatpush1.msra.mxu0 %v7769_v10  ;;  %v7848_v8 = vld [vmem:[%s14108_s5 + $0x818] sm:$0xff]  ;;  %v7796_v10 = vld [vmem:[%s14107_s4 + $0x848] sm:$0xff] }
 0x334   :  { %5480 = vmatprep.subr.mxu1 %v7820_v48  ;;  %5337 = vmatprep.subr.mxu0 %v7768_v63  ;;  %v7847_v48 = vld [vmem:[%s14108_s5 + $0x810] sm:$0xff]  ;;  %v7795_v63 = vld [vmem:[%s14107_s4 + $0x840] sm:$0xff] }
 0x335   :  { %5481 = vmatpush1.msra.mxu1 %v7819_v22  ;;  %5338 = vmatpush1.msra.mxu0 %v7767_v30  ;;  %v7846_v22 = vld [vmem:[%s14108_s5 + $0x808] sm:$0xff]  ;;  %v7794_v30 = vld [vmem:[%s14107_s4 + $0x838] sm:$0xff] }
 0x336   :  { %5482 = vmatprep.subr.mxu1 %v7818_v23  ;;  %5339 = vmatprep.subr.mxu0 %v7766_v15  ;;  %v5307_v23 = vrot.slane %v5243_v37, 2  ;;  %v5308_v15 = vrot.slane %v5245_v51, 2  ;;  %v13354_v37 = vld [vmem:[%s14110_s7 + $0x120] sm:$0xff] }
 0x337   :  { %5483 = vmatpush1.msra.mxu1 %v7817_v20  ;;  %5340 = vmatpush1.msra.mxu0 %v7765_v11  ;;  %v7845_v20 = vld [vmem:[%s14108_s5 + $0x800] sm:$0xff]  ;;  %v7793_v11 = vld [vmem:[%s14107_s4 + $0x830] sm:$0xff] }
 0x338   :  { %5484 = vmatprep.subr.mxu1 %v7816_v3  ;;  %5341 = vmatprep.subr.mxu0 %v7764_v34  ;;  %v7792_v3 = vld [vmem:[%s14107_s4 + $0x828] sm:$0xff]  ;;  %v5309_v34 = vsel %vm3232_vm7, %v5307_v23, %v5308_v15  ;;  %v13408_v23 = vld [vmem:[%s14110_s7 + $0x80] sm:$0xff] }
 0x339   :  { %5485 = vmatpush1.msra.mxu1 %v7815_v42  ;;  %5342 = vmatpush1.msra.mxu0 %v7763_v49  ;;  %v13082_v42 = vld [vmem:[%s14110_s7 + $0x118] sm:$0xff]  ;;  %v7791_v49 = vld [vmem:[%s14107_s4 + $0x820] sm:$0xff] }
 0x33a   :  { %5486 = vmatprep.subr.mxu1 %v7814_v56  ;;  %5343 = vmatprep.subr.mxu0 %v7762_v27  ;;  %v14284_v56 = vmov 0.0   ;;  %v7790_v27 = vld [vmem:[%s14107_s4 + $0x818] sm:$0xff] }
 0x33b   :  { %5487 = vmatpush1.msra.mxu1 %v7813_v44  ;;  %5344 = vmatpush1.msra.mxu0 %v7761_v58  ;;  %v13096_v44 = vld [vmem:[%s14110_s7 + $0x110] sm:$0xff] }
 0x33c   :  { %5496 = vmatprep.subr.mxu1 %v7868_v31  ;;  %5345 = vmatprep.subr.mxu0 %v7760_v60  ;;  %v7789_v58 = vld [vmem:[%s14107_s4 + $0x810] sm:$0xff]  ;;  %v13102_v31 = vld [vmem:[#allocation5 + $0x1] ss:$8 sm:$0x3] }
 0x33d   :  { %5497 = vmatpush2.msra.mxu1 %v7867_v24  ;;  %5346 = vmatpush1.msra.mxu0 %v7759_v35  ;;  %v7788_v60 = vld [vmem:[%s14107_s4 + $0x808] sm:$0xff]  ;;  %v7787_v35 = vld [vmem:[%s14107_s4 + $0x800] sm:$0xff]  ;;  %v5796_v51 = vrot.slane %v13102_v31, %v14280_v9 }
 0x33e   :  { %5498 = vmatprep.subr.mxu1 %v7866_v52  ;;  %5347 = vmatprep.subr.mxu0 %v7758_v17  ;;  %v13111_v24 = vld [vmem:[%s14110_s7 + $0x108] sm:$0xff]  ;;  %v5800_v52 = vrot.slane %v13102_v31, %v14269_v59  ;;  %v13124_v17 = vld [vmem:[%s14110_s7 + $0x100] sm:$0xff] }
 0x33f   :  { %5499 = vmatpush2.msra.mxu1 %v7865_v25  ;;  %5348 = vmatpush1.msra.mxu0 %v7757_v16  ;;  %v13130_v25 = vld [vmem:[%s14110_s7 + $0x78] sm:$0xff]  ;;  %v13457_v31 = vld [vmem:[%s14110_s7 + $0x1a8] sm:$0xff] }
 0x340   :  { %5500 = vmatprep.subr.mxu1 %v7864_v7  ;;  %5349 = vmatprep.subr.mxu0 %v7756_v33  ;;  %v13138_v16 = vld [vmem:[%s14110_s7 + $0xf8] sm:$0xff]  ;;  %v13143_v7 = vld [vmem:[%s14110_s7 + $0x70] sm:$0xff]  ;;  %v13148_v33 = vld [vmem:[#allocation5] ss:$8 sm:$0x3] }
 0x341   :  { %5501 = vmatpush2.msra.mxu1 %v7863_v40  ;;  %5350 = vmatpush1.msra.mxu0 %v7755_v39  ;;  %v13155_v40 = vld [vmem:[%s14110_s7 + $0xf0] sm:$0xff]  ;;  %v5695_v39 = vrot.slane %v13148_v33, %v14269_v59 }
 0x342   :  { %5502 = vmatprep.subr.mxu1 %v7862_v21  ;;  %5359 = vmatprep.subr.mxu0 %v7810_v53  ;;  %v13172_v21 = vld [vmem:[%s14110_s7 + $0xe8] sm:$0xff]  ;;  %v13177_v53 = vld [vmem:[%s14110_s7 + $0x60] sm:$0xff] }
 0x343   :  { %5503 = vmatpush2.msra.mxu1 %v7861_v18  ;;  %5360 = vmatpush2.msra.mxu0 %v7809_v28  ;;  %v13186_v18 = vld [vmem:[%s14110_s7 + $0xe0] sm:$0xff]  ;;  %v13191_v28 = vld [vmem:[%s14110_s7 + $0x58] sm:$0xff] }
 0x344   :  { %5504 = vmatprep.subr.mxu1 %v7860_v41  ;;  %5361 = vmatprep.subr.mxu0 %v7808_v47  ;;  %v13200_v41 = vld [vmem:[%s14110_s7 + $0xd8] sm:$0xff]  ;;  %v13205_v47 = vld [vmem:[%s14110_s7 + $0x50] sm:$0xff] }
 0x345   :  { %5505 = vmatpush2.msra.mxu1 %v7859_v55  ;;  %5362 = vmatpush2.msra.mxu0 %v7807_v4  ;;  %v13214_v55 = vld [vmem:[%s14110_s7 + $0xd0] sm:$0xff]  ;;  %v13219_v4 = vld [vmem:[%s14110_s7 + $0x48] sm:$0xff] }
 0x346   :  { %5506 = vmatprep.subr.mxu1 %v7858_v36  ;;  %5363 = vmatprep.subr.mxu0 %v7806_v43  ;;  %v13228_v36 = vld [vmem:[%s14110_s7 + $0xc8] sm:$0xff]  ;;  %v13233_v43 = vld [vmem:[%s14110_s7 + $0x40] sm:$0xff] }
 0x347   :  { %5507 = vmatpush2.msra.mxu1 %v7857_v61  ;;  %5364 = vmatpush2.msra.mxu0 %v7805_v50  ;;  %v13242_v61 = vld [vmem:[%s14110_s7 + $0xc0] sm:$0xff]  ;;  %v13247_v50 = vld [vmem:[%s14110_s7 + $0x38] sm:$0xff] }
 0x348   :  { %5508 = vmatprep.subr.mxu1 %v7856_v14  ;;  %5365 = vmatprep.subr.mxu0 %v7804_v57  ;;  %v13256_v14 = vld [vmem:[%s14110_s7 + $0xb8] sm:$0xff]  ;;  %v13261_v57 = vld [vmem:[%s14110_s7 + $0x30] sm:$0xff] }
 0x349   :  { %5509 = vmatpush2.msra.mxu1 %v7855_v62  ;;  %5366 = vmatpush2.msra.mxu0 %v7803_v45  ;;  %v13270_v62 = vld [vmem:[%s14110_s7 + $0xb0] sm:$0xff]  ;;  %v13275_v45 = vld [vmem:[%s14110_s7 + $0x28] sm:$0xff] }
 0x34a   :  { %5510 = vmatprep.subr.mxu1 %v7854_v32  ;;  %5367 = vmatprep.subr.mxu0 %v7802_v38  ;;  %v13284_v32 = vld [vmem:[%s14110_s7 + $0xa8] sm:$0xff]  ;;  %v13289_v38 = vld [vmem:[%s14110_s7 + $0x20] sm:$0xff] }
 0x34b   :  { %5511 = vmatpush2.msra.mxu1 %v7853_v0  ;;  %5368 = vmatpush2.msra.mxu0 %v7801_v2  ;;  %v13298_v0 = vld [vmem:[%s14110_s7 + $0xa0] sm:$0xff]  ;;  %v13303_v2 = vld [vmem:[%s14110_s7 + $0x18] sm:$0xff] }
 0x34c   :  { %5512 = vmatprep.subr.mxu1 %v7852_v19  ;;  %5369 = vmatprep.subr.mxu0 %v7800_v1  ;;  %v13312_v19 = vld [vmem:[%s14110_s7 + $0x138] sm:$0xff]  ;;  %v13317_v1 = vld [vmem:[%s14110_s7 + $0x10] sm:$0xff] }
 0x34d   :  { %5513 = vmatpush2.msra.mxu1 %v7851_v5  ;;  %5370 = vmatpush2.msra.mxu0 %v7799_v54  ;;  %v13326_v5 = vld [vmem:[%s14110_s7 + $0x130] sm:$0xff]  ;;  %v13331_v54 = vld [vmem:[%s14110_s7 + $0x8] sm:$0xff] }
 0x34e   :  { %5514 = vmatprep.subr.mxu1 %v7850_v6  ;;  %5371 = vmatprep.subr.mxu0 %v7798_v29  ;;  %v13340_v6 = vld [vmem:[%s14110_s7 + $0x128] sm:$0xff]  ;;  %v13345_v29 = vld [vmem:[%s14110_s7] sm:$0xff] }
 0x34f   :  { %5515 = vmatpush2.msra.mxu1 %v7849_v46  ;;  %5372 = vmatpush2.msra.mxu0 %v7797_v26  ;;  %v13359_v46 = vld [vmem:[%s14110_s7 + $0x98] sm:$0xff]  ;;  %v13363_v26 = vld [vmem:[#allocation5 + $0x3] ss:$8 sm:$0x3] }
 0x350   :  { %5516 = vmatprep.subr.mxu1 %v7848_v8  ;;  %5373 = vmatprep.subr.mxu0 %v7796_v10  ;;  %v13372_v8 = vld [vmem:[%s14110_s7 + $0x258] sm:$0xff]  ;;  %v13379_v10 = vld [vmem:[%s14110_s7 + $0x90] sm:$0xff] }
 0x351   :  { %5517 = vmatpush2.msra.mxu1 %v7847_v48  ;;  %5374 = vmatpush2.msra.mxu0 %v7795_v63  ;;  %v6010_v48 = vrot.slane %v13363_v26, %v14269_v59  ;;  %v13389_v63 = vld [vmem:[%s14110_s7 + $0x250] sm:$0xff] }
 0x352   :  { %5518 = vmatprep.subr.mxu1 %v7846_v22  ;;  %5375 = vmatprep.subr.mxu0 %v7794_v30  ;;  %v13394_v22 = vld [vmem:[%s14110_s7 + $0x88] sm:$0xff] }
 0x353   :  { %5519 = vmatpush2.msra.mxu1 %v7845_v20  ;;  %5376 = vmatpush2.msra.mxu0 %v7793_v11  ;;  %v13403_v30 = vld [vmem:[%s14110_s7 + $0x248] sm:$0xff]  ;;  %v5691_v20 = vrot.slane %v13148_v33, %v14280_v9  ;;  %v13421_v11 = vld [vmem:[%s14110_s7 + $0x240] sm:$0xff]  ;;  %v13485_v33 = vld [vmem:[%s14110_s7 + $0x198] sm:$0xff] }
 0x354   :  { %5521 = vmatmul.mubr.f32.vlgmr.msra.gmra.mxu1 %v5309_v34  ;;  %5804 = vmatprep.subr.mxu1 %v14284_v56 }
 0x355   :  { %5377 = vmatprep.subr.mxu0 %v7792_v3  ;;  %7870 = vmatprep.mubr.msk.f32.mxu1 %vm1185_vm1, %v12756_v12  ;;  %v13428_v3 = vld [vmem:[%s14110_s7 + $0x1b8] sm:$0xff] }
 0x356   :  { %5805 = vmatpush1.msra.mxu1 %v13082_v42  ;;  %5378 = vmatpush2.msra.mxu0 %v7791_v49  ;;  %v13438_v49 = vld [vmem:[%s14110_s7 + $0x238] sm:$0xff] }
 0x357   :  { %5806 = vmatprep.subr.mxu1 %v14284_v56  ;;  %5379 = vmatprep.subr.mxu0 %v7790_v27  ;;  %v13443_v27 = vld [vmem:[%s14110_s7 + $0x1b0] sm:$0xff] }
 0x358   :  { %5807 = vmatpush1.msra.mxu1 %v13096_v44  ;;  %5380 = vmatpush2.msra.mxu0 %v7789_v58  ;;  %v13452_v58 = vld [vmem:[%s14110_s7 + $0x230] sm:$0xff] }
 0x359   :  { %5527 = vmatmul.mubr.f32.gmra.mxu1 %v5308_v15  ;;  %5808 = vmatprep.subr.mxu1 %v14284_v56 }
 0x35a   :  { %5381 = vmatprep.subr.mxu0 %v7788_v60  ;;  %5809 = vmatpush1.msra.mxu1 %v13111_v24  ;;  %v13466_v60 = vld [vmem:[%s14110_s7 + $0x228] sm:$0xff] }
 0x35b   :  { %7892 = vmatprep.mubr.msk.f32.mxu1 %vm66_vm0, %v5800_v52  ;;  %5382 = vmatpush2.msra.mxu0 %v7787_v35  ;;  %14285 = vst [vmem:[#allocation16_spill] sm:$0xff] %v13466_v60  ;;  %v13471_v35 = vld [vmem:[%s14110_s7 + $0x1a0] sm:$0xff] }
 0x35c   :  { %5810 = vmatprep.subr.mxu1 %v14284_v56  ;;  %5384 = vmatmul.mubr.f32.vlgmr.msra.gmra.mxu0 %v5309_v34  ;;  %v13480_v52 = vld [vmem:[%s14110_s7 + $0x220] sm:$0xff] }
 0x35d   :  { %5699 = vmatprep.subr.mxu0 %v14284_v56  ;;  %5811 = vmatpush1.msra.mxu1 %v13124_v17  ;;  %14286 = vst [vmem:[#allocation13_spill] sm:$0xff] %v13480_v52 }
 0x35e   :  { %7812 = vmatprep.mubr.msk.f32.mxu0 %vm1185_vm1, %v12756_v12  ;;  %5700 = vmatpush1.msra.mxu0 %v13130_v25  ;;  %v13162_v12 = vld [vmem:[%s14110_s7 + $0x68] sm:$0xff] }
 0x35f   :  { %5812 = vmatprep.subr.mxu1 %v14284_v56  ;;  %5701 = vmatprep.subr.mxu0 %v14284_v56 }
 0x360   :  { %5813 = vmatpush1.msra.mxu1 %v13138_v16  ;;  %5702 = vmatpush1.msra.mxu0 %v13143_v7 }
 0x361   :  { %5814 = vmatprep.subr.mxu1 %v14284_v56  ;;  %5390 = vmatmul.mubr.f32.gmra.mxu0 %v5308_v15  ;;  %v13412_v15 = vld [vmem:[#allocation5 + $0x2] ss:$8 sm:$0x3] }
 0x362   :  { %5703 = vmatprep.subr.mxu0 %v14284_v56  ;;  %5815 = vmatpush1.msra.mxu1 %v13155_v40  ;;  %v5905_v34 = vrot.slane %v13412_v15, %v14269_v59 }
 0x363   :  { %5704 = vmatpush1.msra.mxu0 %v13162_v12  ;;  %7871 = vmatprep.mubr.msk.f32.mxu0 %vm66_vm0, %v5695_v39  ;;  %v13494_v39 = vld [vmem:[%s14110_s7 + $0x218] sm:$0xff] }
 0x364   :  { %5816 = vmatprep.subr.mxu1 %v14284_v56  ;;  %5705 = vmatprep.subr.mxu0 %v14284_v56  ;;  %14287 = vst [vmem:[#allocation14_spill] sm:$0xff] %v13494_v39 }
 0x365   :  { %5817 = vmatpush1.msra.mxu1 %v13172_v21  ;;  %5706 = vmatpush1.msra.mxu0 %v13177_v53 }
 0x366   :  { %5818 = vmatprep.subr.mxu1 %v14284_v56  ;;  %5707 = vmatprep.subr.mxu0 %v14284_v56 }
 0x367   :  { %5819 = vmatpush1.msra.mxu1 %v13186_v18  ;;  %5708 = vmatpush1.msra.mxu0 %v13191_v28 }
 0x368   :  { %5820 = vmatprep.subr.mxu1 %v14284_v56  ;;  %5709 = vmatprep.subr.mxu0 %v14284_v56 }
 0x369   :  { %5821 = vmatpush1.msra.mxu1 %v13200_v41  ;;  %5710 = vmatpush1.msra.mxu0 %v13205_v47 }
 0x36a   :  { %5822 = vmatprep.subr.mxu1 %v14284_v56  ;;  %5711 = vmatprep.subr.mxu0 %v14284_v56 }
 0x36b   :  { %5823 = vmatpush1.msra.mxu1 %v13214_v55  ;;  %5712 = vmatpush1.msra.mxu0 %v13219_v4 }
 0x36c   :  { %5824 = vmatprep.subr.mxu1 %v14284_v56  ;;  %5713 = vmatprep.subr.mxu0 %v14284_v56 }
 0x36d   :  { %5825 = vmatpush1.msra.mxu1 %v13228_v36  ;;  %5714 = vmatpush1.msra.mxu0 %v13233_v43 }
 0x36e   :  { %5826 = vmatprep.subr.mxu1 %v14284_v56  ;;  %5715 = vmatprep.subr.mxu0 %v14284_v56 }
 0x36f   :  { %5827 = vmatpush1.msra.mxu1 %v13242_v61  ;;  %5716 = vmatpush1.msra.mxu0 %v13247_v50 }
 0x370   :  { %5828 = vmatprep.subr.mxu1 %v14284_v56  ;;  %5717 = vmatprep.subr.mxu0 %v14284_v56 }
 0x371   :  { %5829 = vmatpush1.msra.mxu1 %v13256_v14  ;;  %5718 = vmatpush1.msra.mxu0 %v13261_v57 }
 0x372   :  { %5830 = vmatprep.subr.mxu1 %v14284_v56  ;;  %5719 = vmatprep.subr.mxu0 %v14284_v56 }
 0x373   :  { %5831 = vmatpush1.msra.mxu1 %v13270_v62  ;;  %5720 = vmatpush1.msra.mxu0 %v13275_v45 }
 0x374   :  { %5832 = vmatprep.subr.mxu1 %v14284_v56  ;;  %5721 = vmatprep.subr.mxu0 %v14284_v56 }
 0x375   :  { %5833 = vmatpush1.msra.mxu1 %v13284_v32  ;;  %5722 = vmatpush1.msra.mxu0 %v13289_v38 }
 0x376   :  { %5834 = vmatprep.subr.mxu1 %v14284_v56  ;;  %5723 = vmatprep.subr.mxu0 %v14284_v56 }
 0x377   :  { %5835 = vmatpush1.msra.mxu1 %v13298_v0  ;;  %5724 = vmatpush1.msra.mxu0 %v13303_v2 }
 0x378   :  { %5860 = vmatprep.subr.mxu1 %v14284_v56  ;;  %5725 = vmatprep.subr.mxu0 %v14284_v56 }
 0x379   :  { %5861 = vmatpush2.msra.mxu1 %v13312_v19  ;;  %5726 = vmatpush1.msra.mxu0 %v13317_v1 }
 0x37a   :  { %5862 = vmatprep.subr.mxu1 %v14284_v56  ;;  %5727 = vmatprep.subr.mxu0 %v14284_v56 }
 0x37b   :  { %5863 = vmatpush2.msra.mxu1 %v13326_v5  ;;  %5728 = vmatpush1.msra.mxu0 %v13331_v54 }
 0x37c   :  { %5864 = vmatprep.subr.mxu1 %v14284_v56  ;;  %5729 = vmatprep.subr.mxu0 %v14284_v56 }
 0x37d   :  { %5865 = vmatpush2.msra.mxu1 %v13340_v6  ;;  %5730 = vmatpush1.msra.mxu0 %v13345_v29 }
 0x37e   :  { %5866 = vmatprep.subr.mxu1 %v14284_v56  ;;  %5755 = vmatprep.subr.mxu0 %v14284_v56 }
 0x37f   :  { %5867 = vmatpush2.msra.mxu1 %v13354_v37  ;;  %5756 = vmatpush2.msra.mxu0 %v13359_v46 }
 0x380   :  { %5869 = vmatmul.mubr.f32.vlgmr.msra.gmra.mxu1 %v5796_v51  ;;  %6014 = vmatprep.subr.mxu1 %v14284_v56  ;;  %v13499_v51 = vld [vmem:[%s14110_s7 + $0x190] sm:$0xff] }
 0x381   :  { %5757 = vmatprep.subr.mxu0 %v14284_v56  ;;  %6015 = vmatpush1.msra.mxu1 %v13372_v8 }
 0x382   :  { %7934 = vmatprep.mubr.msk.f32.mxu1 %vm66_vm0, %v6010_v48  ;;  %5758 = vmatpush2.msra.mxu0 %v13379_v10  ;;  %v13508_v48 = vld [vmem:[%s14110_s7 + $0x210] sm:$0xff] }
 0x383   :  { %6016 = vmatprep.subr.mxu1 %v14284_v56  ;;  %5759 = vmatprep.subr.mxu0 %v14284_v56  ;;  %14288 = vst [vmem:[#allocation15_spill] sm:$0xff] %v13508_v48 }
 0x384   :  { %6017 = vmatpush1.msra.mxu1 %v13389_v63  ;;  %5760 = vmatpush2.msra.mxu0 %v13394_v22 }
 0x385   :  { %6018 = vmatprep.subr.mxu1 %v14284_v56  ;;  %5761 = vmatprep.subr.mxu0 %v14284_v56 }
 0x386   :  { %6019 = vmatpush1.msra.mxu1 %v13403_v30  ;;  %5762 = vmatpush2.msra.mxu0 %v13408_v23 }
 0x387   :  { %6020 = vmatprep.subr.mxu1 %v14284_v56  ;;  %5764 = vmatmul.mubr.f32.vlgmr.msra.gmra.mxu0 %v5691_v20  ;;  %v13513_v20 = vld [vmem:[%s14110_s7 + $0x188] sm:$0xff] }
 0x388   :  { %5909 = vmatprep.subr.mxu0 %v14284_v56  ;;  %6021 = vmatpush1.msra.mxu1 %v13421_v11  ;;  %14289 = vst [vmem:[#allocation17_spill] sm:$0xff] %v13513_v20 }
 0x389   :  { %5910 = vmatpush1.msra.mxu0 %v13428_v3  ;;  %7913 = vmatprep.mubr.msk.f32.mxu0 %vm66_vm0, %v5905_v34  ;;  %v13522_v34 = vld [vmem:[%s14110_s7 + $0x208] sm:$0xff] }
 0x38a   :  { %6022 = vmatprep.subr.mxu1 %v14284_v56  ;;  %5911 = vmatprep.subr.mxu0 %v14284_v56  ;;  %14290 = vst [vmem:[#allocation18_spill] sm:$0xff] %v13522_v34 }
 0x38b   :  { %6023 = vmatpush1.msra.mxu1 %v13438_v49  ;;  %5912 = vmatpush1.msra.mxu0 %v13443_v27 }
 0x38c   :  { %6024 = vmatprep.subr.mxu1 %v14284_v56  ;;  %5913 = vmatprep.subr.mxu0 %v14284_v56 }
 0x38d   :  { %6025 = vmatpush1.msra.mxu1 %v13452_v58  ;;  %5914 = vmatpush1.msra.mxu0 %v13457_v31 }
 0x38e   :  { %6026 = vmatprep.subr.mxu1 %v14284_v56  ;;  %5915 = vmatprep.subr.mxu0 %v14284_v56 }
 0x38f   :  { %6027 = vmatpush1.msra.mxu1 %v13466_v60  ;;  %5916 = vmatpush1.msra.mxu0 %v13471_v35  ;;  %v13541_v60 = vld [vmem:[%s14110_s7 + $0x178] sm:$0xff] }
 0x390   :  { %6028 = vmatprep.subr.mxu1 %v14284_v56  ;;  %5917 = vmatprep.subr.mxu0 %v14284_v56  ;;  %14293 = vst [vmem:[#allocation26_spill] sm:$0xff] %v13541_v60 }
 0x391   :  { %6029 = vmatpush1.msra.mxu1 %v13480_v52  ;;  %5918 = vmatpush1.msra.mxu0 %v13485_v33  ;;  %v13527_v52 = vld [vmem:[%s14110_s7 + $0x180] sm:$0xff] }
 0x392   :  { %6030 = vmatprep.subr.mxu1 %v14284_v56  ;;  %5919 = vmatprep.subr.mxu0 %v14284_v56  ;;  %14291 = vst [vmem:[#allocation9_spill] sm:$0xff] %v13527_v52 }
 0x393   :  { %6031 = vmatpush1.msra.mxu1 %v13494_v39  ;;  %5920 = vmatpush1.msra.mxu0 %v13499_v51  ;;  %v13536_v39 = vld [vmem:[%s14110_s7 + $0x200] sm:$0xff] }
 0x394   :  { %6032 = vmatprep.subr.mxu1 %v14284_v56  ;;  %5921 = vmatprep.subr.mxu0 %v14284_v56  ;;  %14292 = vst [vmem:[#allocation12_spill] sm:$0xff] %v13536_v39 }
 0x395   :  { %6033 = vmatpush1.msra.mxu1 %v13508_v48  ;;  %5922 = vmatpush1.msra.mxu0 %v13513_v20  ;;  %v13550_v48 = vld [vmem:[%s14110_s7 + $0x1f8] sm:$0xff]  ;;  %v13555_v20 = vld [vmem:[%s14110_s7 + $0x170] sm:$0xff] }
 0x396   :  { %6034 = vmatprep.subr.mxu1 %v14284_v56  ;;  %5923 = vmatprep.subr.mxu0 %v14284_v56  ;;  %14294 = vst [vmem:[#allocation27_spill] sm:$0xff] %v13550_v48  ;;  %14295 = vst [vmem:[#allocation10_spill] sm:$0xff] %v13555_v20 }
 0x397   :  { %6035 = vmatpush1.msra.mxu1 %v13522_v34  ;;  %5924 = vmatpush1.msra.mxu0 %v13527_v52  ;;  %v13564_v34 = vld [vmem:[%s14110_s7 + $0x1f0] sm:$0xff]  ;;  %v13569_v52 = vld [vmem:[%s14110_s7 + $0x168] sm:$0xff] }
 0x398   :  { %6036 = vmatprep.subr.mxu1 %v14284_v56  ;;  %5925 = vmatprep.subr.mxu0 %v14284_v56  ;;  %14296 = vst [vmem:[#allocation20_spill] sm:$0xff] %v13564_v34  ;;  %14297 = vst [vmem:[#allocation21_spill] sm:$0xff] %v13569_v52 }
 0x399   :  { %6037 = vmatpush1.msra.mxu1 %v13536_v39  ;;  %5926 = vmatpush1.msra.mxu0 %v13541_v60  ;;  %v13578_v39 = vld [vmem:[%s14110_s7 + $0x1e8] sm:$0xff]  ;;  %v13583_v60 = vld [vmem:[%s14110_s7 + $0x160] sm:$0xff] }
 0x39a   :  { %6038 = vmatprep.subr.mxu1 %v14284_v56  ;;  %5927 = vmatprep.subr.mxu0 %v14284_v56  ;;  %14298 = vst [vmem:[#allocation22_spill] sm:$0xff] %v13578_v39  ;;  %14299 = vst [vmem:[#allocation19_spill] sm:$0xff] %v13583_v60 }
 0x39b   :  { %6039 = vmatpush1.msra.mxu1 %v13550_v48  ;;  %5928 = vmatpush1.msra.mxu0 %v13555_v20  ;;  %v13592_v48 = vld [vmem:[%s14110_s7 + $0x1e0] sm:$0xff]  ;;  %v13597_v20 = vld [vmem:[%s14110_s7 + $0x158] sm:$0xff] }
 0x39c   :  { %6040 = vmatprep.subr.mxu1 %v14284_v56  ;;  %5929 = vmatprep.subr.mxu0 %v14284_v56  ;;  %14300 = vst [vmem:[#allocation25_spill] sm:$0xff] %v13592_v48  ;;  %14301 = vst [vmem:[#allocation23_spill] sm:$0xff] %v13597_v20 }
 0x39d   :  { %6041 = vmatpush1.msra.mxu1 %v13564_v34  ;;  %5930 = vmatpush1.msra.mxu0 %v13569_v52  ;;  %v13606_v34 = vld [vmem:[%s14110_s7 + $0x278] sm:$0xff]  ;;  %v13611_v52 = vld [vmem:[%s14110_s7 + $0x150] sm:$0xff] }
 0x39e   :  { %6042 = vmatprep.subr.mxu1 %v14284_v56  ;;  %5931 = vmatprep.subr.mxu0 %v14284_v56  ;;  %14302 = vst [vmem:[#allocation24_spill] sm:$0xff] %v13606_v34  ;;  %14303 = vst [vmem:[#allocation11_spill] sm:$0xff] %v13611_v52 }
 0x39f   :  { %6043 = vmatpush1.msra.mxu1 %v13578_v39  ;;  %5932 = vmatpush1.msra.mxu0 %v13583_v60  ;;  %v13620_v39 = vld [vmem:[%s14110_s7 + $0x270] sm:$0xff]  ;;  %v13625_v60 = vld [vmem:[%s14110_s7 + $0x148] sm:$0xff] }
 0x3a0   :  { %6044 = vmatprep.subr.mxu1 %v14284_v56  ;;  %5933 = vmatprep.subr.mxu0 %v14284_v56  ;;  %14304 = vst [vmem:[#allocation28_spill] sm:$0xff] %v13620_v39  ;;  %14305 = vst [vmem:[#allocation29_spill] sm:$0xff] %v13625_v60 }
 0x3a1   :  { %6045 = vmatpush1.msra.mxu1 %v13592_v48  ;;  %5934 = vmatpush1.msra.mxu0 %v13597_v20  ;;  %v13634_v48 = vld [vmem:[%s14110_s7 + $0x268] sm:$0xff]  ;;  %v13639_v20 = vld [vmem:[%s14110_s7 + $0x140] sm:$0xff] }
 0x3a2   :  { %6070 = vmatprep.subr.mxu1 %v14284_v56  ;;  %5935 = vmatprep.subr.mxu0 %v14284_v56  ;;  %14306 = vst [vmem:[#allocation30_spill] sm:$0xff] %v13634_v48 }
 0x3a3   :  { %6071 = vmatpush2.msra.mxu1 %v13606_v34  ;;  %5936 = vmatpush1.msra.mxu0 %v13611_v52  ;;  %v13648_v34 = vld [vmem:[%s14110_s7 + $0x260] sm:$0xff]  ;;  %v13653_v52 = vld [vmem:[%s14110_s7 + $0x1d8] sm:$0xff] }
 0x3a4   :  { %6072 = vmatprep.subr.mxu1 %v14284_v56  ;;  %5937 = vmatprep.subr.mxu0 %v14284_v56  ;;  %14307 = vst [vmem:[#allocation31_spill] sm:$0xff] %v13648_v34  ;;  %14308 = vst [vmem:[#allocation32_spill] sm:$0xff] %v13653_v52 }
 0x3a5   :  { %6073 = vmatpush2.msra.mxu1 %v13620_v39  ;;  %5938 = vmatpush1.msra.mxu0 %v13625_v60  ;;  %v6006_v39 = vrot.slane %v13363_v26, %v14280_v9  ;;  %v13664_v60 = vld [vmem:[%s14110_s7 + $0x1d0] sm:$0xff]  ;;  %v13672_v26 = vld [vmem:[%s14110_s7 + $0x1c8] sm:$0xff] }
 0x3a6   :  { %6074 = vmatprep.subr.mxu1 %v14284_v56  ;;  %5939 = vmatprep.subr.mxu0 %v14284_v56  ;;  %14309 = vst [vmem:[#allocation33_spill] sm:$0xff] %v13664_v60  ;;  %14310 = vst [vmem:[#allocation34_spill] sm:$0xff] %v13672_v26 }
 0x3a7   :  { %6075 = vmatpush2.msra.mxu1 %v13634_v48  ;;  %5940 = vmatpush1.msra.mxu0 %v13639_v20  ;;  %v13682_v48 = vld [vmem:[#allocation5 + $0x4] ss:$8 sm:$0x3] }
 0x3a8   :  { %6076 = vmatprep.subr.mxu1 %v14284_v56  ;;  %5965 = vmatprep.subr.mxu0 %v14284_v56 }
 0x3a9   :  { %6077 = vmatpush2.msra.mxu1 %v13648_v34  ;;  %5966 = vmatpush2.msra.mxu0 %v13653_v52  ;;  %v13680_v34 = vld [vmem:[%s14110_s7 + $0x1c0] sm:$0xff] }
 0x3aa   :  { %6079 = vmatmul.mubr.f32.vlgmr.msra.gmra.mxu1 %v6006_v39  ;;  %5967 = vmatprep.subr.mxu0 %v14284_v56  ;;  %14311 = vst [vmem:[#allocation35_spill] sm:$0xff] %v13680_v34  ;;  %v5901_v39 = vrot.slane %v13412_v15, %v14280_v9  ;;  %v13704_v15 = vld [vmem:[%s14110_s7 + $0x2f0] sm:$0xff] }
 0x3ab   :  { %5968 = vmatpush2.msra.mxu0 %v13664_v60  ;;  %6225 = vmatprep.subr.mxu1 %v14284_v56  ;;  %v13693_v60 = vld [vmem:[%s14110_s7 + $0x2f8] sm:$0xff]  ;;  %14313 = vst [vmem:[#allocation37_spill] sm:$0xff] %v13704_v15 }
 0x3ac   :  { %5969 = vmatprep.subr.mxu0 %v14284_v56  ;;  %6226 = vmatpush1.msra.mxu1 %v13130_v25  ;;  %14312 = vst [vmem:[#allocation36_spill] sm:$0xff] %v13693_v60  ;;  %v6115_v25 = vrot.slane %v13682_v48, %v14269_v59 }
 0x3ad   :  { %5970 = vmatpush2.msra.mxu0 %v13672_v26  ;;  %6227 = vmatprep.subr.mxu1 %v14284_v56 }
 0x3ae   :  { %5971 = vmatprep.subr.mxu0 %v14284_v56  ;;  %6228 = vmatpush1.msra.mxu1 %v13143_v7  ;;  %v13712_v7 = vld [vmem:[%s14110_s7 + $0x2e8] sm:$0xff] }
 0x3af   :  { %5972 = vmatpush2.msra.mxu0 %v13680_v34  ;;  %6229 = vmatprep.subr.mxu1 %v14284_v56  ;;  %14314 = vst [vmem:[#allocation38_spill] sm:$0xff] %v13712_v7 }
 0x3b0   :  { %5974 = vmatmul.mubr.f32.vlgmr.msra.gmra.mxu0 %v5901_v39  ;;  %6119 = vmatprep.subr.mxu0 %v14284_v56  ;;  %v13721_v39 = vld [vmem:[%s14110_s7 + $0x2e0] sm:$0xff] }
 0x3b1   :  { %6120 = vmatpush1.msra.mxu0 %v13693_v60  ;;  %7955 = vmatprep.mubr.msk.f32.mxu0 %vm66_vm0, %v6115_v25  ;;  %14315 = vst [vmem:[#allocation39_spill] sm:$0xff] %v13721_v39 }
 0x3b2   :  { %6121 = vmatprep.subr.mxu0 %v14284_v56  ;;  %6230 = vmatpush1.msra.mxu1 %v13162_v12  ;;  %v13730_v12 = vld [vmem:[%s14110_s7 + $0x2d8] sm:$0xff] }
 0x3b3   :  { %6122 = vmatpush1.msra.mxu0 %v13704_v15  ;;  %6231 = vmatprep.subr.mxu1 %v14284_v56  ;;  %14316 = vst [vmem:[#allocation40_spill] sm:$0xff] %v13730_v12 }
 0x3b4   :  { %6123 = vmatprep.subr.mxu0 %v14284_v56  ;;  %6232 = vmatpush1.msra.mxu1 %v13177_v53  ;;  %v13739_v53 = vld [vmem:[%s14110_s7 + $0x2d0] sm:$0xff] }
 0x3b5   :  { %6124 = vmatpush1.msra.mxu0 %v13712_v7  ;;  %6233 = vmatprep.subr.mxu1 %v14284_v56  ;;  %14317 = vst [vmem:[#allocation41_spill] sm:$0xff] %v13739_v53 }
 0x3b6   :  { %6125 = vmatprep.subr.mxu0 %v14284_v56  ;;  %6234 = vmatpush1.msra.mxu1 %v13191_v28  ;;  %v13748_v28 = vld [vmem:[%s14110_s7 + $0x2c8] sm:$0xff] }
 0x3b7   :  { %6126 = vmatpush1.msra.mxu0 %v13721_v39  ;;  %6235 = vmatprep.subr.mxu1 %v14284_v56  ;;  %14318 = vst [vmem:[#allocation42_spill] sm:$0xff] %v13748_v28 }
 0x3b8   :  { %6127 = vmatprep.subr.mxu0 %v14284_v56  ;;  %6236 = vmatpush1.msra.mxu1 %v13205_v47  ;;  %v13757_v47 = vld [vmem:[%s14110_s7 + $0x2c0] sm:$0xff] }
 0x3b9   :  { %6128 = vmatpush1.msra.mxu0 %v13730_v12  ;;  %6237 = vmatprep.subr.mxu1 %v14284_v56  ;;  %14319 = vst [vmem:[#allocation43_spill] sm:$0xff] %v13757_v47 }
 0x3ba   :  { %6129 = vmatprep.subr.mxu0 %v14284_v56  ;;  %6238 = vmatpush1.msra.mxu1 %v13219_v4  ;;  %v13766_v4 = vld [vmem:[%s14110_s7 + $0x2b8] sm:$0xff] }
 0x3bb   :  { %6130 = vmatpush1.msra.mxu0 %v13739_v53  ;;  %6239 = vmatprep.subr.mxu1 %v14284_v56  ;;  %14320 = vst [vmem:[#allocation44_spill] sm:$0xff] %v13766_v4 }
 0x3bc   :  { %6131 = vmatprep.subr.mxu0 %v14284_v56  ;;  %6240 = vmatpush1.msra.mxu1 %v13233_v43  ;;  %v13775_v43 = vld [vmem:[%s14110_s7 + $0x2b0] sm:$0xff] }
 0x3bd   :  { %6132 = vmatpush1.msra.mxu0 %v13748_v28  ;;  %6241 = vmatprep.subr.mxu1 %v14284_v56  ;;  %14321 = vst [vmem:[#allocation45_spill] sm:$0xff] %v13775_v43 }
 0x3be   :  { %6133 = vmatprep.subr.mxu0 %v14284_v56  ;;  %6242 = vmatpush1.msra.mxu1 %v13247_v50  ;;  %v13784_v50 = vld [vmem:[%s14110_s7 + $0x2a8] sm:$0xff] }
 0x3bf   :  { %6134 = vmatpush1.msra.mxu0 %v13757_v47  ;;  %6243 = vmatprep.subr.mxu1 %v14284_v56  ;;  %14322 = vst [vmem:[#allocation46_spill] sm:$0xff] %v13784_v50  ;;  %v5537_v47 = vld [vmem:[%s14109_s6] sm:$0x3] }
 0x3c0   :  { %6135 = vmatprep.subr.mxu0 %v14284_v56  ;;  %6244 = vmatpush1.msra.mxu1 %v13261_v57  ;;  %v13793_v57 = vld [vmem:[%s14110_s7 + $0x2a0] sm:$0xff]  ;;  %v5542_v34 = vrot.slane %v5537_v47, %v14280_v9 }
 0x3c1   :  { %6136 = vmatpush1.msra.mxu0 %v13766_v4  ;;  %6245 = vmatprep.subr.mxu1 %v14284_v56  ;;  %14323 = vst [vmem:[#allocation47_spill] sm:$0xff] %v13793_v57 }
 0x3c2   :  { %6137 = vmatprep.subr.mxu0 %v14284_v56  ;;  %6246 = vmatpush1.msra.mxu1 %v13275_v45  ;;  %v13802_v45 = vld [vmem:[%s14110_s7 + $0x298] sm:$0xff] }
 0x3c3   :  { %6138 = vmatpush1.msra.mxu0 %v13775_v43  ;;  %6247 = vmatprep.subr.mxu1 %v14284_v56  ;;  %14324 = vst [vmem:[#allocation48_spill] sm:$0xff] %v13802_v45 }
 0x3c4   :  { %6139 = vmatprep.subr.mxu0 %v14284_v56  ;;  %6248 = vmatpush1.msra.mxu1 %v13289_v38  ;;  %v13811_v38 = vld [vmem:[%s14110_s7 + $0x290] sm:$0xff] }
 0x3c5   :  { %6140 = vmatpush1.msra.mxu0 %v13784_v50  ;;  %6249 = vmatprep.subr.mxu1 %v14284_v56  ;;  %14325 = vst [vmem:[#allocation49_spill] sm:$0xff] %v13811_v38 }
 0x3c6   :  { %6141 = vmatprep.subr.mxu0 %v14284_v56  ;;  %6250 = vmatpush1.msra.mxu1 %v13303_v2  ;;  %v13820_v2 = vld [vmem:[%s14110_s7 + $0x288] sm:$0xff] }
 0x3c7   :  { %6142 = vmatpush1.msra.mxu0 %v13793_v57  ;;  %6251 = vmatprep.subr.mxu1 %v14284_v56  ;;  %14326 = vst [vmem:[#allocation50_spill] sm:$0xff] %v13820_v2 }
 0x3c8   :  { %6143 = vmatprep.subr.mxu0 %v14284_v56  ;;  %6252 = vmatpush1.msra.mxu1 %v13317_v1  ;;  %v13829_v1 = vld [vmem:[%s14110_s7 + $0x280] sm:$0xff] }
 0x3c9   :  { %6144 = vmatpush1.msra.mxu0 %v13802_v45  ;;  %6253 = vmatprep.subr.mxu1 %v14284_v56  ;;  %14327 = vst [vmem:[#allocation51_spill] sm:$0xff] %v13829_v1 }
 0x3ca   :  { %6145 = vmatprep.subr.mxu0 %v14284_v56  ;;  %6254 = vmatpush1.msra.mxu1 %v13331_v54  ;;  %v13838_v54 = vld [vmem:[%s14110_s7 + $0x318] sm:$0xff] }
 0x3cb   :  { %6146 = vmatpush1.msra.mxu0 %v13811_v38  ;;  %6255 = vmatprep.subr.mxu1 %v14284_v56  ;;  %14328 = vst [vmem:[#allocation52_spill] sm:$0xff] %v13838_v54 }
 0x3cc   :  { %6147 = vmatprep.subr.mxu0 %v14284_v56  ;;  %6256 = vmatpush1.msra.mxu1 %v13345_v29  ;;  %v13847_v29 = vld [vmem:[%s14110_s7 + $0x310] sm:$0xff] }
 0x3cd   :  { %6148 = vmatpush1.msra.mxu0 %v13820_v2  ;;  %6281 = vmatprep.subr.mxu1 %v14284_v56  ;;  %14329 = vst [vmem:[#allocation53_spill] sm:$0xff] %v13847_v29 }
 0x3ce   :  { %6149 = vmatprep.subr.mxu0 %v14284_v56  ;;  %6282 = vmatpush2.msra.mxu1 %v13359_v46  ;;  %v13856_v46 = vld [vmem:[%s14110_s7 + $0x308] sm:$0xff] }
 0x3cf   :  { %6150 = vmatpush1.msra.mxu0 %v13829_v1  ;;  %6283 = vmatprep.subr.mxu1 %v14284_v56  ;;  %14330 = vst [vmem:[#allocation54_spill] sm:$0xff] %v13856_v46 }
 0x3d0   :  { %6175 = vmatprep.subr.mxu0 %v14284_v56  ;;  %6284 = vmatpush2.msra.mxu1 %v13379_v10  ;;  %v13865_v10 = vld [vmem:[%s14110_s7 + $0x300] sm:$0xff] }
 0x3d1   :  { %6176 = vmatpush2.msra.mxu0 %v13838_v54  ;;  %6285 = vmatprep.subr.mxu1 %v14284_v56  ;;  %14331 = vst [vmem:[#allocation55_spill] sm:$0xff] %v13865_v10 }
 0x3d2   :  { %6177 = vmatprep.subr.mxu0 %v14284_v56  ;;  %6286 = vmatpush2.msra.mxu1 %v13394_v22  ;;  %v6111_v22 = vrot.slane %v13682_v48, %v14280_v9 }
 0x3d3   :  { %6178 = vmatpush2.msra.mxu0 %v13847_v29  ;;  %6287 = vmatprep.subr.mxu1 %v14284_v56 }
 0x3d4   :  { %6179 = vmatprep.subr.mxu0 %v14284_v56  ;;  %6288 = vmatpush2.msra.mxu1 %v13408_v23  ;;  %v13878_v23 = vpop.f32.mrf.mxu1 }
 0x3d5   :  { %6180 = vmatpush2.msra.mxu0 %v13856_v46  ;;  %6433 = vmatprep.subr.mxu1 %v14284_v56 }
 0x3d6   :  { %6181 = vmatprep.subr.mxu0 %v14284_v56  ;;  %v13884_v48 = vpop.f32.mrf.mxu1 }
 0x3d7   :  { %6182 = vmatpush2.msra.mxu0 %v13865_v10 }
 0x3d8   :  { %6184 = vmatmul.mubr.f32.vlgmr.msra.gmra.mxu0 %v6111_v22  ;;  %6329 = vmatprep.subr.mxu0 %v14284_v56 }
 0x3d9   :  { %6330 = vmatpush1.msra.mxu0 %v13082_v42  ;;  %v13890_v42 = vpop.f32.mrf.mxu1 }
 0x3da   :  { %6331 = vmatprep.subr.mxu0 %v14284_v56 }
 0x3db   :  { %6332 = vmatpush1.msra.mxu0 %v13096_v44  ;;  %v4355_v44 = vpop.f32.mrf.mxu0 }
 0x3dc   :  { %6333 = vmatprep.subr.mxu0 %v14284_v56  ;;  %v4448_v43 = vadd.f32 %v13878_v23, %v4355_v44 }
 0x3dd   :  { %6334 = vmatpush1.msra.mxu0 %v13111_v24  ;;  %v13896_v24 = vpop.f32.mrf.mxu1 }
 0x3de   :  { %6335 = vmatprep.subr.mxu0 %v14284_v56 }
 0x3df   :  { %6336 = vmatpush1.msra.mxu0 %v13124_v17  ;;  %v4357_v17 = vpop.f32.mrf.mxu0 }
 0x3e0   :  { %6337 = vmatprep.subr.mxu0 %v14284_v56  ;;  %v4450_v53 = vadd.f32 %v13884_v48, %v4357_v17 }
 0x3e1   :  { %6338 = vmatpush1.msra.mxu0 %v13138_v16  ;;  %v4657_v16 = vpop.f32.mrf.mxu1 }
 0x3e2   :  { %6339 = vmatprep.subr.mxu0 %v14284_v56 }
 0x3e3   :  { %6340 = vmatpush1.msra.mxu0 %v13155_v40  ;;  %v13902_v40 = vpop.f32.mrf.mxu0 }
 0x3e4   :  { %6341 = vmatprep.subr.mxu0 %v14284_v56 }
 0x3e5   :  { %6342 = vmatpush1.msra.mxu0 %v13172_v21  ;;  %v4659_v21 = vpop.f32.mrf.mxu1 }
 0x3e6   :  { %6343 = vmatprep.subr.mxu0 %v14284_v56 }
 0x3e7   :  { %6344 = vmatpush1.msra.mxu0 %v13186_v18  ;;  %v13908_v18 = vpop.f32.mrf.mxu0 }
 0x3e8   :  { %6345 = vmatprep.subr.mxu0 %v14284_v56 }
 0x3e9   :  { %6346 = vmatpush1.msra.mxu0 %v13200_v41  ;;  %v4663_v41 = vpop.f32.mrf.mxu1  ;;  %v4580_v25 = vpop.f32.mrf.mxu0 }
 0x3ea   :  { %6347 = vmatprep.subr.mxu0 %v14284_v56  ;;  %v4658_v57 = vadd.f32 %v4657_v16, %v4580_v25 }
 0x3eb   :  { %6348 = vmatpush1.msra.mxu0 %v13214_v55  ;;  %v4665_v55 = vpop.f32.mrf.mxu1 }
 0x3ec   :  { %6349 = vmatprep.subr.mxu0 %v14284_v56 }
 0x3ed   :  { %6350 = vmatpush1.msra.mxu0 %v13228_v36  ;;  %v4582_v36 = vpop.f32.mrf.mxu0 }
 0x3ee   :  { %6351 = vmatprep.subr.mxu0 %v14284_v56 }
 0x3ef   :  { %6352 = vmatpush1.msra.mxu0 %v13242_v61  ;;  %v4934_v61 = vpop.f32.mrf.mxu1 }
 0x3f0   :  { %6353 = vmatprep.subr.mxu0 %v14284_v56  ;;  %v4945_v4 = vadd.f32 %v4934_v61, %v4658_v57  ;;  %v4454_v57 = vadd.f32 %v13890_v42, %v13902_v40 }
 0x3f1   :  { %6354 = vmatpush1.msra.mxu0 %v13256_v14  ;;  %v4586_v14 = vpop.f32.mrf.mxu0 }
 0x3f2   :  { %6355 = vmatprep.subr.mxu0 %v14284_v56  ;;  %v4664_v15 = vadd.f32 %v4663_v41, %v4586_v14 }
 0x3f3   :  { %6356 = vmatpush1.msra.mxu0 %v13270_v62  ;;  %v4936_v62 = vpop.f32.mrf.mxu1 }
 0x3f4   :  { %6357 = vmatprep.subr.mxu0 %v14284_v56 }
 0x3f5   :  { %6358 = vmatpush1.msra.mxu0 %v13284_v32  ;;  %v4588_v32 = vpop.f32.mrf.mxu0 }
 0x3f6   :  { %6359 = vmatprep.subr.mxu0 %v14284_v56 }
 0x3f7   :  { %6360 = vmatpush1.msra.mxu0 %v13298_v0  ;;  %v4940_v0 = vpop.f32.mrf.mxu1  ;;  %v4797_v22 = vpop.f32.mrf.mxu0 }
 0x3f8   :  { %6385 = vmatprep.subr.mxu0 %v14284_v56  ;;  %v4808_v39 = vadd.f32 %v4797_v22, %v4448_v43  ;;  %v5546_v43 = vrot.slane %v5537_v47, %v14269_v59 }
 0x3f9   :  { %6386 = vmatpush2.msra.mxu0 %v13312_v19  ;;  %v4942_v19 = vpop.f32.mrf.mxu1  ;;  %v4799_v10 = vpop.f32.mrf.mxu0 }
 0x3fa   :  { %6387 = vmatprep.subr.mxu0 %v14284_v56  ;;  %v4809_v16 = vadd.f32 %v4799_v10, %v4450_v53 }
 0x3fb   :  { %6388 = vmatpush2.msra.mxu0 %v13326_v5  ;;  %v5228_v46 = vpop.f32.mrf.mxu1  ;;  %v4803_v29 = vpop.f32.mrf.mxu0 }
 0x3fc   :  { %6389 = vmatprep.subr.mxu0 %v14284_v56  ;;  %v5239_v7 = vadd.f32 %v5228_v46, %v4945_v4  ;;  %v4456_v46 = vadd.f32 %v13896_v24, %v13908_v18  ;;  %v4810_v53 = vadd.f32 %v4803_v29, %v4454_v57 }
 0x3fd   :  { %6390 = vmatpush2.msra.mxu0 %v13340_v6  ;;  %v5230_v54 = vpop.f32.mrf.mxu1  ;;  %v4805_v5 = vpop.f32.mrf.mxu0 }
 0x3fe   :  { %6391 = vmatprep.subr.mxu0 %v14284_v56  ;;  %v4811_v42 = vadd.f32 %v4805_v5, %v4456_v46 }
 0x3ff   :  { %6392 = vmatpush2.msra.mxu0 %v13354_v37  ;;  %v5234_v1 = vpop.f32.mrf.mxu1  ;;  %v5091_v2 = vpop.f32.mrf.mxu0  ;;  %v4660_v37 = vadd.f32 %v4659_v21, %v4582_v36  ;;  %v4666_v21 = vadd.f32 %v4665_v55, %v4588_v32  ;;  %v4947_v36 = vadd.f32 %v4940_v0, %v4664_v15 }
 0x400   :  { %6537 = vmatprep.subr.mxu0 %v14284_v56  ;;  %v5102_v26 = vadd.f32 %v5091_v2, %v4808_v39 }
 0x401   :  { %v5236_v38 = vpop.f32.mrf.mxu1  ;;  %v5093_v45 = vpop.f32.mrf.mxu0  ;;  %v4946_v12 = vadd.f32 %v4936_v62, %v4660_v37  ;;  %v4948_v17 = vadd.f32 %v4942_v19, %v4666_v21 }
 0x402   :  { %v5103_v52 = vadd.f32 %v5093_v45, %v4809_v16 }
 0x403   :  { %v5097_v50 = vpop.f32.mrf.mxu0  ;;  %v5240_v25 = vadd.f32 %v5230_v54, %v4946_v12  ;;  %v5241_v12 = vadd.f32 %v5234_v1, %v4947_v36  ;;  %v5242_v40 = vadd.f32 %v5236_v38, %v4948_v17 }
 0x404   :  { %v5104_v15 = vadd.f32 %v5097_v50, %v4810_v53 }
 0x405   :  { %v5099_v60 = vpop.f32.mrf.mxu0 }
 0x414   :  { %v5522_v6 = vpop.f32.mrf.mxu1 }
 0x415   :  { %v5533_v23 = vadd.f32 %v5522_v6, %v5239_v7 }
 0x416   :  { %v5524_v28 = vpop.f32.mrf.mxu1 }
 0x417   :  { %v5534_v48 = vadd.f32 %v5524_v28, %v5240_v25  ;;  %v5553_v7 = vadd.f32 %v5542_v34, %v5533_v23 }
 0x419   :  { %v5528_v44 = vpop.f32.mrf.mxu1  ;;  %v5554_v45 = vadd.f32 %v5546_v43, %v5534_v48 }
 0x41a   :  { %v5535_v41 = vadd.f32 %v5528_v44, %v5241_v12 }
 0x41b   :  { %v5530_v2 = vpop.f32.mrf.mxu1 }
 0x41c   :  { %v5385_v61 = vpop.f32.mrf.mxu0  ;;  %v5536_v14 = vadd.f32 %v5530_v2, %v5242_v40  ;;  %v5555_v1 = vadd.f32 %v5542_v34, %v5535_v41 }
 0x41d   :  { %v5396_v4 = vadd.f32 %v5385_v61, %v5102_v26  ;;  %v5105_v26 = vadd.f32 %v5099_v60, %v4811_v42 }
 0x41e   :  { %v5387_v39 = vpop.f32.mrf.mxu0 }
 0x41f   :  { %v5549_v54 = vadd.f32 %v5542_v34, %v5396_v4  ;;  %v5397_v10 = vadd.f32 %v5387_v39, %v5103_v52  ;;  %v5556_v52 = vadd.f32 %v5546_v43, %v5536_v14  ;;  %v14339_v14 = vld [vmem:[#allocation15_spill] sm:$0xff] }
 0x421   :  { %v5557_v28 = vmax.f32 %v5549_v54, %v5553_v7  ;;  %v5550_v55 = vadd.f32 %v5546_v43, %v5397_v10  ;;  %v5391_v47 = vpop.f32.mrf.mxu0 }
 0x422   :  { %v5398_v62 = vadd.f32 %v5391_v47, %v5104_v15 }
 0x423   :  { %v5561_v24 = vmax.f32 %v5557_v28, 0.0  ;;  %v5558_v18 = vmax.f32 %v5550_v55, %v5554_v45  ;;  %v5393_v29 = vpop.f32.mrf.mxu0 }
 0x424   :  { %v5551_v32 = vadd.f32 %v5542_v34, %v5398_v62  ;;  %v5399_v0 = vadd.f32 %v5393_v29, %v5105_v26  ;;  %v14340_v62 = vld [vmem:[#allocation21_spill] sm:$0xff]  ;;  %v14343_v29 = vld [vmem:[#allocation12_spill] sm:$0xff] }
 0x425   :  { %v5569_v22 = vrot.slane %v5561_v24, 6  ;;  %v5562_v19 = vmax.f32 %v5558_v18, 0.0  ;;  %v14341_v24 = vld [vmem:[#allocation18_spill] sm:$0xff]  ;;  %v14342_v18 = vld [vmem:[#allocation19_spill] sm:$0xff] }
 0x426   :  { %v5559_v38 = vmax.f32 %v5551_v32, %v5555_v1  ;;  %v5552_v50 = vadd.f32 %v5546_v43, %v5399_v0  ;;  %v14344_v1 = vld [vmem:[#allocation23_spill] sm:$0xff] }
 0x427   :  { %5579 = vst [vmem:[#allocation4 + $0x10] sm:$0xfc] %v5569_v22  ;;  %v5570_v5 = vrot.slane %v5562_v19, 6  ;;  %v14345_v32 = vld [vmem:[#allocation27_spill] sm:$0xff]  ;;  %v14348_v19 = vld [vmem:[#allocation29_spill] sm:$0xff] }
 0x428   :  { %v5563_v6 = vmax.f32 %v5559_v38, 0.0  ;;  %v5560_v37 = vmax.f32 %v5552_v50, %v5556_v52  ;;  %v14346_v0 = vld [vmem:[#allocation11_spill] sm:$0xff]  ;;  %v14349_v52 = vld [vmem:[#allocation22_spill] sm:$0xff]  ;;  %v14350_v38 = vld [vmem:[#allocation25_spill] sm:$0xff] }
 0x429   :  { %5581 = vst.msk [vmem:[#allocation4 + $0x18] sm:$0xfc] %vm5580_vm13, %v5570_v5  ;;  %v14351_v50 = vld [vmem:[#allocation32_spill] sm:$0xff] }
 0x42a   :  { %v5571_v60 = vrot.slane %v5563_v6, 6  ;;  %v5564_v16 = vmax.f32 %v5560_v37, 0.0  ;;  %v14353_v6 = vld [vmem:[#allocation33_spill] sm:$0xff]  ;;  %v14354_v37 = vld [vmem:[#allocation28_spill] sm:$0xff] }
 0x42c   :  { %v5572_v25 = vsel %vm4368_vm9, %v5569_v22, %v5571_v60  ;;  %v5573_v23 = vrot.slane %v5564_v16, 6  ;;  %v14347_v22 = vld [vmem:[#allocation20_spill] sm:$0xff] }
 0x42d   :  { %5582 = vst [vmem:[#allocation4 + $0x20] sm:$0xf] %v5572_v25  ;;  %v14356_v25 = vld [vmem:[#allocation30_spill] sm:$0xff] }
 0x42e   :  { %v5574_v34 = vsel %vm4368_vm9, %v5570_v5, %v5573_v23  ;;  %v14352_v5 = vld [vmem:[#allocation24_spill] sm:$0xff] }
 0x42f   :  { %5584 = vst.msk [vmem:[#allocation4 + $0x28] sm:$0xf] %vm5583_vm14, %v5574_v34  ;;  %v14357_v34 = vld [vmem:[#allocation35_spill] sm:$0xff] }
 0x430   :  { %v5626_v44 = vld [vmem:[#allocation4 + $0x12] ss:$8 sm:$0x3]  ;;  %v5628_v57 = vld [vmem:[#allocation4 + $0x13] ss:$8 sm:$0x3] }
 0x431   :  { %v5629_v21 = vmax.f32 %v5626_v44, %v5628_v57  ;;  %v5634_v36 = vld [vmem:[#allocation4 + $0x14] ss:$8 sm:$0x3]  ;;  %v5636_v61 = vld [vmem:[#allocation4 + $0x15] ss:$8 sm:$0x3] }
 0x432   :  { %v5637_v48 = vmax.f32 %v5634_v36, %v5636_v61  ;;  %v5642_v43 = vld [vmem:[#allocation4 + $0x16] ss:$8 sm:$0x3]  ;;  %v5644_v4 = vld [vmem:[#allocation4 + $0x17] ss:$8 sm:$0x3] }
 0x433   :  { %v5645_v46 = vmax.f32 %v5642_v43, %v5644_v4  ;;  %5631 = vst.msk [vmem:[#allocation5 + $0x5] ss:$8 sm:$0x3] %vm12607_vm12, %v5629_v21  ;;  %v14358_v44 = vld [vmem:[#allocation31_spill] sm:$0xff]  ;;  %v14359_v21 = vld [vmem:[#allocation36_spill] sm:$0xff]  ;;  %v14360_v61 = vld [vmem:[#allocation37_spill] sm:$0xff] }
 0x434   :  { %5639 = vst.msk [vmem:[#allocation5 + $0x6] ss:$8 sm:$0x3] %vm12607_vm12, %v5637_v48  ;;  %v14361_v43 = vld [vmem:[#allocation38_spill] sm:$0xff] }
 0x435   :  { %5647 = vst.msk [vmem:[#allocation5 + $0x7] ss:$8 sm:$0x3] %vm12607_vm12, %v5645_v46  ;;  %v14363_v46 = vld [vmem:[#allocation40_spill] sm:$0xff] }
 0x436   :  { %v5650_v17 = vld [vmem:[#allocation4 + $0x20] ss:$8 sm:$0x3]  ;;  %v5652_v53 = vld [vmem:[#allocation4 + $0x21] ss:$8 sm:$0x3] }
 0x437   :  { %v5658_v12 = vld [vmem:[#allocation4 + $0x22] ss:$8 sm:$0x3]  ;;  %v5660_v39 = vld [vmem:[#allocation4 + $0x23] ss:$8 sm:$0x3]  ;;  %v5653_v7 = vmax.f32 %v5650_v17, %v5652_v53 }
 0x438   :  { %v5661_v2 = vmax.f32 %v5658_v12, %v5660_v39  ;;  %v14364_v53 = vld [vmem:[#allocation41_spill] sm:$0xff]  ;;  %v14365_v12 = vld [vmem:[#allocation42_spill] sm:$0xff]  ;;  %v14366_v39 = vld [vmem:[#allocation43_spill] sm:$0xff] }
 0x439   :  { %5655 = vst.msk [vmem:[#allocation5 + $0x10] ss:$8 sm:$0x3] %vm12607_vm12, %v5653_v7  ;;  %v14367_v7 = vld [vmem:[#allocation44_spill] sm:$0xff] }
 0x43a   :  { %v6192_v54 = vld [vmem:[#allocation5 + $0x5] ss:$8 sm:$0x3]  ;;  %5663 = vst.msk [vmem:[#allocation5 + $0x11] ss:$8 sm:$0x3] %vm12607_vm12, %v5661_v2 }
 0x43b   :  { %v6217_v10 = vrot.slane %v6192_v54, %v14280_v9  ;;  %v6221_v42 = vrot.slane %v6192_v54, %v14269_v59  ;;  %v6296_v40 = vld [vmem:[#allocation5 + $0x6] ss:$8 sm:$0x3] }
 0x43c   :  { %v6321_v15 = vrot.slane %v6296_v40, %v14280_v9  ;;  %v6325_v41 = vrot.slane %v6296_v40, %v14269_v59  ;;  %v13954_v45 = vld [vmem:[#allocation5 + $0x7] ss:$8 sm:$0x3] }
 0x43d   :  { %7956 = vmatprep.mubr.msk.f32.mxu1 %vm66_vm0, %v6221_v42  ;;  %v6429_v13 = vrot.slane %v13954_v45, %v14269_v59  ;;  %v6425_v16 = vrot.slane %v13954_v45, %v14280_v9  ;;  %v14368_v2 = vld [vmem:[#allocation45_spill] sm:$0xff]  ;;  %v14369_v54 = vld [vmem:[#allocation46_spill] sm:$0xff]  ;;  %v14371_v42 = vld [vmem:[#allocation48_spill] sm:$0xff] }
 0x43e   :  { %7977 = vmatprep.mubr.msk.f32.mxu0 %vm66_vm0, %v6325_v41  ;;  %6290 = vmatmul.mubr.f32.vlgmr.msra.gmra.mxu1 %v6217_v10  ;;  %v14370_v10 = vld [vmem:[#allocation47_spill] sm:$0xff]  ;;  %v14372_v40 = vld [vmem:[#allocation49_spill] sm:$0xff]  ;;  %v14375_v45 = vld [vmem:[#allocation52_spill] sm:$0xff] }
 0x43f   :  { %6394 = vmatmul.mubr.f32.vlgmr.msra.gmra.mxu0 %v6321_v15  ;;  %6434 = vmatpush1.msra.mxu1 %v13428_v3  ;;  %v14373_v15 = vld [vmem:[#allocation50_spill] sm:$0xff]  ;;  %v14374_v41 = vld [vmem:[#allocation51_spill] sm:$0xff] }
 0x440   :  { %v5870_v28 = vpop.f32.mrf.mxu1  ;;  %6538 = vmatpush1.msra.mxu0 %v13372_v8  ;;  %6435 = vmatprep.subr.mxu1 %v14284_v56  ;;  %v13963_v55 = vld [vmem:[#allocation5 + $0x10] ss:$8 sm:$0x3]  ;;  %v5665_v8 = vld [vmem:[%s14111_s8] sm:$0x1] }
 0x441   :  { %7998 = vmatprep.mubr.msk.f32.mxu1 %vm66_vm0, %v6429_v13  ;;  %6539 = vmatprep.subr.mxu0 %v14284_v56  ;;  %v6533_v47 = vrot.slane %v13963_v55, %v14269_v59  ;;  %v6608_v60 = vld [vmem:[#allocation5 + $0x11] ss:$8 sm:$0x3]  ;;  %v6529_v23 = vrot.slane %v13963_v55, %v14280_v9  ;;  %v14376_v13 = vld [vmem:[#allocation53_spill] sm:$0xff] }
 0x442   :  { %v5872_v26 = vpop.f32.mrf.mxu1  ;;  %6436 = vmatpush1.msra.mxu1 %v13443_v27  ;;  %6540 = vmatpush1.msra.mxu0 %v13389_v63  ;;  %v6637_v57 = vrot.slane %v6608_v60, %v14269_v59  ;;  %v14362_v59 = vld [vmem:[#allocation39_spill] sm:$0xff]  ;;  %v6633_v55 = vrot.slane %v6608_v60, %v14280_v9 }
 0x443   :  { %6437 = vmatprep.subr.mxu1 %v14284_v56  ;;  %6541 = vmatprep.subr.mxu0 %v14284_v56 }
 0x444   :  { %6438 = vmatpush1.msra.mxu1 %v13457_v31  ;;  %6542 = vmatpush1.msra.mxu0 %v13403_v30  ;;  %v14333_v31 = vld [vmem:[#allocation16_spill] sm:$0xff] }
 0x445   :  { %8019 = vmatprep.mubr.msk.f32.mxu0 %vm66_vm0, %v6533_v47  ;;  %6439 = vmatprep.subr.mxu1 %v14284_v56  ;;  %v14378_v47 = vld [vmem:[#allocation55_spill] sm:$0xff] }
 0x446   :  { %6543 = vmatprep.subr.mxu0 %v14284_v56  ;;  %6440 = vmatpush1.msra.mxu1 %v13471_v35  ;;  %v14335_v35 = vld [vmem:[#allocation13_spill] sm:$0xff] }
 0x447   :  { %v5765_v63 = vpop.f32.mrf.mxu0  ;;  %6544 = vmatpush1.msra.mxu0 %v13421_v11  ;;  %6441 = vmatprep.subr.mxu1 %v14284_v56  ;;  %v14332_v11 = vld [vmem:[#allocation17_spill] sm:$0xff] }
 0x448   :  { %v5769_v3 = vadd.f32 %v5765_v63, %v5665_v8  ;;  %6545 = vmatprep.subr.mxu0 %v14284_v56  ;;  %6442 = vmatpush1.msra.mxu1 %v13485_v33  ;;  %v14337_v33 = vld [vmem:[#allocation14_spill] sm:$0xff] }
 0x449   :  { %v5767_v30 = vpop.f32.mrf.mxu0  ;;  %6546 = vmatpush1.msra.mxu0 %v13438_v49  ;;  %6443 = vmatprep.subr.mxu1 %v14284_v56  ;;  %v14334_v49 = vld [vmem:[#allocation9_spill] sm:$0xff] }
 0x44a   :  { %6547 = vmatprep.subr.mxu0 %v14284_v56  ;;  %6444 = vmatpush1.msra.mxu1 %v13499_v51  ;;  %v13990_v27 = vadd.f32 %v5870_v28, %v5769_v3  ;;  %v14338_v51 = vld [vmem:[#allocation10_spill] sm:$0xff] }
 0x44b   :  { %6548 = vmatpush1.msra.mxu0 %v13452_v58  ;;  %6445 = vmatprep.subr.mxu1 %v14284_v56  ;;  %v14336_v58 = vld [vmem:[#allocation26_spill] sm:$0xff] }
 0x44c   :  { %6549 = vmatprep.subr.mxu0 %v14284_v56  ;;  %6446 = vmatpush1.msra.mxu1 %v14332_v11  ;;  %v14377_v28 = vld [vmem:[#allocation54_spill] sm:$0xff]  ;;  %v6191_v11 = vld [vmem:[%s14111_s8] sm:$0x1]  ;;  %s8045_s8 = scalar_lea.vmem %s6720_s13, 32 }
 0x44d   :  { %6550 = vmatpush1.msra.mxu0 %v14333_v31  ;;  %6447 = vmatprep.subr.mxu1 %v14284_v56  ;;  %p8046_p0 = scmp.ne.s32.totalorder %s6720_s13, %s8045_s8  ;;  %p8051_p2 = scmp.lt.s32.totalorder %s8045_s8, %s8045_s8 }
 0x44e   :  { %6551 = vmatprep.subr.mxu0 %v14284_v56  ;;  %6448 = vmatpush1.msra.mxu1 %v14334_v49 }
 0x44f   :  { %6552 = vmatpush1.msra.mxu0 %v14335_v35  ;;  %6449 = vmatprep.subr.mxu1 %v14284_v56  ;;  %p8052_p3 = por %p8051_p2, %p8050_p1 }
 0x450   :  { %6553 = vmatprep.subr.mxu0 %v14284_v56  ;;  %6450 = vmatpush1.msra.mxu1 %v14336_v58 }
 0x451   :  { %6554 = vmatpush1.msra.mxu0 %v14337_v33  ;;  %6451 = vmatprep.subr.mxu1 %v14284_v56  ;;  %p8053_p4 = pnand %p8052_p3, %p8046_p0 }
 0x452   :  { %6555 = vmatprep.subr.mxu0 %v14284_v56  ;;  %6452 = vmatpush1.msra.mxu1 %v14338_v51 }
 0x453   :  { %6556 = vmatpush1.msra.mxu0 %v14339_v14  ;;  %6453 = vmatprep.subr.mxu1 %v14284_v56 }
 0x454   :  { %6557 = vmatprep.subr.mxu0 %v14284_v56  ;;  %6454 = vmatpush1.msra.mxu1 %v14340_v62 }
 0x455   :  { %6558 = vmatpush1.msra.mxu0 %v14341_v24  ;;  %6455 = vmatprep.subr.mxu1 %v14284_v56 }
 0x456   :  { %6559 = vmatprep.subr.mxu0 %v14284_v56  ;;  %6456 = vmatpush1.msra.mxu1 %v14342_v18 }
 0x457   :  { %6560 = vmatpush1.msra.mxu0 %v14343_v29  ;;  %6457 = vmatprep.subr.mxu1 %v14284_v56 }
 0x458   :  { %6561 = vmatprep.subr.mxu0 %v14284_v56  ;;  %6458 = vmatpush1.msra.mxu1 %v14344_v1 }
 0x459   :  { %6562 = vmatpush1.msra.mxu0 %v14345_v32  ;;  %6459 = vmatprep.subr.mxu1 %v14284_v56 }
 0x45a   :  { %6563 = vmatprep.subr.mxu0 %v14284_v56  ;;  %6460 = vmatpush1.msra.mxu1 %v14346_v0 }
 0x45b   :  { %6564 = vmatpush1.msra.mxu0 %v14347_v22  ;;  %6461 = vmatprep.subr.mxu1 %v14284_v56 }
 0x45c   :  { %6565 = vmatprep.subr.mxu0 %v14284_v56  ;;  %6462 = vmatpush1.msra.mxu1 %v14348_v19 }
 0x45d   :  { %6566 = vmatpush1.msra.mxu0 %v14349_v52  ;;  %6463 = vmatprep.subr.mxu1 %v14284_v56 }
 0x45e   :  { %6567 = vmatprep.subr.mxu0 %v14284_v56  ;;  %6464 = vmatpush1.msra.mxu1 %v13639_v20  ;;  %v14355_v20 = vld [vmem:[#allocation34_spill] sm:$0xff] }
 0x45f   :  { %6568 = vmatpush1.msra.mxu0 %v14350_v38  ;;  %6489 = vmatprep.subr.mxu1 %v14284_v56 }
 0x460   :  { %6593 = vmatprep.subr.mxu0 %v14284_v56  ;;  %6490 = vmatpush2.msra.mxu1 %v14351_v50 }
 0x461   :  { %6594 = vmatpush2.msra.mxu0 %v14352_v5  ;;  %6491 = vmatprep.subr.mxu1 %v14284_v56 }
 0x462   :  { %6595 = vmatprep.subr.mxu0 %v14284_v56  ;;  %6492 = vmatpush2.msra.mxu1 %v14353_v6 }
 0x463   :  { %6596 = vmatpush2.msra.mxu0 %v14354_v37  ;;  %6493 = vmatprep.subr.mxu1 %v14284_v56 }
 0x464   :  { %6597 = vmatprep.subr.mxu0 %v14284_v56  ;;  %6494 = vmatpush2.msra.mxu1 %v14355_v20 }
 0x465   :  { %6598 = vmatpush2.msra.mxu0 %v14356_v25  ;;  %6495 = vmatprep.subr.mxu1 %v14284_v56 }
 0x466   :  { %6599 = vmatprep.subr.mxu0 %v14284_v56  ;;  %6496 = vmatpush2.msra.mxu1 %v14357_v34 }
 0x467   :  { %6600 = vmatpush2.msra.mxu0 %v14358_v44  ;;  %6498 = vmatmul.mubr.f32.vlgmr.msra.gmra.mxu1 %v6425_v16 }
 0x468   :  { %6602 = vmatmul.mubr.f32.vlgmr.msra.gmra.mxu0 %v6529_v23  ;;  %6641 = vmatprep.subr.mxu1 %v14284_v56 }
 0x469   :  { %6642 = vmatpush1.msra.mxu1 %v14359_v21  ;;  %8040 = vmatprep.mubr.msk.f32.mxu1 %vm66_vm0, %v6637_v57 }
 0x46a   :  { %v6080_v36 = vpop.f32.mrf.mxu1  ;;  %6643 = vmatprep.subr.mxu1 %v14284_v56 }
 0x46b   :  { %6644 = vmatpush1.msra.mxu1 %v14360_v61 }
 0x46c   :  { %v6082_v48 = vpop.f32.mrf.mxu1  ;;  %6645 = vmatprep.subr.mxu1 %v14284_v56 }
 0x46d   :  { %6646 = vmatpush1.msra.mxu1 %v14361_v43 }
 0x46e   :  { %6647 = vmatprep.subr.mxu1 %v14284_v56 }
 0x46f   :  { %6648 = vmatpush1.msra.mxu1 %v14362_v59 }
 0x470   :  { %v5975_v4 = vpop.f32.mrf.mxu0  ;;  %6649 = vmatprep.subr.mxu1 %v14284_v56 }
 0x471   :  { %6650 = vmatpush1.msra.mxu1 %v14363_v46  ;;  %v5979_v26 = vadd.f32 %v5975_v4, %v13990_v27 }
 0x472   :  { %v5977_v17 = vpop.f32.mrf.mxu0  ;;  %6651 = vmatprep.subr.mxu1 %v14284_v56 }
 0x473   :  { %6652 = vmatpush1.msra.mxu1 %v14364_v53  ;;  %v6084_v8 = vadd.f32 %v6080_v36, %v5979_v26 }
 0x474   :  { %6653 = vmatprep.subr.mxu1 %v14284_v56 }
 0x475   :  { %6654 = vmatpush1.msra.mxu1 %v14365_v12 }
 0x476   :  { %6655 = vmatprep.subr.mxu1 %v14284_v56 }
 0x477   :  { %6656 = vmatpush1.msra.mxu1 %v14366_v39 }
 0x478   :  { %6657 = vmatprep.subr.mxu1 %v14284_v56 }
 0x479   :  { %6658 = vmatpush1.msra.mxu1 %v14367_v7 }
 0x47a   :  { %6659 = vmatprep.subr.mxu1 %v14284_v56 }
 0x47b   :  { %6660 = vmatpush1.msra.mxu1 %v14368_v2 }
 0x47c   :  { %6661 = vmatprep.subr.mxu1 %v14284_v56 }
 0x47d   :  { %6662 = vmatpush1.msra.mxu1 %v14369_v54 }
 0x47e   :  { %6663 = vmatprep.subr.mxu1 %v14284_v56 }
 0x47f   :  { %6664 = vmatpush1.msra.mxu1 %v14370_v10 }
 0x480   :  { %6665 = vmatprep.subr.mxu1 %v14284_v56 }
 0x481   :  { %6666 = vmatpush1.msra.mxu1 %v14371_v42 }
 0x482   :  { %6667 = vmatprep.subr.mxu1 %v14284_v56 }
 0x483   :  { %6668 = vmatpush1.msra.mxu1 %v14372_v40 }
 0x484   :  { %6669 = vmatprep.subr.mxu1 %v14284_v56 }
 0x485   :  { %6670 = vmatpush1.msra.mxu1 %v14373_v15 }
 0x486   :  { %6671 = vmatprep.subr.mxu1 %v14284_v56 }
 0x487   :  { %6672 = vmatpush1.msra.mxu1 %v14374_v41 }
 0x488   :  { %6697 = vmatprep.subr.mxu1 %v14284_v56 }
 0x489   :  { %6698 = vmatpush2.msra.mxu1 %v14375_v45 }
 0x48a   :  { %6699 = vmatprep.subr.mxu1 %v14284_v56 }
 0x48b   :  { %6700 = vmatpush2.msra.mxu1 %v14376_v13 }
 0x48c   :  { %6701 = vmatprep.subr.mxu1 %v14284_v56 }
 0x48d   :  { %6702 = vmatpush2.msra.mxu1 %v14377_v28 }
 0x48e   :  { %6703 = vmatprep.subr.mxu1 %v14284_v56 }
 0x48f   :  { %6704 = vmatpush2.msra.mxu1 %v14378_v47 }
 0x490   :  { %6706 = vmatmul.mubr.f32.vlgmr.msra.gmra.mxu1 %v6633_v55 }
 0x498   :  { %v6185_v63 = vpop.f32.mrf.mxu0 }
 0x499   :  { %v6189_v3 = vadd.f32 %v6185_v63, %v6084_v8 }
 0x49a   :  { %v6187_v30 = vpop.f32.mrf.mxu0 }
 0x49b   :  { %6190 = vst [vmem:[#allocation6] sm:$0x1] %v6189_v3 }
 0x4fe   :  { %v6291_v31 = vpop.f32.mrf.mxu1 }
 0x4ff   :  { %v6295_v49 = vadd.f32 %v6291_v31, %v6191_v11  ;;  %v6395_v35 = vpop.f32.mrf.mxu0 }
 0x500   :  { %v6293_v9 = vpop.f32.mrf.mxu1 }
 0x501   :  { %v6399_v58 = vadd.f32 %v6395_v35, %v6295_v49  ;;  %v6397_v56 = vpop.f32.mrf.mxu0 }
 0x527   :  { %v6499_v33 = vpop.f32.mrf.mxu1 }
 0x528   :  { %v6603_v51 = vpop.f32.mrf.mxu0  ;;  %v6503_v27 = vadd.f32 %v6499_v33, %v6399_v58 }
 0x529   :  { %v6501_v14 = vpop.f32.mrf.mxu1 }
 0x52a   :  { %v6605_v62 = vpop.f32.mrf.mxu0  ;;  %v6607_v24 = vadd.f32 %v6603_v51, %v6503_v27 }
 0x550   :  { %v6707_v18 = vpop.f32.mrf.mxu1 }
 0x551   :  { %v6711_v29 = vadd.f32 %v6707_v18, %v6607_v24 }
 0x552   :  { %v6709_v1 = vpop.f32.mrf.mxu1 }
 0x553   :  { %6712 = vst [vmem:[#allocation6 + $0x1] sm:$0x1] %v6711_v29 }
 0x554   :  { %8056 = shalt.err (!%p8053_p4)
}
 0x555   :  { %6722 = dma.vmem_to_hbm [thread:$0]  %s6720_s13, 32, %s14112_s9, [#allocation7]  }
 0x556   :  { %8065 = dma.done.wait [#allocation7], 32  }
 0x557   :  { %8066 = vsyncadd [#allocation7], 4294967264 }
 0x558   :  { %6726 = vsyncpa [#allocation7], 1 }

</bundles_post_ra>
